<compile_context>
chip_gen: v5e
topology: v5e:2x2
jax: 0.10.0
libtpu: 0.0.40
codegen_flags: <defaults>
</compile_context>

<pallas_src>
import jax
import jax.numpy as jnp
from jax import lax
from jax.experimental import pallas as pl
from jax.experimental.pallas import tpu as pltpu

MAX_ITER = 20  # qpth pdipm_b maxIter


def _nn(a, b):
    # a @ b (plain NN contraction, f32 accumulation)
    return lax.dot_general(a, b, (((1,), (0,)), ((), ())),
                           preferred_element_type=jnp.float32)


def pdipm_kernel(p_ref, G_ref, h_ref, QGt_ref, QiQiGt_ref, GQinv_ref,
                 R_ref, Sinv0_ref, zhat_ref):
    p = p_ref[...]            # (B, nz)
    G = G_ref[...]            # (ni, nz)
    h = h_ref[...]            # (1, ni)
    QGt = QGt_ref[...]        # (nz, nz+ni)   [Q | G^T]
    QiQiGt = QiQiGt_ref[...]  # (nz, nz+ni)   [Q^{-1} | Q^{-1} G^T]
    GQinv = GQinv_ref[...]    # (ni, nz)      G Q^{-1}
    R = R_ref[...]            # (ni, ni)      G Q^{-1} G^T
    Sinv0 = Sinv0_ref[...]    # (ni, ni)      (R + I)^{-1}  (init Schur inverse)

    B, nz = p.shape
    ni = G.shape[0]
    f32 = jnp.float32
    FMAX = float(jnp.finfo(f32).max)

    # ---- loop-invariant constants (hoisted out of the PDIPM loop) ----
    eye_ni = (lax.broadcasted_iota(jnp.int32, (ni, ni), 0) ==
              lax.broadcasted_iota(jnp.int32, (ni, ni), 1)).astype(f32)
    eye_aug = jnp.zeros((B, ni, ni), f32) + eye_ni[None]          # (B, ni, ni)
    eye_mask3 = (lax.broadcasted_iota(jnp.int32, (1, ni, ni), 1) ==
                 lax.broadcasted_iota(jnp.int32, (1, ni, ni), 2))
    row_iota = lax.broadcasted_iota(jnp.int32, (1, ni, 1), 1)
    rowk_masks = [row_iota == k for k in range(ni)]               # (1, ni, 1)

    def gj_inverse(S):
        # Batched Gauss-Jordan inverse on the augmented system [S | I],
        # fully unrolled (ni static) with static slicing.  S = R + diag(s/z)
        # is SPD, so no pivoting is needed for stability.
        AI = jnp.concatenate([S, eye_aug], axis=2)                # (B, ni, 2ni)
        for k in range(ni):
            piv = AI[:, k:k + 1, k:k + 1]                         # (B, 1, 1)
            pr = AI[:, k:k + 1, :] / piv                          # normalized pivot row
            col = AI[:, :, k:k + 1]                               # pivot column
            AI = jnp.where(rowk_masks[k], pr, AI - col * pr)
        return AI[:, :, ni:]
        # TODO(synk): a lane-dense (ni, B*ni) repack of this sweep (batch along
        # lanes) would raise VPU lane utilization further; kept in the batched
        # 3-D layout for robustness.

    def solve_kkt(rx, rs, rz, inv_d, sinv_mul):
        # qpth pdipm_b.solve_kkt specialized to neq == 0, using the fused
        # constant [Q^{-1} | Q^{-1}G^T] (one matmul for both rx terms).
        t = _nn(rx, QiQiGt)                       # [rx Q^{-1} | rx Q^{-1} G^T]
        rx_Qinv = t[:, :nz]
        rhs = t[:, nz:] + rs * inv_d - rz         # (B, ni)
        w = sinv_mul(rhs)                         # -S^{-1} rhs
        dx = -rx_Qinv - _nn(w, GQinv)
        ds = (-rs - w) * inv_d
        return dx, ds, w                          # dz == w

    def solve_kkt_corrector(rs, inv_d, sinv_mul):
        # Centering-corrector step: rx == 0 and rz == 0 exactly.
        rhs = rs * inv_d
        w = sinv_mul(rhs)
        dx = -_nn(w, GQinv)
        ds = (-rs - w) * inv_d
        return dx, ds, w

    def get_step(v, dv):
        # Step-to-boundary; only components with dv < 0 constrain the step
        # (dv == 0 must NOT produce +/-inf).
        neg = dv < 0
        a = jnp.where(neg, -v / jnp.where(neg, dv, -1.0), FMAX)
        return jnp.min(a, axis=1, keepdims=True)                  # (B, 1)

    # ---- initialization: solve KKT with d = 1 using the hoisted (R+I)^{-1} ----
    x, s, z = solve_kkt(p, 0.0, -h, 1.0, lambda r: -_nn(r, Sinv0))

    # shift slacks / duals to be >= 1
    min_s = jnp.min(s, axis=1, keepdims=True)
    s = jnp.where(min_s < 0, s - min_s + 1.0, s)
    min_z = jnp.min(z, axis=1, keepdims=True)
    z = jnp.where(min_z < 0, z - min_z + 1.0, z)

    best_resids = jnp.full((B, 1), jnp.inf, f32)
    best_x = jnp.zeros_like(x)

    def iter_body(_, carry):
        x, s, z, best_resids, best_x = carry

        # residuals (Q symmetric; fused [Q | G^T] -> single matmul for x terms)
        xt = _nn(x, QGt)                          # [x Q | x G^T]
        rx = _nn(z, G) + xt[:, :nz] + p           # dual residual
        rs = z
        rz = xt[:, nz:] + s - h                   # primal residual
        mu = jnp.abs(jnp.sum(s * z, axis=1, keepdims=True)) * (1.0 / ni)
        z_resid = jnp.sqrt(jnp.sum(rz * rz, axis=1, keepdims=True))
        dual_resid = jnp.sqrt(jnp.sum(rx * rx, axis=1, keepdims=True))
        resids = z_resid + dual_resid + ni * mu

        improved = resids < best_resids
        best_resids = jnp.where(improved, resids, best_resids)
        best_x = jnp.where(improved, x, best_x)

        d = z / s
        inv_d = pl.reciprocal(d, approx=True)     # EUP; off the VALU path
        S = R[None] + jnp.where(eye_mask3, (s / z)[:, None, :], 0.0)
        Sinv = gj_inverse(S)
        sinv_mul = lambda r: -jnp.sum(Sinv * r[:, None, :], axis=2)

        # affine (predictor) direction
        dx_a, ds_a, dz_a = solve_kkt(rx, rs, rz, inv_d, sinv_mul)
        alpha = jnp.minimum(jnp.minimum(get_step(z, dz_a),
                                        get_step(s, ds_a)), 1.0)
        t1 = s + alpha * ds_a
        t2 = z + alpha * dz_a
        t3 = jnp.sum(t1 * t2, axis=1, keepdims=True)
        t4 = jnp.sum(s * z, axis=1, keepdims=True)
        sig = (t3 / t4) ** 3

        # centering-corrector direction (rx = rz = 0 -> specialized solve)
        rs_cor = ((-mu * sig) + ds_a * dz_a) / s
        dx_c, ds_c, dz_c = solve_kkt_corrector(rs_cor, inv_d, sinv_mul)

        dx = dx_a + dx_c
        ds = ds_a + ds_c
        dz = dz_a + dz_c
        alpha = jnp.minimum(0.999 * jnp.minimum(get_step(z, dz),
                                                get_step(s, ds)), 1.0)
        x = x + alpha * dx
        s = s + alpha * ds
        z = z + alpha * dz
        return x, s, z, best_resids, best_x

    x, s, z, best_resids, best_x = lax.fori_loop(
        0, MAX_ITER, iter_body, (x, s, z, best_resids, best_x))

    # TODO(synk): qpth's data-dependent early exit (notImprovedLim=3, eps=1e-12,
    # mu blow-up guard) is not replicated; we run the full maxIter=20 sweep and
    # return the per-batch best-residual iterate (same best-tracking rule).
    zhat_ref[...] = best_x


def optnet_forward(x, M, L_raw, G, s0, z0, eps=1e-4):
    """Forward of OptNet_imp_fun: x -> zhat (solution of the batched QP)."""
    f32 = x.dtype
    nz = M.shape[0]
    ni = G.shape[0]
    B = x.shape[0]

    # One-time, batch-independent preprocessing (plain-JAX glue).
    L = M * L_raw
    Q = L @ L.T + eps * jnp.eye(nz, dtype=f32)
    Qinv = jnp.linalg.inv(Q)
    Gt = G.T
    QinvGt = Qinv @ Gt                                    # Q^{-1} G^T
    GQinv = QinvGt.T                                      # G Q^{-1}
    R = G @ QinvGt                                        # G Q^{-1} G^T
    Sinv0 = jnp.linalg.inv(R + jnp.eye(ni, dtype=f32))    # init Schur inverse
    h = (z0 @ Gt + s0)[None, :]                           # (1, ni)
    QGt = jnp.concatenate([Q, Gt], axis=1)                # [Q | G^T]
    QiQiGt = jnp.concatenate([Qinv, QinvGt], axis=1)      # [Q^{-1} | Q^{-1} G^T]

    # Shard the batch across a 2-wide "parallel" grid (2 TensorCores on v7x)
    # when the resulting block still satisfies the (8, 128) sublane rule.
    if B % 2 == 0 and (B // 2) % 8 == 0:
        n_blocks = 2
    else:
        n_blocks = 1
    bb = B // n_blocks

    def const_spec(arr):
        nd = arr.ndim
        return pl.BlockSpec(arr.shape, lambda i, _nd=nd: (0,) * _nd)

    batched_in = pl.BlockSpec((bb, nz), lambda i: (i, 0))
    batched_out = pl.BlockSpec((bb, nz), lambda i: (i, 0))

    return pl.pallas_call(
        pdipm_kernel,
        out_shape=jax.ShapeDtypeStruct((B, nz), f32),
        grid=(n_blocks,),
        in_specs=[batched_in, const_spec(G), const_spec(h), const_spec(QGt),
                  const_spec(QiQiGt), const_spec(GQinv), const_spec(R),
                  const_spec(Sinv0)],
        out_specs=batched_out,
        compiler_params=pltpu.CompilerParams(
            dimension_semantics=("parallel",)),
    )(x, G, h, QGt, QiQiGt, GQinv, R, Sinv0)


if __name__ == "__main__":
    # Module config: in_features = out_features = 32 (forward feeds x as the
    # QP linear term, so x must have out_features columns), nineq=16, neq=0.
    nBatch, nz, nineq = 16, 32, 16
    key = jax.random.PRNGKey(0)
    k1, k2, k3 = jax.random.split(key, 3)

    # Deterministic parameter init matching __init__ shapes.
    M = jnp.tril(jnp.ones((nz, nz), jnp.float32))                       # tril(ones)
    L_raw = jnp.tril(jax.random.uniform(k1, (nz, nz), jnp.float32))     # tril(rand)
    G = jax.random.uniform(k2, (nineq, nz), jnp.float32,
                           minval=-1.0, maxval=1.0)                     # U(-1,1)
    s0 = jnp.ones((nineq,), jnp.float32)
    z0 = jnp.zeros((nz,), jnp.float32)
    # (self.p / self.A / self.b are declared but unused in forward; A, b empty.)

    x = jax.random.normal(k3, (nBatch, nz), jnp.float32)

    fwd = jax.jit(optnet_forward)
    zhat = fwd(x, M, L_raw, G, s0, z0)
    zhat = jax.block_until_ready(zhat)

    assert zhat.shape == (nBatch, nz)
    assert bool(jnp.all(jnp.isfinite(zhat)))
    print("KERNEL_OK")
</pallas_src>

<mosaic_0001>
module attributes {stable_mosaic.version = 11 : i64} {
  func.func @pdipm_kernel(%arg0: i32, %arg1: memref<8x32xf32, #tpu.memory_space<vmem>>, %arg2: memref<16x32xf32, #tpu.memory_space<vmem>>, %arg3: memref<1x16xf32, #tpu.memory_space<vmem>>, %arg4: memref<32x48xf32, #tpu.memory_space<vmem>>, %arg5: memref<32x48xf32, #tpu.memory_space<vmem>>, %arg6: memref<16x32xf32, #tpu.memory_space<vmem>>, %arg7: memref<16x16xf32, #tpu.memory_space<vmem>>, %arg8: memref<16x16xf32, #tpu.memory_space<vmem>>, %arg9: memref<8x32xf32, #tpu.memory_space<vmem>>) attributes {dimension_semantics = [#tpu.dimension_semantics<parallel>], iteration_bounds = array<i64: 2>, scalar_prefetch = 0 : i64, scratch_operands = 0 : i64, tpu.core_type = #tpu.core_type<tc>, window_params = [{transform_indices = @transform_0, window_bounds = array<i64: 8, 32>}, {pipeline_mode = #tpu.pipeline_mode<synchronous>, transform_indices = @transform_1, window_bounds = array<i64: 16, 32>}, {pipeline_mode = #tpu.pipeline_mode<synchronous>, transform_indices = @transform_2, window_bounds = array<i64: 1, 16>}, {pipeline_mode = #tpu.pipeline_mode<synchronous>, transform_indices = @transform_3, window_bounds = array<i64: 32, 48>}, {pipeline_mode = #tpu.pipeline_mode<synchronous>, transform_indices = @transform_4, window_bounds = array<i64: 32, 48>}, {pipeline_mode = #tpu.pipeline_mode<synchronous>, transform_indices = @transform_5, window_bounds = array<i64: 16, 32>}, {pipeline_mode = #tpu.pipeline_mode<synchronous>, transform_indices = @transform_6, window_bounds = array<i64: 16, 16>}, {pipeline_mode = #tpu.pipeline_mode<synchronous>, transform_indices = @transform_7, window_bounds = array<i64: 16, 16>}, {transform_indices = @transform_8, window_bounds = array<i64: 8, 32>}]} {
    %c0 = arith.constant 0 : index
    %c0_0 = arith.constant 0 : index
    %0 = vector.load %arg1[%c0, %c0_0] : memref<8x32xf32, #tpu.memory_space<vmem>>, vector<8x32xf32>
    %c0_1 = arith.constant 0 : index
    %c0_2 = arith.constant 0 : index
    %1 = vector.load %arg2[%c0_1, %c0_2] : memref<16x32xf32, #tpu.memory_space<vmem>>, vector<16x32xf32>
    %c0_3 = arith.constant 0 : index
    %c0_4 = arith.constant 0 : index
    %2 = vector.load %arg3[%c0_3, %c0_4] : memref<1x16xf32, #tpu.memory_space<vmem>>, vector<1x16xf32>
    %c0_5 = arith.constant 0 : index
    %c0_6 = arith.constant 0 : index
    %3 = vector.load %arg4[%c0_5, %c0_6] : memref<32x48xf32, #tpu.memory_space<vmem>>, vector<32x48xf32>
    %c0_7 = arith.constant 0 : index
    %c0_8 = arith.constant 0 : index
    %4 = vector.load %arg5[%c0_7, %c0_8] : memref<32x48xf32, #tpu.memory_space<vmem>>, vector<32x48xf32>
    %c0_9 = arith.constant 0 : index
    %c0_10 = arith.constant 0 : index
    %5 = vector.load %arg6[%c0_9, %c0_10] : memref<16x32xf32, #tpu.memory_space<vmem>>, vector<16x32xf32>
    %c0_11 = arith.constant 0 : index
    %c0_12 = arith.constant 0 : index
    %6 = vector.load %arg7[%c0_11, %c0_12] : memref<16x16xf32, #tpu.memory_space<vmem>>, vector<16x16xf32>
    %c0_13 = arith.constant 0 : index
    %c0_14 = arith.constant 0 : index
    %7 = vector.load %arg8[%c0_13, %c0_14] : memref<16x16xf32, #tpu.memory_space<vmem>>, vector<16x16xf32>
    %8 = tpu.iota {dimensions = array<i32: 0>} : vector<16x16xi32>
    %9 = tpu.iota {dimensions = array<i32: 1>} : vector<16x16xi32>
    %10 = arith.cmpi eq, %8, %9 : vector<16x16xi32>
    %11 = arith.extui %10 : vector<16x16xi1> to vector<16x16xi32>
    %12 = arith.sitofp %11 : vector<16x16xi32> to vector<16x16xf32>
    %cst = arith.constant 0.000000e+00 : f32
    %13 = vector.broadcast %cst : f32 to vector<8x16x16xf32>
    %14 = vector.shape_cast %12 : vector<16x16xf32> to vector<1x16x16xf32>
    %15 = vector.broadcast %14 : vector<1x16x16xf32> to vector<8x16x16xf32>
    %16 = arith.addf %13, %15 : vector<8x16x16xf32>
    %17 = tpu.iota {dimensions = array<i32: 1>} : vector<1x16x16xi32>
    %18 = tpu.iota {dimensions = array<i32: 2>} : vector<1x16x16xi32>
    %19 = arith.cmpi eq, %17, %18 : vector<1x16x16xi32>
    %20 = tpu.iota {dimensions = array<i32: 1>} : vector<1x16x1xi32>
    %c0_i32 = arith.constant 0 : i32
    %21 = vector.broadcast %c0_i32 : i32 to vector<1x16x1xi32>
    %22 = arith.cmpi eq, %20, %21 : vector<1x16x1xi32>
    %c1_i32 = arith.constant 1 : i32
    %23 = vector.broadcast %c1_i32 : i32 to vector<1x16x1xi32>
    %24 = arith.cmpi eq, %20, %23 : vector<1x16x1xi32>
    %c2_i32 = arith.constant 2 : i32
    %25 = vector.broadcast %c2_i32 : i32 to vector<1x16x1xi32>
    %26 = arith.cmpi eq, %20, %25 : vector<1x16x1xi32>
    %c3_i32 = arith.constant 3 : i32
    %27 = vector.broadcast %c3_i32 : i32 to vector<1x16x1xi32>
    %28 = arith.cmpi eq, %20, %27 : vector<1x16x1xi32>
    %c4_i32 = arith.constant 4 : i32
    %29 = vector.broadcast %c4_i32 : i32 to vector<1x16x1xi32>
    %30 = arith.cmpi eq, %20, %29 : vector<1x16x1xi32>
    %c5_i32 = arith.constant 5 : i32
    %31 = vector.broadcast %c5_i32 : i32 to vector<1x16x1xi32>
    %32 = arith.cmpi eq, %20, %31 : vector<1x16x1xi32>
    %c6_i32 = arith.constant 6 : i32
    %33 = vector.broadcast %c6_i32 : i32 to vector<1x16x1xi32>
    %34 = arith.cmpi eq, %20, %33 : vector<1x16x1xi32>
    %c7_i32 = arith.constant 7 : i32
    %35 = vector.broadcast %c7_i32 : i32 to vector<1x16x1xi32>
    %36 = arith.cmpi eq, %20, %35 : vector<1x16x1xi32>
    %c8_i32 = arith.constant 8 : i32
    %37 = vector.broadcast %c8_i32 : i32 to vector<1x16x1xi32>
    %38 = arith.cmpi eq, %20, %37 : vector<1x16x1xi32>
    %c9_i32 = arith.constant 9 : i32
    %39 = vector.broadcast %c9_i32 : i32 to vector<1x16x1xi32>
    %40 = arith.cmpi eq, %20, %39 : vector<1x16x1xi32>
    %c10_i32 = arith.constant 10 : i32
    %41 = vector.broadcast %c10_i32 : i32 to vector<1x16x1xi32>
    %42 = arith.cmpi eq, %20, %41 : vector<1x16x1xi32>
    %c11_i32 = arith.constant 11 : i32
    %43 = vector.broadcast %c11_i32 : i32 to vector<1x16x1xi32>
    %44 = arith.cmpi eq, %20, %43 : vector<1x16x1xi32>
    %c12_i32 = arith.constant 12 : i32
    %45 = vector.broadcast %c12_i32 : i32 to vector<1x16x1xi32>
    %46 = arith.cmpi eq, %20, %45 : vector<1x16x1xi32>
    %c13_i32 = arith.constant 13 : i32
    %47 = vector.broadcast %c13_i32 : i32 to vector<1x16x1xi32>
    %48 = arith.cmpi eq, %20, %47 : vector<1x16x1xi32>
    %c14_i32 = arith.constant 14 : i32
    %49 = vector.broadcast %c14_i32 : i32 to vector<1x16x1xi32>
    %50 = arith.cmpi eq, %20, %49 : vector<1x16x1xi32>
    %c15_i32 = arith.constant 15 : i32
    %51 = vector.broadcast %c15_i32 : i32 to vector<1x16x1xi32>
    %52 = arith.cmpi eq, %20, %51 : vector<1x16x1xi32>
    %cst_15 = arith.constant 0.000000e+00 : f32
    %53 = vector.broadcast %cst_15 : f32 to vector<1x16xf32>
    %54 = arith.subf %53, %2 : vector<1x16xf32>
    %cst_16 = arith.constant dense<0.000000e+00> : vector<8x48xf32>
    %55 = tpu.matmul %0, %4, %cst_16 {dimension_numbers = #tpu.dot_dimension_numbers<[1], [0], [0], [1], [0, 0, 1, 1], [], []>} : vector<8x32xf32>, vector<32x48xf32>, vector<8x48xf32> -> vector<8x48xf32>
    %56 = vector.extract_strided_slice %55 {offsets = [0, 0], sizes = [8, 32], strides = [1, 1]} : vector<8x48xf32> to vector<8x32xf32>
    %57 = vector.extract_strided_slice %55 {offsets = [0, 32], sizes = [8, 16], strides = [1, 1]} : vector<8x48xf32> to vector<8x16xf32>
    %cst_17 = arith.constant 0.000000e+00 : f32
    %58 = vector.broadcast %cst_17 : f32 to vector<8x16xf32>
    %59 = arith.addf %57, %58 : vector<8x16xf32>
    %60 = vector.broadcast %54 : vector<1x16xf32> to vector<8x16xf32>
    %61 = arith.subf %59, %60 : vector<8x16xf32>
    %cst_18 = arith.constant dense<0.000000e+00> : vector<8x16xf32>
    %62 = tpu.matmul %61, %7, %cst_18 {dimension_numbers = #tpu.dot_dimension_numbers<[1], [0], [0], [1], [0, 0, 1, 1], [], []>} : vector<8x16xf32>, vector<16x16xf32>, vector<8x16xf32> -> vector<8x16xf32>
    %cst_19 = arith.constant 0.000000e+00 : f32
    %63 = vector.broadcast %cst_19 : f32 to vector<8x16xf32>
    %64 = arith.subf %63, %62 : vector<8x16xf32>
    %cst_20 = arith.constant 0.000000e+00 : f32
    %65 = vector.broadcast %cst_20 : f32 to vector<8x32xf32>
    %66 = arith.subf %65, %56 : vector<8x32xf32>
    %cst_21 = arith.constant dense<0.000000e+00> : vector<8x32xf32>
    %67 = tpu.matmul %64, %5, %cst_21 {dimension_numbers = #tpu.dot_dimension_numbers<[1], [0], [0], [1], [0, 0, 1, 1], [], []>} : vector<8x16xf32>, vector<16x32xf32>, vector<8x32xf32> -> vector<8x32xf32>
    %68 = arith.subf %66, %67 : vector<8x32xf32>
    %cst_22 = arith.constant -0.000000e+00 : f32
    %69 = vector.broadcast %cst_22 : f32 to vector<8x16xf32>
    %70 = arith.subf %69, %64 : vector<8x16xf32>
    %cst_23 = arith.constant 1.000000e+00 : f32
    %71 = vector.broadcast %cst_23 : f32 to vector<8x16xf32>
    %72 = arith.mulf %70, %71 : vector<8x16xf32>
    %cst_24 = arith.constant dense<0x7F800000> : vector<8xf32>
    %73 = vector.multi_reduction <minimumf>, %72, %cst_24 [1] : vector<8x16xf32> to vector<8xf32>
    %74 = vector.shape_cast %73 : vector<8xf32> to vector<8x1xf32>
    %cst_25 = arith.constant 0.000000e+00 : f32
    %75 = vector.broadcast %cst_25 : f32 to vector<8x1xf32>
    %76 = arith.cmpf olt, %74, %75 : vector<8x1xf32>
    %77 = vector.broadcast %74 : vector<8x1xf32> to vector<8x16xf32>
    %78 = arith.subf %72, %77 : vector<8x16xf32>
    %cst_26 = arith.constant 1.000000e+00 : f32
    %79 = vector.broadcast %cst_26 : f32 to vector<8x16xf32>
    %80 = arith.addf %78, %79 : vector<8x16xf32>
    %81 = vector.shape_cast %76 : vector<8x1xi1> to vector<8x1xi1>
    %82 = vector.broadcast %81 : vector<8x1xi1> to vector<8x16xi1>
    %83 = arith.select %82, %80, %72 : vector<8x16xi1>, vector<8x16xf32>
    %cst_27 = arith.constant dense<0x7F800000> : vector<8xf32>
    %84 = vector.multi_reduction <minimumf>, %64, %cst_27 [1] : vector<8x16xf32> to vector<8xf32>
    %85 = vector.shape_cast %84 : vector<8xf32> to vector<8x1xf32>
    %cst_28 = arith.constant 0.000000e+00 : f32
    %86 = vector.broadcast %cst_28 : f32 to vector<8x1xf32>
    %87 = arith.cmpf olt, %85, %86 : vector<8x1xf32>
    %88 = vector.broadcast %85 : vector<8x1xf32> to vector<8x16xf32>
    %89 = arith.subf %64, %88 : vector<8x16xf32>
    %cst_29 = arith.constant 1.000000e+00 : f32
    %90 = vector.broadcast %cst_29 : f32 to vector<8x16xf32>
    %91 = arith.addf %89, %90 : vector<8x16xf32>
    %92 = vector.shape_cast %87 : vector<8x1xi1> to vector<8x1xi1>
    %93 = vector.broadcast %92 : vector<8x1xi1> to vector<8x16xi1>
    %94 = arith.select %93, %91, %64 : vector<8x16xi1>, vector<8x16xf32>
    %cst_30 = arith.constant 0x7F800000 : f32
    %95 = vector.broadcast %cst_30 : f32 to vector<8x1xf32>
    %cst_31 = arith.constant 0.000000e+00 : f32
    %96 = vector.broadcast %cst_31 : f32 to vector<8x32xf32>
    %c0_i32_32 = arith.constant 0 : i32
    %c20_i32 = arith.constant 20 : i32
    %97 = arith.addi %c0_i32_32, %c20_i32 : i32
    %c1_i32_33 = arith.constant 1 : i32
    %98:5 = scf.for %arg10 = %c0_i32_32 to %97 step %c1_i32_33 iter_args(%arg11 = %68, %arg12 = %83, %arg13 = %94, %arg14 = %95, %arg15 = %96) -> (vector<8x32xf32>, vector<8x16xf32>, vector<8x16xf32>, vector<8x1xf32>, vector<8x32xf32>)  : i32 {
      %cst_36 = arith.constant dense<0.000000e+00> : vector<8x48xf32>
      %100 = tpu.matmul %arg11, %3, %cst_36 {dimension_numbers = #tpu.dot_dimension_numbers<[1], [0], [0], [1], [0, 0, 1, 1], [], []>} : vector<8x32xf32>, vector<32x48xf32>, vector<8x48xf32> -> vector<8x48xf32>
      %cst_37 = arith.constant dense<0.000000e+00> : vector<8x32xf32>
      %101 = tpu.matmul %arg13, %1, %cst_37 {dimension_numbers = #tpu.dot_dimension_numbers<[1], [0], [0], [1], [0, 0, 1, 1], [], []>} : vector<8x16xf32>, vector<16x32xf32>, vector<8x32xf32> -> vector<8x32xf32>
      %102 = vector.extract_strided_slice %100 {offsets = [0, 0], sizes = [8, 32], strides = [1, 1]} : vector<8x48xf32> to vector<8x32xf32>
      %103 = arith.addf %101, %102 : vector<8x32xf32>
      %104 = arith.addf %103, %0 : vector<8x32xf32>
      %105 = vector.extract_strided_slice %100 {offsets = [0, 32], sizes = [8, 16], strides = [1, 1]} : vector<8x48xf32> to vector<8x16xf32>
      %106 = arith.addf %105, %arg12 : vector<8x16xf32>
      %107 = vector.broadcast %2 : vector<1x16xf32> to vector<8x16xf32>
      %108 = arith.subf %106, %107 : vector<8x16xf32>
      %109 = arith.mulf %arg12, %arg13 : vector<8x16xf32>
      %cst_38 = arith.constant dense<0.000000e+00> : vector<8xf32>
      %110 = vector.multi_reduction <add>, %109, %cst_38 [1] : vector<8x16xf32> to vector<8xf32>
      %111 = vector.shape_cast %110 : vector<8xf32> to vector<8x1xf32>
      %112 = math.absf %111 : vector<8x1xf32>
      %cst_39 = arith.constant 6.250000e-02 : f32
      %113 = vector.broadcast %cst_39 : f32 to vector<8x1xf32>
      %114 = arith.mulf %112, %113 : vector<8x1xf32>
      %115 = arith.mulf %108, %108 : vector<8x16xf32>
      %cst_40 = arith.constant dense<0.000000e+00> : vector<8xf32>
      %116 = vector.multi_reduction <add>, %115, %cst_40 [1] : vector<8x16xf32> to vector<8xf32>
      %117 = vector.shape_cast %116 : vector<8xf32> to vector<8x1xf32>
      %118 = math.sqrt %117 : vector<8x1xf32>
      %119 = arith.mulf %104, %104 : vector<8x32xf32>
      %cst_41 = arith.constant dense<0.000000e+00> : vector<8xf32>
      %120 = vector.multi_reduction <add>, %119, %cst_41 [1] : vector<8x32xf32> to vector<8xf32>
      %121 = vector.shape_cast %120 : vector<8xf32> to vector<8x1xf32>
      %122 = math.sqrt %121 : vector<8x1xf32>
      %123 = arith.addf %118, %122 : vector<8x1xf32>
      %cst_42 = arith.constant 1.600000e+01 : f32
      %124 = vector.broadcast %cst_42 : f32 to vector<8x1xf32>
      %125 = arith.mulf %124, %114 : vector<8x1xf32>
      %126 = arith.addf %123, %125 : vector<8x1xf32>
      %127 = arith.cmpf olt, %126, %arg14 : vector<8x1xf32>
      %128 = arith.select %127, %126, %arg14 : vector<8x1xi1>, vector<8x1xf32>
      %129 = vector.shape_cast %127 : vector<8x1xi1> to vector<8x1xi1>
      %130 = vector.broadcast %129 : vector<8x1xi1> to vector<8x32xi1>
      %131 = arith.select %130, %arg11, %arg15 : vector<8x32xi1>, vector<8x32xf32>
      %132 = arith.divf %arg13, %arg12 : vector<8x16xf32>
      %133 = tpu.reciprocal %132 {approx = true} : vector<8x16xf32> -> vector<8x16xf32>
      %134 = vector.shape_cast %6 : vector<16x16xf32> to vector<1x16x16xf32>
      %135 = arith.divf %arg12, %arg13 : vector<8x16xf32>
      %136 = vector.shape_cast %135 : vector<8x16xf32> to vector<8x1x16xf32>
      %cst_43 = arith.constant 0.000000e+00 : f32
      %137 = vector.shape_cast %19 : vector<1x16x16xi1> to vector<1x16x16xi1>
      %138 = vector.broadcast %137 : vector<1x16x16xi1> to vector<8x16x16xi1>
      %139 = vector.shape_cast %136 : vector<8x1x16xf32> to vector<8x1x16xf32>
      %140 = vector.broadcast %139 : vector<8x1x16xf32> to vector<8x16x16xf32>
      %141 = vector.broadcast %cst_43 : f32 to vector<8x16x16xf32>
      %142 = arith.select %138, %140, %141 : vector<8x16x16xi1>, vector<8x16x16xf32>
      %143 = vector.broadcast %134 : vector<1x16x16xf32> to vector<8x16x16xf32>
      %144 = arith.addf %143, %142 : vector<8x16x16xf32>
      %145 = tpu.concatenate %144, %16 in 2 : vector<8x16x16xf32>, vector<8x16x16xf32> -> vector<8x16x32xf32>
      %146 = vector.extract_strided_slice %145 {offsets = [0, 0, 0], sizes = [8, 1, 1], strides = [1, 1, 1]} : vector<8x16x32xf32> to vector<8x1x1xf32>
      %147 = vector.extract_strided_slice %145 {offsets = [0, 0, 0], sizes = [8, 1, 32], strides = [1, 1, 1]} : vector<8x16x32xf32> to vector<8x1x32xf32>
      %148 = vector.broadcast %146 : vector<8x1x1xf32> to vector<8x1x32xf32>
      %149 = arith.divf %147, %148 : vector<8x1x32xf32>
      %150 = vector.extract_strided_slice %145 {offsets = [0, 0, 0], sizes = [8, 16, 1], strides = [1, 1, 1]} : vector<8x16x32xf32> to vector<8x16x1xf32>
      %151 = vector.broadcast %150 : vector<8x16x1xf32> to vector<8x16x32xf32>
      %152 = vector.broadcast %149 : vector<8x1x32xf32> to vector<8x16x32xf32>
      %153 = arith.mulf %151, %152 : vector<8x16x32xf32>
      %154 = arith.subf %145, %153 : vector<8x16x32xf32>
      %155 = vector.shape_cast %22 : vector<1x16x1xi1> to vector<1x16x1xi1>
      %156 = vector.broadcast %155 : vector<1x16x1xi1> to vector<8x16x32xi1>
      %157 = vector.shape_cast %149 : vector<8x1x32xf32> to vector<8x1x32xf32>
      %158 = vector.broadcast %157 : vector<8x1x32xf32> to vector<8x16x32xf32>
      %159 = arith.select %156, %158, %154 : vector<8x16x32xi1>, vector<8x16x32xf32>
      %160 = vector.extract_strided_slice %159 {offsets = [0, 1, 1], sizes = [8, 1, 1], strides = [1, 1, 1]} : vector<8x16x32xf32> to vector<8x1x1xf32>
      %161 = vector.extract_strided_slice %159 {offsets = [0, 1, 0], sizes = [8, 1, 32], strides = [1, 1, 1]} : vector<8x16x32xf32> to vector<8x1x32xf32>
      %162 = vector.broadcast %160 : vector<8x1x1xf32> to vector<8x1x32xf32>
      %163 = arith.divf %161, %162 : vector<8x1x32xf32>
      %164 = vector.extract_strided_slice %159 {offsets = [0, 0, 1], sizes = [8, 16, 1], strides = [1, 1, 1]} : vector<8x16x32xf32> to vector<8x16x1xf32>
      %165 = vector.broadcast %164 : vector<8x16x1xf32> to vector<8x16x32xf32>
      %166 = vector.broadcast %163 : vector<8x1x32xf32> to vector<8x16x32xf32>
      %167 = arith.mulf %165, %166 : vector<8x16x32xf32>
      %168 = arith.subf %159, %167 : vector<8x16x32xf32>
      %169 = vector.shape_cast %24 : vector<1x16x1xi1> to vector<1x16x1xi1>
      %170 = vector.broadcast %169 : vector<1x16x1xi1> to vector<8x16x32xi1>
      %171 = vector.shape_cast %163 : vector<8x1x32xf32> to vector<8x1x32xf32>
      %172 = vector.broadcast %171 : vector<8x1x32xf32> to vector<8x16x32xf32>
      %173 = arith.select %170, %172, %168 : vector<8x16x32xi1>, vector<8x16x32xf32>
      %174 = vector.extract_strided_slice %173 {offsets = [0, 2, 2], sizes = [8, 1, 1], strides = [1, 1, 1]} : vector<8x16x32xf32> to vector<8x1x1xf32>
      %175 = vector.extract_strided_slice %173 {offsets = [0, 2, 0], sizes = [8, 1, 32], strides = [1, 1, 1]} : vector<8x16x32xf32> to vector<8x1x32xf32>
      %176 = vector.broadcast %174 : vector<8x1x1xf32> to vector<8x1x32xf32>
      %177 = arith.divf %175, %176 : vector<8x1x32xf32>
      %178 = vector.extract_strided_slice %173 {offsets = [0, 0, 2], sizes = [8, 16, 1], strides = [1, 1, 1]} : vector<8x16x32xf32> to vector<8x16x1xf32>
      %179 = vector.broadcast %178 : vector<8x16x1xf32> to vector<8x16x32xf32>
      %180 = vector.broadcast %177 : vector<8x1x32xf32> to vector<8x16x32xf32>
      %181 = arith.mulf %179, %180 : vector<8x16x32xf32>
      %182 = arith.subf %173, %181 : vector<8x16x32xf32>
      %183 = vector.shape_cast %26 : vector<1x16x1xi1> to vector<1x16x1xi1>
      %184 = vector.broadcast %183 : vector<1x16x1xi1> to vector<8x16x32xi1>
      %185 = vector.shape_cast %177 : vector<8x1x32xf32> to vector<8x1x32xf32>
      %186 = vector.broadcast %185 : vector<8x1x32xf32> to vector<8x16x32xf32>
      %187 = arith.select %184, %186, %182 : vector<8x16x32xi1>, vector<8x16x32xf32>
      %188 = vector.extract_strided_slice %187 {offsets = [0, 3, 3], sizes = [8, 1, 1], strides = [1, 1, 1]} : vector<8x16x32xf32> to vector<8x1x1xf32>
      %189 = vector.extract_strided_slice %187 {offsets = [0, 3, 0], sizes = [8, 1, 32], strides = [1, 1, 1]} : vector<8x16x32xf32> to vector<8x1x32xf32>
      %190 = vector.broadcast %188 : vector<8x1x1xf32> to vector<8x1x32xf32>
      %191 = arith.divf %189, %190 : vector<8x1x32xf32>
      %192 = vector.extract_strided_slice %187 {offsets = [0, 0, 3], sizes = [8, 16, 1], strides = [1, 1, 1]} : vector<8x16x32xf32> to vector<8x16x1xf32>
      %193 = vector.broadcast %192 : vector<8x16x1xf32> to vector<8x16x32xf32>
      %194 = vector.broadcast %191 : vector<8x1x32xf32> to vector<8x16x32xf32>
      %195 = arith.mulf %193, %194 : vector<8x16x32xf32>
      %196 = arith.subf %187, %195 : vector<8x16x32xf32>
      %197 = vector.shape_cast %28 : vector<1x16x1xi1> to vector<1x16x1xi1>
      %198 = vector.broadcast %197 : vector<1x16x1xi1> to vector<8x16x32xi1>
      %199 = vector.shape_cast %191 : vector<8x1x32xf32> to vector<8x1x32xf32>
      %200 = vector.broadcast %199 : vector<8x1x32xf32> to vector<8x16x32xf32>
      %201 = arith.select %198, %200, %196 : vector<8x16x32xi1>, vector<8x16x32xf32>
      %202 = vector.extract_strided_slice %201 {offsets = [0, 4, 4], sizes = [8, 1, 1], strides = [1, 1, 1]} : vector<8x16x32xf32> to vector<8x1x1xf32>
      %203 = vector.extract_strided_slice %201 {offsets = [0, 4, 0], sizes = [8, 1, 32], strides = [1, 1, 1]} : vector<8x16x32xf32> to vector<8x1x32xf32>
      %204 = vector.broadcast %202 : vector<8x1x1xf32> to vector<8x1x32xf32>
      %205 = arith.divf %203, %204 : vector<8x1x32xf32>
      %206 = vector.extract_strided_slice %201 {offsets = [0, 0, 4], sizes = [8, 16, 1], strides = [1, 1, 1]} : vector<8x16x32xf32> to vector<8x16x1xf32>
      %207 = vector.broadcast %206 : vector<8x16x1xf32> to vector<8x16x32xf32>
      %208 = vector.broadcast %205 : vector<8x1x32xf32> to vector<8x16x32xf32>
      %209 = arith.mulf %207, %208 : vector<8x16x32xf32>
      %210 = arith.subf %201, %209 : vector<8x16x32xf32>
      %211 = vector.shape_cast %30 : vector<1x16x1xi1> to vector<1x16x1xi1>
      %212 = vector.broadcast %211 : vector<1x16x1xi1> to vector<8x16x32xi1>
      %213 = vector.shape_cast %205 : vector<8x1x32xf32> to vector<8x1x32xf32>
      %214 = vector.broadcast %213 : vector<8x1x32xf32> to vector<8x16x32xf32>
      %215 = arith.select %212, %214, %210 : vector<8x16x32xi1>, vector<8x16x32xf32>
      %216 = vector.extract_strided_slice %215 {offsets = [0, 5, 5], sizes = [8, 1, 1], strides = [1, 1, 1]} : vector<8x16x32xf32> to vector<8x1x1xf32>
      %217 = vector.extract_strided_slice %215 {offsets = [0, 5, 0], sizes = [8, 1, 32], strides = [1, 1, 1]} : vector<8x16x32xf32> to vector<8x1x32xf32>
      %218 = vector.broadcast %216 : vector<8x1x1xf32> to vector<8x1x32xf32>
      %219 = arith.divf %217, %218 : vector<8x1x32xf32>
      %220 = vector.extract_strided_slice %215 {offsets = [0, 0, 5], sizes = [8, 16, 1], strides = [1, 1, 1]} : vector<8x16x32xf32> to vector<8x16x1xf32>
      %221 = vector.broadcast %220 : vector<8x16x1xf32> to vector<8x16x32xf32>
      %222 = vector.broadcast %219 : vector<8x1x32xf32> to vector<8x16x32xf32>
      %223 = arith.mulf %221, %222 : vector<8x16x32xf32>
      %224 = arith.subf %215, %223 : vector<8x16x32xf32>
      %225 = vector.shape_cast %32 : vector<1x16x1xi1> to vector<1x16x1xi1>
      %226 = vector.broadcast %225 : vector<1x16x1xi1> to vector<8x16x32xi1>
      %227 = vector.shape_cast %219 : vector<8x1x32xf32> to vector<8x1x32xf32>
      %228 = vector.broadcast %227 : vector<8x1x32xf32> to vector<8x16x32xf32>
      %229 = arith.select %226, %228, %224 : vector<8x16x32xi1>, vector<8x16x32xf32>
      %230 = vector.extract_strided_slice %229 {offsets = [0, 6, 6], sizes = [8, 1, 1], strides = [1, 1, 1]} : vector<8x16x32xf32> to vector<8x1x1xf32>
      %231 = vector.extract_strided_slice %229 {offsets = [0, 6, 0], sizes = [8, 1, 32], strides = [1, 1, 1]} : vector<8x16x32xf32> to vector<8x1x32xf32>
      %232 = vector.broadcast %230 : vector<8x1x1xf32> to vector<8x1x32xf32>
      %233 = arith.divf %231, %232 : vector<8x1x32xf32>
      %234 = vector.extract_strided_slice %229 {offsets = [0, 0, 6], sizes = [8, 16, 1], strides = [1, 1, 1]} : vector<8x16x32xf32> to vector<8x16x1xf32>
      %235 = vector.broadcast %234 : vector<8x16x1xf32> to vector<8x16x32xf32>
      %236 = vector.broadcast %233 : vector<8x1x32xf32> to vector<8x16x32xf32>
      %237 = arith.mulf %235, %236 : vector<8x16x32xf32>
      %238 = arith.subf %229, %237 : vector<8x16x32xf32>
      %239 = vector.shape_cast %34 : vector<1x16x1xi1> to vector<1x16x1xi1>
      %240 = vector.broadcast %239 : vector<1x16x1xi1> to vector<8x16x32xi1>
      %241 = vector.shape_cast %233 : vector<8x1x32xf32> to vector<8x1x32xf32>
      %242 = vector.broadcast %241 : vector<8x1x32xf32> to vector<8x16x32xf32>
      %243 = arith.select %240, %242, %238 : vector<8x16x32xi1>, vector<8x16x32xf32>
      %244 = vector.extract_strided_slice %243 {offsets = [0, 7, 7], sizes = [8, 1, 1], strides = [1, 1, 1]} : vector<8x16x32xf32> to vector<8x1x1xf32>
      %245 = vector.extract_strided_slice %243 {offsets = [0, 7, 0], sizes = [8, 1, 32], strides = [1, 1, 1]} : vector<8x16x32xf32> to vector<8x1x32xf32>
      %246 = vector.broadcast %244 : vector<8x1x1xf32> to vector<8x1x32xf32>
      %247 = arith.divf %245, %246 : vector<8x1x32xf32>
      %248 = vector.extract_strided_slice %243 {offsets = [0, 0, 7], sizes = [8, 16, 1], strides = [1, 1, 1]} : vector<8x16x32xf32> to vector<8x16x1xf32>
      %249 = vector.broadcast %248 : vector<8x16x1xf32> to vector<8x16x32xf32>
      %250 = vector.broadcast %247 : vector<8x1x32xf32> to vector<8x16x32xf32>
      %251 = arith.mulf %249, %250 : vector<8x16x32xf32>
      %252 = arith.subf %243, %251 : vector<8x16x32xf32>
      %253 = vector.shape_cast %36 : vector<1x16x1xi1> to vector<1x16x1xi1>
      %254 = vector.broadcast %253 : vector<1x16x1xi1> to vector<8x16x32xi1>
      %255 = vector.shape_cast %247 : vector<8x1x32xf32> to vector<8x1x32xf32>
      %256 = vector.broadcast %255 : vector<8x1x32xf32> to vector<8x16x32xf32>
      %257 = arith.select %254, %256, %252 : vector<8x16x32xi1>, vector<8x16x32xf32>
      %258 = vector.extract_strided_slice %257 {offsets = [0, 8, 8], sizes = [8, 1, 1], strides = [1, 1, 1]} : vector<8x16x32xf32> to vector<8x1x1xf32>
      %259 = vector.extract_strided_slice %257 {offsets = [0, 8, 0], sizes = [8, 1, 32], strides = [1, 1, 1]} : vector<8x16x32xf32> to vector<8x1x32xf32>
      %260 = vector.broadcast %258 : vector<8x1x1xf32> to vector<8x1x32xf32>
      %261 = arith.divf %259, %260 : vector<8x1x32xf32>
      %262 = vector.extract_strided_slice %257 {offsets = [0, 0, 8], sizes = [8, 16, 1], strides = [1, 1, 1]} : vector<8x16x32xf32> to vector<8x16x1xf32>
      %263 = vector.broadcast %262 : vector<8x16x1xf32> to vector<8x16x32xf32>
      %264 = vector.broadcast %261 : vector<8x1x32xf32> to vector<8x16x32xf32>
      %265 = arith.mulf %263, %264 : vector<8x16x32xf32>
      %266 = arith.subf %257, %265 : vector<8x16x32xf32>
      %267 = vector.shape_cast %38 : vector<1x16x1xi1> to vector<1x16x1xi1>
      %268 = vector.broadcast %267 : vector<1x16x1xi1> to vector<8x16x32xi1>
      %269 = vector.shape_cast %261 : vector<8x1x32xf32> to vector<8x1x32xf32>
      %270 = vector.broadcast %269 : vector<8x1x32xf32> to vector<8x16x32xf32>
      %271 = arith.select %268, %270, %266 : vector<8x16x32xi1>, vector<8x16x32xf32>
      %272 = vector.extract_strided_slice %271 {offsets = [0, 9, 9], sizes = [8, 1, 1], strides = [1, 1, 1]} : vector<8x16x32xf32> to vector<8x1x1xf32>
      %273 = vector.extract_strided_slice %271 {offsets = [0, 9, 0], sizes = [8, 1, 32], strides = [1, 1, 1]} : vector<8x16x32xf32> to vector<8x1x32xf32>
      %274 = vector.broadcast %272 : vector<8x1x1xf32> to vector<8x1x32xf32>
      %275 = arith.divf %273, %274 : vector<8x1x32xf32>
      %276 = vector.extract_strided_slice %271 {offsets = [0, 0, 9], sizes = [8, 16, 1], strides = [1, 1, 1]} : vector<8x16x32xf32> to vector<8x16x1xf32>
      %277 = vector.broadcast %276 : vector<8x16x1xf32> to vector<8x16x32xf32>
      %278 = vector.broadcast %275 : vector<8x1x32xf32> to vector<8x16x32xf32>
      %279 = arith.mulf %277, %278 : vector<8x16x32xf32>
      %280 = arith.subf %271, %279 : vector<8x16x32xf32>
      %281 = vector.shape_cast %40 : vector<1x16x1xi1> to vector<1x16x1xi1>
      %282 = vector.broadcast %281 : vector<1x16x1xi1> to vector<8x16x32xi1>
      %283 = vector.shape_cast %275 : vector<8x1x32xf32> to vector<8x1x32xf32>
      %284 = vector.broadcast %283 : vector<8x1x32xf32> to vector<8x16x32xf32>
      %285 = arith.select %282, %284, %280 : vector<8x16x32xi1>, vector<8x16x32xf32>
      %286 = vector.extract_strided_slice %285 {offsets = [0, 10, 10], sizes = [8, 1, 1], strides = [1, 1, 1]} : vector<8x16x32xf32> to vector<8x1x1xf32>
      %287 = vector.extract_strided_slice %285 {offsets = [0, 10, 0], sizes = [8, 1, 32], strides = [1, 1, 1]} : vector<8x16x32xf32> to vector<8x1x32xf32>
      %288 = vector.broadcast %286 : vector<8x1x1xf32> to vector<8x1x32xf32>
      %289 = arith.divf %287, %288 : vector<8x1x32xf32>
      %290 = vector.extract_strided_slice %285 {offsets = [0, 0, 10], sizes = [8, 16, 1], strides = [1, 1, 1]} : vector<8x16x32xf32> to vector<8x16x1xf32>
      %291 = vector.broadcast %290 : vector<8x16x1xf32> to vector<8x16x32xf32>
      %292 = vector.broadcast %289 : vector<8x1x32xf32> to vector<8x16x32xf32>
      %293 = arith.mulf %291, %292 : vector<8x16x32xf32>
      %294 = arith.subf %285, %293 : vector<8x16x32xf32>
      %295 = vector.shape_cast %42 : vector<1x16x1xi1> to vector<1x16x1xi1>
      %296 = vector.broadcast %295 : vector<1x16x1xi1> to vector<8x16x32xi1>
      %297 = vector.shape_cast %289 : vector<8x1x32xf32> to vector<8x1x32xf32>
      %298 = vector.broadcast %297 : vector<8x1x32xf32> to vector<8x16x32xf32>
      %299 = arith.select %296, %298, %294 : vector<8x16x32xi1>, vector<8x16x32xf32>
      %300 = vector.extract_strided_slice %299 {offsets = [0, 11, 11], sizes = [8, 1, 1], strides = [1, 1, 1]} : vector<8x16x32xf32> to vector<8x1x1xf32>
      %301 = vector.extract_strided_slice %299 {offsets = [0, 11, 0], sizes = [8, 1, 32], strides = [1, 1, 1]} : vector<8x16x32xf32> to vector<8x1x32xf32>
      %302 = vector.broadcast %300 : vector<8x1x1xf32> to vector<8x1x32xf32>
      %303 = arith.divf %301, %302 : vector<8x1x32xf32>
      %304 = vector.extract_strided_slice %299 {offsets = [0, 0, 11], sizes = [8, 16, 1], strides = [1, 1, 1]} : vector<8x16x32xf32> to vector<8x16x1xf32>
      %305 = vector.broadcast %304 : vector<8x16x1xf32> to vector<8x16x32xf32>
      %306 = vector.broadcast %303 : vector<8x1x32xf32> to vector<8x16x32xf32>
      %307 = arith.mulf %305, %306 : vector<8x16x32xf32>
      %308 = arith.subf %299, %307 : vector<8x16x32xf32>
      %309 = vector.shape_cast %44 : vector<1x16x1xi1> to vector<1x16x1xi1>
      %310 = vector.broadcast %309 : vector<1x16x1xi1> to vector<8x16x32xi1>
      %311 = vector.shape_cast %303 : vector<8x1x32xf32> to vector<8x1x32xf32>
      %312 = vector.broadcast %311 : vector<8x1x32xf32> to vector<8x16x32xf32>
      %313 = arith.select %310, %312, %308 : vector<8x16x32xi1>, vector<8x16x32xf32>
      %314 = vector.extract_strided_slice %313 {offsets = [0, 12, 12], sizes = [8, 1, 1], strides = [1, 1, 1]} : vector<8x16x32xf32> to vector<8x1x1xf32>
      %315 = vector.extract_strided_slice %313 {offsets = [0, 12, 0], sizes = [8, 1, 32], strides = [1, 1, 1]} : vector<8x16x32xf32> to vector<8x1x32xf32>
      %316 = vector.broadcast %314 : vector<8x1x1xf32> to vector<8x1x32xf32>
      %317 = arith.divf %315, %316 : vector<8x1x32xf32>
      %318 = vector.extract_strided_slice %313 {offsets = [0, 0, 12], sizes = [8, 16, 1], strides = [1, 1, 1]} : vector<8x16x32xf32> to vector<8x16x1xf32>
      %319 = vector.broadcast %318 : vector<8x16x1xf32> to vector<8x16x32xf32>
      %320 = vector.broadcast %317 : vector<8x1x32xf32> to vector<8x16x32xf32>
      %321 = arith.mulf %319, %320 : vector<8x16x32xf32>
      %322 = arith.subf %313, %321 : vector<8x16x32xf32>
      %323 = vector.shape_cast %46 : vector<1x16x1xi1> to vector<1x16x1xi1>
      %324 = vector.broadcast %323 : vector<1x16x1xi1> to vector<8x16x32xi1>
      %325 = vector.shape_cast %317 : vector<8x1x32xf32> to vector<8x1x32xf32>
      %326 = vector.broadcast %325 : vector<8x1x32xf32> to vector<8x16x32xf32>
      %327 = arith.select %324, %326, %322 : vector<8x16x32xi1>, vector<8x16x32xf32>
      %328 = vector.extract_strided_slice %327 {offsets = [0, 13, 13], sizes = [8, 1, 1], strides = [1, 1, 1]} : vector<8x16x32xf32> to vector<8x1x1xf32>
      %329 = vector.extract_strided_slice %327 {offsets = [0, 13, 0], sizes = [8, 1, 32], strides = [1, 1, 1]} : vector<8x16x32xf32> to vector<8x1x32xf32>
      %330 = vector.broadcast %328 : vector<8x1x1xf32> to vector<8x1x32xf32>
      %331 = arith.divf %329, %330 : vector<8x1x32xf32>
      %332 = vector.extract_strided_slice %327 {offsets = [0, 0, 13], sizes = [8, 16, 1], strides = [1, 1, 1]} : vector<8x16x32xf32> to vector<8x16x1xf32>
      %333 = vector.broadcast %332 : vector<8x16x1xf32> to vector<8x16x32xf32>
      %334 = vector.broadcast %331 : vector<8x1x32xf32> to vector<8x16x32xf32>
      %335 = arith.mulf %333, %334 : vector<8x16x32xf32>
      %336 = arith.subf %327, %335 : vector<8x16x32xf32>
      %337 = vector.shape_cast %48 : vector<1x16x1xi1> to vector<1x16x1xi1>
      %338 = vector.broadcast %337 : vector<1x16x1xi1> to vector<8x16x32xi1>
      %339 = vector.shape_cast %331 : vector<8x1x32xf32> to vector<8x1x32xf32>
      %340 = vector.broadcast %339 : vector<8x1x32xf32> to vector<8x16x32xf32>
      %341 = arith.select %338, %340, %336 : vector<8x16x32xi1>, vector<8x16x32xf32>
      %342 = vector.extract_strided_slice %341 {offsets = [0, 14, 14], sizes = [8, 1, 1], strides = [1, 1, 1]} : vector<8x16x32xf32> to vector<8x1x1xf32>
      %343 = vector.extract_strided_slice %341 {offsets = [0, 14, 0], sizes = [8, 1, 32], strides = [1, 1, 1]} : vector<8x16x32xf32> to vector<8x1x32xf32>
      %344 = vector.broadcast %342 : vector<8x1x1xf32> to vector<8x1x32xf32>
      %345 = arith.divf %343, %344 : vector<8x1x32xf32>
      %346 = vector.extract_strided_slice %341 {offsets = [0, 0, 14], sizes = [8, 16, 1], strides = [1, 1, 1]} : vector<8x16x32xf32> to vector<8x16x1xf32>
      %347 = vector.broadcast %346 : vector<8x16x1xf32> to vector<8x16x32xf32>
      %348 = vector.broadcast %345 : vector<8x1x32xf32> to vector<8x16x32xf32>
      %349 = arith.mulf %347, %348 : vector<8x16x32xf32>
      %350 = arith.subf %341, %349 : vector<8x16x32xf32>
      %351 = vector.shape_cast %50 : vector<1x16x1xi1> to vector<1x16x1xi1>
      %352 = vector.broadcast %351 : vector<1x16x1xi1> to vector<8x16x32xi1>
      %353 = vector.shape_cast %345 : vector<8x1x32xf32> to vector<8x1x32xf32>
      %354 = vector.broadcast %353 : vector<8x1x32xf32> to vector<8x16x32xf32>
      %355 = arith.select %352, %354, %350 : vector<8x16x32xi1>, vector<8x16x32xf32>
      %356 = vector.extract_strided_slice %355 {offsets = [0, 15, 15], sizes = [8, 1, 1], strides = [1, 1, 1]} : vector<8x16x32xf32> to vector<8x1x1xf32>
      %357 = vector.extract_strided_slice %355 {offsets = [0, 15, 0], sizes = [8, 1, 32], strides = [1, 1, 1]} : vector<8x16x32xf32> to vector<8x1x32xf32>
      %358 = vector.broadcast %356 : vector<8x1x1xf32> to vector<8x1x32xf32>
      %359 = arith.divf %357, %358 : vector<8x1x32xf32>
      %360 = vector.extract_strided_slice %355 {offsets = [0, 0, 15], sizes = [8, 16, 1], strides = [1, 1, 1]} : vector<8x16x32xf32> to vector<8x16x1xf32>
      %361 = vector.broadcast %360 : vector<8x16x1xf32> to vector<8x16x32xf32>
      %362 = vector.broadcast %359 : vector<8x1x32xf32> to vector<8x16x32xf32>
      %363 = arith.mulf %361, %362 : vector<8x16x32xf32>
      %364 = arith.subf %355, %363 : vector<8x16x32xf32>
      %365 = vector.shape_cast %52 : vector<1x16x1xi1> to vector<1x16x1xi1>
      %366 = vector.broadcast %365 : vector<1x16x1xi1> to vector<8x16x32xi1>
      %367 = vector.shape_cast %359 : vector<8x1x32xf32> to vector<8x1x32xf32>
      %368 = vector.broadcast %367 : vector<8x1x32xf32> to vector<8x16x32xf32>
      %369 = arith.select %366, %368, %364 : vector<8x16x32xi1>, vector<8x16x32xf32>
      %370 = vector.extract_strided_slice %369 {offsets = [0, 0, 16], sizes = [8, 16, 16], strides = [1, 1, 1]} : vector<8x16x32xf32> to vector<8x16x16xf32>
      %cst_44 = arith.constant dense<0.000000e+00> : vector<8x48xf32>
      %371 = tpu.matmul %104, %4, %cst_44 {dimension_numbers = #tpu.dot_dimension_numbers<[1], [0], [0], [1], [0, 0, 1, 1], [], []>} : vector<8x32xf32>, vector<32x48xf32>, vector<8x48xf32> -> vector<8x48xf32>
      %372 = vector.extract_strided_slice %371 {offsets = [0, 0], sizes = [8, 32], strides = [1, 1]} : vector<8x48xf32> to vector<8x32xf32>
      %373 = vector.extract_strided_slice %371 {offsets = [0, 32], sizes = [8, 16], strides = [1, 1]} : vector<8x48xf32> to vector<8x16xf32>
      %374 = arith.mulf %arg13, %133 : vector<8x16xf32>
      %375 = arith.addf %373, %374 : vector<8x16xf32>
      %376 = arith.subf %375, %108 : vector<8x16xf32>
      %377 = vector.shape_cast %376 : vector<8x16xf32> to vector<8x1x16xf32>
      %378 = vector.broadcast %377 : vector<8x1x16xf32> to vector<8x16x16xf32>
      %379 = arith.mulf %370, %378 : vector<8x16x16xf32>
      %cst_45 = arith.constant dense<0.000000e+00> : vector<8x16xf32>
      %380 = vector.multi_reduction <add>, %379, %cst_45 [2] : vector<8x16x16xf32> to vector<8x16xf32>
      %cst_46 = arith.constant 0.000000e+00 : f32
      %381 = vector.broadcast %cst_46 : f32 to vector<8x16xf32>
      %382 = arith.subf %381, %380 : vector<8x16xf32>
      %cst_47 = arith.constant 0.000000e+00 : f32
      %383 = vector.broadcast %cst_47 : f32 to vector<8x32xf32>
      %384 = arith.subf %383, %372 : vector<8x32xf32>
      %cst_48 = arith.constant dense<0.000000e+00> : vector<8x32xf32>
      %385 = tpu.matmul %382, %5, %cst_48 {dimension_numbers = #tpu.dot_dimension_numbers<[1], [0], [0], [1], [0, 0, 1, 1], [], []>} : vector<8x16xf32>, vector<16x32xf32>, vector<8x32xf32> -> vector<8x32xf32>
      %386 = arith.subf %384, %385 : vector<8x32xf32>
      %cst_49 = arith.constant 0.000000e+00 : f32
      %387 = vector.broadcast %cst_49 : f32 to vector<8x16xf32>
      %388 = arith.subf %387, %arg13 : vector<8x16xf32>
      %389 = arith.subf %388, %382 : vector<8x16xf32>
      %390 = arith.mulf %389, %133 : vector<8x16xf32>
      %cst_50 = arith.constant 0.000000e+00 : f32
      %391 = vector.broadcast %cst_50 : f32 to vector<8x16xf32>
      %392 = arith.cmpf olt, %382, %391 : vector<8x16xf32>
      %cst_51 = arith.constant 0.000000e+00 : f32
      %393 = vector.broadcast %cst_51 : f32 to vector<8x16xf32>
      %394 = arith.subf %393, %arg13 : vector<8x16xf32>
      %cst_52 = arith.constant -1.000000e+00 : f32
      %395 = vector.broadcast %cst_52 : f32 to vector<8x16xf32>
      %396 = arith.select %392, %382, %395 : vector<8x16xi1>, vector<8x16xf32>
      %397 = arith.divf %394, %396 : vector<8x16xf32>
      %cst_53 = arith.constant 3.40282347E+38 : f32
      %398 = vector.broadcast %cst_53 : f32 to vector<8x16xf32>
      %399 = arith.select %392, %397, %398 : vector<8x16xi1>, vector<8x16xf32>
      %cst_54 = arith.constant dense<0x7F800000> : vector<8xf32>
      %400 = vector.multi_reduction <minimumf>, %399, %cst_54 [1] : vector<8x16xf32> to vector<8xf32>
      %401 = vector.shape_cast %400 : vector<8xf32> to vector<8x1xf32>
      %cst_55 = arith.constant 0.000000e+00 : f32
      %402 = vector.broadcast %cst_55 : f32 to vector<8x16xf32>
      %403 = arith.cmpf olt, %390, %402 : vector<8x16xf32>
      %cst_56 = arith.constant 0.000000e+00 : f32
      %404 = vector.broadcast %cst_56 : f32 to vector<8x16xf32>
      %405 = arith.subf %404, %arg12 : vector<8x16xf32>
      %cst_57 = arith.constant -1.000000e+00 : f32
      %406 = vector.broadcast %cst_57 : f32 to vector<8x16xf32>
      %407 = arith.select %403, %390, %406 : vector<8x16xi1>, vector<8x16xf32>
      %408 = arith.divf %405, %407 : vector<8x16xf32>
      %cst_58 = arith.constant 3.40282347E+38 : f32
      %409 = vector.broadcast %cst_58 : f32 to vector<8x16xf32>
      %410 = arith.select %403, %408, %409 : vector<8x16xi1>, vector<8x16xf32>
      %cst_59 = arith.constant dense<0x7F800000> : vector<8xf32>
      %411 = vector.multi_reduction <minimumf>, %410, %cst_59 [1] : vector<8x16xf32> to vector<8xf32>
      %412 = vector.shape_cast %411 : vector<8xf32> to vector<8x1xf32>
      %413 = arith.minimumf %401, %412 : vector<8x1xf32>
      %cst_60 = arith.constant 1.000000e+00 : f32
      %414 = vector.broadcast %cst_60 : f32 to vector<8x1xf32>
      %415 = arith.minimumf %413, %414 : vector<8x1xf32>
      %416 = vector.broadcast %415 : vector<8x1xf32> to vector<8x16xf32>
      %417 = arith.mulf %416, %390 : vector<8x16xf32>
      %418 = arith.addf %arg12, %417 : vector<8x16xf32>
      %419 = vector.broadcast %415 : vector<8x1xf32> to vector<8x16xf32>
      %420 = arith.mulf %419, %382 : vector<8x16xf32>
      %421 = arith.addf %arg13, %420 : vector<8x16xf32>
      %422 = arith.mulf %418, %421 : vector<8x16xf32>
      %cst_61 = arith.constant dense<0.000000e+00> : vector<8xf32>
      %423 = vector.multi_reduction <add>, %422, %cst_61 [1] : vector<8x16xf32> to vector<8xf32>
      %424 = vector.shape_cast %423 : vector<8xf32> to vector<8x1xf32>
      %425 = arith.mulf %arg12, %arg13 : vector<8x16xf32>
      %cst_62 = arith.constant dense<0.000000e+00> : vector<8xf32>
      %426 = vector.multi_reduction <add>, %425, %cst_62 [1] : vector<8x16xf32> to vector<8xf32>
      %427 = vector.shape_cast %426 : vector<8xf32> to vector<8x1xf32>
      %428 = arith.divf %424, %427 : vector<8x1xf32>
      %429 = arith.mulf %428, %428 : vector<8x1xf32>
      %430 = arith.mulf %428, %429 : vector<8x1xf32>
      %cst_63 = arith.constant 0.000000e+00 : f32
      %431 = vector.broadcast %cst_63 : f32 to vector<8x1xf32>
      %432 = arith.subf %431, %114 : vector<8x1xf32>
      %433 = arith.mulf %432, %430 : vector<8x1xf32>
      %434 = arith.mulf %390, %382 : vector<8x16xf32>
      %435 = vector.broadcast %433 : vector<8x1xf32> to vector<8x16xf32>
      %436 = arith.addf %435, %434 : vector<8x16xf32>
      %437 = arith.divf %436, %arg12 : vector<8x16xf32>
      %438 = arith.mulf %437, %133 : vector<8x16xf32>
      %439 = vector.shape_cast %438 : vector<8x16xf32> to vector<8x1x16xf32>
      %440 = vector.broadcast %439 : vector<8x1x16xf32> to vector<8x16x16xf32>
      %441 = arith.mulf %370, %440 : vector<8x16x16xf32>
      %cst_64 = arith.constant dense<0.000000e+00> : vector<8x16xf32>
      %442 = vector.multi_reduction <add>, %441, %cst_64 [2] : vector<8x16x16xf32> to vector<8x16xf32>
      %cst_65 = arith.constant 0.000000e+00 : f32
      %443 = vector.broadcast %cst_65 : f32 to vector<8x16xf32>
      %444 = arith.subf %443, %442 : vector<8x16xf32>
      %cst_66 = arith.constant dense<0.000000e+00> : vector<8x32xf32>
      %445 = tpu.matmul %444, %5, %cst_66 {dimension_numbers = #tpu.dot_dimension_numbers<[1], [0], [0], [1], [0, 0, 1, 1], [], []>} : vector<8x16xf32>, vector<16x32xf32>, vector<8x32xf32> -> vector<8x32xf32>
      %cst_67 = arith.constant 0.000000e+00 : f32
      %446 = vector.broadcast %cst_67 : f32 to vector<8x32xf32>
      %447 = arith.subf %446, %445 : vector<8x32xf32>
      %cst_68 = arith.constant 0.000000e+00 : f32
      %448 = vector.broadcast %cst_68 : f32 to vector<8x16xf32>
      %449 = arith.subf %448, %437 : vector<8x16xf32>
      %450 = arith.subf %449, %444 : vector<8x16xf32>
      %451 = arith.mulf %450, %133 : vector<8x16xf32>
      %452 = arith.addf %386, %447 : vector<8x32xf32>
      %453 = arith.addf %390, %451 : vector<8x16xf32>
      %454 = arith.addf %382, %444 : vector<8x16xf32>
      %cst_69 = arith.constant 0.000000e+00 : f32
      %455 = vector.broadcast %cst_69 : f32 to vector<8x16xf32>
      %456 = arith.cmpf olt, %454, %455 : vector<8x16xf32>
      %cst_70 = arith.constant 0.000000e+00 : f32
      %457 = vector.broadcast %cst_70 : f32 to vector<8x16xf32>
      %458 = arith.subf %457, %arg13 : vector<8x16xf32>
      %cst_71 = arith.constant -1.000000e+00 : f32
      %459 = vector.broadcast %cst_71 : f32 to vector<8x16xf32>
      %460 = arith.select %456, %454, %459 : vector<8x16xi1>, vector<8x16xf32>
      %461 = arith.divf %458, %460 : vector<8x16xf32>
      %cst_72 = arith.constant 3.40282347E+38 : f32
      %462 = vector.broadcast %cst_72 : f32 to vector<8x16xf32>
      %463 = arith.select %456, %461, %462 : vector<8x16xi1>, vector<8x16xf32>
      %cst_73 = arith.constant dense<0x7F800000> : vector<8xf32>
      %464 = vector.multi_reduction <minimumf>, %463, %cst_73 [1] : vector<8x16xf32> to vector<8xf32>
      %465 = vector.shape_cast %464 : vector<8xf32> to vector<8x1xf32>
      %cst_74 = arith.constant 0.000000e+00 : f32
      %466 = vector.broadcast %cst_74 : f32 to vector<8x16xf32>
      %467 = arith.cmpf olt, %453, %466 : vector<8x16xf32>
      %cst_75 = arith.constant 0.000000e+00 : f32
      %468 = vector.broadcast %cst_75 : f32 to vector<8x16xf32>
      %469 = arith.subf %468, %arg12 : vector<8x16xf32>
      %cst_76 = arith.constant -1.000000e+00 : f32
      %470 = vector.broadcast %cst_76 : f32 to vector<8x16xf32>
      %471 = arith.select %467, %453, %470 : vector<8x16xi1>, vector<8x16xf32>
      %472 = arith.divf %469, %471 : vector<8x16xf32>
      %cst_77 = arith.constant 3.40282347E+38 : f32
      %473 = vector.broadcast %cst_77 : f32 to vector<8x16xf32>
      %474 = arith.select %467, %472, %473 : vector<8x16xi1>, vector<8x16xf32>
      %cst_78 = arith.constant dense<0x7F800000> : vector<8xf32>
      %475 = vector.multi_reduction <minimumf>, %474, %cst_78 [1] : vector<8x16xf32> to vector<8xf32>
      %476 = vector.shape_cast %475 : vector<8xf32> to vector<8x1xf32>
      %477 = arith.minimumf %465, %476 : vector<8x1xf32>
      %cst_79 = arith.constant 9.990000e-01 : f32
      %478 = vector.broadcast %cst_79 : f32 to vector<8x1xf32>
      %479 = arith.mulf %478, %477 : vector<8x1xf32>
      %cst_80 = arith.constant 1.000000e+00 : f32
      %480 = vector.broadcast %cst_80 : f32 to vector<8x1xf32>
      %481 = arith.minimumf %479, %480 : vector<8x1xf32>
      %482 = vector.broadcast %481 : vector<8x1xf32> to vector<8x32xf32>
      %483 = arith.mulf %482, %452 : vector<8x32xf32>
      %484 = arith.addf %arg11, %483 : vector<8x32xf32>
      %485 = vector.broadcast %481 : vector<8x1xf32> to vector<8x16xf32>
      %486 = arith.mulf %485, %453 : vector<8x16xf32>
      %487 = arith.addf %arg12, %486 : vector<8x16xf32>
      %488 = vector.broadcast %481 : vector<8x1xf32> to vector<8x16xf32>
      %489 = arith.mulf %488, %454 : vector<8x16xf32>
      %490 = arith.addf %arg13, %489 : vector<8x16xf32>
      scf.yield %484, %487, %490, %128, %131 : vector<8x32xf32>, vector<8x16xf32>, vector<8x16xf32>, vector<8x1xf32>, vector<8x32xf32>
    }
    %c0_34 = arith.constant 0 : index
    %c0_35 = arith.constant 0 : index
    %99 = vector.load %arg9[%c0_34, %c0_35] : memref<8x32xf32, #tpu.memory_space<vmem>>, vector<8x32xf32>
    tpu.vector_store %arg9[%c0_34, %c0_35], %98#4 {strides = array<i32>} : memref<8x32xf32, #tpu.memory_space<vmem>>, vector<8x32xf32>,
    return
  }
  func.func @transform_0(%arg0: i32) -> (i32, i32) {
    %c0_i32 = arith.constant 0 : i32
    %c0_i32_0 = arith.constant 0 : i32
    return %arg0, %c0_i32 : i32, i32
  }
  func.func @transform_1(%arg0: i32) -> (i32, i32) {
    %c0_i32 = arith.constant 0 : i32
    %c0_i32_0 = arith.constant 0 : i32
    %c0_i32_1 = arith.constant 0 : i32
    return %c0_i32, %c0_i32_0 : i32, i32
  }
  func.func @transform_2(%arg0: i32) -> (i32, i32) {
    %c0_i32 = arith.constant 0 : i32
    %c0_i32_0 = arith.constant 0 : i32
    %c0_i32_1 = arith.constant 0 : i32
    return %c0_i32, %c0_i32_0 : i32, i32
  }
  func.func @transform_3(%arg0: i32) -> (i32, i32) {
    %c0_i32 = arith.constant 0 : i32
    %c0_i32_0 = arith.constant 0 : i32
    %c0_i32_1 = arith.constant 0 : i32
    return %c0_i32, %c0_i32_0 : i32, i32
  }
  func.func @transform_4(%arg0: i32) -> (i32, i32) {
    %c0_i32 = arith.constant 0 : i32
    %c0_i32_0 = arith.constant 0 : i32
    %c0_i32_1 = arith.constant 0 : i32
    return %c0_i32, %c0_i32_0 : i32, i32
  }
  func.func @transform_5(%arg0: i32) -> (i32, i32) {
    %c0_i32 = arith.constant 0 : i32
    %c0_i32_0 = arith.constant 0 : i32
    %c0_i32_1 = arith.constant 0 : i32
    return %c0_i32, %c0_i32_0 : i32, i32
  }
  func.func @transform_6(%arg0: i32) -> (i32, i32) {
    %c0_i32 = arith.constant 0 : i32
    %c0_i32_0 = arith.constant 0 : i32
    %c0_i32_1 = arith.constant 0 : i32
    return %c0_i32, %c0_i32_0 : i32, i32
  }
  func.func @transform_7(%arg0: i32) -> (i32, i32) {
    %c0_i32 = arith.constant 0 : i32
    %c0_i32_0 = arith.constant 0 : i32
    %c0_i32_1 = arith.constant 0 : i32
    return %c0_i32, %c0_i32_0 : i32, i32
  }
  func.func @transform_8(%arg0: i32) -> (i32, i32) {
    %c0_i32 = arith.constant 0 : i32
    %c0_i32_0 = arith.constant 0 : i32
    return %arg0, %c0_i32 : i32, i32
  }
}

</mosaic_0001>

<bundles_post_ra>
// kernel: custom-call.22
= control target key start
LH: loop header
LB: loop body
LE: loop exit
PB: predicated region body
PF: predicated region fallthrough
CT: control target
= control target key end

     0   :  { %5 = vsyncpa [#allocation4], 0  ;;  %s1064_s0 = inlined_call_operand.vmem [shape: f32[32,32], index: 0, kind: input, shape index: {}]   ;;  %s1065_s1 = inlined_call_operand.vmem [shape: f32[32,32], index: 1, kind: output, shape index: {0}]   ;;  %s1066_s2 = inlined_call_operand.hbm [shape: s32[32], index: 2, kind: output, shape index: {1}]   ;;  %s1067_s3 = inlined_call_operand.vmem [shape: s32[32], index: 3, kind: output, shape index: {2}]  }
   0x1   :  { %s15_s14 = scalar_lea.vmem %s1064_s0, 24 }
   0x2   :  { %p556_p0 = scmp.gt.s32.totalorder %s1064_s0, %s15_s14 }
   0x3   :  { %s855_s17 = smov (!%p556_p0), [#allocation0]   ;;  %s859_s20 = smov (!%p556_p0), %s1064_s0  }
   0x4   :  { %557 = sbr.rel (%p556_p0) target bundleno = 17 (0x11), region = 165 }
   0x9 LB: > { %v49_v0 = vld [vmem:[%s861_s20] sm:$0xff]  ;;  %s51_s20 = scalar_lea.vmem %s861_s20, 8   ;;  %s861_s20 = sphi %s859_s20, %s51_s20   ;;  %s857_s17 = sphi %s855_s17, %s52_s17  }
   0xa   : > { %50 = vst [vmem:[%s857_s17] sm:$0xff] %v49_v0  ;;  %s52_s17 = scalar_lea.vmem %s857_s17, 8   ;;  %p46_p1 = scmp.gt.s32.totalorder %s51_s20, %s15_s14 }
   0xc   :  { %48 = sbr.rel (!%p46_p1) target bundleno = 9 (0x9), region = 171 }
  0x11 PF:  { %v62_v1 = vld [vmem:[#allocation0] sm:$0xff]  ;;  %v66_v2 = vld [vmem:[#allocation0 + $0x8] sm:$0xff]  ;;  %v70_v3 = vld [vmem:[#allocation0 + $0x10] sm:$0xff]  ;;  %v77_v4 = vlaneseq  ;;  %v879_v7 = vmov 0   ;;  %s863_s0 = smov 0  }
  0x12   :  { %63 = vst [vmem:[#allocation1] sm:$0xff] %v62_v1  ;;  %v74_v5 = vld [vmem:[#allocation0 + $0x18] sm:$0xff] }
  0x13   :  { %67 = vst [vmem:[#allocation1 + $0x8] sm:$0xff] %v66_v2  ;;  %v911_v6 = vshrl.u32 %v77_v4, 7 }
  0x14   :  { %71 = vst [vmem:[#allocation1 + $0x10] sm:$0xff] %v70_v3 }
  0x15   :  { %75 = vst [vmem:[#allocation1 + $0x18] sm:$0xff] %v74_v5 }
  0x16   :  { %76 = vst [vmem:[#allocation2] sm:$0x1] %v879_v7 }
  0x17 LB: > { %s614_s21 = sshll.u32 %s865_s0, 3  ;;  %s85_s0 = sadd.s32 1, %s865_s0   ;;  %s865_s0 = sphi %s863_s0, %s85_s0  }
  0x18   : > { %v89_v8 = vstv %s614_s21  ;;  %s87_s22 = scalar_lea.vmem [#allocation7], %s614_s21  ;;  %p82_p2 = scmp.ge.s32.totalorder %s85_s0, 4  }
  0x19   : > { %v90_v9 = vadd.s32 %v89_v8, %v911_v6  ;;  %s914_s23 = smov (%p82_p2), 0  }
  0x1a   :  { %84 = sbr.rel (!%p82_p2) target bundleno = 23 (0x17), region = 182 }
  0x1b   : > { %91 = vst [vmem:[%s87_s22] sm:$0xff] %v90_v9 }
  0x1f LB: > { %v102_v10 = vld [vmem:[#allocation1] sm:$0xff]  ;;  %v114_v11 = vld [vmem:[#allocation1 + $0x8] sm:$0xff]  ;;  %v920_v12 = vadd.s32 8, %v911_v6  ;;  %v923_v14 = vstv %s869_s23  ;;  %v126_v16 = vld [vmem:[#allocation1 + $0x10] sm:$0xff]  ;;  %v928_v17 = vadd.s32 16, %v911_v6  ;;  %v935_v22 = vadd.s32 24, %v911_v6  ;;  %s869_s23 = sphi %s914_s23, %s97_s23  }
  0x20   : > { %v103_v13 = vand.u32 2147483647, %v102_v10  ;;  %v115_v15 = vand.u32 2147483647, %v114_v11  ;;  %vm106_vm0 = vcmp.ge.s32.totalorder %v911_v6, %v923_v14  ;;  %v127_v20 = vand.u32 2147483647, %v126_v16 }
  0x21   : > { %vm118_vm3 = vcmp.ge.s32.totalorder %v920_v12, %v923_v14  ;;  %v138_v21 = vld [vmem:[#allocation1 + $0x18] sm:$0xff]  ;;  %vm130_vm6 = vcmp.ge.s32.totalorder %v928_v17, %v923_v14  ;;  %vm142_vm9 = vcmp.ge.s32.totalorder %v935_v22, %v923_v14  ;;  %s184_s24 = ssub.s32 128, %s869_s23  ;;  %v946_v58 = vand.u32 127, %v77_v4  ;;  %v193_v60 = vld [vmem:[#allocation2] ss:$0 sm:$0xff]  ;;  %s196_s26 = scalar_lea.vmem [#allocation1], %s869_s23 }
  0x22   : > { %vm616_vm1 = vcmp.gt.f32.partialorder %v103_v13, -inf  ;;  %v139_v25 = vand.u32 2147483647, %v138_v21  ;;  %v198_v61 = vld [vmem:[%s196_s26] ss:$0 sm:$0xff]  ;;  %s202_s28 = scalar_lea.vmem [#allocation7], %s869_s23 }
  0x23   : > { %vm110_vm2 = vmand %vm106_vm0, %vm616_vm1  ;;  %v204_v1 = vld [vmem:[%s202_s28] ss:$0 sm:$0xff]  ;;  %s97_s23 = sadd.s32 1, %s869_s23  }
  0x24   : > { %v111_v18 = vsel %vm110_vm2, %v911_v6, %v923_v14  ;;  %v112_v19 = vsel %vm110_vm2, %v103_v13, -inf  ;;  %p94_p3 = scmp.ge.s32.totalorder %s97_s23, 32  }
  0x25   : > { %vm121_vm4 = vcmp.lt.f32.partialorder %v112_v19, %v115_v15  ;;  %s871_s5 = smov (%p94_p3), %s1065_s1   ;;  %s875_s6 = smov (%p94_p3), [#allocation1]  }
  0x26   : > { %vm122_vm5 = vmand %vm118_vm3, %vm121_vm4  ;;  %vm950_vm3 = vcmp.eq.s32.totalorder %v946_v58, %v923_v14 }
  0x27   : > { %v123_v23 = vsel %vm122_vm5, %v920_v12, %v111_v18  ;;  %v124_v24 = vsel %vm122_vm5, %v115_v15, %v112_v19  ;;  %vm306_vm5 = vcmp.gt.s32.totalorder %v935_v22, %v923_v14 }
  0x28   : > { %vm133_vm7 = vcmp.lt.f32.partialorder %v124_v24, %v127_v20 }
  0x29   : > { %vm134_vm8 = vmand %vm130_vm6, %vm133_vm7  ;;  %vm250_vm6 = vcmp.gt.s32.totalorder %v920_v12, %v923_v14  ;;  %vm222_vm7 = vcmp.gt.s32.totalorder %v911_v6, %v923_v14 }
  0x2a   : > { %v135_v26 = vsel %vm134_vm8, %v928_v17, %v123_v23  ;;  %v136_v27 = vsel %vm134_vm8, %v127_v20, %v124_v24 }
  0x2b   : > { %vm145_vm10 = vcmp.lt.f32.partialorder %v136_v27, %v139_v25 }
  0x2c   : > { %vm146_vm11 = vmand %vm142_vm9, %vm145_vm10  ;;  %vm1068_vm9 = vcmp.gt.s32.totalorder %v928_v17, %v923_v14 }
  0x2d   : > { %v147_v28 = vsel %vm146_vm11, %v935_v22, %v135_v26  ;;  %v148_v29 = vsel %vm146_vm11, %v139_v25, %v136_v27 }
  0x2e   : > { %v149_v30 = vrot.slane %v148_v29, 1  ;;  %v150_v31 = vrot.slane %v147_v28, 1 }
  0x30   : > { %vm151_vm12 = vcmp.ge.f32.partialorder %v149_v30, %v148_v29  ;;  %v154_v32 = vrot.slane %v149_v30, 1  ;;  %v155_v33 = vrot.slane %v150_v31, 1 }
  0x31   : > { %v152_v34 = vsel %vm151_vm12, %v149_v30, %v148_v29  ;;  %v153_v35 = vsel %vm151_vm12, %v150_v31, %v147_v28 }
  0x32   : > { %vm156_vm13 = vcmp.ge.f32.partialorder %v154_v32, %v152_v34  ;;  %v159_v36 = vrot.slane %v154_v32, 1  ;;  %v160_v37 = vrot.slane %v155_v33, 1 }
  0x33   : > { %v157_v38 = vsel %vm156_vm13, %v154_v32, %v152_v34  ;;  %v158_v39 = vsel %vm156_vm13, %v155_v33, %v153_v35 }
  0x34   : > { %vm161_vm14 = vcmp.ge.f32.partialorder %v159_v36, %v157_v38  ;;  %v164_v40 = vrot.slane %v159_v36, 1  ;;  %v165_v41 = vrot.slane %v160_v37, 1 }
  0x35   : > { %v162_v42 = vsel %vm161_vm14, %v159_v36, %v157_v38  ;;  %v163_v43 = vsel %vm161_vm14, %v160_v37, %v158_v39 }
  0x36   : > { %vm166_vm15 = vcmp.ge.f32.partialorder %v164_v40, %v162_v42  ;;  %v169_v44 = vrot.slane %v164_v40, 1  ;;  %v170_v45 = vrot.slane %v165_v41, 1 }
  0x37   : > { %v167_v46 = vsel %vm166_vm15, %v164_v40, %v162_v42  ;;  %v168_v47 = vsel %vm166_vm15, %v165_v41, %v163_v43 }
  0x38   : > { %vm171_vm0 = vcmp.ge.f32.partialorder %v169_v44, %v167_v46  ;;  %v174_v48 = vrot.slane %v169_v44, 1  ;;  %v175_v49 = vrot.slane %v170_v45, 1 }
  0x39   : > { %v172_v50 = vsel %vm171_vm0, %v169_v44, %v167_v46  ;;  %v173_v51 = vsel %vm171_vm0, %v170_v45, %v168_v47  ;;  %vm1002_vm0 = vmand %vm306_vm5, %vm950_vm3 }
  0x3a   : > { %vm176_vm1 = vcmp.ge.f32.partialorder %v174_v48, %v172_v50  ;;  %v179_v52 = vrot.slane %v174_v48, 1  ;;  %v180_v53 = vrot.slane %v175_v49, 1 }
  0x3b   : > { %v177_v54 = vsel %vm176_vm1, %v174_v48, %v172_v50  ;;  %v178_v55 = vsel %vm176_vm1, %v175_v49, %v173_v51 }
  0x3c   : > { %vm181_vm2 = vcmp.ge.f32.partialorder %v179_v52, %v177_v54 }
  0x3d   : > { %v183_v56 = vsel %vm181_vm2, %v180_v53, %v178_v55  ;;  %vm1011_vm2 = vmand %vm250_vm6, %vm950_vm3 }
  0x3e   : > { %185 = vrot.lane.b32.xlu0 %v183_v56, %s184_s24 }
  0xb0   : > { %v186_v57 = vpop.permute.xlu0 %185 }
  0xb1   : > { %624 = vpush %v186_v57 }
  0xe2   : > { %s625_s25 = spop %624 }
  0xe3   : > { %v192_v62 = vstv %s625_s25  ;;  %s197_s27 = scalar_lea.vmem [#allocation1], %s625_s25  ;;  %s203_s29 = scalar_lea.vmem [#allocation7], %s625_s25 }
  0xe4   : > { %v194_v63 = vsel %vm950_vm3, %v192_v62, %v193_v60  ;;  %v957_v0 = vld [vmem:[%s197_s27] ss:$0 sm:$0xff] }
  0xe5   : > { %195 = vst [vmem:[#allocation2] sm:$0x1] %v194_v63  ;;  %v205_v2 = vld [vmem:[%s203_s29] ss:$0 sm:$0xff]  ;;  %vm208_vm4 = vcmp.ne.f32.partialorder %v957_v0, 0.0 }
  0xe6   : > { %200 = vst [vmem:[%s197_s27] sm:$0x1] %v198_v61  ;;  %vm209_vm8 = vmand %vm950_vm3, %vm208_vm4 }
  0xe7   : > { %201 = vst [vmem:[%s196_s26] sm:$0x1] %v957_v0  ;;  %v210_v3 = vsel %vm209_vm8, %v957_v0, 1.0 }
  0xe8   : > { %206 = vst [vmem:[%s203_s29] sm:$0x1] %v204_v1  ;;  %v307_v5 = vsel %vm306_vm5, %v210_v3, 1.0  ;;  %v251_v7 = vsel %vm250_vm6, %v210_v3, 1.0  ;;  %v223_v8 = vsel %vm222_vm7, %v210_v3, 1.0  ;;  %v985_v9 = vsel %vm1068_vm9, %v210_v3, 1.0 }
  0xe9   : > { %207 = vst [vmem:[%s202_s28] sm:$0x1] %v205_v2  ;;  %757 = vrcp.f32 %v307_v5  ;;  %v317_v10 = vand.u32 2147483647, %v307_v5  ;;  %v319_v11 = vand.u32 2147483648, %v307_v5  ;;  %v261_v15 = vand.u32 2147483647, %v251_v7 }
  0xea   : > { %759 = vrcp.f32 %v251_v7  ;;  %v263_v16 = vand.u32 2147483648, %v251_v7  ;;  %vm313_vm10 = vweird.f32 %v307_v5  ;;  %vm257_vm11 = vweird.f32 %v251_v7 }
  0xeb   : > { %761 = vrcp.f32 %v223_v8  ;;  %vm988_vm12 = vcmp.eq.f32.partialorder %v317_v10, 8.507059e+37  ;;  %v320_v25 = vor.u32 1.1754944e-38, %v319_v11  ;;  %vm992_vm13 = vcmp.eq.f32.partialorder %v261_v15, 8.507059e+37 }
  0xec   : > { %763 = vrcp.f32 %v985_v9  ;;  %v264_v30 = vor.u32 1.1754944e-38, %v263_v16  ;;  %vm229_vm14 = vweird.f32 %v223_v8  ;;  %v233_v36 = vand.u32 2147483647, %v223_v8 }
  0xed   : > { %v235_v37 = vand.u32 2147483648, %v223_v8  ;;  %vm285_vm8 = vweird.f32 %v985_v9  ;;  %v289_v42 = vand.u32 2147483647, %v985_v9  ;;  %v291_v43 = vand.u32 2147483648, %v985_v9 }
  0xee   : > { %v303_v46 = vld [vmem:[#allocation1 + $0x18] sm:$0xff]  ;;  %v247_v51 = vld [vmem:[#allocation1 + $0x8] sm:$0xff]  ;;  %v219_v57 = vld [vmem:[#allocation1] sm:$0xff] }
  0xef   : > { %v758_v13 = vpop.eup %757  ;;  %v236_v49 = vor.u32 1.1754944e-38, %v235_v37  ;;  %v292_v1 = vor.u32 1.1754944e-38, %v291_v43 }
  0xf0   : > { %v760_v18 = vpop.eup %759  ;;  %v309_v19 = vmul.f32 %v758_v13, %v307_v5  ;;  %vm314_vm15 = vweird.f32 %v758_v13 }
  0xf1   : > { %v762_v20 = vpop.eup %761  ;;  %v253_v21 = vmul.f32 %v760_v18, %v251_v7  ;;  %vm258_vm1 = vweird.f32 %v760_v18  ;;  %vm315_vm5 = vmor %vm313_vm10, %vm314_vm15  ;;  %vm234_vm15 = vcmp.eq.f32.partialorder %v233_v36, 8.507059e+37  ;;  %v275_v7 = vld [vmem:[#allocation1 + $0x10] sm:$0xff] }
  0xf2   : > { %v310_v23 = vsub.f32 1.0, %v309_v19  ;;  %v225_v26 = vmul.f32 %v762_v20, %v223_v8  ;;  %v764_v27 = vpop.eup %763  ;;  %vm230_vm4 = vweird.f32 %v762_v20  ;;  %vm259_vm9 = vmor %vm257_vm11, %vm258_vm1 }
  0xf3   : > { %v254_v28 = vsub.f32 1.0, %v253_v21  ;;  %v281_v33 = vmul.f32 %v764_v27, %v985_v9  ;;  %vm286_vm6 = vweird.f32 %v764_v27  ;;  %vm231_vm10 = vmor %vm229_vm14, %vm230_vm4  ;;  %vm214_vm14 = vcmp.gt.s32.totalorder %v946_v58, %v923_v14  ;;  %v332_v58 = vld [vmem:[#allocation7 + $0x8] sm:$0xff] (%p94_p3) }
  0xf4   : > { %v311_v31 = vmul.f32 %v758_v13, %v310_v23  ;;  %v226_v32 = vsub.f32 1.0, %v225_v26  ;;  %vm1031_vm11 = vmand %vm222_vm7, %vm950_vm3  ;;  %vm290_vm7 = vcmp.eq.f32.partialorder %v289_v42, 8.507059e+37  ;;  %v215_v10 = vsel %vm214_vm14, %v957_v0, 0.0  ;;  %v334_v0 = vld [vmem:[#allocation7 + $0x10] sm:$0xff] (%p94_p3)  ;;  %v384_v26 = vld [vmem:[#allocation2] sm:$0x1] (%p94_p3) }
  0xf5   : > { %v255_v35 = vmul.f32 %v760_v18, %v254_v28  ;;  %v282_v22 = vsub.f32 1.0, %v281_v33  ;;  %387 = vst [vmem:[#allocation3] sm:$0x1] (%p94_p3), %v384_v26 }
  0xf6   : > { %v312_v38 = vadd.f32 %v758_v13, %v311_v31  ;;  %v227_v40 = vmul.f32 %v762_v20, %v226_v32 }
  0xf7   : > { %v256_v41 = vadd.f32 %v760_v18, %v255_v35  ;;  %v283_v45 = vmul.f32 %v764_v27, %v282_v22 }
  0xf8   : > { %v316_v44 = vsel %vm315_vm5, %v758_v13, %v312_v38  ;;  %v228_v12 = vadd.f32 %v762_v20, %v227_v40 }
  0xf9   : > { %v321_v47 = vsel %vm988_vm12, %v320_v25, %v316_v44  ;;  %v260_v48 = vsel %vm259_vm9, %v760_v18, %v256_v41  ;;  %v284_v55 = vadd.f32 %v764_v27, %v283_v45  ;;  %vm287_vm9 = vmor %vm285_vm8, %vm286_vm6  ;;  %vm1081_vm12 = vcmp.gt.s32.totalorder %v928_v17, %v923_v14  ;;  %v330_v14 = vld [vmem:[#allocation7] sm:$0xff] (%p94_p3)  ;;  %v336_v25 = vld [vmem:[#allocation7 + $0x18] sm:$0xff] (%p94_p3) }
  0xfa   : > { %v322_v50 = vmul.f32 %v321_v47, %v303_v46  ;;  %v265_v52 = vsel %vm992_vm13, %v264_v30, %v260_v48  ;;  %v232_v53 = vsel %vm231_vm10, %v762_v20, %v228_v12  ;;  %vm295_vm13 = vmand %vm1081_vm12, %vm950_vm3 }
  0xfb   : > { %v266_v56 = vmul.f32 %v265_v52, %v247_v51  ;;  %v237_v60 = vsel %vm234_vm15, %v236_v49, %v232_v53  ;;  %v288_v63 = vsel %vm287_vm9, %v764_v27, %v284_v55 }
  0xfc   : > { %v324_v61 = vsel %vm1002_vm0, %v322_v50, 0.0  ;;  %v238_v62 = vmul.f32 %v237_v60, %v219_v57  ;;  %v293_v5 = vsel %vm290_vm7, %v292_v1, %v288_v63 }
  0xfd   : > { %325 = vadd.xlane.f32.xlu2 %v324_v61  ;;  %v268_v2 = vsel %vm1011_vm2, %v266_v56, 0.0  ;;  %v294_v8 = vmul.f32 %v293_v5, %v275_v7 }
  0xfe   : > { %269 = vadd.xlane.f32.xlu1 %v268_v2  ;;  %v240_v3 = vsel %vm1031_vm11, %v238_v62, 0.0 }
  0xff   : > { %241 = vadd.xlane.f32.xlu0 %v240_v3  ;;  %v296_v9 = vsel %vm295_vm13, %v294_v8, 0.0 }
 0x106   : > { %297 = vadd.xlane.f32.xlu1 %v296_v9 }
 0x128   :  { %349 = vxpose.xlu0.b32.start [1/4] (short) (narrow) (%p94_p3), %v330_v14, 8 }
 0x130   :  { %350 = vxpose.xlu0.b32.cont [2/4] (short) (narrow) (%p94_p3), %v332_v58, 8 }
 0x138   :  { %351 = vxpose.xlu0.b32.cont [3/4] (short) (narrow) (%p94_p3), %v334_v0, 8 }
 0x140   :  { %352 = vxpose.xlu0.b32.end [4/4] (short) (narrow) (%p94_p3), %v336_v25, 8 }
 0x170   : > { %v326_v11 = vpop.xlane.xlu2 %325 }
 0x171   : > { %v327_v13 = vmul.f32 %v326_v11, %v215_v10  ;;  %v270_v15 = vpop.xlane.xlu1 %269 }
 0x172   : > { %v271_v16 = vmul.f32 %v270_v15, %v215_v10  ;;  %v242_v18 = vpop.xlane.xlu0 %241 }
 0x173   : > { %v328_v19 = vsub.f32 %v322_v50, %v327_v13  ;;  %v243_v20 = vmul.f32 %v242_v18, %v215_v10 }
 0x174   : > { %v272_v21 = vsub.f32 %v266_v56, %v271_v16 }
 0x175   : > { %329 = vst [vmem:[#allocation1 + $0x18] sm:$0xff] %v328_v19  ;;  %v244_v59 = vsub.f32 %v238_v62, %v243_v20 }
 0x176   : > { %273 = vst [vmem:[#allocation1 + $0x8] sm:$0xff] %v272_v21 }
 0x177   : > { %245 = vst [vmem:[#allocation1] sm:$0xff] %v244_v59 }
 0x179   : > { %v298_v17 = vpop.xlane.xlu1 %297 }
 0x17a   : > { %v299_v23 = vmul.f32 %v298_v17, %v215_v10 }
 0x17c   : > { %v300_v24 = vsub.f32 %v294_v8, %v299_v23  ;;  %96 = sbr.rel (!%p94_p3) target bundleno = 31 (0x1f), region = 193 }
 0x17e   : > { %301 = vst [vmem:[#allocation1 + $0x10] sm:$0xff] %v300_v24 }
 0x1cc   :  { %v365_v27 = vpop.trf.xlu0 }
 0x1cd   :  { %381 = vst [vmem:[#allocation5] sm:$0x1] %v365_v27 }
 0x1d4   :  { %v390_v28 = vld [vmem:[#allocation5] sm:$0x1] }
 0x1d5   :  { %393 = vst [vmem:[#allocation6] sm:$0x1] %v390_v28 }
 0x1d6 LB: > { %v437_v4 = vld [vmem:[%s877_s6] sm:$0xff]  ;;  %s439_s6 = scalar_lea.vmem %s877_s6, 8   ;;  %s877_s6 = sphi %s875_s6, %s439_s6   ;;  %s873_s5 = sphi %s871_s5, %s440_s5  }
 0x1d7   : > { %438 = vst [vmem:[%s873_s5] sm:$0xff] %v437_v4  ;;  %s440_s5 = scalar_lea.vmem %s873_s5, 8   ;;  %p434_p4 = scmp.gt.s32.totalorder %s439_s6, [#allocation1 + $0x18] }
 0x1d8   :  { %s457_s9 = sshll.u32 (%p434_p4), %s1066_s2, 4  ;;  %s880_s10 = smov (%p434_p4), [#allocation3]   ;;  %s458_s9 = int_to_ptr.hbm [resolvable:$true] %s457_s9 }
 0x1d9   :  { %436 = sbr.rel (!%p434_p4) target bundleno = 470 (0x1d6), region = 215  ;;  %s455_s1 = sshll.u32 (%p434_p4), %s880_s10, 4  ;;  %s456_s1 = int_to_ptr.vmem [resolvable:$true] %s455_s1 }
 0x1da   :  { %460 = dma.vmem_to_hbm [thread:$0]  (%p434_p4), %s456_s1, 16, %s458_s9, [#allocation4]  }
 0x1dc   :  { %v517_v6 = vld [vmem:[#allocation6] sm:$0x1] (%p434_p4) }
 0x1dd   :  { %518 = vst [vmem:[%s1067_s3] sm:$0x1] (%p434_p4), %v517_v6 }
 0x1de   :  { %853 = dma.done.wait [#allocation4], 16  }
 0x1df   :  { %854 = vsyncadd [#allocation4], 4294967280 }
 0x1e0   :  { %525 = vsyncpa [#allocation4], 1 }

// kernel: custom-call.23
= control target key start
LH: loop header
LB: loop body
LE: loop exit
PB: predicated region body
PF: predicated region fallthrough
CT: control target
= control target key end

     0   :  { %v47_v0 = vlaneseq  ;;  %v835_v19 = vmov -1.0   ;;  %s1141_s0 = inlined_call_operand.vmem [shape: f32[1,32,32], index: 0, kind: input, shape index: {}]   ;;  %s1142_s1 = inlined_call_operand.vmem [shape: f32[1,32,32], index: 1, kind: output, shape index: {}]  }
   0x1   :  { %v42_v3 = vld [vmem:[%s1141_s0 + $0x18] sm:$0xff]  ;;  %v40_v35 = vld [vmem:[%s1141_s0 + $0x10] sm:$0xff] }
   0x2   :  { %v847_v1 = vand.u32 127, %v47_v0  ;;  %v849_v2 = vshrl.u32 %v47_v0, 7 }
   0x4   :  { %v139_v4 = vadd.s32 24, %v849_v2  ;;  %vm49_vm1 = vcmp.lt.s32.totalorder %v847_v1, 32  ;;  %vm193_vm8 = vcmp.eq.s32.totalorder %v847_v1, 31  ;;  %vm201_vm10 = vcmp.eq.s32.totalorder %v847_v1, 30 }
   0x5   :  { %v194_v20 = vsel %vm193_vm8, 1.0, %v835_v19  ;;  %vm211_vm11 = vcmp.eq.s32.totalorder %v847_v1, 29  ;;  %v110_v36 = vadd.s32 16, %v849_v2  ;;  %vm221_vm13 = vcmp.eq.s32.totalorder %v847_v1, 28 }
   0x6   :  { %vm140_vm0 = vcmp.eq.s32.totalorder %v139_v4, %v847_v1  ;;  %vm145_vm2 = vcmp.le.s32.totalorder %v139_v4, %v847_v1  ;;  %vm190_vm9 = vcmp.eq.s32.totalorder %v847_v1, %v139_v4 }
   0x7   :  { %v142_v5 = vsel %vm140_vm0, %v42_v3, 0.0  ;;  %vm146_vm3 = vmand %vm145_vm2, %vm49_vm1  ;;  %v195_v21 = vsel %vm190_vm9, %v194_v20, 0.0  ;;  %vm111_vm12 = vcmp.eq.s32.totalorder %v110_v36, %v847_v1  ;;  %vm116_vm14 = vcmp.le.s32.totalorder %v110_v36, %v847_v1 }
   0x8   :  { %143 = vadd.xlane.f32.xlu0 %v142_v5  ;;  %v147_v14 = vsel %vm146_vm3, %v42_v3, 0.0  ;;  %v113_v37 = vsel %vm111_vm12, %v40_v35, 0.0  ;;  %vm117_vm2 = vmand %vm116_vm14, %vm49_vm1  ;;  %vm183_vm8 = vcmp.eq.s32.totalorder %v847_v1, %v110_v36  ;;  %vm251_vm9 = vcmp.eq.s32.totalorder %v847_v1, 25 }
   0x9   :  { %v118_v52 = vsel %vm117_vm2, %v40_v35, 0.0  ;;  %vm285_vm12 = vcmp.eq.s32.totalorder %v847_v1, 22  ;;  %vm313_vm14 = vcmp.eq.s32.totalorder %v847_v1, 20  ;;  %vm341_vm2 = vcmp.eq.s32.totalorder %v847_v1, 18 }
  0x7b   :  { %v856_v6 = vpop.xlane.xlu0 %143 }
  0x7c   :  { %827 = vrcp.f32 %v856_v6  ;;  %v159_v10 = vand.u32 2147483648, %v856_v6  ;;  %v157_v12 = vand.u32 2147483647, %v856_v6  ;;  %vm153_vm5 = vweird.f32 %v856_v6 }
  0x7e   :  { %v160_v15 = vor.u32 1.1754944e-38, %v159_v10  ;;  %vm158_vm7 = vcmp.eq.f32.partialorder %v157_v12, 8.507059e+37 }
  0x82   :  { %v828_v7 = vpop.eup %827 }
  0x83   :  { %v149_v8 = vmul.f32 %v828_v7, %v856_v6  ;;  %vm154_vm4 = vweird.f32 %v828_v7 }
  0x84   :  { %vm155_vm6 = vmor %vm153_vm5, %vm154_vm4 }
  0x85   :  { %v150_v9 = vsub.f32 1.0, %v149_v8 }
  0x87   :  { %v151_v11 = vmul.f32 %v828_v7, %v150_v9 }
  0x89   :  { %v152_v13 = vadd.f32 %v828_v7, %v151_v11 }
  0x8b   :  { %v156_v16 = vsel %vm155_vm6, %v828_v7, %v152_v13  ;;  %vm231_vm6 = vcmp.eq.s32.totalorder %v847_v1, 27  ;;  %v836_v7 = vmov 0.0  }
  0x8c   :  { %v869_v17 = vsel %vm158_vm7, %v160_v15, %v156_v16  ;;  %vm241_vm7 = vcmp.eq.s32.totalorder %v847_v1, 26  ;;  %v184_v8 = vsel %vm183_vm8, -1.0, %v836_v7 }
  0x8d   :  { %v162_v18 = vmul.f32 %v869_v17, %v147_v14 }
  0x8f   :  { %163 = vst [vmem:[#allocation2 + $0x18] sm:$0xff] %v162_v18 }
  0x96   :  { %v197_v22 = vld [vmem:[#allocation2 + $0x1e] ss:$0 sm:$0xff]  ;;  %v207_v25 = vld [vmem:[#allocation2 + $0x1d] ss:$0 sm:$0xff]  ;;  %v217_v30 = vld [vmem:[#allocation2 + $0x1c] ss:$0 sm:$0xff] }
  0x97   :  { %v198_v23 = vxor.u32 2147483648, %v197_v22  ;;  %v208_v27 = vxor.u32 2147483648, %v207_v25  ;;  %v218_v32 = vxor.u32 2147483648, %v217_v30  ;;  %v227_v38 = vld [vmem:[#allocation2 + $0x1b] ss:$0 sm:$0xff] }
  0x98   :  { %v228_v40 = vxor.u32 2147483648, %v227_v38  ;;  %v237_v56 = vld [vmem:[#allocation2 + $0x1a] ss:$0 sm:$0xff]  ;;  %v247_v61 = vld [vmem:[#allocation2 + $0x19] ss:$0 sm:$0xff] }
  0x99   :  { %v202_v24 = vmul.f32 %v198_v23, %v195_v21  ;;  %v238_v58 = vxor.u32 2147483648, %v237_v56  ;;  %v248_v63 = vxor.u32 2147483648, %v247_v61  ;;  %v257_v10 = vld [vmem:[#allocation2 + $0x18] ss:$0 sm:$0xff] }
  0x9a   :  { %v258_v12 = vxor.u32 2147483648, %v257_v10 }
  0x9b   :  { %203 = vadd.xlane.f32.xlu0 %v202_v24 }
 0x10e   :  { %v204_v26 = vpop.xlane.xlu0 %203 }
 0x10f   :  { %v205_v28 = vsel %vm201_vm10, %v204_v26, %v195_v21  ;;  %vm271_vm10 = vcmp.eq.s32.totalorder %v847_v1, 23 }
 0x110   :  { %v212_v29 = vmul.f32 %v208_v27, %v205_v28 }
 0x112   :  { %213 = vadd.xlane.f32.xlu1 %v212_v29 }
 0x185   :  { %v214_v31 = vpop.xlane.xlu1 %213 }
 0x186   :  { %v215_v33 = vsel %vm211_vm11, %v214_v31, %v205_v28  ;;  %vm261_vm11 = vcmp.eq.s32.totalorder %v847_v1, 24 }
 0x187   :  { %v222_v34 = vmul.f32 %v218_v32, %v215_v33 }
 0x189   :  { %223 = vadd.xlane.f32.xlu1 %v222_v34 }
 0x191   :  { %114 = vadd.xlane.f32.xlu1 %v113_v37 }
 0x1fc   :  { %v224_v39 = vpop.xlane.xlu1 %223 }
 0x1fd   :  { %v225_v41 = vsel %vm221_vm13, %v224_v39, %v215_v33  ;;  %vm299_vm13 = vcmp.eq.s32.totalorder %v847_v1, 21 }
 0x1fe   :  { %v232_v42 = vmul.f32 %v228_v40, %v225_v41 }
 0x200   :  { %233 = vadd.xlane.f32.xlu2 %v232_v42 }
 0x204   :  { %v882_v43 = vpop.xlane.xlu1 %114 }
 0x205   :  { %829 = vrcp.f32 %v882_v43  ;;  %v130_v46 = vand.u32 2147483648, %v882_v43  ;;  %vm124_vm15 = vweird.f32 %v882_v43  ;;  %v128_v48 = vand.u32 2147483647, %v882_v43 }
 0x207   :  { %v131_v50 = vor.u32 1.1754944e-38, %v130_v46  ;;  %vm129_vm4 = vcmp.eq.f32.partialorder %v128_v48, 8.507059e+37 }
 0x20b   :  { %v830_v44 = vpop.eup %829 }
 0x20c   :  { %v120_v45 = vmul.f32 %v830_v44, %v882_v43  ;;  %vm125_vm0 = vweird.f32 %v830_v44 }
 0x20d   :  { %vm126_vm3 = vmor %vm124_vm15, %vm125_vm0  ;;  %vm327_vm0 = vcmp.eq.s32.totalorder %v847_v1, 19 }
 0x20e   :  { %v121_v47 = vsub.f32 1.0, %v120_v45 }
 0x210   :  { %v122_v49 = vmul.f32 %v830_v44, %v121_v47 }
 0x212   :  { %v123_v51 = vadd.f32 %v830_v44, %v122_v49 }
 0x214   :  { %v127_v53 = vsel %vm126_vm3, %v830_v44, %v123_v51  ;;  %vm355_vm3 = vcmp.eq.s32.totalorder %v847_v1, 17 }
 0x215   :  { %v894_v54 = vsel %vm129_vm4, %v131_v50, %v127_v53 }
 0x216   :  { %v133_v55 = vmul.f32 %v894_v54, %v118_v52 }
 0x218   :  { %134 = vst [vmem:[#allocation2 + $0x10] sm:$0xff] %v133_v55 }
 0x21f   :  { %v267_v3 = vld [vmem:[#allocation2 + $0x17] ss:$0 sm:$0xff]  ;;  %v281_v15 = vld [vmem:[#allocation2 + $0x16] ss:$0 sm:$0xff]  ;;  %v295_v24 = vld [vmem:[#allocation2 + $0x15] ss:$0 sm:$0xff] }
 0x220   :  { %v268_v5 = vxor.u32 2147483648, %v267_v3  ;;  %v282_v16 = vxor.u32 2147483648, %v281_v15  ;;  %v296_v26 = vxor.u32 2147483648, %v295_v24  ;;  %v309_v32 = vld [vmem:[#allocation2 + $0x14] ss:$0 sm:$0xff] }
 0x221   :  { %v310_v34 = vxor.u32 2147483648, %v309_v32  ;;  %v323_v40 = vld [vmem:[#allocation2 + $0x13] ss:$0 sm:$0xff]  ;;  %v337_v49 = vld [vmem:[#allocation2 + $0x12] ss:$0 sm:$0xff] }
 0x222   :  { %v272_v9 = vmul.f32 %v268_v5, %v184_v8  ;;  %v324_v42 = vxor.u32 2147483648, %v323_v40  ;;  %v338_v51 = vxor.u32 2147483648, %v337_v49 }
 0x273   :  { %v234_v57 = vpop.xlane.xlu2 %233 }
 0x274   :  { %v235_v59 = vsel %vm231_vm6, %v234_v57, %v225_v41 }
 0x275   :  { %v242_v60 = vmul.f32 %v238_v58, %v235_v59  ;;  %v351_v58 = vld [vmem:[#allocation2 + $0x11] ss:$0 sm:$0xff] }
 0x277   :  { %243 = vadd.xlane.f32.xlu2 %v242_v60  ;;  %v352_v60 = vxor.u32 2147483648, %v351_v58 }
 0x2ea   :  { %v244_v62 = vpop.xlane.xlu2 %243 }
 0x2eb   :  { %v245_v0 = vsel %vm241_vm7, %v244_v62, %v235_v59 }
 0x2ec   :  { %v252_v4 = vmul.f32 %v248_v63, %v245_v0 }
 0x2ee   :  { %253 = vadd.xlane.f32.xlu0 %v252_v4  ;;  %v81_v4 = vadd.s32 8, %v849_v2 }
 0x2f0   :  { %vm82_vm4 = vcmp.eq.s32.totalorder %v81_v4, %v847_v1  ;;  %vm87_vm6 = vcmp.le.s32.totalorder %v81_v4, %v847_v1 }
 0x2f6   :  { %273 = vadd.xlane.f32.xlu0 %v272_v9 }
 0x361   :  { %v254_v11 = vpop.xlane.xlu0 %253 }
 0x362   :  { %v255_v13 = vsel %vm251_vm9, %v254_v11, %v245_v0  ;;  %vm88_vm9 = vmand %vm87_vm6, %vm49_vm1  ;;  %vm473_vm6 = vcmp.eq.s32.totalorder %v847_v1, 10 }
 0x363   :  { %v262_v14 = vmul.f32 %v258_v12, %v255_v13 }
 0x365   :  { %263 = vadd.xlane.f32.xlu2 %v262_v14 }
 0x369   :  { %v274_v18 = vpop.xlane.xlu0 %273 }
 0x36a   :  { %v275_v19 = vsel %vm271_vm10, %v274_v18, %v184_v8  ;;  %v38_v8 = vld [vmem:[%s1141_s0 + $0x8] sm:$0xff] }
 0x36b   :  { %v286_v20 = vmul.f32 %v282_v16, %v275_v19  ;;  %v84_v12 = vsel %vm82_vm4, %v38_v8, 0.0  ;;  %vm455_vm4 = vcmp.eq.s32.totalorder %v847_v1, 11 }
 0x36d   :  { %287 = vadd.xlane.f32.xlu2 %v286_v20 }
 0x3d8   :  { %v264_v21 = vpop.xlane.xlu2 %263 }
 0x3d9   :  { %v265_v22 = vsel %vm261_vm11, %v264_v21, %v255_v13 }
 0x3da   :  { %v276_v23 = vmul.f32 %v268_v5, %v265_v22  ;;  %v365_v5 = vld [vmem:[#allocation2 + $0x10] ss:$0 sm:$0xff] }
 0x3db   :  { %v366_v10 = vxor.u32 2147483648, %v365_v5 }
 0x3dc   :  { %277 = vadd.xlane.f32.xlu1 %v276_v23 }
 0x3e0   :  { %v288_v25 = vpop.xlane.xlu2 %287 }
 0x3e1   :  { %v289_v27 = vsel %vm285_vm12, %v288_v25, %v275_v19 }
 0x3e2   :  { %v300_v28 = vmul.f32 %v296_v26, %v289_v27 }
 0x3e4   :  { %301 = vadd.xlane.f32.xlu1 %v300_v28 }
 0x44f   :  { %v278_v29 = vpop.xlane.xlu1 %277 }
 0x450   :  { %v279_v30 = vsel %vm271_vm10, %v278_v29, %v265_v22 }
 0x451   :  { %v290_v31 = vmul.f32 %v282_v16, %v279_v30 }
 0x453   :  { %291 = vadd.xlane.f32.xlu0 %v290_v31 }
 0x457   :  { %v302_v33 = vpop.xlane.xlu1 %301 }
 0x458   :  { %v303_v35 = vsel %vm299_vm13, %v302_v33, %v289_v27  ;;  %v89_v27 = vsel %vm88_vm9, %v38_v8, 0.0  ;;  %vm491_vm9 = vcmp.eq.s32.totalorder %v847_v1, 9 }
 0x459   :  { %v314_v36 = vmul.f32 %v310_v34, %v303_v35 }
 0x45b   :  { %315 = vadd.xlane.f32.xlu0 %v314_v36 }
 0x4c6   :  { %v292_v37 = vpop.xlane.xlu0 %291 }
 0x4c7   :  { %v293_v38 = vsel %vm285_vm12, %v292_v37, %v279_v30  ;;  %vm176_vm12 = vcmp.eq.s32.totalorder %v847_v1, %v81_v4 }
 0x4c8   :  { %v304_v39 = vmul.f32 %v296_v26, %v293_v38  ;;  %v177_v33 = vsel %vm176_vm12, -1.0, %v836_v7 }
 0x4ca   :  { %305 = vadd.xlane.f32.xlu2 %v304_v39 }
 0x4ce   :  { %v316_v41 = vpop.xlane.xlu0 %315 }
 0x4cf   :  { %v317_v44 = vsel %vm313_vm14, %v316_v41, %v303_v35 }
 0x4d0   :  { %v328_v45 = vmul.f32 %v324_v42, %v317_v44 }
 0x4d2   :  { %329 = vadd.xlane.f32.xlu2 %v328_v45 }
 0x53d   :  { %v306_v46 = vpop.xlane.xlu2 %305 }
 0x53e   :  { %v307_v47 = vsel %vm299_vm13, %v306_v46, %v293_v38  ;;  %vm369_vm13 = vcmp.eq.s32.totalorder %v847_v1, 16 }
 0x53f   :  { %v318_v48 = vmul.f32 %v310_v34, %v307_v47 }
 0x541   :  { %319 = vadd.xlane.f32.xlu1 %v318_v48 }
 0x545   :  { %v330_v50 = vpop.xlane.xlu2 %329 }
 0x546   :  { %v331_v52 = vsel %vm327_vm0, %v330_v50, %v317_v44 }
 0x547   :  { %v342_v53 = vmul.f32 %v338_v51, %v331_v52 }
 0x549   :  { %343 = vadd.xlane.f32.xlu1 %v342_v53 }
 0x5b4   :  { %v320_v55 = vpop.xlane.xlu1 %319 }
 0x5b5   :  { %v321_v56 = vsel %vm313_vm14, %v320_v55, %v307_v47  ;;  %vm383_vm14 = vcmp.eq.s32.totalorder %v847_v1, 15 }
 0x5b6   :  { %v332_v57 = vmul.f32 %v324_v42, %v321_v56 }
 0x5b8   :  { %333 = vadd.xlane.f32.xlu0 %v332_v57 }
 0x5bc   :  { %v344_v59 = vpop.xlane.xlu1 %343 }
 0x5bd   :  { %v345_v61 = vsel %vm341_vm2, %v344_v59, %v331_v52 }
 0x5be   :  { %v356_v62 = vmul.f32 %v352_v60, %v345_v61 }
 0x5c0   :  { %357 = vadd.xlane.f32.xlu0 %v356_v62 }
 0x62b   :  { %v334_v63 = vpop.xlane.xlu0 %333 }
 0x62c   :  { %v335_v0 = vsel %vm327_vm0, %v334_v63, %v321_v56  ;;  %vm401_vm0 = vcmp.eq.s32.totalorder %v847_v1, 14 }
 0x62d   :  { %v346_v3 = vmul.f32 %v338_v51, %v335_v0 }
 0x62f   :  { %347 = vadd.xlane.f32.xlu2 %v346_v3 }
 0x633   :  { %v358_v9 = vpop.xlane.xlu0 %357 }
 0x634   :  { %v359_v11 = vsel %vm355_vm3, %v358_v9, %v345_v61 }
 0x635   :  { %v370_v13 = vmul.f32 %v366_v10, %v359_v11 }
 0x637   :  { %371 = vadd.xlane.f32.xlu0 %v370_v13  ;;  %85 = vadd.xlane.f32.xlu2 %v84_v12 }
 0x6a2   :  { %v348_v14 = vpop.xlane.xlu2 %347 }
 0x6a3   :  { %v349_v15 = vsel %vm341_vm2, %v348_v14, %v335_v0  ;;  %vm419_vm2 = vcmp.eq.s32.totalorder %v847_v1, 13 }
 0x6a4   :  { %v360_v16 = vmul.f32 %v352_v60, %v349_v15 }
 0x6a6   :  { %361 = vadd.xlane.f32.xlu1 %v360_v16 }
 0x6aa   :  { %v941_v18 = vpop.xlane.xlu2 %85  ;;  %v372_v31 = vpop.xlane.xlu0 %371 }
 0x6ab   :  { %831 = vrcp.f32 %v941_v18  ;;  %v101_v21 = vand.u32 2147483648, %v941_v18  ;;  %vm95_vm7 = vweird.f32 %v941_v18  ;;  %v99_v23 = vand.u32 2147483647, %v941_v18 }
 0x6ac   :  { %v373_v35 = vsel %vm369_vm13, %v372_v31, %v359_v11 }
 0x6ad   :  { %v102_v25 = vor.u32 1.1754944e-38, %v101_v21  ;;  %vm100_vm11 = vcmp.eq.f32.partialorder %v99_v23, 8.507059e+37 }
 0x6b1   :  { %v832_v19 = vpop.eup %831 }
 0x6b2   :  { %v91_v20 = vmul.f32 %v832_v19, %v941_v18  ;;  %vm96_vm8 = vweird.f32 %v832_v19 }
 0x6b3   :  { %vm97_vm10 = vmor %vm95_vm7, %vm96_vm8  ;;  %vm53_vm8 = vcmp.eq.s32.totalorder %v849_v2, %v847_v1 }
 0x6b4   :  { %v92_v22 = vsub.f32 1.0, %v91_v20 }
 0x6b6   :  { %v93_v24 = vmul.f32 %v832_v19, %v92_v22 }
 0x6b8   :  { %v94_v26 = vadd.f32 %v832_v19, %v93_v24 }
 0x6ba   :  { %v98_v28 = vsel %vm97_vm10, %v832_v19, %v94_v26  ;;  %vm58_vm10 = vcmp.le.s32.totalorder %v849_v2, %v847_v1 }
 0x6bb   :  { %v953_v29 = vsel %vm100_vm11, %v102_v25, %v98_v28 }
 0x6bc   :  { %v104_v30 = vmul.f32 %v953_v29, %v89_v27 }
 0x6be   :  { %105 = vst [vmem:[#allocation2 + $0x8] sm:$0xff] %v104_v30 }
 0x6c5   :  { %v379_v32 = vld [vmem:[#allocation2 + $0xf] ss:$0 sm:$0xff]  ;;  %v397_v41 = vld [vmem:[#allocation2 + $0xe] ss:$0 sm:$0xff]  ;;  %v415_v53 = vld [vmem:[#allocation2 + $0xd] ss:$0 sm:$0xff] }
 0x6c6   :  { %v380_v34 = vxor.u32 2147483648, %v379_v32  ;;  %v398_v42 = vxor.u32 2147483648, %v397_v41  ;;  %v416_v57 = vxor.u32 2147483648, %v415_v53  ;;  %v433_v3 = vld [vmem:[#allocation2 + $0xc] ss:$0 sm:$0xff] }
 0x6c7   :  { %v434_v8 = vxor.u32 2147483648, %v433_v3  ;;  %v451_v16 = vld [vmem:[#allocation2 + $0xb] ss:$0 sm:$0xff]  ;;  %v469_v30 = vld [vmem:[#allocation2 + $0xa] ss:$0 sm:$0xff] }
 0x6c8   :  { %v388_v36 = vmul.f32 %v380_v34, %v373_v35  ;;  %v384_v37 = vmul.f32 %v380_v34, %v177_v33  ;;  %v452_v21 = vxor.u32 2147483648, %v451_v16  ;;  %v487_v41 = vld [vmem:[#allocation2 + $0x9] ss:$0 sm:$0xff] }
 0x6ca   :  { %389 = vadd.xlane.f32.xlu0 %v388_v36  ;;  %385 = vadd.xlane.f32.xlu2 %v384_v37 }
 0x719   :  { %v362_v38 = vpop.xlane.xlu1 %361 }
 0x71a   :  { %v363_v39 = vsel %vm355_vm3, %v362_v38, %v349_v15  ;;  %vm437_vm3 = vcmp.eq.s32.totalorder %v847_v1, 12 }
 0x71b   :  { %v374_v40 = vmul.f32 %v366_v10, %v363_v39 }
 0x71d   :  { %375 = vadd.xlane.f32.xlu1 %v374_v40 }
 0x73d   :  { %v390_v44 = vpop.xlane.xlu0 %389  ;;  %v386_v45 = vpop.xlane.xlu2 %385 }
 0x73e   :  { %v391_v46 = vsel %vm383_vm14, %v390_v44, %v373_v35  ;;  %v387_v47 = vsel %vm383_vm14, %v386_v45, %v177_v33  ;;  %v470_v33 = vxor.u32 2147483648, %v469_v30  ;;  %v488_v45 = vxor.u32 2147483648, %v487_v41 }
 0x73f   :  { %v406_v48 = vmul.f32 %v398_v42, %v391_v46  ;;  %v402_v49 = vmul.f32 %v398_v42, %v387_v47 }
 0x741   :  { %407 = vadd.xlane.f32.xlu0 %v406_v48  ;;  %403 = vadd.xlane.f32.xlu2 %v402_v49 }
 0x790   :  { %v376_v50 = vpop.xlane.xlu1 %375 }
 0x791   :  { %v377_v51 = vsel %vm369_vm13, %v376_v50, %v363_v39  ;;  %v36_v50 = vld [vmem:[%s1141_s0] sm:$0xff]  ;;  %vm59_vm13 = vmand %vm58_vm10, %vm49_vm1  ;;  %vm509_vm1 = vcmp.eq.s32.totalorder %v847_v1, 8  ;;  %vm637_vm10 = vcmp.eq.s32.totalorder %v847_v1, 2 }
 0x792   :  { %v392_v52 = vmul.f32 %v380_v34, %v377_v51 }
 0x794   :  { %393 = vadd.xlane.f32.xlu1 %v392_v52 }
 0x7b4   :  { %v408_v55 = vpop.xlane.xlu0 %407  ;;  %v404_v56 = vpop.xlane.xlu2 %403 }
 0x7b5   :  { %v409_v58 = vsel %vm401_vm0, %v408_v55, %v391_v46  ;;  %v405_v59 = vsel %vm401_vm0, %v404_v56, %v387_v47  ;;  %v505_v56 = vld [vmem:[#allocation2 + $0x8] ss:$0 sm:$0xff] }
 0x7b6   :  { %v424_v60 = vmul.f32 %v416_v57, %v409_v58  ;;  %v420_v61 = vmul.f32 %v416_v57, %v405_v59 }
 0x7b8   :  { %425 = vadd.xlane.f32.xlu0 %v424_v60  ;;  %421 = vadd.xlane.f32.xlu2 %v420_v61 }
 0x807   :  { %v394_v62 = vpop.xlane.xlu1 %393 }
 0x808   :  { %v395_v63 = vsel %vm383_vm14, %v394_v62, %v377_v51  ;;  %v55_v51 = vsel %vm53_vm8, %v36_v50, 0.0  ;;  %vm593_vm8 = vcmp.eq.s32.totalorder %v847_v1, 4 }
 0x809   :  { %v410_v0 = vmul.f32 %v398_v42, %v395_v63 }
 0x80b   :  { %411 = vadd.xlane.f32.xlu1 %v410_v0 }
 0x82b   :  { %v426_v4 = vpop.xlane.xlu0 %425  ;;  %v422_v5 = vpop.xlane.xlu2 %421 }
 0x82c   :  { %v427_v9 = vsel %vm419_vm2, %v426_v4, %v409_v58  ;;  %v423_v10 = vsel %vm419_vm2, %v422_v5, %v405_v59  ;;  %v506_v58 = vxor.u32 2147483648, %v505_v56 }
 0x82d   :  { %v442_v11 = vmul.f32 %v434_v8, %v427_v9  ;;  %v438_v12 = vmul.f32 %v434_v8, %v423_v10 }
 0x82f   :  { %443 = vadd.xlane.f32.xlu0 %v442_v11  ;;  %439 = vadd.xlane.f32.xlu2 %v438_v12 }
 0x87e   :  { %v412_v13 = vpop.xlane.xlu1 %411 }
 0x87f   :  { %v413_v14 = vsel %vm401_vm0, %v412_v13, %v395_v63 }
 0x880   :  { %v428_v15 = vmul.f32 %v416_v57, %v413_v14 }
 0x882   :  { %429 = vadd.xlane.f32.xlu1 %v428_v15 }
 0x8a2   :  { %v444_v19 = vpop.xlane.xlu0 %443  ;;  %v440_v20 = vpop.xlane.xlu2 %439 }
 0x8a3   :  { %v445_v22 = vsel %vm437_vm3, %v444_v19, %v427_v9  ;;  %v441_v23 = vsel %vm437_vm3, %v440_v20, %v423_v10  ;;  %v60_v10 = vsel %vm59_vm13, %v36_v50, 0.0  ;;  %vm680_vm13 = vcmp.eq.s32.totalorder %v847_v1, 0 }
 0x8a4   :  { %v460_v24 = vmul.f32 %v452_v21, %v445_v22  ;;  %v456_v25 = vmul.f32 %v452_v21, %v441_v23 }
 0x8a6   :  { %461 = vadd.xlane.f32.xlu0 %v460_v24  ;;  %457 = vadd.xlane.f32.xlu2 %v456_v25 }
 0x8f5   :  { %v430_v26 = vpop.xlane.xlu1 %429 }
 0x8f6   :  { %v431_v27 = vsel %vm419_vm2, %v430_v26, %v413_v14  ;;  %vm169_vm2 = vcmp.eq.s32.totalorder %v847_v1, %v849_v2 }
 0x8f7   :  { %v446_v28 = vmul.f32 %v434_v8, %v431_v27  ;;  %v170_v14 = vsel %vm169_vm2, -1.0, %v836_v7 }
 0x8f9   :  { %447 = vadd.xlane.f32.xlu1 %v446_v28 }
 0x919   :  { %v462_v31 = vpop.xlane.xlu0 %461  ;;  %v458_v32 = vpop.xlane.xlu2 %457 }
 0x91a   :  { %v463_v34 = vsel %vm455_vm4, %v462_v31, %v445_v22  ;;  %v459_v35 = vsel %vm455_vm4, %v458_v32, %v441_v23 }
 0x91b   :  { %v478_v36 = vmul.f32 %v470_v33, %v463_v34  ;;  %v474_v37 = vmul.f32 %v470_v33, %v459_v35 }
 0x91d   :  { %479 = vadd.xlane.f32.xlu0 %v478_v36  ;;  %475 = vadd.xlane.f32.xlu2 %v474_v37 }
 0x96c   :  { %v448_v38 = vpop.xlane.xlu1 %447 }
 0x96d   :  { %v449_v39 = vsel %vm437_vm3, %v448_v38, %v431_v27  ;;  %vm527_vm3 = vcmp.eq.s32.totalorder %v847_v1, 7 }
 0x96e   :  { %v464_v40 = vmul.f32 %v452_v21, %v449_v39 }
 0x970   :  { %465 = vadd.xlane.f32.xlu1 %v464_v40 }
 0x990   :  { %v480_v42 = vpop.xlane.xlu0 %479  ;;  %v476_v44 = vpop.xlane.xlu2 %475 }
 0x991   :  { %v481_v46 = vsel %vm473_vm6, %v480_v42, %v463_v34  ;;  %v477_v47 = vsel %vm473_vm6, %v476_v44, %v459_v35 }
 0x992   :  { %v496_v48 = vmul.f32 %v488_v45, %v481_v46  ;;  %v492_v49 = vmul.f32 %v488_v45, %v477_v47 }
 0x994   :  { %497 = vadd.xlane.f32.xlu0 %v496_v48  ;;  %493 = vadd.xlane.f32.xlu2 %v492_v49 }
 0x99c   :  { %56 = vadd.xlane.f32.xlu2 %v55_v51 }
 0x9e3   :  { %v466_v52 = vpop.xlane.xlu1 %465 }
 0x9e4   :  { %v467_v53 = vsel %vm455_vm4, %v466_v52, %v449_v39  ;;  %vm549_vm4 = vcmp.eq.s32.totalorder %v847_v1, 6 }
 0x9e5   :  { %v482_v55 = vmul.f32 %v470_v33, %v467_v53 }
 0x9e7   :  { %483 = vadd.xlane.f32.xlu1 %v482_v55 }
 0xa07   :  { %v494_v57 = vpop.xlane.xlu2 %493  ;;  %v498_v23 = vpop.xlane.xlu0 %497 }
 0xa08   :  { %v495_v59 = vsel %vm491_vm9, %v494_v57, %v477_v47  ;;  %v499_v24 = vsel %vm491_vm9, %v498_v23, %v481_v46 }
 0xa09   :  { %v510_v60 = vmul.f32 %v506_v58, %v495_v59  ;;  %v514_v25 = vmul.f32 %v506_v58, %v499_v24 }
 0xa0b   :  { %511 = vadd.xlane.f32.xlu0 %v510_v60 }
 0xa0f   :  { %v1013_v61 = vpop.xlane.xlu2 %56 }
 0xa10   :  { %833 = vrcp.f32 %v1013_v61  ;;  %v72_v0 = vand.u32 2147483648, %v1013_v61  ;;  %vm66_vm11 = vweird.f32 %v1013_v61  ;;  %v70_v4 = vand.u32 2147483647, %v1013_v61 }
 0xa12   :  { %v73_v8 = vor.u32 1.1754944e-38, %v72_v0  ;;  %vm71_vm0 = vcmp.eq.f32.partialorder %v70_v4, 8.507059e+37 }
 0xa16   :  { %v834_v62 = vpop.eup %833 }
 0xa17   :  { %v62_v63 = vmul.f32 %v834_v62, %v1013_v61  ;;  %vm67_vm12 = vweird.f32 %v834_v62 }
 0xa18   :  { %vm68_vm14 = vmor %vm66_vm11, %vm67_vm12  ;;  %vm659_vm12 = vcmp.eq.s32.totalorder %v847_v1, 1 }
 0xa19   :  { %v63_v3 = vsub.f32 1.0, %v62_v63 }
 0xa1b   :  { %v64_v5 = vmul.f32 %v834_v62, %v63_v3 }
 0xa1d   :  { %v65_v9 = vadd.f32 %v834_v62, %v64_v5 }
 0xa1f   :  { %v69_v11 = vsel %vm68_vm14, %v834_v62, %v65_v9 }
 0xa20   :  { %v1026_v12 = vsel %vm71_vm0, %v73_v8, %v69_v11 }
 0xa21   :  { %v75_v13 = vmul.f32 %v1026_v12, %v60_v10 }
 0xa23   :  { %76 = vst [vmem:[#allocation2] sm:$0xff] %v75_v13 }
 0xa2a   :  { %v523_v15 = vld [vmem:[#allocation2 + $0x7] ss:$0 sm:$0xff]  ;;  %v545_v27 = vld [vmem:[#allocation2 + $0x6] ss:$0 sm:$0xff]  ;;  %v567_v42 = vld [vmem:[#allocation2 + $0x5] ss:$0 sm:$0xff] }
 0xa2b   :  { %v524_v16 = vxor.u32 2147483648, %v523_v15  ;;  %v546_v28 = vxor.u32 2147483648, %v545_v27  ;;  %v568_v44 = vxor.u32 2147483648, %v567_v42 }
 0xa2d   :  { %v528_v19 = vmul.f32 %v524_v16, %v170_v14 }
 0xa2f   :  { %529 = vadd.xlane.f32.xlu0 %v528_v19 }
 0xa5a   :  { %v484_v20 = vpop.xlane.xlu1 %483 }
 0xa5b   :  { %v485_v21 = vsel %vm473_vm6, %v484_v20, %v467_v53  ;;  %vm571_vm6 = vcmp.eq.s32.totalorder %v847_v1, 5 }
 0xa5c   :  { %v500_v22 = vmul.f32 %v488_v45, %v485_v21 }
 0xa5e   :  { %501 = vadd.xlane.f32.xlu1 %v500_v22 }
 0xa66   :  { %515 = vadd.xlane.f32.xlu1 %v514_v25 }
 0xa7e   :  { %v512_v2 = vpop.xlane.xlu0 %511 }
 0xa7f   :  { %v513_v7 = vsel %vm509_vm1, %v512_v2, %v495_v59 }
 0xa80   :  { %v532_v26 = vmul.f32 %v524_v16, %v513_v7 }
 0xa82   :  { %533 = vadd.xlane.f32.xlu1 %v532_v26 }
 0xaa2   :  { %v530_v30 = vpop.xlane.xlu0 %529 }
 0xaa3   :  { %v531_v31 = vsel %vm527_vm3, %v530_v30, %v170_v14  ;;  %v611_v14 = vld [vmem:[#allocation2 + $0x3] ss:$0 sm:$0xff] }
 0xaa4   :  { %v550_v32 = vmul.f32 %v546_v28, %v531_v31 }
 0xaa6   :  { %551 = vadd.xlane.f32.xlu1 %v550_v32 }
 0xad1   :  { %v502_v33 = vpop.xlane.xlu1 %501 }
 0xad2   :  { %v503_v34 = vsel %vm491_vm9, %v502_v33, %v485_v21  ;;  %vm615_vm9 = vcmp.eq.s32.totalorder %v847_v1, 3 }
 0xad3   :  { %v518_v35 = vmul.f32 %v506_v58, %v503_v34  ;;  %v589_v58 = vld [vmem:[#allocation2 + $0x4] ss:$0 sm:$0xff] }
 0xad4   :  { %v590_v60 = vxor.u32 2147483648, %v589_v58 }
 0xad5   :  { %519 = vadd.xlane.f32.xlu2 %v518_v35 }
 0xad9   :  { %v516_v36 = vpop.xlane.xlu1 %515 }
 0xada   :  { %v517_v37 = vsel %vm509_vm1, %v516_v36, %v499_v24 }
 0xadb   :  { %v536_v38 = vmul.f32 %v524_v16, %v517_v37 }
 0xadd   :  { %537 = vadd.xlane.f32.xlu2 %v536_v38 }
 0xaf5   :  { %v534_v39 = vpop.xlane.xlu1 %533 }
 0xaf6   :  { %v535_v40 = vsel %vm527_vm3, %v534_v39, %v513_v7 }
 0xaf7   :  { %v554_v41 = vmul.f32 %v546_v28, %v535_v40 }
 0xaf9   :  { %555 = vadd.xlane.f32.xlu2 %v554_v41 }
 0xb19   :  { %v552_v45 = vpop.xlane.xlu1 %551 }
 0xb1a   :  { %v553_v46 = vsel %vm549_vm4, %v552_v45, %v531_v31 }
 0xb1b   :  { %v572_v47 = vmul.f32 %v568_v44, %v553_v46 }
 0xb1d   :  { %573 = vadd.xlane.f32.xlu2 %v572_v47 }
 0xb48   :  { %v520_v48 = vpop.xlane.xlu2 %519 }
 0xb49   :  { %v521_v49 = vsel %vm509_vm1, %v520_v48, %v503_v34 }
 0xb4a   :  { %v540_v50 = vmul.f32 %v524_v16, %v521_v49  ;;  %v612_v16 = vxor.u32 2147483648, %v611_v14 }
 0xb4c   :  { %541 = vadd.xlane.f32.xlu0 %v540_v50 }
 0xb50   :  { %v538_v51 = vpop.xlane.xlu2 %537 }
 0xb51   :  { %v539_v52 = vsel %vm527_vm3, %v538_v51, %v517_v37 }
 0xb52   :  { %v558_v53 = vmul.f32 %v546_v28, %v539_v52 }
 0xb54   :  { %559 = vadd.xlane.f32.xlu0 %v558_v53 }
 0xb6c   :  { %v556_v55 = vpop.xlane.xlu2 %555 }
 0xb6d   :  { %v557_v56 = vsel %vm549_vm4, %v556_v55, %v535_v40 }
 0xb6e   :  { %v576_v57 = vmul.f32 %v568_v44, %v557_v56 }
 0xb70   :  { %577 = vadd.xlane.f32.xlu0 %v576_v57 }
 0xb90   :  { %v574_v59 = vpop.xlane.xlu2 %573 }
 0xb91   :  { %v575_v62 = vsel %vm571_vm6, %v574_v59, %v553_v46  ;;  %v676_v59 = vld [vmem:[#allocation2] ss:$0 sm:$0xff] }
 0xb92   :  { %v594_v63 = vmul.f32 %v590_v60, %v575_v62 }
 0xb94   :  { %595 = vadd.xlane.f32.xlu0 %v594_v63 }
 0xbbf   :  { %v542_v0 = vpop.xlane.xlu0 %541 }
 0xbc0   :  { %v543_v3 = vsel %vm527_vm3, %v542_v0, %v521_v49 }
 0xbc1   :  { %v562_v4 = vmul.f32 %v546_v28, %v543_v3  ;;  %v633_v28 = vld [vmem:[#allocation2 + $0x2] ss:$0 sm:$0xff] }
 0xbc2   :  { %v634_v31 = vxor.u32 2147483648, %v633_v28 }
 0xbc3   :  { %563 = vadd.xlane.f32.xlu1 %v562_v4 }
 0xbc7   :  { %v560_v5 = vpop.xlane.xlu0 %559 }
 0xbc8   :  { %v561_v8 = vsel %vm549_vm4, %v560_v5, %v539_v52 }
 0xbc9   :  { %v580_v9 = vmul.f32 %v568_v44, %v561_v8 }
 0xbcb   :  { %581 = vadd.xlane.f32.xlu1 %v580_v9 }
 0xbe3   :  { %v578_v10 = vpop.xlane.xlu0 %577 }
 0xbe4   :  { %v579_v11 = vsel %vm571_vm6, %v578_v10, %v557_v56 }
 0xbe5   :  { %v598_v13 = vmul.f32 %v590_v60, %v579_v11 }
 0xbe7   :  { %599 = vadd.xlane.f32.xlu1 %v598_v13 }
 0xc07   :  { %v596_v15 = vpop.xlane.xlu0 %595 }
 0xc08   :  { %v597_v19 = vsel %vm593_vm8, %v596_v15, %v575_v62  ;;  %v677_v62 = vxor.u32 2147483648, %v676_v59 }
 0xc09   :  { %v616_v20 = vmul.f32 %v612_v16, %v597_v19 }
 0xc0b   :  { %617 = vadd.xlane.f32.xlu1 %v616_v20 }
 0xc36   :  { %v564_v21 = vpop.xlane.xlu1 %563 }
 0xc37   :  { %v565_v22 = vsel %vm549_vm4, %v564_v21, %v543_v3 }
 0xc38   :  { %v584_v23 = vmul.f32 %v568_v44, %v565_v22  ;;  %v655_v44 = vld [vmem:[#allocation2 + $0x1] ss:$0 sm:$0xff] }
 0xc39   :  { %v656_v46 = vxor.u32 2147483648, %v655_v44 }
 0xc3a   :  { %585 = vadd.xlane.f32.xlu2 %v584_v23 }
 0xc3e   :  { %v582_v24 = vpop.xlane.xlu1 %581 }
 0xc3f   :  { %v583_v25 = vsel %vm571_vm6, %v582_v24, %v561_v8 }
 0xc40   :  { %v602_v2 = vmul.f32 %v590_v60, %v583_v25 }
 0xc42   :  { %603 = vadd.xlane.f32.xlu2 %v602_v2 }
 0xc5a   :  { %v600_v7 = vpop.xlane.xlu1 %599 }
 0xc5b   :  { %v601_v26 = vsel %vm593_vm8, %v600_v7, %v579_v11 }
 0xc5c   :  { %v620_v27 = vmul.f32 %v612_v16, %v601_v26 }
 0xc5e   :  { %621 = vadd.xlane.f32.xlu2 %v620_v27 }
 0xc7e   :  { %v618_v30 = vpop.xlane.xlu1 %617 }
 0xc7f   :  { %v619_v32 = vsel %vm615_vm9, %v618_v30, %v597_v19 }
 0xc80   :  { %v638_v33 = vmul.f32 %v634_v31, %v619_v32 }
 0xc82   :  { %639 = vadd.xlane.f32.xlu2 %v638_v33 }
 0xcad   :  { %v586_v34 = vpop.xlane.xlu2 %585 }
 0xcae   :  { %v587_v35 = vsel %vm571_vm6, %v586_v34, %v565_v22 }
 0xcaf   :  { %v606_v36 = vmul.f32 %v590_v60, %v587_v35 }
 0xcb1   :  { %607 = vadd.xlane.f32.xlu0 %v606_v36 }
 0xcb5   :  { %v604_v37 = vpop.xlane.xlu2 %603 }
 0xcb6   :  { %v605_v38 = vsel %vm593_vm8, %v604_v37, %v583_v25 }
 0xcb7   :  { %v624_v39 = vmul.f32 %v612_v16, %v605_v38 }
 0xcb9   :  { %625 = vadd.xlane.f32.xlu0 %v624_v39 }
 0xcd1   :  { %v622_v40 = vpop.xlane.xlu2 %621 }
 0xcd2   :  { %v623_v41 = vsel %vm615_vm9, %v622_v40, %v601_v26 }
 0xcd3   :  { %v642_v42 = vmul.f32 %v634_v31, %v623_v41 }
 0xcd5   :  { %643 = vadd.xlane.f32.xlu0 %v642_v42 }
 0xcf5   :  { %v640_v45 = vpop.xlane.xlu2 %639 }
 0xcf6   :  { %v641_v47 = vsel %vm637_vm10, %v640_v45, %v619_v32 }
 0xcf7   :  { %v660_v48 = vmul.f32 %v656_v46, %v641_v47 }
 0xcf9   :  { %661 = vadd.xlane.f32.xlu0 %v660_v48 }
 0xd24   :  { %v608_v49 = vpop.xlane.xlu0 %607 }
 0xd25   :  { %v609_v50 = vsel %vm593_vm8, %v608_v49, %v587_v35 }
 0xd26   :  { %v628_v51 = vmul.f32 %v612_v16, %v609_v50 }
 0xd28   :  { %629 = vadd.xlane.f32.xlu1 %v628_v51 }
 0xd2c   :  { %v626_v52 = vpop.xlane.xlu0 %625 }
 0xd2d   :  { %v627_v53 = vsel %vm615_vm9, %v626_v52, %v605_v38 }
 0xd2e   :  { %v646_v55 = vmul.f32 %v634_v31, %v627_v53 }
 0xd30   :  { %647 = vadd.xlane.f32.xlu1 %v646_v55 }
 0xd48   :  { %v644_v56 = vpop.xlane.xlu0 %643 }
 0xd49   :  { %v645_v57 = vsel %vm637_vm10, %v644_v56, %v623_v41 }
 0xd4a   :  { %v664_v58 = vmul.f32 %v656_v46, %v645_v57 }
 0xd4c   :  { %665 = vadd.xlane.f32.xlu1 %v664_v58 }
 0xd6c   :  { %v662_v60 = vpop.xlane.xlu0 %661 }
 0xd6d   :  { %v663_v63 = vsel %vm659_vm12, %v662_v60, %v641_v47 }
 0xd6e   :  { %v681_v0 = vmul.f32 %v677_v62, %v663_v63 }
 0xd70   :  { %682 = vadd.xlane.f32.xlu1 %v681_v0 }
 0xd9b   :  { %v630_v3 = vpop.xlane.xlu1 %629 }
 0xd9c   :  { %v631_v4 = vsel %vm615_vm9, %v630_v3, %v609_v50 }
 0xd9d   :  { %v650_v5 = vmul.f32 %v634_v31, %v631_v4 }
 0xd9f   :  { %651 = vadd.xlane.f32.xlu2 %v650_v5 }
 0xda3   :  { %v648_v8 = vpop.xlane.xlu1 %647 }
 0xda4   :  { %v649_v9 = vsel %vm637_vm10, %v648_v8, %v627_v53 }
 0xda5   :  { %v668_v10 = vmul.f32 %v656_v46, %v649_v9 }
 0xda7   :  { %669 = vadd.xlane.f32.xlu2 %v668_v10 }
 0xdbf   :  { %v666_v11 = vpop.xlane.xlu1 %665 }
 0xdc0   :  { %v667_v13 = vsel %vm659_vm12, %v666_v11, %v645_v57 }
 0xdc1   :  { %v685_v14 = vmul.f32 %v677_v62, %v667_v13 }
 0xdc3   :  { %686 = vadd.xlane.f32.xlu2 %v685_v14 }
 0xde3   :  { %v683_v15 = vpop.xlane.xlu1 %682 }
 0xde4   :  { %v684_v16 = vsel %vm680_vm13, %v683_v15, %v663_v63 }
 0xde5   :  { %v711_v19 = vmul.f32 %v684_v16, %v1026_v12 }
 0xde7   :  { %v713_v20 = vsel %vm66_vm11, %v684_v16, %v711_v19 }
 0xde8   :  { %807 = vst [vmem:[%s1142_s1] sm:$0xff] %v713_v20 }
 0xe12   :  { %v652_v21 = vpop.xlane.xlu2 %651 }
 0xe13   :  { %v653_v22 = vsel %vm637_vm10, %v652_v21, %v631_v4 }
 0xe14   :  { %v672_v23 = vmul.f32 %v656_v46, %v653_v22 }
 0xe16   :  { %673 = vadd.xlane.f32.xlu0 %v672_v23 }
 0xe1a   :  { %v670_v24 = vpop.xlane.xlu2 %669 }
 0xe1b   :  { %v671_v25 = vsel %vm659_vm12, %v670_v24, %v649_v9 }
 0xe1c   :  { %v689_v2 = vmul.f32 %v677_v62, %v671_v25 }
 0xe1e   :  { %690 = vadd.xlane.f32.xlu0 %v689_v2 }
 0xe36   :  { %v687_v12 = vpop.xlane.xlu2 %686 }
 0xe37   :  { %v688_v61 = vsel %vm680_vm13, %v687_v12, %v667_v13 }
 0xe38   :  { %v729_v7 = vmul.f32 %v688_v61, %v953_v29 }
 0xe3a   :  { %v731_v26 = vsel %vm95_vm7, %v688_v61, %v729_v7 }
 0xe3b   :  { %809 = vst [vmem:[%s1142_s1 + $0x8] sm:$0xff] %v731_v26 }
 0xe89   :  { %v674_v27 = vpop.xlane.xlu0 %673 }
 0xe8a   :  { %v675_v28 = vsel %vm659_vm12, %v674_v27, %v653_v22 }
 0xe8b   :  { %v693_v30 = vmul.f32 %v677_v62, %v675_v28 }
 0xe8d   :  { %694 = vadd.xlane.f32.xlu1 %v693_v30 }
 0xe91   :  { %v691_v31 = vpop.xlane.xlu0 %690 }
 0xe92   :  { %v692_v32 = vsel %vm680_vm13, %v691_v31, %v671_v25 }
 0xe93   :  { %v748_v33 = vmul.f32 %v692_v32, %v894_v54 }
 0xe95   :  { %v750_v18 = vsel %vm124_vm15, %v692_v32, %v748_v33 }
 0xe96   :  { %811 = vst [vmem:[%s1142_s1 + $0x10] sm:$0xff] %v750_v18 }
 0xf00   :  { %v695_v29 = vpop.xlane.xlu1 %694 }
 0xf01   :  { %v696_v34 = vsel %vm680_vm13, %v695_v29, %v675_v28 }
 0xf02   :  { %v767_v35 = vmul.f32 %v696_v34, %v869_v17 }
 0xf04   :  { %v769_v36 = vsel %vm153_vm5, %v696_v34, %v767_v35 }
 0xf05   :  { %813 = vst [vmem:[%s1142_s1 + $0x18] sm:$0xff] %v769_v36 }

// kernel: custom-call.24
= control target key start
LH: loop header
LB: loop body
LE: loop exit
PB: predicated region body
PF: predicated region fallthrough
CT: control target
= control target key end

     0   :  { %v47_v0 = vlaneseq  ;;  %v836_v18 = vmov -1.0   ;;  %v837_v61 = vmov 0.0   ;;  %s1040_s0 = inlined_call_operand.vmem [shape: f32[1,32,32], index: 0, kind: input, shape index: {}]   ;;  %s1041_s1 = inlined_call_operand.vmem [shape: f32[1,32,32], index: 1, kind: output, shape index: {}]  }
   0x1   :  { %v36_v1 = vld [vmem:[%s1040_s0] sm:$0xff]  ;;  %v38_v39 = vld [vmem:[%s1040_s0 + $0x8] sm:$0xff] }
   0x2   :  { %v851_v2 = vand.u32 127, %v47_v0  ;;  %v853_v3 = vshrl.u32 %v47_v0, 7 }
   0x4   :  { %vm53_vm0 = vcmp.eq.s32.totalorder %v853_v3, %v851_v2  ;;  %vm49_vm1 = vcmp.lt.s32.totalorder %v851_v2, 32  ;;  %vm58_vm2 = vcmp.ge.s32.totalorder %v853_v3, %v851_v2  ;;  %vm172_vm8 = vcmp.eq.s32.totalorder %v851_v2, 0 }
   0x5   :  { %v55_v4 = vsel %vm53_vm0, %v36_v1, 0.0  ;;  %vm59_vm3 = vmand %vm58_vm2, %vm49_vm1  ;;  %vm169_vm9 = vcmp.eq.s32.totalorder %v851_v2, %v853_v3  ;;  %v173_v19 = vsel %vm172_vm8, 1.0, %v836_v18  ;;  %vm201_vm10 = vcmp.eq.s32.totalorder %v851_v2, 1 }
   0x6   :  { %56 = vadd.xlane.f32.xlu0 %v55_v4  ;;  %v60_v13 = vsel %vm59_vm3, %v36_v1, 0.0  ;;  %v174_v20 = vsel %vm169_vm9, %v173_v19, 0.0  ;;  %vm211_vm11 = vcmp.eq.s32.totalorder %v851_v2, 2  ;;  %vm221_vm12 = vcmp.eq.s32.totalorder %v851_v2, 3 }
   0x7   :  { %v81_v40 = vadd.s32 8, %v853_v3  ;;  %vm231_vm14 = vcmp.eq.s32.totalorder %v851_v2, 4  ;;  %vm241_vm8 = vcmp.eq.s32.totalorder %v851_v2, 5  ;;  %vm251_vm9 = vcmp.eq.s32.totalorder %v851_v2, 6 }
   0x9   :  { %vm82_vm13 = vcmp.eq.s32.totalorder %v81_v40, %v851_v2  ;;  %vm87_vm15 = vcmp.ge.s32.totalorder %v81_v40, %v851_v2 }
   0xa   :  { %v84_v41 = vsel %vm82_vm13, %v38_v39, 0.0  ;;  %vm88_vm3 = vmand %vm87_vm15, %vm49_vm1  ;;  %vm299_vm13 = vcmp.eq.s32.totalorder %v851_v2, 10  ;;  %vm327_vm15 = vcmp.eq.s32.totalorder %v851_v2, 12 }
   0xb   :  { %v89_v56 = vsel %vm88_vm3, %v38_v39, 0.0  ;;  %vm341_vm3 = vcmp.eq.s32.totalorder %v851_v2, 13 }
  0x79   :  { %v857_v5 = vpop.xlane.xlu0 %56 }
  0x7a   :  { %828 = vrcp.f32 %v857_v5  ;;  %v72_v9 = vand.u32 2147483648, %v857_v5  ;;  %v70_v11 = vand.u32 2147483647, %v857_v5  ;;  %vm66_vm5 = vweird.f32 %v857_v5 }
  0x7c   :  { %v73_v14 = vor.u32 1.1754944e-38, %v72_v9  ;;  %vm71_vm7 = vcmp.eq.f32.partialorder %v70_v11, 8.507059e+37 }
  0x80   :  { %v829_v6 = vpop.eup %828 }
  0x81   :  { %v62_v7 = vmul.f32 %v829_v6, %v857_v5  ;;  %vm67_vm4 = vweird.f32 %v829_v6 }
  0x82   :  { %vm68_vm6 = vmor %vm66_vm5, %vm67_vm4 }
  0x83   :  { %v63_v8 = vsub.f32 1.0, %v62_v7 }
  0x85   :  { %v64_v10 = vmul.f32 %v829_v6, %v63_v8 }
  0x87   :  { %v65_v12 = vadd.f32 %v829_v6, %v64_v10 }
  0x89   :  { %v69_v15 = vsel %vm68_vm6, %v829_v6, %v65_v12 }
  0x8a   :  { %v871_v16 = vsel %vm71_vm7, %v73_v14, %v69_v15  ;;  %vm180_vm7 = vcmp.eq.s32.totalorder %v851_v2, %v81_v40 }
  0x8b   :  { %v75_v17 = vmul.f32 %v871_v16, %v60_v13  ;;  %v181_v62 = vsel %vm180_vm7, -1.0, %v837_v61 }
  0x8d   :  { %76 = vst [vmem:[#allocation2] sm:$0xff] %v75_v17 }
  0x94   :  { %v197_v21 = vld [vmem:[#allocation2 + $0x1] ss:$0 sm:$0xff]  ;;  %v207_v24 = vld [vmem:[#allocation2 + $0x2] ss:$0 sm:$0xff]  ;;  %v217_v29 = vld [vmem:[#allocation2 + $0x3] ss:$0 sm:$0xff] }
  0x95   :  { %v198_v22 = vxor.u32 2147483648, %v197_v21  ;;  %v208_v26 = vxor.u32 2147483648, %v207_v24  ;;  %v218_v31 = vxor.u32 2147483648, %v217_v29  ;;  %v227_v34 = vld [vmem:[#allocation2 + $0x4] ss:$0 sm:$0xff] }
  0x96   :  { %v228_v36 = vxor.u32 2147483648, %v227_v34  ;;  %v237_v42 = vld [vmem:[#allocation2 + $0x5] ss:$0 sm:$0xff]  ;;  %v247_v60 = vld [vmem:[#allocation2 + $0x6] ss:$0 sm:$0xff] }
  0x97   :  { %v202_v23 = vmul.f32 %v198_v22, %v174_v20  ;;  %v238_v44 = vxor.u32 2147483648, %v237_v42  ;;  %v248_v1 = vxor.u32 2147483648, %v247_v60  ;;  %v257_v9 = vld [vmem:[#allocation2 + $0x7] ss:$0 sm:$0xff] }
  0x98   :  { %v258_v11 = vxor.u32 2147483648, %v257_v9 }
  0x99   :  { %203 = vadd.xlane.f32.xlu0 %v202_v23 }
 0x10c   :  { %v204_v25 = vpop.xlane.xlu0 %203 }
 0x10d   :  { %v205_v27 = vsel %vm201_vm10, %v204_v25, %v174_v20  ;;  %vm261_vm10 = vcmp.eq.s32.totalorder %v851_v2, 7 }
 0x10e   :  { %v212_v28 = vmul.f32 %v208_v26, %v205_v27 }
 0x110   :  { %213 = vadd.xlane.f32.xlu1 %v212_v28 }
 0x183   :  { %v214_v30 = vpop.xlane.xlu1 %213 }
 0x184   :  { %v215_v32 = vsel %vm211_vm11, %v214_v30, %v205_v27  ;;  %vm271_vm11 = vcmp.eq.s32.totalorder %v851_v2, 8 }
 0x185   :  { %v222_v33 = vmul.f32 %v218_v31, %v215_v32 }
 0x187   :  { %223 = vadd.xlane.f32.xlu1 %v222_v33 }
 0x18f   :  { %85 = vadd.xlane.f32.xlu1 %v84_v41 }
 0x1fa   :  { %v224_v35 = vpop.xlane.xlu1 %223 }
 0x1fb   :  { %v225_v37 = vsel %vm221_vm12, %v224_v35, %v215_v32  ;;  %vm285_vm12 = vcmp.eq.s32.totalorder %v851_v2, 9 }
 0x1fc   :  { %v232_v38 = vmul.f32 %v228_v36, %v225_v37 }
 0x1fe   :  { %233 = vadd.xlane.f32.xlu2 %v232_v38 }
 0x202   :  { %v886_v47 = vpop.xlane.xlu1 %85 }
 0x203   :  { %830 = vrcp.f32 %v886_v47  ;;  %v101_v50 = vand.u32 2147483648, %v886_v47  ;;  %vm95_vm0 = vweird.f32 %v886_v47  ;;  %v99_v52 = vand.u32 2147483647, %v886_v47 }
 0x205   :  { %v102_v54 = vor.u32 1.1754944e-38, %v101_v50  ;;  %vm100_vm6 = vcmp.eq.f32.partialorder %v99_v52, 8.507059e+37 }
 0x209   :  { %v831_v48 = vpop.eup %830 }
 0x20a   :  { %v91_v49 = vmul.f32 %v831_v48, %v886_v47  ;;  %vm96_vm2 = vweird.f32 %v831_v48 }
 0x20b   :  { %vm97_vm4 = vmor %vm95_vm0, %vm96_vm2 }
 0x20c   :  { %v92_v51 = vsub.f32 1.0, %v91_v49 }
 0x20e   :  { %v93_v53 = vmul.f32 %v831_v48, %v92_v51 }
 0x210   :  { %v94_v55 = vadd.f32 %v831_v48, %v93_v53 }
 0x212   :  { %v98_v57 = vsel %vm97_vm4, %v831_v48, %v94_v55 }
 0x213   :  { %v898_v58 = vsel %vm100_vm6, %v102_v54, %v98_v57  ;;  %v40_v57 = vld [vmem:[%s1040_s0 + $0x10] sm:$0xff] }
 0x214   :  { %v104_v59 = vmul.f32 %v898_v58, %v89_v56  ;;  %v110_v56 = vadd.s32 16, %v853_v3 }
 0x216   :  { %105 = vst [vmem:[#allocation2 + $0x8] sm:$0xff] %v104_v59  ;;  %vm111_vm2 = vcmp.eq.s32.totalorder %v110_v56, %v851_v2  ;;  %vm116_vm4 = vcmp.ge.s32.totalorder %v110_v56, %v851_v2 }
 0x217   :  { %v113_v59 = vsel %vm111_vm2, %v40_v57, 0.0  ;;  %vm419_vm2 = vcmp.eq.s32.totalorder %v851_v2, 18 }
 0x21d   :  { %v267_v63 = vld [vmem:[#allocation2 + $0x8] ss:$0 sm:$0xff]  ;;  %v281_v18 = vld [vmem:[#allocation2 + $0x9] ss:$0 sm:$0xff]  ;;  %v295_v26 = vld [vmem:[#allocation2 + $0xa] ss:$0 sm:$0xff] }
 0x21e   :  { %v268_v4 = vxor.u32 2147483648, %v267_v63  ;;  %v282_v20 = vxor.u32 2147483648, %v281_v18  ;;  %v296_v28 = vxor.u32 2147483648, %v295_v26  ;;  %v309_v34 = vld [vmem:[#allocation2 + $0xb] ss:$0 sm:$0xff] }
 0x21f   :  { %v310_v36 = vxor.u32 2147483648, %v309_v34  ;;  %v323_v42 = vld [vmem:[#allocation2 + $0xc] ss:$0 sm:$0xff]  ;;  %v337_v51 = vld [vmem:[#allocation2 + $0xd] ss:$0 sm:$0xff] }
 0x220   :  { %v276_v8 = vmul.f32 %v268_v4, %v181_v62  ;;  %v338_v53 = vxor.u32 2147483648, %v337_v51 }
 0x222   :  { %277 = vadd.xlane.f32.xlu1 %v276_v8 }
 0x271   :  { %v234_v43 = vpop.xlane.xlu2 %233 }
 0x272   :  { %v235_v45 = vsel %vm231_vm14, %v234_v43, %v225_v37  ;;  %vm313_vm14 = vcmp.eq.s32.totalorder %v851_v2, 11 }
 0x273   :  { %v242_v46 = vmul.f32 %v238_v44, %v235_v45  ;;  %v324_v44 = vxor.u32 2147483648, %v323_v42 }
 0x275   :  { %243 = vadd.xlane.f32.xlu2 %v242_v46 }
 0x295   :  { %v278_v19 = vpop.xlane.xlu1 %277 }
 0x296   :  { %v279_v21 = vsel %vm271_vm11, %v278_v19, %v181_v62 }
 0x297   :  { %v290_v22 = vmul.f32 %v282_v20, %v279_v21 }
 0x2e8   :  { %v244_v0 = vpop.xlane.xlu2 %243 }
 0x2e9   :  { %v245_v6 = vsel %vm241_vm8, %v244_v0, %v235_v45  ;;  %v351_v0 = vld [vmem:[#allocation2 + $0xe] ss:$0 sm:$0xff]  ;;  %vm117_vm8 = vmand %vm116_vm4, %vm49_vm1  ;;  %vm455_vm4 = vcmp.eq.s32.totalorder %v851_v2, 20 }
 0x2ea   :  { %v252_v7 = vmul.f32 %v248_v1, %v245_v6  ;;  %v118_v18 = vsel %vm117_vm8, %v40_v57, 0.0 }
 0x2ec   :  { %253 = vadd.xlane.f32.xlu0 %v252_v7 }
 0x35f   :  { %v254_v10 = vpop.xlane.xlu0 %253 }
 0x360   :  { %v255_v12 = vsel %vm251_vm9, %v254_v10, %v245_v6 }
 0x361   :  { %v262_v13 = vmul.f32 %v258_v11, %v255_v12 }
 0x363   :  { %263 = vadd.xlane.f32.xlu2 %v262_v13 }
 0x3d6   :  { %v264_v14 = vpop.xlane.xlu2 %263 }
 0x3d7   :  { %v265_v15 = vsel %vm261_vm10, %v264_v14, %v255_v12 }
 0x3d8   :  { %v272_v17 = vmul.f32 %v268_v4, %v265_v15  ;;  %v352_v4 = vxor.u32 2147483648, %v351_v0 }
 0x3da   :  { %273 = vadd.xlane.f32.xlu0 %v272_v17 }
 0x3e2   :  { %291 = vadd.xlane.f32.xlu0 %v290_v22 }
 0x44d   :  { %v274_v23 = vpop.xlane.xlu0 %273 }
 0x44e   :  { %v275_v24 = vsel %vm271_vm11, %v274_v23, %v265_v15  ;;  %vm355_vm11 = vcmp.eq.s32.totalorder %v851_v2, 14 }
 0x44f   :  { %v286_v25 = vmul.f32 %v282_v20, %v275_v24 }
 0x451   :  { %287 = vadd.xlane.f32.xlu2 %v286_v25  ;;  %v365_v25 = vld [vmem:[#allocation2 + $0xf] ss:$0 sm:$0xff] }
 0x455   :  { %v292_v27 = vpop.xlane.xlu0 %291 }
 0x456   :  { %v293_v29 = vsel %vm285_vm12, %v292_v27, %v279_v21  ;;  %v366_v27 = vxor.u32 2147483648, %v365_v25 }
 0x457   :  { %v304_v30 = vmul.f32 %v296_v28, %v293_v29 }
 0x459   :  { %305 = vadd.xlane.f32.xlu2 %v304_v30 }
 0x4c4   :  { %v288_v31 = vpop.xlane.xlu2 %287 }
 0x4c5   :  { %v289_v32 = vsel %vm285_vm12, %v288_v31, %v275_v24  ;;  %vm187_vm12 = vcmp.eq.s32.totalorder %v851_v2, %v110_v56 }
 0x4c6   :  { %v300_v33 = vmul.f32 %v296_v28, %v289_v32 }
 0x4c8   :  { %301 = vadd.xlane.f32.xlu1 %v300_v33 }
 0x4cc   :  { %v306_v35 = vpop.xlane.xlu2 %305 }
 0x4cd   :  { %v307_v37 = vsel %vm299_vm13, %v306_v35, %v293_v29 }
 0x4ce   :  { %v318_v38 = vmul.f32 %v310_v36, %v307_v37 }
 0x4d0   :  { %319 = vadd.xlane.f32.xlu1 %v318_v38 }
 0x53b   :  { %v302_v39 = vpop.xlane.xlu1 %301 }
 0x53c   :  { %v303_v40 = vsel %vm299_vm13, %v302_v39, %v289_v32  ;;  %v188_v32 = vsel %vm187_vm12, -1.0, %v837_v61  ;;  %vm369_vm13 = vcmp.eq.s32.totalorder %v851_v2, 15 }
 0x53d   :  { %v314_v41 = vmul.f32 %v310_v36, %v303_v40 }
 0x53f   :  { %315 = vadd.xlane.f32.xlu0 %v314_v41 }
 0x543   :  { %v320_v43 = vpop.xlane.xlu1 %319 }
 0x544   :  { %v321_v45 = vsel %vm313_vm14, %v320_v43, %v307_v37 }
 0x545   :  { %v332_v46 = vmul.f32 %v324_v44, %v321_v45 }
 0x547   :  { %333 = vadd.xlane.f32.xlu0 %v332_v46 }
 0x5b2   :  { %v316_v48 = vpop.xlane.xlu0 %315 }
 0x5b3   :  { %v317_v49 = vsel %vm313_vm14, %v316_v48, %v303_v40  ;;  %vm383_vm14 = vcmp.eq.s32.totalorder %v851_v2, 16 }
 0x5b4   :  { %v328_v50 = vmul.f32 %v324_v44, %v317_v49 }
 0x5b6   :  { %329 = vadd.xlane.f32.xlu2 %v328_v50 }
 0x5ba   :  { %v334_v52 = vpop.xlane.xlu0 %333 }
 0x5bb   :  { %v335_v54 = vsel %vm327_vm15, %v334_v52, %v321_v45 }
 0x5bc   :  { %v346_v55 = vmul.f32 %v338_v53, %v335_v54 }
 0x5be   :  { %347 = vadd.xlane.f32.xlu2 %v346_v55 }
 0x5c6   :  { %114 = vadd.xlane.f32.xlu2 %v113_v59 }
 0x629   :  { %v330_v60 = vpop.xlane.xlu2 %329 }
 0x62a   :  { %v331_v62 = vsel %vm327_vm15, %v330_v60, %v317_v49  ;;  %vm401_vm15 = vcmp.eq.s32.totalorder %v851_v2, 17 }
 0x62b   :  { %v342_v63 = vmul.f32 %v338_v53, %v331_v62 }
 0x62d   :  { %343 = vadd.xlane.f32.xlu1 %v342_v63 }
 0x631   :  { %v348_v1 = vpop.xlane.xlu2 %347 }
 0x632   :  { %v349_v6 = vsel %vm341_vm3, %v348_v1, %v335_v54 }
 0x633   :  { %v360_v7 = vmul.f32 %v352_v4, %v349_v6 }
 0x635   :  { %361 = vadd.xlane.f32.xlu1 %v360_v7 }
 0x639   :  { %v919_v8 = vpop.xlane.xlu2 %114 }
 0x63a   :  { %832 = vrcp.f32 %v919_v8  ;;  %v130_v11 = vand.u32 2147483648, %v919_v8  ;;  %vm124_vm6 = vweird.f32 %v919_v8  ;;  %v128_v13 = vand.u32 2147483647, %v919_v8 }
 0x63c   :  { %v131_v15 = vor.u32 1.1754944e-38, %v130_v11  ;;  %vm129_vm10 = vcmp.eq.f32.partialorder %v128_v13, 8.507059e+37 }
 0x640   :  { %v833_v9 = vpop.eup %832 }
 0x641   :  { %v120_v10 = vmul.f32 %v833_v9, %v919_v8  ;;  %vm125_vm7 = vweird.f32 %v833_v9 }
 0x642   :  { %vm126_vm9 = vmor %vm124_vm6, %vm125_vm7  ;;  %vm473_vm7 = vcmp.eq.s32.totalorder %v851_v2, 21 }
 0x643   :  { %v121_v12 = vsub.f32 1.0, %v120_v10 }
 0x645   :  { %v122_v14 = vmul.f32 %v833_v9, %v121_v12 }
 0x647   :  { %v123_v17 = vadd.f32 %v833_v9, %v122_v14 }
 0x649   :  { %v127_v19 = vsel %vm126_vm9, %v833_v9, %v123_v17  ;;  %vm491_vm9 = vcmp.eq.s32.totalorder %v851_v2, 22 }
 0x64a   :  { %v931_v20 = vsel %vm129_vm10, %v131_v15, %v127_v19 }
 0x64b   :  { %v133_v21 = vmul.f32 %v931_v20, %v118_v18 }
 0x64d   :  { %134 = vst [vmem:[#allocation2 + $0x10] sm:$0xff] %v133_v21 }
 0x654   :  { %v379_v29 = vld [vmem:[#allocation2 + $0x10] ss:$0 sm:$0xff]  ;;  %v397_v40 = vld [vmem:[#allocation2 + $0x11] ss:$0 sm:$0xff]  ;;  %v415_v52 = vld [vmem:[#allocation2 + $0x12] ss:$0 sm:$0xff] }
 0x655   :  { %v380_v31 = vxor.u32 2147483648, %v379_v29  ;;  %v398_v41 = vxor.u32 2147483648, %v397_v40  ;;  %v416_v54 = vxor.u32 2147483648, %v415_v52  ;;  %v433_v1 = vld [vmem:[#allocation2 + $0x13] ss:$0 sm:$0xff] }
 0x656   :  { %v451_v17 = vld [vmem:[#allocation2 + $0x14] ss:$0 sm:$0xff]  ;;  %v469_v29 = vld [vmem:[#allocation2 + $0x15] ss:$0 sm:$0xff]  ;;  %v487_v40 = vld [vmem:[#allocation2 + $0x16] ss:$0 sm:$0xff] }
 0x657   :  { %v392_v33 = vmul.f32 %v380_v31, %v188_v32  ;;  %v452_v19 = vxor.u32 2147483648, %v451_v17 }
 0x6a0   :  { %v344_v22 = vpop.xlane.xlu1 %343 }
 0x6a1   :  { %v345_v23 = vsel %vm341_vm3, %v344_v22, %v331_v62  ;;  %vm437_vm3 = vcmp.eq.s32.totalorder %v851_v2, 19 }
 0x6a2   :  { %v356_v24 = vmul.f32 %v352_v4, %v345_v23 }
 0x6a4   :  { %357 = vadd.xlane.f32.xlu0 %v356_v24 }
 0x6a8   :  { %v362_v26 = vpop.xlane.xlu1 %361 }
 0x6a9   :  { %v363_v28 = vsel %vm355_vm11, %v362_v26, %v349_v6  ;;  %v434_v6 = vxor.u32 2147483648, %v433_v1 }
 0x6aa   :  { %v374_v30 = vmul.f32 %v366_v27, %v363_v28 }
 0x6ac   :  { %375 = vadd.xlane.f32.xlu1 %v374_v30 }
 0x6b4   :  { %393 = vadd.xlane.f32.xlu1 %v392_v33 }
 0x717   :  { %v358_v34 = vpop.xlane.xlu0 %357 }
 0x718   :  { %v359_v35 = vsel %vm355_vm11, %v358_v34, %v345_v23 }
 0x719   :  { %v370_v36 = vmul.f32 %v366_v27, %v359_v35 }
 0x71b   :  { %371 = vadd.xlane.f32.xlu0 %v370_v36 }
 0x71f   :  { %v376_v37 = vpop.xlane.xlu1 %375 }
 0x720   :  { %v377_v38 = vsel %vm369_vm13, %v376_v37, %v363_v28 }
 0x721   :  { %v388_v39 = vmul.f32 %v380_v31, %v377_v38 }
 0x723   :  { %389 = vadd.xlane.f32.xlu0 %v388_v39 }
 0x727   :  { %v394_v42 = vpop.xlane.xlu1 %393 }
 0x728   :  { %v395_v43 = vsel %vm383_vm14, %v394_v42, %v188_v32  ;;  %v488_v42 = vxor.u32 2147483648, %v487_v40 }
 0x729   :  { %v410_v44 = vmul.f32 %v398_v41, %v395_v43 }
 0x72b   :  { %411 = vadd.xlane.f32.xlu1 %v410_v44 }
 0x78e   :  { %v372_v45 = vpop.xlane.xlu0 %371 }
 0x78f   :  { %v373_v46 = vsel %vm369_vm13, %v372_v45, %v359_v35 }
 0x790   :  { %v384_v48 = vmul.f32 %v380_v31, %v373_v46  ;;  %v470_v31 = vxor.u32 2147483648, %v469_v29 }
 0x792   :  { %385 = vadd.xlane.f32.xlu2 %v384_v48 }
 0x796   :  { %v390_v49 = vpop.xlane.xlu0 %389 }
 0x797   :  { %v391_v50 = vsel %vm383_vm14, %v390_v49, %v377_v38 }
 0x798   :  { %v406_v51 = vmul.f32 %v398_v41, %v391_v50 }
 0x79a   :  { %407 = vadd.xlane.f32.xlu0 %v406_v51 }
 0x79e   :  { %v412_v53 = vpop.xlane.xlu1 %411 }
 0x79f   :  { %v413_v55 = vsel %vm401_vm15, %v412_v53, %v395_v43 }
 0x7a0   :  { %v428_v56 = vmul.f32 %v416_v54, %v413_v55 }
 0x7a2   :  { %429 = vadd.xlane.f32.xlu1 %v428_v56  ;;  %v505_v56 = vld [vmem:[#allocation2 + $0x17] ss:$0 sm:$0xff] }
 0x805   :  { %v386_v57 = vpop.xlane.xlu2 %385 }
 0x806   :  { %v387_v59 = vsel %vm383_vm14, %v386_v57, %v373_v46  ;;  %v42_v57 = vld [vmem:[%s1040_s0 + $0x18] sm:$0xff] }
 0x807   :  { %v402_v60 = vmul.f32 %v398_v41, %v387_v59 }
 0x809   :  { %403 = vadd.xlane.f32.xlu2 %v402_v60  ;;  %v506_v60 = vxor.u32 2147483648, %v505_v56 }
 0x80d   :  { %v408_v62 = vpop.xlane.xlu0 %407 }
 0x80e   :  { %v409_v63 = vsel %vm401_vm15, %v408_v62, %v391_v50 }
 0x80f   :  { %v424_v0 = vmul.f32 %v416_v54, %v409_v63 }
 0x811   :  { %425 = vadd.xlane.f32.xlu0 %v424_v0 }
 0x815   :  { %v430_v4 = vpop.xlane.xlu1 %429 }
 0x816   :  { %v431_v7 = vsel %vm419_vm2, %v430_v4, %v413_v55  ;;  %v139_v55 = vadd.s32 24, %v853_v3 }
 0x817   :  { %v446_v9 = vmul.f32 %v434_v6, %v431_v7 }
 0x818   :  { %vm140_vm8 = vcmp.eq.s32.totalorder %v139_v55, %v851_v2  ;;  %vm145_vm10 = vcmp.ge.s32.totalorder %v139_v55, %v851_v2 }
 0x819   :  { %447 = vadd.xlane.f32.xlu1 %v446_v9  ;;  %vm146_vm13 = vmand %vm145_vm10, %vm49_vm1  ;;  %vm194_vm1 = vcmp.eq.s32.totalorder %v851_v2, %v139_v55  ;;  %vm637_vm10 = vcmp.eq.s32.totalorder %v851_v2, 29 }
 0x87c   :  { %v404_v10 = vpop.xlane.xlu2 %403 }
 0x87d   :  { %v405_v11 = vsel %vm401_vm15, %v404_v10, %v387_v59 }
 0x87e   :  { %v420_v12 = vmul.f32 %v416_v54, %v405_v11 }
 0x880   :  { %421 = vadd.xlane.f32.xlu2 %v420_v12 }
 0x884   :  { %v426_v13 = vpop.xlane.xlu0 %425 }
 0x885   :  { %v427_v14 = vsel %vm419_vm2, %v426_v13, %v409_v63  ;;  %v142_v63 = vsel %vm140_vm8, %v42_v57, 0.0  ;;  %vm593_vm8 = vcmp.eq.s32.totalorder %v851_v2, 27 }
 0x886   :  { %v442_v15 = vmul.f32 %v434_v6, %v427_v14 }
 0x888   :  { %443 = vadd.xlane.f32.xlu0 %v442_v15 }
 0x88c   :  { %v448_v18 = vpop.xlane.xlu1 %447 }
 0x88d   :  { %v449_v21 = vsel %vm437_vm3, %v448_v18, %v431_v7 }
 0x88e   :  { %v464_v22 = vmul.f32 %v452_v19, %v449_v21 }
 0x890   :  { %465 = vadd.xlane.f32.xlu1 %v464_v22 }
 0x8f3   :  { %v422_v23 = vpop.xlane.xlu2 %421 }
 0x8f4   :  { %v423_v24 = vsel %vm419_vm2, %v422_v23, %v405_v11  ;;  %vm509_vm2 = vcmp.eq.s32.totalorder %v851_v2, 23 }
 0x8f5   :  { %v438_v25 = vmul.f32 %v434_v6, %v423_v24 }
 0x8f7   :  { %439 = vadd.xlane.f32.xlu2 %v438_v25 }
 0x8fb   :  { %v444_v26 = vpop.xlane.xlu0 %443 }
 0x8fc   :  { %v445_v27 = vsel %vm437_vm3, %v444_v26, %v427_v14 }
 0x8fd   :  { %v460_v28 = vmul.f32 %v452_v19, %v445_v27 }
 0x8ff   :  { %461 = vadd.xlane.f32.xlu0 %v460_v28 }
 0x903   :  { %v466_v30 = vpop.xlane.xlu1 %465 }
 0x904   :  { %v467_v32 = vsel %vm455_vm4, %v466_v30, %v449_v21  ;;  %v147_v21 = vsel %vm146_vm13, %v42_v57, 0.0  ;;  %vm681_vm13 = vcmp.eq.s32.totalorder %v851_v2, 31 }
 0x905   :  { %v482_v33 = vmul.f32 %v470_v31, %v467_v32 }
 0x907   :  { %483 = vadd.xlane.f32.xlu1 %v482_v33 }
 0x96a   :  { %v440_v34 = vpop.xlane.xlu2 %439 }
 0x96b   :  { %v441_v35 = vsel %vm437_vm3, %v440_v34, %v423_v24  ;;  %vm527_vm3 = vcmp.eq.s32.totalorder %v851_v2, 24 }
 0x96c   :  { %v456_v36 = vmul.f32 %v452_v19, %v441_v35 }
 0x96e   :  { %457 = vadd.xlane.f32.xlu2 %v456_v36  ;;  %v195_v36 = vsel %vm194_vm1, -1.0, %v837_v61 }
 0x972   :  { %v462_v37 = vpop.xlane.xlu0 %461 }
 0x973   :  { %v463_v38 = vsel %vm455_vm4, %v462_v37, %v445_v27 }
 0x974   :  { %v478_v39 = vmul.f32 %v470_v31, %v463_v38 }
 0x976   :  { %479 = vadd.xlane.f32.xlu0 %v478_v39 }
 0x97a   :  { %v484_v41 = vpop.xlane.xlu1 %483 }
 0x97b   :  { %v485_v43 = vsel %vm473_vm7, %v484_v41, %v467_v32 }
 0x97c   :  { %v500_v44 = vmul.f32 %v488_v42, %v485_v43 }
 0x97e   :  { %501 = vadd.xlane.f32.xlu1 %v500_v44 }
 0x9e1   :  { %v458_v45 = vpop.xlane.xlu2 %457 }
 0x9e2   :  { %v459_v46 = vsel %vm455_vm4, %v458_v45, %v441_v35  ;;  %vm549_vm4 = vcmp.eq.s32.totalorder %v851_v2, 25 }
 0x9e3   :  { %v474_v48 = vmul.f32 %v470_v31, %v459_v46 }
 0x9e5   :  { %475 = vadd.xlane.f32.xlu2 %v474_v48 }
 0x9e9   :  { %v480_v49 = vpop.xlane.xlu0 %479 }
 0x9ea   :  { %v481_v50 = vsel %vm473_vm7, %v480_v49, %v463_v38 }
 0x9eb   :  { %v496_v51 = vmul.f32 %v488_v42, %v481_v50 }
 0x9ed   :  { %497 = vadd.xlane.f32.xlu0 %v496_v51 }
 0x9f1   :  { %v502_v1 = vpop.xlane.xlu1 %501 }
 0x9f2   :  { %v503_v4 = vsel %vm491_vm9, %v502_v1, %v485_v43 }
 0x9f3   :  { %v518_v3 = vmul.f32 %v506_v60, %v503_v4 }
 0xa58   :  { %v476_v52 = vpop.xlane.xlu2 %475 }
 0xa59   :  { %v477_v53 = vsel %vm473_vm7, %v476_v52, %v459_v46  ;;  %vm571_vm7 = vcmp.eq.s32.totalorder %v851_v2, 26 }
 0xa5a   :  { %v492_v54 = vmul.f32 %v488_v42, %v477_v53 }
 0xa5c   :  { %493 = vadd.xlane.f32.xlu2 %v492_v54 }
 0xa60   :  { %v498_v59 = vpop.xlane.xlu0 %497 }
 0xa61   :  { %v499_v62 = vsel %vm491_vm9, %v498_v59, %v481_v50 }
 0xa62   :  { %v514_v0 = vmul.f32 %v506_v60, %v499_v62 }
 0xa64   :  { %143 = vadd.xlane.f32.xlu2 %v142_v63  ;;  %515 = vadd.xlane.f32.xlu1 %v514_v0 }
 0xa6c   :  { %519 = vadd.xlane.f32.xlu2 %v518_v3 }
 0xacf   :  { %v494_v6 = vpop.xlane.xlu2 %493 }
 0xad0   :  { %v495_v7 = vsel %vm491_vm9, %v494_v6, %v477_v53  ;;  %vm615_vm9 = vcmp.eq.s32.totalorder %v851_v2, 28 }
 0xad1   :  { %v510_v9 = vmul.f32 %v506_v60, %v495_v7 }
 0xad3   :  { %511 = vadd.xlane.f32.xlu0 %v510_v9 }
 0xad7   :  { %v982_v10 = vpop.xlane.xlu2 %143  ;;  %v516_v25 = vpop.xlane.xlu1 %515 }
 0xad8   :  { %834 = vrcp.f32 %v982_v10  ;;  %v159_v13 = vand.u32 2147483648, %v982_v10  ;;  %vm153_vm11 = vweird.f32 %v982_v10  ;;  %v157_v15 = vand.u32 2147483647, %v982_v10 }
 0xad9   :  { %v517_v29 = vsel %vm509_vm2, %v516_v25, %v499_v62 }
 0xada   :  { %v160_v18 = vor.u32 1.1754944e-38, %v159_v13  ;;  %vm158_vm15 = vcmp.eq.f32.partialorder %v157_v15, 8.507059e+37 }
 0xade   :  { %v835_v11 = vpop.eup %834 }
 0xadf   :  { %v149_v12 = vmul.f32 %v835_v11, %v982_v10  ;;  %vm154_vm12 = vweird.f32 %v835_v11  ;;  %v520_v26 = vpop.xlane.xlu2 %519 }
 0xae0   :  { %vm155_vm14 = vmor %vm153_vm11, %vm154_vm12  ;;  %v521_v30 = vsel %vm509_vm2, %v520_v26, %v503_v4  ;;  %vm659_vm12 = vcmp.eq.s32.totalorder %v851_v2, 30 }
 0xae1   :  { %v150_v14 = vsub.f32 1.0, %v149_v12 }
 0xae3   :  { %v151_v17 = vmul.f32 %v835_v11, %v150_v14 }
 0xae5   :  { %v152_v19 = vadd.f32 %v835_v11, %v151_v17 }
 0xae7   :  { %v156_v22 = vsel %vm155_vm14, %v835_v11, %v152_v19 }
 0xae8   :  { %v994_v23 = vsel %vm158_vm15, %v160_v18, %v156_v22 }
 0xae9   :  { %v162_v24 = vmul.f32 %v994_v23, %v147_v21 }
 0xaeb   :  { %163 = vst [vmem:[#allocation2 + $0x18] sm:$0xff] %v162_v24 }
 0xaf2   :  { %v523_v27 = vld [vmem:[#allocation2 + $0x18] ss:$0 sm:$0xff]  ;;  %v545_v38 = vld [vmem:[#allocation2 + $0x19] ss:$0 sm:$0xff]  ;;  %v567_v52 = vld [vmem:[#allocation2 + $0x1a] ss:$0 sm:$0xff] }
 0xaf3   :  { %v524_v28 = vxor.u32 2147483648, %v523_v27  ;;  %v546_v41 = vxor.u32 2147483648, %v545_v38  ;;  %v568_v55 = vxor.u32 2147483648, %v567_v52  ;;  %v589_v6 = vld [vmem:[#allocation2 + $0x1b] ss:$0 sm:$0xff] }
 0xaf4   :  { %v590_v11 = vxor.u32 2147483648, %v589_v6  ;;  %v611_v25 = vld [vmem:[#allocation2 + $0x1c] ss:$0 sm:$0xff] }
 0xaf5   :  { %v536_v31 = vmul.f32 %v524_v28, %v521_v30  ;;  %v532_v32 = vmul.f32 %v524_v28, %v517_v29  ;;  %v540_v37 = vmul.f32 %v524_v28, %v195_v36 }
 0xaf7   :  { %537 = vadd.xlane.f32.xlu2 %v536_v31  ;;  %533 = vadd.xlane.f32.xlu1 %v532_v32 }
 0xb46   :  { %v512_v33 = vpop.xlane.xlu0 %511 }
 0xb47   :  { %v513_v34 = vsel %vm509_vm2, %v512_v33, %v495_v7 }
 0xb48   :  { %v528_v35 = vmul.f32 %v524_v28, %v513_v34  ;;  %v612_v28 = vxor.u32 2147483648, %v611_v25 }
 0xb4a   :  { %529 = vadd.xlane.f32.xlu0 %v528_v35 }
 0xb52   :  { %541 = vadd.xlane.f32.xlu0 %v540_v37 }
 0xb6a   :  { %v538_v39 = vpop.xlane.xlu2 %537  ;;  %v534_v40 = vpop.xlane.xlu1 %533 }
 0xb6b   :  { %v539_v42 = vsel %vm527_vm3, %v538_v39, %v521_v30  ;;  %v535_v43 = vsel %vm527_vm3, %v534_v40, %v517_v29  ;;  %v633_v39 = vld [vmem:[#allocation2 + $0x1d] ss:$0 sm:$0xff] }
 0xb6c   :  { %v554_v44 = vmul.f32 %v546_v41, %v535_v43  ;;  %v558_v45 = vmul.f32 %v546_v41, %v539_v42 }
 0xb6e   :  { %555 = vadd.xlane.f32.xlu2 %v554_v44  ;;  %559 = vadd.xlane.f32.xlu0 %v558_v45 }
 0xbbd   :  { %v530_v46 = vpop.xlane.xlu0 %529 }
 0xbbe   :  { %v531_v48 = vsel %vm527_vm3, %v530_v46, %v513_v34 }
 0xbbf   :  { %v550_v49 = vmul.f32 %v546_v41, %v531_v48 }
 0xbc1   :  { %551 = vadd.xlane.f32.xlu1 %v550_v49 }
 0xbc5   :  { %v542_v50 = vpop.xlane.xlu0 %541 }
 0xbc6   :  { %v543_v61 = vsel %vm527_vm3, %v542_v50, %v195_v36 }
 0xbc7   :  { %v562_v51 = vmul.f32 %v546_v41, %v543_v61 }
 0xbc9   :  { %563 = vadd.xlane.f32.xlu1 %v562_v51 }
 0xbe1   :  { %v556_v53 = vpop.xlane.xlu2 %555  ;;  %v560_v54 = vpop.xlane.xlu0 %559 }
 0xbe2   :  { %v557_v56 = vsel %vm549_vm4, %v556_v53, %v535_v43  ;;  %v561_v57 = vsel %vm549_vm4, %v560_v54, %v539_v42  ;;  %v634_v42 = vxor.u32 2147483648, %v633_v39  ;;  %v655_v53 = vld [vmem:[#allocation2 + $0x1e] ss:$0 sm:$0xff] }
 0xbe3   :  { %v576_v59 = vmul.f32 %v568_v55, %v557_v56  ;;  %v580_v60 = vmul.f32 %v568_v55, %v561_v57 }
 0xbe5   :  { %577 = vadd.xlane.f32.xlu0 %v576_v59  ;;  %581 = vadd.xlane.f32.xlu1 %v580_v60 }
 0xc34   :  { %v552_v62 = vpop.xlane.xlu1 %551 }
 0xc35   :  { %v553_v63 = vsel %vm549_vm4, %v552_v62, %v531_v48 }
 0xc36   :  { %v572_v0 = vmul.f32 %v568_v55, %v553_v63 }
 0xc38   :  { %573 = vadd.xlane.f32.xlu2 %v572_v0 }
 0xc3c   :  { %v564_v1 = vpop.xlane.xlu1 %563 }
 0xc3d   :  { %v565_v4 = vsel %vm549_vm4, %v564_v1, %v543_v61 }
 0xc3e   :  { %v584_v3 = vmul.f32 %v568_v55, %v565_v4 }
 0xc40   :  { %585 = vadd.xlane.f32.xlu2 %v584_v3 }
 0xc58   :  { %v582_v7 = vpop.xlane.xlu1 %581  ;;  %v578_v9 = vpop.xlane.xlu0 %577 }
 0xc59   :  { %v583_v12 = vsel %vm571_vm7, %v582_v7, %v561_v57  ;;  %v579_v13 = vsel %vm571_vm7, %v578_v9, %v557_v56  ;;  %v656_v56 = vxor.u32 2147483648, %v655_v53  ;;  %v677_v7 = vld [vmem:[#allocation2 + $0x1f] ss:$0 sm:$0xff] }
 0xc5a   :  { %v602_v14 = vmul.f32 %v590_v11, %v583_v12  ;;  %v598_v15 = vmul.f32 %v590_v11, %v579_v13 }
 0xc5c   :  { %603 = vadd.xlane.f32.xlu2 %v602_v14  ;;  %599 = vadd.xlane.f32.xlu1 %v598_v15 }
 0xcab   :  { %v574_v17 = vpop.xlane.xlu2 %573 }
 0xcac   :  { %v575_v18 = vsel %vm571_vm7, %v574_v17, %v553_v63 }
 0xcad   :  { %v594_v19 = vmul.f32 %v590_v11, %v575_v18 }
 0xcaf   :  { %595 = vadd.xlane.f32.xlu0 %v594_v19 }
 0xcb3   :  { %v586_v21 = vpop.xlane.xlu2 %585 }
 0xcb4   :  { %v587_v22 = vsel %vm571_vm7, %v586_v21, %v565_v4 }
 0xcb5   :  { %v606_v24 = vmul.f32 %v590_v11, %v587_v22 }
 0xcb7   :  { %607 = vadd.xlane.f32.xlu0 %v606_v24 }
 0xccf   :  { %v604_v26 = vpop.xlane.xlu2 %603  ;;  %v600_v27 = vpop.xlane.xlu1 %599 }
 0xcd0   :  { %v605_v29 = vsel %vm593_vm8, %v604_v26, %v583_v12  ;;  %v601_v30 = vsel %vm593_vm8, %v600_v27, %v579_v13  ;;  %v678_v12 = vxor.u32 2147483648, %v677_v7 }
 0xcd1   :  { %v624_v31 = vmul.f32 %v612_v28, %v605_v29  ;;  %v620_v32 = vmul.f32 %v612_v28, %v601_v30 }
 0xcd3   :  { %625 = vadd.xlane.f32.xlu0 %v624_v31  ;;  %621 = vadd.xlane.f32.xlu2 %v620_v32 }
 0xd22   :  { %v596_v33 = vpop.xlane.xlu0 %595 }
 0xd23   :  { %v597_v34 = vsel %vm593_vm8, %v596_v33, %v575_v18 }
 0xd24   :  { %v616_v35 = vmul.f32 %v612_v28, %v597_v34 }
 0xd26   :  { %617 = vadd.xlane.f32.xlu1 %v616_v35 }
 0xd2a   :  { %v608_v36 = vpop.xlane.xlu0 %607 }
 0xd2b   :  { %v609_v37 = vsel %vm593_vm8, %v608_v36, %v587_v22 }
 0xd2c   :  { %v628_v38 = vmul.f32 %v612_v28, %v609_v37 }
 0xd2e   :  { %629 = vadd.xlane.f32.xlu1 %v628_v38 }
 0xd46   :  { %v622_v40 = vpop.xlane.xlu2 %621  ;;  %v626_v41 = vpop.xlane.xlu0 %625 }
 0xd47   :  { %v623_v43 = vsel %vm615_vm9, %v622_v40, %v601_v30  ;;  %v627_v44 = vsel %vm615_vm9, %v626_v41, %v605_v29 }
 0xd48   :  { %v642_v45 = vmul.f32 %v634_v42, %v623_v43  ;;  %v646_v46 = vmul.f32 %v634_v42, %v627_v44 }
 0xd4a   :  { %643 = vadd.xlane.f32.xlu0 %v642_v45  ;;  %647 = vadd.xlane.f32.xlu1 %v646_v46 }
 0xd99   :  { %v618_v48 = vpop.xlane.xlu1 %617 }
 0xd9a   :  { %v619_v49 = vsel %vm615_vm9, %v618_v48, %v597_v34 }
 0xd9b   :  { %v638_v50 = vmul.f32 %v634_v42, %v619_v49 }
 0xd9d   :  { %639 = vadd.xlane.f32.xlu2 %v638_v50 }
 0xda1   :  { %v630_v61 = vpop.xlane.xlu1 %629 }
 0xda2   :  { %v631_v51 = vsel %vm615_vm9, %v630_v61, %v609_v37 }
 0xda3   :  { %v650_v52 = vmul.f32 %v634_v42, %v631_v51 }
 0xda5   :  { %651 = vadd.xlane.f32.xlu2 %v650_v52 }
 0xdbd   :  { %v648_v54 = vpop.xlane.xlu1 %647  ;;  %v644_v55 = vpop.xlane.xlu0 %643 }
 0xdbe   :  { %v649_v57 = vsel %vm637_vm10, %v648_v54, %v627_v44  ;;  %v645_v59 = vsel %vm637_vm10, %v644_v55, %v623_v43 }
 0xdbf   :  { %v668_v60 = vmul.f32 %v656_v56, %v649_v57  ;;  %v664_v62 = vmul.f32 %v656_v56, %v645_v59 }
 0xdc1   :  { %669 = vadd.xlane.f32.xlu2 %v668_v60  ;;  %665 = vadd.xlane.f32.xlu1 %v664_v62 }
 0xe10   :  { %v640_v63 = vpop.xlane.xlu2 %639 }
 0xe11   :  { %v641_v0 = vsel %vm637_vm10, %v640_v63, %v619_v49 }
 0xe12   :  { %v660_v1 = vmul.f32 %v656_v56, %v641_v0 }
 0xe14   :  { %661 = vadd.xlane.f32.xlu0 %v660_v1 }
 0xe18   :  { %v652_v4 = vpop.xlane.xlu2 %651 }
 0xe19   :  { %v653_v3 = vsel %vm637_vm10, %v652_v4, %v631_v51 }
 0xe1a   :  { %v672_v6 = vmul.f32 %v656_v56, %v653_v3 }
 0xe1c   :  { %673 = vadd.xlane.f32.xlu0 %v672_v6 }
 0xe34   :  { %v670_v9 = vpop.xlane.xlu2 %669  ;;  %v666_v11 = vpop.xlane.xlu1 %665 }
 0xe35   :  { %v671_v13 = vsel %vm659_vm12, %v670_v9, %v649_v57  ;;  %v667_v14 = vsel %vm659_vm12, %v666_v11, %v645_v59 }
 0xe36   :  { %v690_v15 = vmul.f32 %v678_v12, %v671_v13  ;;  %v686_v17 = vmul.f32 %v678_v12, %v667_v14 }
 0xe38   :  { %691 = vadd.xlane.f32.xlu0 %v690_v15  ;;  %687 = vadd.xlane.f32.xlu2 %v686_v17 }
 0xe87   :  { %v662_v18 = vpop.xlane.xlu0 %661 }
 0xe88   :  { %v663_v19 = vsel %vm659_vm12, %v662_v18, %v641_v0 }
 0xe89   :  { %v682_v21 = vmul.f32 %v678_v12, %v663_v19 }
 0xe8b   :  { %683 = vadd.xlane.f32.xlu1 %v682_v21 }
 0xe8f   :  { %v674_v22 = vpop.xlane.xlu0 %673 }
 0xe90   :  { %v675_v24 = vsel %vm659_vm12, %v674_v22, %v653_v3 }
 0xe91   :  { %v694_v25 = vmul.f32 %v678_v12, %v675_v24 }
 0xe93   :  { %695 = vadd.xlane.f32.xlu1 %v694_v25 }
 0xeab   :  { %v688_v26 = vpop.xlane.xlu2 %687  ;;  %v692_v27 = vpop.xlane.xlu0 %691 }
 0xeac   :  { %v689_v28 = vsel %vm681_vm13, %v688_v26, %v667_v14  ;;  %v693_v29 = vsel %vm681_vm13, %v692_v27, %v671_v13 }
 0xead   :  { %v730_v30 = vmul.f32 %v689_v28, %v898_v58  ;;  %v749_v31 = vmul.f32 %v693_v29, %v931_v20 }
 0xeaf   :  { %v732_v32 = vsel %vm95_vm0, %v689_v28, %v730_v30  ;;  %v751_v33 = vsel %vm124_vm6, %v693_v29, %v749_v31 }
 0xeb0   :  { %810 = vst [vmem:[%s1041_s1 + $0x8] sm:$0xff] %v732_v32 }
 0xeb1   :  { %812 = vst [vmem:[%s1041_s1 + $0x10] sm:$0xff] %v751_v33 }
 0xefe   :  { %v684_v34 = vpop.xlane.xlu1 %683 }
 0xeff   :  { %v685_v58 = vsel %vm681_vm13, %v684_v34, %v663_v19 }
 0xf00   :  { %v712_v20 = vmul.f32 %v685_v58, %v871_v16 }
 0xf02   :  { %v714_v47 = vsel %vm66_vm5, %v685_v58, %v712_v20 }
 0xf03   :  { %808 = vst [vmem:[%s1041_s1] sm:$0xff] %v714_v47 }
 0xf06   :  { %v696_v8 = vpop.xlane.xlu1 %695 }
 0xf07   :  { %v697_v35 = vsel %vm681_vm13, %v696_v8, %v675_v24 }
 0xf08   :  { %v768_v36 = vmul.f32 %v697_v35, %v994_v23 }
 0xf0a   :  { %v770_v37 = vsel %vm153_vm11, %v697_v35, %v768_v36 }
 0xf0b   :  { %814 = vst [vmem:[%s1041_s1 + $0x18] sm:$0xff] %v770_v37 }

// kernel: custom-call.25
= control target key start
LH: loop header
LB: loop body
LE: loop exit
PB: predicated region body
PF: predicated region fallthrough
CT: control target
= control target key end

     0   :  { %5 = vsyncpa [#allocation4], 0  ;;  %s888_s0 = inlined_call_operand.vmem [shape: f32[16,16], index: 0, kind: input, shape index: {}]   ;;  %s889_s1 = inlined_call_operand.vmem [shape: f32[16,16], index: 1, kind: output, shape index: {0}]   ;;  %s890_s2 = inlined_call_operand.hbm [shape: s32[16], index: 2, kind: output, shape index: {1}]   ;;  %s891_s3 = inlined_call_operand.vmem [shape: s32[16], index: 3, kind: output, shape index: {2}]  }
   0x1   :  { %s15_s14 = scalar_lea.vmem %s888_s0, 8 }
   0x2   :  { %p466_p0 = scmp.gt.s32.totalorder %s888_s0, %s15_s14 }
   0x3   :  { %s761_s17 = smov (!%p466_p0), [#allocation0]   ;;  %s765_s20 = smov (!%p466_p0), %s888_s0  }
   0x4   :  { %467 = sbr.rel (%p466_p0) target bundleno = 17 (0x11), region = 157 }
   0x9 LB: > { %v49_v0 = vld [vmem:[%s767_s20] sm:$0xff]  ;;  %s51_s20 = scalar_lea.vmem %s767_s20, 8   ;;  %s767_s20 = sphi %s765_s20, %s51_s20   ;;  %s763_s17 = sphi %s761_s17, %s52_s17  }
   0xa   : > { %50 = vst [vmem:[%s763_s17] sm:$0xff] %v49_v0  ;;  %s52_s17 = scalar_lea.vmem %s763_s17, 8   ;;  %p46_p1 = scmp.gt.s32.totalorder %s51_s20, %s15_s14 }
   0xc   :  { %48 = sbr.rel (!%p46_p1) target bundleno = 9 (0x9), region = 163 }
  0x11 PF:  { %v62_v1 = vld [vmem:[#allocation0] sm:$0xff]  ;;  %v66_v2 = vld [vmem:[#allocation0 + $0x8] sm:$0xff]  ;;  %v69_v3 = vlaneseq  ;;  %v785_v5 = vmov 0   ;;  %s769_s0 = smov 0  }
  0x12   :  { %63 = vst [vmem:[#allocation1] sm:$0xff] %v62_v1 }
  0x13   :  { %67 = vst [vmem:[#allocation1 + $0x8] sm:$0xff] %v66_v2  ;;  %v817_v4 = vshrl.u32 %v69_v3, 7 }
  0x14   :  { %68 = vst [vmem:[#allocation2] sm:$0x1] %v785_v5 }
  0x15 LB: > { %s524_s21 = sshll.u32 %s771_s0, 3  ;;  %s77_s0 = sadd.s32 1, %s771_s0   ;;  %s771_s0 = sphi %s769_s0, %s77_s0  }
  0x16   : > { %v81_v6 = vstv %s524_s21  ;;  %s79_s22 = scalar_lea.vmem [#allocation7], %s524_s21  ;;  %p74_p2 = scmp.ge.s32.totalorder %s77_s0, 2  }
  0x17   : > { %v82_v7 = vadd.s32 %v81_v6, %v817_v4  ;;  %s820_s23 = smov (%p74_p2), 0  }
  0x18   :  { %76 = sbr.rel (!%p74_p2) target bundleno = 21 (0x15), region = 174 }
  0x19   : > { %83 = vst [vmem:[%s79_s22] sm:$0xff] %v82_v7 }
  0x1d LB: > { %v94_v8 = vld [vmem:[#allocation1] sm:$0xff]  ;;  %v106_v9 = vld [vmem:[#allocation1 + $0x8] sm:$0xff]  ;;  %v826_v10 = vadd.s32 8, %v817_v4  ;;  %v829_v12 = vstv %s775_s23  ;;  %s152_s24 = ssub.s32 128, %s775_s23  ;;  %v840_v46 = vand.u32 127, %v69_v3  ;;  %s164_s26 = scalar_lea.vmem [#allocation1], %s775_s23  ;;  %s775_s23 = sphi %s820_s23, %s89_s23  }
  0x1e   : > { %v95_v11 = vand.u32 2147483647, %v94_v8  ;;  %v107_v13 = vand.u32 2147483647, %v106_v9  ;;  %vm98_vm0 = vcmp.ge.s32.totalorder %v817_v4, %v829_v12  ;;  %v161_v47 = vld [vmem:[#allocation2] ss:$0 sm:$0xff] }
  0x1f   : > { %vm110_vm3 = vcmp.ge.s32.totalorder %v826_v10, %v829_v12  ;;  %vm159_vm13 = vcmp.eq.s32.totalorder %v840_v46, %v829_v12  ;;  %v166_v48 = vld [vmem:[%s164_s26] ss:$0 sm:$0xff]  ;;  %s170_s28 = scalar_lea.vmem [#allocation7], %s775_s23  ;;  %vm218_vm15 = vcmp.gt.s32.totalorder %v826_v10, %v829_v12  ;;  %s89_s23 = sadd.s32 1, %s775_s23  }
  0x20   : > { %vm526_vm1 = vcmp.gt.f32.partialorder %v95_v11, -inf  ;;  %v172_v52 = vld [vmem:[%s170_s28] ss:$0 sm:$0xff]  ;;  %p86_p3 = scmp.ge.s32.totalorder %s89_s23, 16  }
  0x21   : > { %vm102_vm2 = vmand %vm98_vm0, %vm526_vm1  ;;  %vm190_vm0 = vcmp.gt.s32.totalorder %v817_v4, %v829_v12  ;;  %s777_s5 = smov (%p86_p3), %s889_s1   ;;  %s781_s6 = smov (%p86_p3), [#allocation1]  }
  0x22   : > { %v103_v14 = vsel %vm102_vm2, %v817_v4, %v829_v12  ;;  %v104_v15 = vsel %vm102_vm2, %v95_v11, -inf }
  0x23   : > { %vm113_vm4 = vcmp.lt.f32.partialorder %v104_v15, %v107_v13 }
  0x24   : > { %vm114_vm5 = vmand %vm110_vm3, %vm113_vm4 }
  0x25   : > { %v115_v16 = vsel %vm114_vm5, %v826_v10, %v103_v14  ;;  %v116_v17 = vsel %vm114_vm5, %v107_v13, %v104_v15 }
  0x26   : > { %v117_v18 = vrot.slane %v116_v17, 1  ;;  %v118_v19 = vrot.slane %v115_v16, 1 }
  0x28   : > { %vm119_vm6 = vcmp.ge.f32.partialorder %v117_v18, %v116_v17  ;;  %v122_v20 = vrot.slane %v117_v18, 1  ;;  %v123_v21 = vrot.slane %v118_v19, 1 }
  0x29   : > { %v120_v22 = vsel %vm119_vm6, %v117_v18, %v116_v17  ;;  %v121_v23 = vsel %vm119_vm6, %v118_v19, %v115_v16 }
  0x2a   : > { %vm124_vm7 = vcmp.ge.f32.partialorder %v122_v20, %v120_v22  ;;  %v127_v24 = vrot.slane %v122_v20, 1  ;;  %v128_v25 = vrot.slane %v123_v21, 1 }
  0x2b   : > { %v125_v26 = vsel %vm124_vm7, %v122_v20, %v120_v22  ;;  %v126_v27 = vsel %vm124_vm7, %v123_v21, %v121_v23 }
  0x2c   : > { %vm129_vm8 = vcmp.ge.f32.partialorder %v127_v24, %v125_v26  ;;  %v132_v28 = vrot.slane %v127_v24, 1  ;;  %v133_v29 = vrot.slane %v128_v25, 1 }
  0x2d   : > { %v130_v30 = vsel %vm129_vm8, %v127_v24, %v125_v26  ;;  %v131_v31 = vsel %vm129_vm8, %v128_v25, %v126_v27 }
  0x2e   : > { %vm134_vm9 = vcmp.ge.f32.partialorder %v132_v28, %v130_v30  ;;  %v137_v32 = vrot.slane %v132_v28, 1  ;;  %v138_v33 = vrot.slane %v133_v29, 1 }
  0x2f   : > { %v135_v34 = vsel %vm134_vm9, %v132_v28, %v130_v30  ;;  %v136_v35 = vsel %vm134_vm9, %v133_v29, %v131_v31  ;;  %vm235_vm9 = vmand %vm218_vm15, %vm159_vm13 }
  0x30   : > { %vm139_vm10 = vcmp.ge.f32.partialorder %v137_v32, %v135_v34  ;;  %v142_v36 = vrot.slane %v137_v32, 1  ;;  %v143_v37 = vrot.slane %v138_v33, 1 }
  0x31   : > { %v140_v38 = vsel %vm139_vm10, %v137_v32, %v135_v34  ;;  %v141_v39 = vsel %vm139_vm10, %v138_v33, %v136_v35 }
  0x32   : > { %vm144_vm11 = vcmp.ge.f32.partialorder %v142_v36, %v140_v38  ;;  %v147_v40 = vrot.slane %v142_v36, 1  ;;  %v148_v41 = vrot.slane %v143_v37, 1 }
  0x33   : > { %v145_v42 = vsel %vm144_vm11, %v142_v36, %v140_v38  ;;  %v146_v43 = vsel %vm144_vm11, %v143_v37, %v141_v39  ;;  %vm207_vm11 = vmand %vm190_vm0, %vm159_vm13 }
  0x34   : > { %vm149_vm12 = vcmp.ge.f32.partialorder %v147_v40, %v145_v42 }
  0x35   : > { %v151_v44 = vsel %vm149_vm12, %v148_v41, %v146_v43  ;;  %vm182_vm12 = vcmp.gt.s32.totalorder %v840_v46, %v829_v12 }
  0x36   : > { %153 = vrot.lane.b32.xlu0 %v151_v44, %s152_s24 }
  0xa8   : > { %v154_v45 = vpop.permute.xlu0 %153 }
  0xa9   : > { %534 = vpush %v154_v45 }
  0xda   : > { %s535_s25 = spop %534 }
  0xdb   : > { %v160_v49 = vstv %s535_s25  ;;  %s165_s27 = scalar_lea.vmem [#allocation1], %s535_s25  ;;  %s171_s29 = scalar_lea.vmem [#allocation7], %s535_s25 }
  0xdc   : > { %v162_v50 = vsel %vm159_vm13, %v160_v49, %v161_v47  ;;  %v167_v51 = vld [vmem:[%s165_s27] ss:$0 sm:$0xff] }
  0xdd   : > { %163 = vst [vmem:[#allocation2] sm:$0x1] %v162_v50  ;;  %v173_v53 = vld [vmem:[%s171_s29] ss:$0 sm:$0xff]  ;;  %vm176_vm14 = vcmp.ne.f32.partialorder %v167_v51, 0.0  ;;  %v183_v10 = vsel %vm182_vm12, %v167_v51, 0.0 }
  0xde   : > { %168 = vst [vmem:[%s165_s27] sm:$0x1] %v166_v48  ;;  %vm177_vm1 = vmand %vm159_vm13, %vm176_vm14 }
  0xdf   : > { %169 = vst [vmem:[%s164_s26] sm:$0x1] %v167_v51  ;;  %v178_v54 = vsel %vm177_vm1, %v167_v51, 1.0 }
  0xe0   : > { %174 = vst [vmem:[%s171_s29] sm:$0x1] %v172_v52  ;;  %v219_v55 = vsel %vm218_vm15, %v178_v54, 1.0  ;;  %v191_v56 = vsel %vm190_vm0, %v178_v54, 1.0 }
  0xe1   : > { %175 = vst [vmem:[%s170_s28] sm:$0x1] %v173_v53  ;;  %667 = vrcp.f32 %v219_v55  ;;  %v231_v62 = vand.u32 2147483648, %v219_v55  ;;  %v229_v1 = vand.u32 2147483647, %v219_v55  ;;  %v203_v2 = vand.u32 2147483648, %v191_v56 }
  0xe2   : > { %669 = vrcp.f32 %v191_v56  ;;  %v201_v6 = vand.u32 2147483647, %v191_v56  ;;  %vm225_vm4 = vweird.f32 %v219_v55  ;;  %vm197_vm6 = vweird.f32 %v191_v56 }
  0xe3   : > { %v232_v8 = vor.u32 1.1754944e-38, %v231_v62  ;;  %vm230_vm7 = vcmp.eq.f32.partialorder %v229_v1, 8.507059e+37  ;;  %v204_v13 = vor.u32 1.1754944e-38, %v203_v2 }
  0xe4   : > { %vm202_vm10 = vcmp.eq.f32.partialorder %v201_v6, 8.507059e+37  ;;  %v294_v12 = vld [vmem:[#allocation2] sm:$0x1] (%p86_p3) }
  0xe5   :  { %297 = vst [vmem:[#allocation3] sm:$0x1] (%p86_p3), %v294_v12 }
  0xe6   : > { %v215_v14 = vld [vmem:[#allocation1 + $0x8] sm:$0xff]  ;;  %v187_v18 = vld [vmem:[#allocation1] sm:$0xff] }
  0xe7   : > { %v668_v57 = vpop.eup %667 }
  0xe8   : > { %v670_v58 = vpop.eup %669  ;;  %v221_v59 = vmul.f32 %v668_v57, %v219_v55  ;;  %vm226_vm2 = vweird.f32 %v668_v57  ;;  %v242_v29 = vld [vmem:[#allocation7] sm:$0xff] (%p86_p3)  ;;  %v244_v30 = vld [vmem:[#allocation7 + $0x8] sm:$0xff] (%p86_p3) }
  0xe9   : > { %v193_v60 = vmul.f32 %v670_v58, %v191_v56  ;;  %vm198_vm3 = vweird.f32 %v670_v58  ;;  %vm227_vm5 = vmor %vm225_vm4, %vm226_vm2 }
  0xea   : > { %v222_v61 = vsub.f32 1.0, %v221_v59  ;;  %vm199_vm8 = vmor %vm197_vm6, %vm198_vm3 }
  0xeb   : > { %v194_v63 = vsub.f32 1.0, %v193_v60 }
  0xec   : > { %v223_v0 = vmul.f32 %v668_v57, %v222_v61 }
  0xed   : > { %v195_v5 = vmul.f32 %v670_v58, %v194_v63 }
  0xee   : > { %v224_v7 = vadd.f32 %v668_v57, %v223_v0 }
  0xef   : > { %v196_v9 = vadd.f32 %v670_v58, %v195_v5 }
  0xf0   : > { %v228_v11 = vsel %vm227_vm5, %v668_v57, %v224_v7 }
  0xf1   : > { %v233_v15 = vsel %vm230_vm7, %v232_v8, %v228_v11  ;;  %v200_v16 = vsel %vm199_vm8, %v670_v58, %v196_v9 }
  0xf2   : > { %v234_v17 = vmul.f32 %v233_v15, %v215_v14  ;;  %v205_v19 = vsel %vm202_vm10, %v204_v13, %v200_v16 }
  0xf3   : > { %v206_v20 = vmul.f32 %v205_v19, %v187_v18 }
  0xf4   : > { %v236_v21 = vsel %vm235_vm9, %v234_v17, 0.0 }
  0xf5   : > { %237 = vadd.xlane.f32.xlu1 %v236_v21  ;;  %v208_v22 = vsel %vm207_vm11, %v206_v20, 0.0 }
  0xf6   : > { %209 = vadd.xlane.f32.xlu0 %v208_v22 }
 0x11f   :  { %259 = vxpose.xlu0.b32.start [1/2] (short) (narrow) (%p86_p3), %v242_v29, 8 }
 0x127   :  { %260 = vxpose.xlu0.b32.end [2/2] (short) (narrow) (%p86_p3), %v244_v30, 8 }
 0x168   : > { %v238_v23 = vpop.xlane.xlu1 %237 }
 0x169   : > { %v239_v24 = vmul.f32 %v238_v23, %v183_v10  ;;  %v210_v25 = vpop.xlane.xlu0 %209 }
 0x16a   : > { %v211_v26 = vmul.f32 %v210_v25, %v183_v10  ;;  %88 = sbr.rel (!%p86_p3) target bundleno = 29 (0x1d), region = 185 }
 0x16b   : > { %v240_v27 = vsub.f32 %v234_v17, %v239_v24 }
 0x16c   : > { %v212_v28 = vsub.f32 %v206_v20, %v211_v26 }
 0x16d   : > { %241 = vst [vmem:[#allocation1 + $0x8] sm:$0xff] %v240_v27 }
 0x16e   : > { %213 = vst [vmem:[#allocation1] sm:$0xff] %v212_v28 }
 0x1c3   :  { %v275_v31 = vpop.trf.xlu0 }
 0x1c4   :  { %291 = vst [vmem:[#allocation5] sm:$0x1] %v275_v31 }
 0x1cb   :  { %v300_v32 = vld [vmem:[#allocation5] sm:$0x1] }
 0x1cc   :  { %303 = vst [vmem:[#allocation6] sm:$0x1] %v300_v32 }
 0x1cd LB: > { %v347_v33 = vld [vmem:[%s783_s6] sm:$0xff]  ;;  %s349_s6 = scalar_lea.vmem %s783_s6, 8   ;;  %s783_s6 = sphi %s781_s6, %s349_s6   ;;  %s779_s5 = sphi %s777_s5, %s350_s5  }
 0x1ce   : > { %348 = vst [vmem:[%s779_s5] sm:$0xff] %v347_v33  ;;  %s350_s5 = scalar_lea.vmem %s779_s5, 8   ;;  %p344_p4 = scmp.gt.s32.totalorder %s349_s6, [#allocation1 + $0x8] }
 0x1cf   :  { %s367_s9 = sshll.u32 (%p344_p4), %s890_s2, 4  ;;  %s786_s10 = smov (%p344_p4), [#allocation3]   ;;  %s368_s9 = int_to_ptr.hbm [resolvable:$true] %s367_s9 }
 0x1d0   :  { %346 = sbr.rel (!%p344_p4) target bundleno = 461 (0x1cd), region = 207  ;;  %s365_s1 = sshll.u32 (%p344_p4), %s786_s10, 4  ;;  %s366_s1 = int_to_ptr.vmem [resolvable:$true] %s365_s1 }
 0x1d1   :  { %370 = dma.vmem_to_hbm [thread:$0]  (%p344_p4), %s366_s1, 16, %s368_s9, [#allocation4]  }
 0x1d3   :  { %v427_v3 = vld [vmem:[#allocation6] sm:$0x1] (%p344_p4) }
 0x1d4   :  { %428 = vst [vmem:[%s891_s3] sm:$0x1] (%p344_p4), %v427_v3 }
 0x1d5   :  { %759 = dma.done.wait [#allocation4], 16  }
 0x1d6   :  { %760 = vsyncadd [#allocation4], 4294967280 }
 0x1d7   :  { %435 = vsyncpa [#allocation4], 1 }

// kernel: custom-call.26
= control target key start
LH: loop header
LB: loop body
LE: loop exit
PB: predicated region body
PF: predicated region fallthrough
CT: control target
= control target key end

     0   :  { %v39_v0 = vlaneseq  ;;  %v385_v19 = vmov -1.0   ;;  %s502_s0 = inlined_call_operand.vmem [shape: f32[1,16,16], index: 0, kind: input, shape index: {}]   ;;  %s503_s1 = inlined_call_operand.vmem [shape: f32[1,16,16], index: 1, kind: output, shape index: {}]  }
   0x1   :  { %v34_v3 = vld [vmem:[%s502_s0 + $0x8] sm:$0xff]  ;;  %v32_v35 = vld [vmem:[%s502_s0] sm:$0xff] }
   0x2   :  { %v397_v1 = vand.u32 127, %v39_v0  ;;  %v399_v2 = vshrl.u32 %v39_v0, 7 }
   0x4   :  { %v73_v4 = vadd.s32 8, %v399_v2  ;;  %vm41_vm1 = vcmp.lt.s32.totalorder %v397_v1, 16  ;;  %vm113_vm8 = vcmp.eq.s32.totalorder %v397_v1, 15  ;;  %vm121_vm10 = vcmp.eq.s32.totalorder %v397_v1, 14 }
   0x5   :  { %v114_v20 = vsel %vm113_vm8, 1.0, %v385_v19  ;;  %vm131_vm11 = vcmp.eq.s32.totalorder %v397_v1, 13  ;;  %vm45_vm12 = vcmp.eq.s32.totalorder %v399_v2, %v397_v1  ;;  %vm141_vm13 = vcmp.eq.s32.totalorder %v397_v1, 12 }
   0x6   :  { %vm74_vm0 = vcmp.eq.s32.totalorder %v73_v4, %v397_v1  ;;  %vm79_vm2 = vcmp.le.s32.totalorder %v73_v4, %v397_v1  ;;  %vm110_vm9 = vcmp.eq.s32.totalorder %v397_v1, %v73_v4  ;;  %v47_v36 = vsel %vm45_vm12, %v32_v35, 0.0 }
   0x7   :  { %v76_v5 = vsel %vm74_vm0, %v34_v3, 0.0  ;;  %vm80_vm3 = vmand %vm79_vm2, %vm41_vm1  ;;  %v115_v21 = vsel %vm110_vm9, %v114_v20, 0.0  ;;  %vm50_vm14 = vcmp.le.s32.totalorder %v399_v2, %v397_v1  ;;  %vm171_vm8 = vcmp.eq.s32.totalorder %v397_v1, 9 }
   0x8   :  { %77 = vadd.xlane.f32.xlu0 %v76_v5  ;;  %v81_v14 = vsel %vm80_vm3, %v34_v3, 0.0  ;;  %vm51_vm2 = vmand %vm50_vm14, %vm41_vm1  ;;  %vm161_vm1 = vcmp.eq.s32.totalorder %v397_v1, 10  ;;  %v386_v5 = vmov 0.0   ;;  %vm191_vm9 = vcmp.eq.s32.totalorder %v397_v1, 7 }
   0x9   :  { %v52_v51 = vsel %vm51_vm2, %v32_v35, 0.0  ;;  %vm219_vm12 = vcmp.eq.s32.totalorder %v397_v1, 5  ;;  %vm247_vm14 = vcmp.eq.s32.totalorder %v397_v1, 3  ;;  %vm275_vm2 = vcmp.eq.s32.totalorder %v397_v1, 1 }
  0x7b   :  { %v406_v6 = vpop.xlane.xlu0 %77 }
  0x7c   :  { %381 = vrcp.f32 %v406_v6  ;;  %v93_v10 = vand.u32 2147483648, %v406_v6  ;;  %v91_v12 = vand.u32 2147483647, %v406_v6  ;;  %vm87_vm5 = vweird.f32 %v406_v6 }
  0x7e   :  { %v94_v15 = vor.u32 1.1754944e-38, %v93_v10  ;;  %vm92_vm7 = vcmp.eq.f32.partialorder %v91_v12, 8.507059e+37 }
  0x82   :  { %v382_v7 = vpop.eup %381 }
  0x83   :  { %v83_v8 = vmul.f32 %v382_v7, %v406_v6  ;;  %vm88_vm4 = vweird.f32 %v382_v7 }
  0x84   :  { %vm89_vm6 = vmor %vm87_vm5, %vm88_vm4 }
  0x85   :  { %v84_v9 = vsub.f32 1.0, %v83_v8 }
  0x87   :  { %v85_v11 = vmul.f32 %v382_v7, %v84_v9 }
  0x89   :  { %v86_v13 = vadd.f32 %v382_v7, %v85_v11 }
  0x8b   :  { %v90_v16 = vsel %vm89_vm6, %v382_v7, %v86_v13  ;;  %vm151_vm6 = vcmp.eq.s32.totalorder %v397_v1, 11 }
  0x8c   :  { %v419_v17 = vsel %vm92_vm7, %v94_v15, %v90_v16  ;;  %vm103_vm7 = vcmp.eq.s32.totalorder %v397_v1, %v399_v2 }
  0x8d   :  { %v96_v18 = vmul.f32 %v419_v17, %v81_v14  ;;  %v104_v7 = vsel %vm103_vm7, -1.0, %v386_v5 }
  0x8f   :  { %97 = vst [vmem:[#allocation2 + $0x8] sm:$0xff] %v96_v18 }
  0x96   :  { %v117_v22 = vld [vmem:[#allocation2 + $0xe] ss:$0 sm:$0xff]  ;;  %v127_v25 = vld [vmem:[#allocation2 + $0xd] ss:$0 sm:$0xff]  ;;  %v137_v30 = vld [vmem:[#allocation2 + $0xc] ss:$0 sm:$0xff] }
  0x97   :  { %v118_v23 = vxor.u32 2147483648, %v117_v22  ;;  %v128_v27 = vxor.u32 2147483648, %v127_v25  ;;  %v138_v32 = vxor.u32 2147483648, %v137_v30  ;;  %v147_v37 = vld [vmem:[#allocation2 + $0xb] ss:$0 sm:$0xff] }
  0x98   :  { %v148_v39 = vxor.u32 2147483648, %v147_v37  ;;  %v157_v55 = vld [vmem:[#allocation2 + $0xa] ss:$0 sm:$0xff]  ;;  %v167_v60 = vld [vmem:[#allocation2 + $0x9] ss:$0 sm:$0xff] }
  0x99   :  { %v122_v24 = vmul.f32 %v118_v23, %v115_v21  ;;  %v158_v57 = vxor.u32 2147483648, %v157_v55  ;;  %v168_v62 = vxor.u32 2147483648, %v167_v60  ;;  %v177_v9 = vld [vmem:[#allocation2 + $0x8] ss:$0 sm:$0xff] }
  0x9a   :  { %v178_v11 = vxor.u32 2147483648, %v177_v9 }
  0x9b   :  { %123 = vadd.xlane.f32.xlu0 %v122_v24 }
 0x10e   :  { %v124_v26 = vpop.xlane.xlu0 %123 }
 0x10f   :  { %v125_v28 = vsel %vm121_vm10, %v124_v26, %v115_v21  ;;  %vm181_vm10 = vcmp.eq.s32.totalorder %v397_v1, 8 }
 0x110   :  { %v132_v29 = vmul.f32 %v128_v27, %v125_v28 }
 0x112   :  { %133 = vadd.xlane.f32.xlu1 %v132_v29 }
 0x185   :  { %v134_v31 = vpop.xlane.xlu1 %133 }
 0x186   :  { %v135_v33 = vsel %vm131_vm11, %v134_v31, %v125_v28  ;;  %vm205_vm11 = vcmp.eq.s32.totalorder %v397_v1, 6 }
 0x187   :  { %v142_v34 = vmul.f32 %v138_v32, %v135_v33 }
 0x189   :  { %143 = vadd.xlane.f32.xlu1 %v142_v34 }
 0x191   :  { %48 = vadd.xlane.f32.xlu1 %v47_v36 }
 0x1fc   :  { %v144_v38 = vpop.xlane.xlu1 %143 }
 0x1fd   :  { %v145_v40 = vsel %vm141_vm13, %v144_v38, %v135_v33  ;;  %vm233_vm13 = vcmp.eq.s32.totalorder %v397_v1, 4 }
 0x1fe   :  { %v152_v41 = vmul.f32 %v148_v39, %v145_v40 }
 0x200   :  { %153 = vadd.xlane.f32.xlu2 %v152_v41 }
 0x204   :  { %v432_v42 = vpop.xlane.xlu1 %48 }
 0x205   :  { %383 = vrcp.f32 %v432_v42  ;;  %v64_v45 = vand.u32 2147483648, %v432_v42  ;;  %vm58_vm15 = vweird.f32 %v432_v42  ;;  %v62_v47 = vand.u32 2147483647, %v432_v42 }
 0x207   :  { %v65_v49 = vor.u32 1.1754944e-38, %v64_v45  ;;  %vm63_vm4 = vcmp.eq.f32.partialorder %v62_v47, 8.507059e+37 }
 0x20b   :  { %v384_v43 = vpop.eup %383 }
 0x20c   :  { %v54_v44 = vmul.f32 %v384_v43, %v432_v42  ;;  %vm59_vm0 = vweird.f32 %v384_v43 }
 0x20d   :  { %vm60_vm3 = vmor %vm58_vm15, %vm59_vm0  ;;  %vm261_vm0 = vcmp.eq.s32.totalorder %v397_v1, 2 }
 0x20e   :  { %v55_v46 = vsub.f32 1.0, %v54_v44 }
 0x210   :  { %v56_v48 = vmul.f32 %v384_v43, %v55_v46 }
 0x212   :  { %v57_v50 = vadd.f32 %v384_v43, %v56_v48 }
 0x214   :  { %v61_v52 = vsel %vm60_vm3, %v384_v43, %v57_v50  ;;  %vm288_vm3 = vcmp.eq.s32.totalorder %v397_v1, 0 }
 0x215   :  { %v445_v53 = vsel %vm63_vm4, %v65_v49, %v61_v52 }
 0x216   :  { %v67_v54 = vmul.f32 %v445_v53, %v52_v51 }
 0x218   :  { %68 = vst [vmem:[#allocation2] sm:$0xff] %v67_v54 }
 0x21f   :  { %v187_v0 = vld [vmem:[#allocation2 + $0x7] ss:$0 sm:$0xff]  ;;  %v201_v14 = vld [vmem:[#allocation2 + $0x6] ss:$0 sm:$0xff]  ;;  %v215_v22 = vld [vmem:[#allocation2 + $0x5] ss:$0 sm:$0xff] }
 0x220   :  { %v188_v4 = vxor.u32 2147483648, %v187_v0  ;;  %v202_v15 = vxor.u32 2147483648, %v201_v14  ;;  %v216_v24 = vxor.u32 2147483648, %v215_v22  ;;  %v229_v30 = vld [vmem:[#allocation2 + $0x4] ss:$0 sm:$0xff] }
 0x221   :  { %v230_v32 = vxor.u32 2147483648, %v229_v30  ;;  %v243_v38 = vld [vmem:[#allocation2 + $0x3] ss:$0 sm:$0xff]  ;;  %v257_v47 = vld [vmem:[#allocation2 + $0x2] ss:$0 sm:$0xff] }
 0x222   :  { %v192_v8 = vmul.f32 %v188_v4, %v104_v7  ;;  %v258_v49 = vxor.u32 2147483648, %v257_v47  ;;  %v284_v0 = vld [vmem:[#allocation2] ss:$0 sm:$0xff] }
 0x273   :  { %v154_v56 = vpop.xlane.xlu2 %153 }
 0x274   :  { %v155_v58 = vsel %vm151_vm6, %v154_v56, %v145_v40  ;;  %v244_v40 = vxor.u32 2147483648, %v243_v38  ;;  %v271_v56 = vld [vmem:[#allocation2 + $0x1] ss:$0 sm:$0xff] }
 0x275   :  { %v162_v59 = vmul.f32 %v158_v57, %v155_v58 }
 0x277   :  { %163 = vadd.xlane.f32.xlu2 %v162_v59 }
 0x2ea   :  { %v164_v61 = vpop.xlane.xlu2 %163 }
 0x2eb   :  { %v165_v63 = vsel %vm161_vm1, %v164_v61, %v155_v58  ;;  %v272_v58 = vxor.u32 2147483648, %v271_v56 }
 0x2ec   :  { %v172_v3 = vmul.f32 %v168_v62, %v165_v63 }
 0x2ee   :  { %173 = vadd.xlane.f32.xlu0 %v172_v3 }
 0x2f6   :  { %193 = vadd.xlane.f32.xlu0 %v192_v8 }
 0x361   :  { %v174_v10 = vpop.xlane.xlu0 %173 }
 0x362   :  { %v175_v12 = vsel %vm171_vm8, %v174_v10, %v165_v63 }
 0x363   :  { %v182_v13 = vmul.f32 %v178_v11, %v175_v12 }
 0x365   :  { %183 = vadd.xlane.f32.xlu2 %v182_v13 }
 0x369   :  { %v194_v16 = vpop.xlane.xlu0 %193 }
 0x36a   :  { %v195_v2 = vsel %vm191_vm9, %v194_v16, %v104_v7 }
 0x36b   :  { %v206_v18 = vmul.f32 %v202_v15, %v195_v2 }
 0x36d   :  { %207 = vadd.xlane.f32.xlu2 %v206_v18 }
 0x3d8   :  { %v184_v19 = vpop.xlane.xlu2 %183 }
 0x3d9   :  { %v185_v20 = vsel %vm181_vm10, %v184_v19, %v175_v12 }
 0x3da   :  { %v196_v21 = vmul.f32 %v188_v4, %v185_v20  ;;  %v285_v4 = vxor.u32 2147483648, %v284_v0 }
 0x3dc   :  { %197 = vadd.xlane.f32.xlu1 %v196_v21 }
 0x3e0   :  { %v208_v23 = vpop.xlane.xlu2 %207 }
 0x3e1   :  { %v209_v25 = vsel %vm205_vm11, %v208_v23, %v195_v2 }
 0x3e2   :  { %v220_v26 = vmul.f32 %v216_v24, %v209_v25 }
 0x3e4   :  { %221 = vadd.xlane.f32.xlu1 %v220_v26 }
 0x44f   :  { %v198_v27 = vpop.xlane.xlu1 %197 }
 0x450   :  { %v199_v28 = vsel %vm191_vm9, %v198_v27, %v185_v20 }
 0x451   :  { %v210_v29 = vmul.f32 %v202_v15, %v199_v28 }
 0x453   :  { %211 = vadd.xlane.f32.xlu0 %v210_v29 }
 0x457   :  { %v222_v31 = vpop.xlane.xlu1 %221 }
 0x458   :  { %v223_v33 = vsel %vm219_vm12, %v222_v31, %v209_v25 }
 0x459   :  { %v234_v34 = vmul.f32 %v230_v32, %v223_v33 }
 0x45b   :  { %235 = vadd.xlane.f32.xlu0 %v234_v34 }
 0x4c6   :  { %v212_v35 = vpop.xlane.xlu0 %211 }
 0x4c7   :  { %v213_v36 = vsel %vm205_vm11, %v212_v35, %v199_v28 }
 0x4c8   :  { %v224_v37 = vmul.f32 %v216_v24, %v213_v36 }
 0x4ca   :  { %225 = vadd.xlane.f32.xlu2 %v224_v37 }
 0x4ce   :  { %v236_v39 = vpop.xlane.xlu0 %235 }
 0x4cf   :  { %v237_v41 = vsel %vm233_vm13, %v236_v39, %v223_v33 }
 0x4d0   :  { %v248_v43 = vmul.f32 %v244_v40, %v237_v41 }
 0x4d2   :  { %249 = vadd.xlane.f32.xlu2 %v248_v43 }
 0x53d   :  { %v226_v44 = vpop.xlane.xlu2 %225 }
 0x53e   :  { %v227_v45 = vsel %vm219_vm12, %v226_v44, %v213_v36 }
 0x53f   :  { %v238_v46 = vmul.f32 %v230_v32, %v227_v45 }
 0x541   :  { %239 = vadd.xlane.f32.xlu1 %v238_v46 }
 0x545   :  { %v250_v48 = vpop.xlane.xlu2 %249 }
 0x546   :  { %v251_v50 = vsel %vm247_vm14, %v250_v48, %v237_v41 }
 0x547   :  { %v262_v51 = vmul.f32 %v258_v49, %v251_v50 }
 0x549   :  { %263 = vadd.xlane.f32.xlu1 %v262_v51 }
 0x5b4   :  { %v240_v52 = vpop.xlane.xlu1 %239 }
 0x5b5   :  { %v241_v54 = vsel %vm233_vm13, %v240_v52, %v227_v45 }
 0x5b6   :  { %v252_v55 = vmul.f32 %v244_v40, %v241_v54 }
 0x5b8   :  { %253 = vadd.xlane.f32.xlu0 %v252_v55 }
 0x5bc   :  { %v264_v57 = vpop.xlane.xlu1 %263 }
 0x5bd   :  { %v265_v59 = vsel %vm261_vm0, %v264_v57, %v251_v50 }
 0x5be   :  { %v276_v60 = vmul.f32 %v272_v58, %v265_v59 }
 0x5c0   :  { %277 = vadd.xlane.f32.xlu0 %v276_v60 }
 0x62b   :  { %v254_v61 = vpop.xlane.xlu0 %253 }
 0x62c   :  { %v255_v62 = vsel %vm247_vm14, %v254_v61, %v241_v54 }
 0x62d   :  { %v266_v63 = vmul.f32 %v258_v49, %v255_v62 }
 0x62f   :  { %267 = vadd.xlane.f32.xlu2 %v266_v63 }
 0x633   :  { %v278_v3 = vpop.xlane.xlu0 %277 }
 0x634   :  { %v279_v5 = vsel %vm275_vm2, %v278_v3, %v265_v59 }
 0x635   :  { %v289_v7 = vmul.f32 %v285_v4, %v279_v5 }
 0x637   :  { %290 = vadd.xlane.f32.xlu2 %v289_v7 }
 0x6a2   :  { %v268_v8 = vpop.xlane.xlu2 %267 }
 0x6a3   :  { %v269_v9 = vsel %vm261_vm0, %v268_v8, %v255_v62 }
 0x6a4   :  { %v280_v10 = vmul.f32 %v272_v58, %v269_v9 }
 0x6a6   :  { %281 = vadd.xlane.f32.xlu1 %v280_v10 }
 0x6aa   :  { %v291_v11 = vpop.xlane.xlu2 %290 }
 0x6ab   :  { %v292_v12 = vsel %vm288_vm3, %v291_v11, %v279_v5 }
 0x6ac   :  { %v311_v13 = vmul.f32 %v292_v12, %v445_v53 }
 0x6ae   :  { %v313_v14 = vsel %vm58_vm15, %v292_v12, %v311_v13 }
 0x6af   :  { %365 = vst [vmem:[%s503_s1] sm:$0xff] %v313_v14 }
 0x719   :  { %v282_v15 = vpop.xlane.xlu1 %281 }
 0x71a   :  { %v283_v16 = vsel %vm275_vm2, %v282_v15, %v269_v9 }
 0x71b   :  { %v293_v2 = vmul.f32 %v285_v4, %v283_v16 }
 0x71d   :  { %294 = vadd.xlane.f32.xlu0 %v293_v2 }
 0x790   :  { %v295_v18 = vpop.xlane.xlu0 %294 }
 0x791   :  { %v296_v19 = vsel %vm288_vm3, %v295_v18, %v283_v16 }
 0x792   :  { %v329_v20 = vmul.f32 %v296_v19, %v419_v17 }
 0x794   :  { %v331_v53 = vsel %vm87_vm5, %v296_v19, %v329_v20 }
 0x795   :  { %367 = vst [vmem:[%s503_s1 + $0x8] sm:$0xff] %v331_v53 }

// kernel: custom-call.27
= control target key start
LH: loop header
LB: loop body
LE: loop exit
PB: predicated region body
PF: predicated region fallthrough
CT: control target
= control target key end

     0   :  { %v39_v0 = vlaneseq  ;;  %v386_v18 = vmov -1.0   ;;  %v387_v61 = vmov 0.0   ;;  %s469_s0 = inlined_call_operand.vmem [shape: f32[1,16,16], index: 0, kind: input, shape index: {}]   ;;  %s470_s1 = inlined_call_operand.vmem [shape: f32[1,16,16], index: 1, kind: output, shape index: {}]  }
   0x1   :  { %v32_v1 = vld [vmem:[%s469_s0] sm:$0xff]  ;;  %v34_v39 = vld [vmem:[%s469_s0 + $0x8] sm:$0xff] }
   0x2   :  { %v401_v2 = vand.u32 127, %v39_v0  ;;  %v43_v3 = vshrl.u32 %v39_v0, 7 }
   0x4   :  { %vm45_vm0 = vcmp.eq.s32.totalorder %v43_v3, %v401_v2  ;;  %vm41_vm1 = vcmp.lt.s32.totalorder %v401_v2, 16  ;;  %vm50_vm2 = vcmp.ge.s32.totalorder %v43_v3, %v401_v2  ;;  %vm106_vm8 = vcmp.eq.s32.totalorder %v401_v2, 0 }
   0x5   :  { %v47_v4 = vsel %vm45_vm0, %v32_v1, 0.0  ;;  %vm51_vm3 = vmand %vm50_vm2, %vm41_vm1  ;;  %vm103_vm9 = vcmp.eq.s32.totalorder %v401_v2, %v43_v3  ;;  %v107_v19 = vsel %vm106_vm8, 1.0, %v386_v18  ;;  %vm121_vm10 = vcmp.eq.s32.totalorder %v401_v2, 1 }
   0x6   :  { %48 = vadd.xlane.f32.xlu0 %v47_v4  ;;  %v52_v13 = vsel %vm51_vm3, %v32_v1, 0.0  ;;  %v108_v20 = vsel %vm103_vm9, %v107_v19, 0.0  ;;  %vm131_vm11 = vcmp.eq.s32.totalorder %v401_v2, 2  ;;  %vm141_vm12 = vcmp.eq.s32.totalorder %v401_v2, 3 }
   0x7   :  { %v73_v40 = vadd.s32 8, %v43_v3  ;;  %vm151_vm14 = vcmp.eq.s32.totalorder %v401_v2, 4  ;;  %vm161_vm8 = vcmp.eq.s32.totalorder %v401_v2, 5  ;;  %vm181_vm9 = vcmp.eq.s32.totalorder %v401_v2, 7 }
   0x9   :  { %vm74_vm13 = vcmp.eq.s32.totalorder %v73_v40, %v401_v2  ;;  %vm79_vm15 = vcmp.ge.s32.totalorder %v73_v40, %v401_v2 }
   0xa   :  { %v76_v41 = vsel %vm74_vm13, %v34_v39, 0.0  ;;  %vm80_vm3 = vmand %vm79_vm15, %vm41_vm1  ;;  %vm171_vm1 = vcmp.eq.s32.totalorder %v401_v2, 6  ;;  %vm233_vm13 = vcmp.eq.s32.totalorder %v401_v2, 11  ;;  %vm261_vm15 = vcmp.eq.s32.totalorder %v401_v2, 13 }
   0xb   :  { %v81_v56 = vsel %vm80_vm3, %v34_v39, 0.0  ;;  %vm289_vm3 = vcmp.eq.s32.totalorder %v401_v2, 15 }
  0x79   :  { %v404_v5 = vpop.xlane.xlu0 %48 }
  0x7a   :  { %382 = vrcp.f32 %v404_v5  ;;  %v64_v9 = vand.u32 2147483648, %v404_v5  ;;  %v62_v11 = vand.u32 2147483647, %v404_v5  ;;  %vm58_vm5 = vweird.f32 %v404_v5 }
  0x7c   :  { %v65_v14 = vor.u32 1.1754944e-38, %v64_v9  ;;  %vm63_vm7 = vcmp.eq.f32.partialorder %v62_v11, 8.507059e+37 }
  0x80   :  { %v383_v6 = vpop.eup %382 }
  0x81   :  { %v54_v7 = vmul.f32 %v383_v6, %v404_v5  ;;  %vm59_vm4 = vweird.f32 %v383_v6 }
  0x82   :  { %vm60_vm6 = vmor %vm58_vm5, %vm59_vm4 }
  0x83   :  { %v55_v8 = vsub.f32 1.0, %v54_v7 }
  0x85   :  { %v56_v10 = vmul.f32 %v383_v6, %v55_v8 }
  0x87   :  { %v57_v12 = vadd.f32 %v383_v6, %v56_v10 }
  0x89   :  { %v61_v15 = vsel %vm60_vm6, %v383_v6, %v57_v12 }
  0x8a   :  { %v417_v16 = vsel %vm63_vm7, %v65_v14, %v61_v15  ;;  %vm114_vm7 = vcmp.eq.s32.totalorder %v401_v2, %v73_v40 }
  0x8b   :  { %v67_v17 = vmul.f32 %v417_v16, %v52_v13  ;;  %v115_v62 = vsel %vm114_vm7, -1.0, %v387_v61 }
  0x8d   :  { %68 = vst [vmem:[#allocation2] sm:$0xff] %v67_v17 }
  0x94   :  { %v117_v21 = vld [vmem:[#allocation2 + $0x1] ss:$0 sm:$0xff]  ;;  %v127_v24 = vld [vmem:[#allocation2 + $0x2] ss:$0 sm:$0xff]  ;;  %v137_v29 = vld [vmem:[#allocation2 + $0x3] ss:$0 sm:$0xff] }
  0x95   :  { %v118_v22 = vxor.u32 2147483648, %v117_v21  ;;  %v128_v26 = vxor.u32 2147483648, %v127_v24  ;;  %v138_v31 = vxor.u32 2147483648, %v137_v29  ;;  %v147_v34 = vld [vmem:[#allocation2 + $0x4] ss:$0 sm:$0xff] }
  0x96   :  { %v148_v36 = vxor.u32 2147483648, %v147_v34  ;;  %v157_v42 = vld [vmem:[#allocation2 + $0x5] ss:$0 sm:$0xff]  ;;  %v167_v60 = vld [vmem:[#allocation2 + $0x6] ss:$0 sm:$0xff] }
  0x97   :  { %v122_v23 = vmul.f32 %v118_v22, %v108_v20  ;;  %v158_v44 = vxor.u32 2147483648, %v157_v42  ;;  %v168_v1 = vxor.u32 2147483648, %v167_v60  ;;  %v177_v8 = vld [vmem:[#allocation2 + $0x7] ss:$0 sm:$0xff] }
  0x98   :  { %v178_v10 = vxor.u32 2147483648, %v177_v8 }
  0x99   :  { %123 = vadd.xlane.f32.xlu0 %v122_v23 }
 0x10c   :  { %v124_v25 = vpop.xlane.xlu0 %123 }
 0x10d   :  { %v125_v27 = vsel %vm121_vm10, %v124_v25, %v108_v20  ;;  %vm191_vm10 = vcmp.eq.s32.totalorder %v401_v2, 8 }
 0x10e   :  { %v132_v28 = vmul.f32 %v128_v26, %v125_v27 }
 0x110   :  { %133 = vadd.xlane.f32.xlu1 %v132_v28 }
 0x183   :  { %v134_v30 = vpop.xlane.xlu1 %133 }
 0x184   :  { %v135_v32 = vsel %vm131_vm11, %v134_v30, %v125_v27  ;;  %vm205_vm11 = vcmp.eq.s32.totalorder %v401_v2, 9 }
 0x185   :  { %v142_v33 = vmul.f32 %v138_v31, %v135_v32 }
 0x187   :  { %143 = vadd.xlane.f32.xlu1 %v142_v33 }
 0x18f   :  { %77 = vadd.xlane.f32.xlu1 %v76_v41 }
 0x1fa   :  { %v144_v35 = vpop.xlane.xlu1 %143 }
 0x1fb   :  { %v145_v37 = vsel %vm141_vm12, %v144_v35, %v135_v32  ;;  %vm219_vm12 = vcmp.eq.s32.totalorder %v401_v2, 10 }
 0x1fc   :  { %v152_v38 = vmul.f32 %v148_v36, %v145_v37 }
 0x1fe   :  { %153 = vadd.xlane.f32.xlu2 %v152_v38 }
 0x202   :  { %v430_v47 = vpop.xlane.xlu1 %77 }
 0x203   :  { %384 = vrcp.f32 %v430_v47  ;;  %v93_v50 = vand.u32 2147483648, %v430_v47  ;;  %vm87_vm0 = vweird.f32 %v430_v47  ;;  %v91_v52 = vand.u32 2147483647, %v430_v47 }
 0x205   :  { %v94_v54 = vor.u32 1.1754944e-38, %v93_v50  ;;  %vm92_vm6 = vcmp.eq.f32.partialorder %v91_v52, 8.507059e+37 }
 0x209   :  { %v385_v48 = vpop.eup %384 }
 0x20a   :  { %v83_v49 = vmul.f32 %v385_v48, %v430_v47  ;;  %vm88_vm2 = vweird.f32 %v385_v48 }
 0x20b   :  { %vm89_vm4 = vmor %vm87_vm0, %vm88_vm2  ;;  %vm275_vm2 = vcmp.eq.s32.totalorder %v401_v2, 14 }
 0x20c   :  { %v84_v51 = vsub.f32 1.0, %v83_v49 }
 0x20e   :  { %v85_v53 = vmul.f32 %v385_v48, %v84_v51 }
 0x210   :  { %v86_v55 = vadd.f32 %v385_v48, %v85_v53 }
 0x212   :  { %v90_v57 = vsel %vm89_vm4, %v385_v48, %v86_v55 }
 0x213   :  { %v442_v58 = vsel %vm92_vm6, %v94_v54, %v90_v57 }
 0x214   :  { %v96_v59 = vmul.f32 %v442_v58, %v81_v56 }
 0x216   :  { %97 = vst [vmem:[#allocation2 + $0x8] sm:$0xff] %v96_v59 }
 0x21d   :  { %v187_v63 = vld [vmem:[#allocation2 + $0x8] ss:$0 sm:$0xff]  ;;  %v201_v17 = vld [vmem:[#allocation2 + $0x9] ss:$0 sm:$0xff]  ;;  %v215_v25 = vld [vmem:[#allocation2 + $0xa] ss:$0 sm:$0xff] }
 0x21e   :  { %v188_v3 = vxor.u32 2147483648, %v187_v63  ;;  %v202_v19 = vxor.u32 2147483648, %v201_v17  ;;  %v216_v27 = vxor.u32 2147483648, %v215_v25  ;;  %v229_v33 = vld [vmem:[#allocation2 + $0xb] ss:$0 sm:$0xff] }
 0x21f   :  { %v230_v35 = vxor.u32 2147483648, %v229_v33  ;;  %v243_v41 = vld [vmem:[#allocation2 + $0xc] ss:$0 sm:$0xff]  ;;  %v257_v50 = vld [vmem:[#allocation2 + $0xd] ss:$0 sm:$0xff] }
 0x220   :  { %v196_v7 = vmul.f32 %v188_v3, %v115_v62  ;;  %v258_v52 = vxor.u32 2147483648, %v257_v50  ;;  %v271_v59 = vld [vmem:[#allocation2 + $0xe] ss:$0 sm:$0xff] }
 0x221   :  { %v272_v61 = vxor.u32 2147483648, %v271_v59 }
 0x222   :  { %197 = vadd.xlane.f32.xlu1 %v196_v7 }
 0x271   :  { %v154_v43 = vpop.xlane.xlu2 %153 }
 0x272   :  { %v155_v45 = vsel %vm151_vm14, %v154_v43, %v145_v37  ;;  %v244_v43 = vxor.u32 2147483648, %v243_v41  ;;  %vm247_vm14 = vcmp.eq.s32.totalorder %v401_v2, 12 }
 0x273   :  { %v162_v46 = vmul.f32 %v158_v44, %v155_v45 }
 0x275   :  { %163 = vadd.xlane.f32.xlu2 %v162_v46 }
 0x295   :  { %v198_v18 = vpop.xlane.xlu1 %197 }
 0x296   :  { %v199_v20 = vsel %vm191_vm10, %v198_v18, %v115_v62 }
 0x297   :  { %v210_v21 = vmul.f32 %v202_v19, %v199_v20 }
 0x2e8   :  { %v164_v0 = vpop.xlane.xlu2 %163 }
 0x2e9   :  { %v165_v4 = vsel %vm161_vm8, %v164_v0, %v155_v45 }
 0x2ea   :  { %v172_v6 = vmul.f32 %v168_v1, %v165_v4 }
 0x2ec   :  { %173 = vadd.xlane.f32.xlu0 %v172_v6 }
 0x35f   :  { %v174_v9 = vpop.xlane.xlu0 %173 }
 0x360   :  { %v175_v11 = vsel %vm171_vm1, %v174_v9, %v165_v4  ;;  %v285_v4 = vld [vmem:[#allocation2 + $0xf] ss:$0 sm:$0xff] }
 0x361   :  { %v182_v12 = vmul.f32 %v178_v10, %v175_v11  ;;  %v286_v7 = vxor.u32 2147483648, %v285_v4 }
 0x363   :  { %183 = vadd.xlane.f32.xlu2 %v182_v12 }
 0x3d6   :  { %v184_v13 = vpop.xlane.xlu2 %183 }
 0x3d7   :  { %v185_v14 = vsel %vm181_vm9, %v184_v13, %v175_v11 }
 0x3d8   :  { %v192_v15 = vmul.f32 %v188_v3, %v185_v14 }
 0x3da   :  { %193 = vadd.xlane.f32.xlu0 %v192_v15 }
 0x3e2   :  { %211 = vadd.xlane.f32.xlu0 %v210_v21 }
 0x44d   :  { %v194_v22 = vpop.xlane.xlu0 %193 }
 0x44e   :  { %v195_v23 = vsel %vm191_vm10, %v194_v22, %v185_v14 }
 0x44f   :  { %v206_v24 = vmul.f32 %v202_v19, %v195_v23 }
 0x451   :  { %207 = vadd.xlane.f32.xlu2 %v206_v24 }
 0x455   :  { %v212_v26 = vpop.xlane.xlu0 %211 }
 0x456   :  { %v213_v28 = vsel %vm205_vm11, %v212_v26, %v199_v20 }
 0x457   :  { %v224_v29 = vmul.f32 %v216_v27, %v213_v28 }
 0x459   :  { %225 = vadd.xlane.f32.xlu2 %v224_v29 }
 0x4c4   :  { %v208_v30 = vpop.xlane.xlu2 %207 }
 0x4c5   :  { %v209_v31 = vsel %vm205_vm11, %v208_v30, %v195_v23 }
 0x4c6   :  { %v220_v32 = vmul.f32 %v216_v27, %v209_v31 }
 0x4c8   :  { %221 = vadd.xlane.f32.xlu1 %v220_v32 }
 0x4cc   :  { %v226_v34 = vpop.xlane.xlu2 %225 }
 0x4cd   :  { %v227_v36 = vsel %vm219_vm12, %v226_v34, %v213_v28 }
 0x4ce   :  { %v238_v37 = vmul.f32 %v230_v35, %v227_v36 }
 0x4d0   :  { %239 = vadd.xlane.f32.xlu1 %v238_v37 }
 0x53b   :  { %v222_v38 = vpop.xlane.xlu1 %221 }
 0x53c   :  { %v223_v39 = vsel %vm219_vm12, %v222_v38, %v209_v31 }
 0x53d   :  { %v234_v40 = vmul.f32 %v230_v35, %v223_v39 }
 0x53f   :  { %235 = vadd.xlane.f32.xlu0 %v234_v40 }
 0x543   :  { %v240_v42 = vpop.xlane.xlu1 %239 }
 0x544   :  { %v241_v44 = vsel %vm233_vm13, %v240_v42, %v227_v36 }
 0x545   :  { %v252_v45 = vmul.f32 %v244_v43, %v241_v44 }
 0x547   :  { %253 = vadd.xlane.f32.xlu0 %v252_v45 }
 0x5b2   :  { %v236_v46 = vpop.xlane.xlu0 %235 }
 0x5b3   :  { %v237_v48 = vsel %vm233_vm13, %v236_v46, %v223_v39 }
 0x5b4   :  { %v248_v49 = vmul.f32 %v244_v43, %v237_v48 }
 0x5b6   :  { %249 = vadd.xlane.f32.xlu2 %v248_v49 }
 0x5ba   :  { %v254_v51 = vpop.xlane.xlu0 %253 }
 0x5bb   :  { %v255_v53 = vsel %vm247_vm14, %v254_v51, %v241_v44 }
 0x5bc   :  { %v266_v54 = vmul.f32 %v258_v52, %v255_v53 }
 0x5be   :  { %267 = vadd.xlane.f32.xlu2 %v266_v54 }
 0x629   :  { %v250_v55 = vpop.xlane.xlu2 %249 }
 0x62a   :  { %v251_v56 = vsel %vm247_vm14, %v250_v55, %v237_v48 }
 0x62b   :  { %v262_v57 = vmul.f32 %v258_v52, %v251_v56 }
 0x62d   :  { %263 = vadd.xlane.f32.xlu1 %v262_v57 }
 0x631   :  { %v268_v60 = vpop.xlane.xlu2 %267 }
 0x632   :  { %v269_v62 = vsel %vm261_vm15, %v268_v60, %v255_v53 }
 0x633   :  { %v280_v63 = vmul.f32 %v272_v61, %v269_v62 }
 0x635   :  { %281 = vadd.xlane.f32.xlu1 %v280_v63 }
 0x6a0   :  { %v264_v0 = vpop.xlane.xlu1 %263 }
 0x6a1   :  { %v265_v1 = vsel %vm261_vm15, %v264_v0, %v251_v56 }
 0x6a2   :  { %v276_v3 = vmul.f32 %v272_v61, %v265_v1 }
 0x6a4   :  { %277 = vadd.xlane.f32.xlu0 %v276_v3 }
 0x6a8   :  { %v282_v6 = vpop.xlane.xlu1 %281 }
 0x6a9   :  { %v283_v8 = vsel %vm275_vm2, %v282_v6, %v269_v62 }
 0x6aa   :  { %v294_v9 = vmul.f32 %v286_v7, %v283_v8 }
 0x6ac   :  { %295 = vadd.xlane.f32.xlu0 %v294_v9 }
 0x717   :  { %v278_v10 = vpop.xlane.xlu0 %277 }
 0x718   :  { %v279_v11 = vsel %vm275_vm2, %v278_v10, %v265_v1 }
 0x719   :  { %v290_v12 = vmul.f32 %v286_v7, %v279_v11 }
 0x71b   :  { %291 = vadd.xlane.f32.xlu2 %v290_v12 }
 0x71f   :  { %v296_v13 = vpop.xlane.xlu0 %295 }
 0x720   :  { %v297_v14 = vsel %vm289_vm3, %v296_v13, %v283_v8 }
 0x721   :  { %v330_v15 = vmul.f32 %v297_v14, %v442_v58 }
 0x723   :  { %v332_v17 = vsel %vm87_vm0, %v297_v14, %v330_v15 }
 0x724   :  { %368 = vst [vmem:[%s470_s1 + $0x8] sm:$0xff] %v332_v17 }
 0x78e   :  { %v292_v18 = vpop.xlane.xlu2 %291 }
 0x78f   :  { %v293_v19 = vsel %vm289_vm3, %v292_v18, %v279_v11 }
 0x790   :  { %v312_v20 = vmul.f32 %v293_v19, %v417_v16 }
 0x792   :  { %v314_v21 = vsel %vm58_vm5, %v293_v19, %v312_v20 }
 0x793   :  { %366 = vst [vmem:[%s470_s1] sm:$0xff] %v314_v21 }

// kernel: optnet_forward.1
= control target key start
LH: loop header
LB: loop body
LE: loop exit
PB: predicated region body
PF: predicated region fallthrough
CT: control target
= control target key end

     0   :  { %s11154_s0 = inlined_call_operand.vmem [shape: f32[16,32], index: 0, kind: input, shape index: {}]   ;;  %s11155_s1 = inlined_call_operand.vmem [shape: f32[16,32], index: 1, kind: input, shape index: {}]   ;;  %s11156_s2 = inlined_call_operand.vmem [shape: f32[1,16], index: 2, kind: input, shape index: {}]   ;;  %s11157_s3 = inlined_call_operand.vmem [shape: f32[32,48], index: 3, kind: input, shape index: {}]   ;;  %s11158_s4 = inlined_call_operand.vmem [shape: f32[32,48], index: 4, kind: input, shape index: {}]   ;;  %s11159_s5 = inlined_call_operand.vmem [shape: f32[16,32], index: 5, kind: input, shape index: {}]   ;;  %s11160_s6 = inlined_call_operand.vmem [shape: f32[16,16], index: 6, kind: input, shape index: {}]   ;;  %s11161_s7 = inlined_call_operand.vmem [shape: f32[16,16], index: 7, kind: input, shape index: {}]   ;;  %s11162_s8 = inlined_call_operand.hbm [shape: f32[16,32], index: 8, kind: output, shape index: {}]  }
   0x1   :  { %11230 = sst [smem:[#allocation40_spill]] %s11154_s0 }
   0x2   :  { %13 = vsyncpa [#allocation3], 0 }
   0x3   :  { %15 = vsyncpa [#allocation3 + $0x1], 0  ;;  %s6983_s27 = smov 0   ;;  %s6985_s28 = smov 0  }
   0x4   :  { %s6987_s29 = smov 0   ;;  %s6989_s30 = smov 0  }
   0x5 LB: > { %s7004_s9 = sadd.s32 4294967295, %s6889_s30   ;;  %s6324_s10 = sadd.s32 4294967294, %s6889_s30   ;;  %s6889_s30 = sphi %s6989_s30, %s11556_s30   ;;  %s6885_s29 = sphi %s6987_s29, %s11555_s29   ;;  %s6881_s28 = sphi %s6985_s28, %s11554_s28   ;;  %s6877_s27 = sphi %s6983_s27, %s11553_s27  }
   0x6   : > { %s7008_s11 = sadd.s32 1, %s6889_s30   ;;  %s201_s12 = sadd.s32 1, %s6885_s29 }
   0x7   : > { %s198_s13 = ssub.s32 %s6889_s30, %s7008_s11  ;;  %p211_p0 = scmp.ne.s32.totalorder %s6885_s29, %s6881_s28 }
   0x8   : > { %p199_p1 = scmp.eq.s32.totalorder %s198_s13, 0  ;;  %p212_p2 = scmp.eq.s32.totalorder %s7004_s9, 1 }
   0x9   : > { %p217_p3 = scmp.ne.s32.totalorder %s6881_s28, %s6877_s27  ;;  %p218_p4 = scmp.eq.s32.totalorder %s6324_s10, 1 }
   0xa   : > { %s7019_s14 = scalar_select %p199_p1, %s6885_s29, %s201_s12  }
   0xb   : > { %p7021_p5 = por %p212_p2, %p211_p0  ;;  %p7025_p6 = por %p218_p4, %p217_p3 }
   0xc   : > { %p6327_p7 = scmp.ge.s32.totalorder %s6889_s30, 1  ;;  %p264_p8 = scmp.lt.s32.totalorder %s6889_s30, 3 }
   0xe   : > { %p265_p9 = pnand %p6327_p7, %p264_p8 }
  0x10   : > { %268 = sbr.rel (%p265_p9) target bundleno = 4635 (0x121b), region = 52 }
  0x15   : > { %s294_s17 = sand.u32 1, %s6881_s28   ;;  %v7035_v0 = vld [vmem:[%s11155_s1] sm:$0xff]  ;;  %v7040_v1 = vld [vmem:[%s11155_s1 + $0x8] sm:$0xff]  ;;  %v319_v3 = vlaneseq  ;;  %p297_p10 = scmp.lt.s32.totalorder %s7004_s9, 1  ;;  %v7060_v5 = vld [vmem:[%s11157_s3 + $0x10] sm:$0xff]  ;;  %vm11165_vm0 = vcmask 261120  }
  0x16   : > { %11233 = vst [vmem:[#allocation5_spill] sm:$0xff] %v7035_v0  ;;  %v7045_v2 = vld [vmem:[%s11157_s3] sm:$0xff]  ;;  %s7050_s24 = sshll.u32 %s294_s17, 3  ;;  %v7055_v4 = vld [vmem:[%s11157_s3 + $0x8] sm:$0xff]  ;;  %v7065_v6 = vld [vmem:[%s11157_s3 + $0x18] sm:$0xff]  ;;  %v11245_v14 = vmov 0 }
  0x17   : > { %11234 = vst [vmem:[#allocation6_spill] sm:$0xff] %v7040_v1  ;;  %v7070_v7 = vld [vmem:[%s11158_s4 + $0x18] sm:$0xff]  ;;  %v7075_v8 = vld [vmem:[%s11160_s6] sm:$0xff]  ;;  %v7080_v9 = vld [vmem:[%s11160_s6 + $0x8] sm:$0xff]  ;;  %v7082_v10 = vshrl.u32 %v319_v3, 7  ;;  %v7084_v11 = vand.u32 127, %v319_v3 }
  0x18   : > { %11235 = vst [vmem:[#allocation7_spill] sm:$0xff] %v7045_v2  ;;  %381 = vmatpush.msra.mxu0 %v7070_v7  ;;  %v7090_v12 = vld [vmem:[%s11158_s4 + $0x10] sm:$0xff]  ;;  %s298_s12 = scalar_select %p297_p10, %s7004_s9, 1  ;;  %v7107_v15 = vld [vmem:[%s11158_s4 + $0x8] sm:$0xff]  ;;  %v6915_v16 = vmov 0.0   ;;  %v11250_v18 = vmov 0 }
  0x19   : > { %11236 = vst [vmem:[#allocation8_spill] sm:$0xff] %v7055_v4  ;;  %v7094_v13 = vadd.s32 8, %v7082_v10  ;;  %vm7098_vm1 = vcmp.eq.s32.totalorder %v7082_v10, %v7084_v11  ;;  %v7129_v19 = vld [vmem:[%s11158_s4] sm:$0xff]  ;;  %s11254_s0 = sld [smem:[#allocation40_spill]]  ;;  %v318_v25 = vld [vmem:[%s11161_s7 + $0x8] sm:$0xff]  ;;  %s6917_s21 = smov 96  }
  0x1a   : > { %11237 = vst [vmem:[#allocation9_spill] sm:$0xff] %v7060_v5  ;;  %v11246_v14 = vsel %vm7098_vm1, 4294967295, %v11245_v14  ;;  %v7111_v17 = vsel %vm7098_vm1, 1.0, %v6915_v16  ;;  %382 = vmatpush.msra.mxu0 %v7090_v12  ;;  %s6329_s19 = sshll.u32 %s298_s12, 3  ;;  %v7137_v20 = vld [vmem:[%s11156_s2] sm:$0x1]  ;;  %416 = vmatpush.msra.mxu1 %v318_v25 }
  0x1b   : > { %11238 = vst [vmem:[#allocation10_spill] sm:$0xff] %v7065_v6  ;;  %vm7119_vm7 = vcmp.eq.s32.totalorder %v7094_v13, %v7084_v11  ;;  %v364_v23 = vsub.f32 0.0, %v7137_v20  ;;  %s6916_s12 = smov 32   ;;  %v317_v26 = vld [vmem:[%s11161_s7] sm:$0xff]  ;;  %vm399_vm8 = vcmask 130048   ;;  %v7168_v31 = vld [vmem:[%s11159_s5 + $0x8] sm:$0xff] }
  0x1c   : > { %11239 = vst [vmem:[#allocation11_spill] sm:$0xff] %v7070_v7  ;;  %v11251_v18 = vsel %vm7119_vm7, 4294967295, %v11250_v18  ;;  %v7141_v21 = vsel %vm7119_vm7, 1.0, %v6915_v16  ;;  %383 = vmatpush.msra.mxu0 %v7107_v15  ;;  %417 = vmatpush.msra.mxu1 %v317_v26  ;;  %v7174_v32 = vld [vmem:[%s11159_s5] sm:$0xff]  ;;  %s296_s10 = scalar_lea.vmem [#allocation2], %s7050_s24  ;;  %v7181_v49 = vmov 0.0  }
  0x1d   : > { %11240 = vst [vmem:[#allocation12_spill] sm:$0xff] %v7075_v8  ;;  %v391_v24 = vperm.slane %v364_v23, 0  ;;  %441 = vmatpush.msra.mxu2 %v7168_v31  ;;  %v7183_v50 = vmov inf  }
  0x1e   : > { %11241 = vst [vmem:[#allocation13_spill] sm:$0xff] %v7080_v9  ;;  %384 = vmatpush.msra.mxu0 %v7129_v19 }
  0x1f   : > { %11242 = vst [vmem:[#allocation14_spill] sm:$0xff] %v7082_v10  ;;  %s300_s25 = scalar_lea.vmem %s11254_s0, %s6329_s19  ;;  %392 = vrot.lane.b32.xlu0 %v391_v24, %s6916_s12  ;;  %442 = vmatpush.msra.mxu2 %v7174_v32  ;;  %s7191_s12 = smov 0  }
  0x20   : > { %11243 = vst [vmem:[#allocation15_spill] sm:$0xff] %v7084_v11  ;;  %v7147_v22 = vld [vmem:[%s300_s25] sm:$0xff] }
  0x21   : > { %11244 = vst [vmem:[#allocation16_spill] sm:$0xff] %v7090_v12  ;;  %6332 = vmatmul.msk.f32.vlgmr.msra.gmra.mxu0 %vm11165_vm0, %v7147_v22 }
  0x22   : > { %11247 = vst [vmem:[#allocation17_spill] sm:$0xff] %v11246_v14 }
  0x23   : > { %11248 = vst [vmem:[#allocation18_spill] sm:$0xff] %v7107_v15 }
  0x24   : > { %11249 = vst [vmem:[#allocation19_spill] sm:$0xff] %v7111_v17 }
  0x25   : > { %11252 = vst [vmem:[#allocation20_spill] sm:$0xff] %v11251_v18 }
  0x26   : > { %11253 = vst [vmem:[#allocation21_spill] sm:$0xff] %v7129_v19 }
  0x27   : > { %11255 = vst [vmem:[#allocation22_spill] sm:$0xff] %v7137_v20 }
  0x28   : > { %11256 = vst [vmem:[#allocation23_spill] sm:$0xff] %v7141_v21 }
  0x29   : > { %11257 = vst [vmem:[#allocation24_spill] sm:$0xff] %v7147_v22 }
  0x2a   : > { %11258 = vst [vmem:[#allocation25_spill] sm:$0xff] %v7168_v31 }
  0x2b   : > { %11259 = vst [vmem:[#allocation26_spill] sm:$0xff] %v7174_v32 }
  0x91   : > { %v393_v27 = vpop.permute.xlu0 %392 }
  0x9e   : > { %v386_v28 = vpop.f32.mrf.mxu0 }
  0x9f   : > { %v395_v29 = vsub.f32 %v386_v28, %v393_v27  ;;  %v423_v45 = vsub.f32 0.0, %v386_v28 }
  0xa1   : > { %397 = vrot.lane.b32.xlu0 %v395_v29, %s6917_s21 }
 0x113   : > { %v398_v30 = vpop.permute.xlu0 %397 }
 0x114   : > { %6333 = vmatmul.msk.f32.vlgmr.msra.gmra.mxu1 %vm399_vm8, %v398_v30 }
 0x191   : > { %v419_v33 = vpop.f32.mrf.mxu1 }
 0x192   : > { %v422_v34 = vsub.f32 0.0, %v419_v33 }
 0x194   : > { %6334 = vmatmul.msk.f32.vlgmr.msra.gmra.mxu2 %vm399_vm8, %v422_v34  ;;  %v448_v35 = vsub.f32 -0.0, %v422_v34  ;;  %v458_v37 = vsel %vm399_vm8, %v422_v34, inf }
 0x196   : > { %v449_v36 = vsel %vm399_vm8, %v448_v35, inf }
 0x197   : > { %450 = vmin.xlane.f32.xlu1 %v449_v36 }
 0x19f   : > { %459 = vmin.xlane.f32.xlu1 %v458_v37 }
 0x20a   : > { %v451_v38 = vpop.xlane.xlu1 %450 }
 0x20b   : > { %v453_v39 = vsub.f32 %v448_v35, %v451_v38  ;;  %vm452_vm9 = vcmp.lt.f32.partialorder %v451_v38, 0.0 }
 0x20d   : > { %v454_v40 = vadd.f32 1.0, %v453_v39 }
 0x20f   : > { %v457_v41 = vsel %vm452_vm9, %v454_v40, %v448_v35  }
 0x212   : > { %v460_v42 = vpop.xlane.xlu1 %459 }
 0x213   : > { %v462_v43 = vsub.f32 %v422_v34, %v460_v42  ;;  %vm461_vm10 = vcmp.lt.f32.partialorder %v460_v42, 0.0 }
 0x215   : > { %v463_v44 = vadd.f32 1.0, %v462_v43 }
 0x217   : > { %v466_v46 = vsel %vm461_vm10, %v463_v44, %v422_v34   ;;  %v444_v47 = vpop.f32.mrf.mxu2 }
 0x218   : > { %v447_v48 = vsub.f32 %v423_v45, %v444_v47  }
 0x219 LB: >> { %v11260_v10 = vld [vmem:[#allocation14_spill] sm:$0xff]  ;;  %v11262_v31 = vld [vmem:[#allocation25_spill] sm:$0xff]  ;;  %v11266_v8 = vld [vmem:[#allocation12_spill] sm:$0xff]  ;;  %11267 = vst [vmem:[#allocation27_spill] sm:$0xff] %v6901_v46  ;;  %s6918_s13 = smov 32   ;;  %v536_v51 = vmul.f32 %v6901_v46, %v6905_v41  ;;  %s6919_s18 = smov 16   ;;  %6527 = vrcp.f32 %v6901_v46  ;;  %vm607_vm9 = vweird.f32 %v6901_v46  ;;  %v6893_v49 = vphi %v7181_v49, %v11549_v49   ;;  %s6913_s12 = sphi %s7191_s12, %s472_s12   ;;  %v6909_v48 = vphi %v447_v48, %v6175_v48   ;;  %v6905_v41 = vphi %v457_v41, %v6177_v41   ;;  %v6901_v46 = vphi %v466_v46, %v6227_v46   ;;  %v6897_v50 = vphi %v7183_v50, %v11550_v50  }
 0x21a   : >> { %v11261_v32 = vld [vmem:[#allocation26_spill] sm:$0xff]  ;;  %v11265_v9 = vld [vmem:[#allocation13_spill] sm:$0xff]  ;;  %11268 = vst [vmem:[#allocation28_spill] sm:$0xff] %v6905_v41  ;;  %v11272_v7 = vld [vmem:[#allocation11_spill] sm:$0xff]  ;;  %5146 = vmatpush.msra.mxu3 %v11262_v31  ;;  %526 = vrot.lane.b32.xlu0 %v6905_v41, %s6918_s13  ;;  %vm11280_vm0 = vcmask 261120   ;;  %v11163_v58 = vmov 0  }
 0x21b   : >> { %11269 = vst [vmem:[#allocation29_spill] sm:$0xff] %v6909_v48  ;;  %v11270_v6 = vld [vmem:[#allocation10_spill] sm:$0xff]  ;;  %4874 = vmatpush.msra.mxu2 %v11272_v7  ;;  %v11273_v5 = vld [vmem:[#allocation9_spill] sm:$0xff]  ;;  %v11275_v21 = vld [vmem:[#allocation23_spill] sm:$0xff]  ;;  %v537_v52 = vsel %vm399_vm8, %v536_v51, 0.0  ;;  %6456 = vset.pattern.permute.xlu2 %v11163_v58  ;;  %v613_v59 = vand.u32 2147483648, %v6901_v46 }
 0x21c   : >> { %493 = vmatpush.msra.mxu0 %v11270_v6  ;;  %v11271_v1 = vld [vmem:[#allocation6_spill] sm:$0xff]  ;;  %v11274_v0 = vld [vmem:[#allocation5_spill] sm:$0xff]  ;;  %679 = vrot.lane.b32.xlu2 %v11275_v21, %s6919_s18  ;;  %v11276_v4 = vld [vmem:[#allocation8_spill] sm:$0xff]  ;;  %v611_v61 = vand.u32 2147483647, %v6901_v46  ;;  %s6921_s19 = smov 96  }
 0x21d   : >> { %518 = vmatpush.msra.mxu1 %v11271_v1  ;;  %538 = vadd.xlane.f32.xlu1 %v537_v52  ;;  %v11277_v12 = vld [vmem:[#allocation16_spill] sm:$0xff]  ;;  %v11278_v2 = vld [vmem:[#allocation7_spill] sm:$0xff]  ;;  %v11279_v20 = vld [vmem:[#allocation22_spill] sm:$0xff]  ;;  %v614_v62 = vor.u32 1.1754944e-38, %v613_v59  ;;  %vm11296_vm2 = vcmp.eq.s32.totalorder %v11260_v10, 0  ;;  %vm11302_vm3 = vcmp.eq.s32.totalorder %v11260_v10, 1 }
 0x21e   : >> { %494 = vmatpush.msra.mxu0 %v11273_v5  ;;  %4875 = vmatpush.msra.mxu2 %v11277_v12  ;;  %v531_v53 = vperm.slane %v11279_v20, 0  ;;  %v11281_v15 = vld [vmem:[#allocation18_spill] sm:$0xff]  ;;  %v11282_v19 = vld [vmem:[#allocation21_spill] sm:$0xff]  ;;  %v11283_v17 = vld [vmem:[#allocation19_spill] sm:$0xff]  ;;  %vm612_vm14 = vcmp.eq.f32.partialorder %v611_v61, 8.507059e+37  ;;  %vm11311_vm4 = vcmp.eq.s32.totalorder %v11260_v10, 2 }
 0x21f   : >> { %519 = vmatpush.msra.mxu1 %v11274_v0  ;;  %5147 = vmatpush.msra.mxu3 %v11261_v32  ;;  %v6528_v54 = vpop.eup %6527  ;;  %v11284_v22 = vld [vmem:[#allocation24_spill] sm:$0xff]  ;;  %vm11312_vm5 = vcmp.eq.s32.totalorder %v11260_v10, 3  ;;  %s6936_s20 = smov 112   ;;  %s472_s12 = sadd.s32 1, %s6913_s12  }
 0x220   : >> { %495 = vmatpush.msra.mxu0 %v11276_v4  ;;  %6336 = vmatmul.msk.f32.vlgmr.msra.gmra.mxu1 %vm399_vm8, %v6901_v46  ;;  %v603_v55 = vmul.f32 %v6901_v46, %v6528_v54  ;;  %vm608_vm10 = vweird.f32 %v6528_v54  ;;  %p469_p11 = scmp.ge.s32.totalorder %s472_s12, 20  }
 0x221   : >> { %4876 = vmatpush.msra.mxu2 %v11281_v15  ;;  %5790 = vmatpush.msrb.mxu1 %v11262_v31  ;;  %vm609_vm15 = vmor %vm607_vm9, %vm608_vm10  ;;  %s6341_s21 = sshll.u32 (%p469_p11), %s7004_s9, 3  ;;  %s6242_s26 = sshll.u32 (%p469_p11), %s296_s10, 4  ;;  %s6243_s26 = int_to_ptr.vmem [resolvable:$true] %s6242_s26 }
 0x222   : >> { %496 = vmatpush.msra.mxu0 %v11278_v2  ;;  %532 = vrot.lane.b32.xlu0 %v531_v53, %s6918_s13  ;;  %v604_v56 = vsub.f32 1.0, %v603_v55  ;;  %s6240_s25 = scalar_lea.hbm (%p469_p11), %s11162_s8, %s6341_s21  ;;  %s6230_s12 = scalar_lea.sflag (%p469_p11), [#allocation3], %s294_s17 }
 0x223   : >> { %6335 = vmatmul.msk.f32.vlgmr.msra.gmra.mxu0 %vm11280_vm0, %v6909_v48  ;;  %4877 = vmatpush.msra.mxu2 %v11282_v19  ;;  %s6823_s0 = scalar_lea.hbm (%p469_p11), %s11162_s8, 16 }
 0x224   : >> { %5791 = vmatpush.msrb.mxu1 %v11261_v32  ;;  %v605_v57 = vmul.f32 %v6528_v54, %v604_v56  ;;  %6455 = vset.pattern.permute.xlu1 %v11163_v58 }
 0x225   : >> { %6454 = vset.pattern.permute.xlu0 %v11163_v58 }
 0x226   : >> { %v606_v60 = vadd.f32 %v6528_v54, %v605_v57 }
 0x228   : >> { %v610_v63 = vsel %vm609_vm15, %v6528_v54, %v606_v60 }
 0x229   : >> { %v615_v3 = vsel %vm612_vm14, %v614_v62, %v610_v63 }
 0x22a   : >> { %677 = vrot.lane.b32.xlu0 %v11283_v17, %s6919_s18  ;;  %v616_v16 = vmul.f32 %v6905_v41, %v615_v3 }
 0x22c   : >> { %v620_v24 = vrot.slane %v616_v16, 3  ;;  %v618_v25 = vrot.slane %v616_v16, 1  ;;  %v627_v26 = vperm.slane %v616_v16, 0  ;;  %v623_v30 = vrot.slane %v616_v16, 6 }
 0x22d   : >> { %v619_v36 = vrot.slane %v616_v16, 2  ;;  %v621_v37 = vrot.slane %v616_v16, 4  ;;  %v622_v55 = vrot.slane %v616_v16, 5  ;;  %v624_v59 = vrot.slane %v616_v16, 7 }
 0x22e   : >> { %v7251_v27 = vperm.slane %v620_v24, 0  ;;  %v628_v28 = vperm.slane %v618_v25, 0  ;;  %v643_v33 = vsel %vm7098_vm1, %v627_v26, 0.0  ;;  %v7265_v42 = vperm.slane %v623_v30, 0 }
 0x22f   : >> { %v659_v38 = vadd.f32 %v643_v33, %v11266_v8  ;;  %v629_v43 = vperm.slane %v619_v36, 0  ;;  %v631_v44 = vperm.slane %v621_v37, 0  ;;  %v632_v24 = vperm.slane %v622_v55, 0 }
 0x230   : >> { %v649_v34 = vsel %vm7098_vm1, %v7251_v27, 0.0  ;;  %v645_v35 = vsel %vm7098_vm1, %v628_v28, 0.0  ;;  %v655_v53 = vsel %vm7098_vm1, %v7265_v42, 0.0  ;;  %v634_v30 = vperm.slane %v624_v59, 0 }
 0x231   : >> { %v665_v39 = vadd.f32 %v649_v34, %v11266_v8  ;;  %v661_v40 = vadd.f32 %v645_v35, %v11266_v8  ;;  %v647_v54 = vsel %vm7098_vm1, %v629_v43, 0.0  ;;  %v651_v57 = vsel %vm7098_vm1, %v631_v44, 0.0 }
 0x232   : >> { %v671_v62 = vadd.f32 %v655_v53, %v11266_v8  ;;  %v663_v63 = vadd.f32 %v647_v54, %v11266_v8  ;;  %v667_v3 = vadd.f32 %v651_v57, %v11266_v8  ;;  %v646_v33 = vsel %vm7119_vm7, %v628_v28, 0.0 }
 0x233   : >> { %v653_v36 = vsel %vm7098_vm1, %v632_v24, 0.0  ;;  %v662_v28 = vadd.f32 %v646_v33, %v11265_v9  ;;  %v657_v37 = vsel %vm7098_vm1, %v634_v30, 0.0  ;;  %v644_v54 = vsel %vm7119_vm7, %v627_v26, 0.0 }
 0x234   : >> { %v652_v55 = vsel %vm7119_vm7, %v631_v44, 0.0  ;;  %v648_v59 = vsel %vm7119_vm7, %v629_v43, 0.0  ;;  %v660_v26 = vadd.f32 %v644_v54, %v11265_v9  ;;  %v654_v33 = vsel %vm7119_vm7, %v632_v24, 0.0 }
 0x235   : >> { %v664_v44 = vadd.f32 %v648_v59, %v11265_v9 }
 0x28c   : >> { %v7249_v23 = vpop.permute.xlu0 %526 }
 0x294   : >> { %v7253_v29 = vpop.permute.xlu0 %532 }
 0x29c   : >> { %v678_v45 = vpop.permute.xlu0 %677 }
 0x29d   : >> { %v7268_v47 = vsel %vm399_vm8, %v659_v38, %v678_v45  ;;  %v7271_v51 = vsel %vm399_vm8, %v665_v39, %v678_v45  ;;  %v7274_v52 = vsel %vm399_vm8, %v661_v40, %v678_v45  ;;  %v521_v60 = vpop.f32.mrf.mxu1  ;;  %v7294_v34 = vsel %vm399_vm8, %v671_v62, %v678_v45  ;;  %v680_v38 = vpop.permute.xlu2 %679 }
 0x29e   : >> { %701 = vperm.xlu0 %6454, %v7268_v47   ;;  %716 = vperm.xlu2 %6456, %v7271_v51   ;;  %v7297_v16 = vsel %vm399_vm8, %v663_v63, %v678_v45  ;;  %v7302_v35 = vsel %vm399_vm8, %v667_v3, %v678_v45  ;;  %v669_v39 = vadd.f32 %v653_v36, %v11266_v8  ;;  %v658_v3 = vsel %vm7119_vm7, %v634_v30, 0.0 }
 0x29f   : >> { %706 = vperm.xlu1 %6455, %v7274_v52   ;;  %v673_v40 = vadd.f32 %v657_v37, %v11266_v8  ;;  %v7313_v53 = vsel %vm399_vm8, %v662_v28, %v680_v38  ;;  %v7334_v62 = vsel %vm399_vm8, %v660_v26, %v680_v38  ;;  %v7340_v63 = vsel %vm399_vm8, %v664_v44, %v680_v38 }
 0x2a0   : >> { %v498_v56 = vpop.f32.mrf.mxu0  ;;  %v7320_v57 = vsel %vm399_vm8, %v669_v39, %v678_v45  ;;  %v674_v28 = vadd.f32 %v658_v3, %v11265_v9  ;;  %v670_v37 = vadd.f32 %v654_v33, %v11265_v9  ;;  %v656_v30 = vsel %vm7119_vm7, %v7265_v42, 0.0 }
 0x2a1   : >> { %v522_v61 = vadd.f32 %v521_v60, %v498_v56  ;;  %v7327_v60 = vsel %vm399_vm8, %v673_v40, %v678_v45  ;;  %v650_v45 = vsel %vm7119_vm7, %v7251_v27, 0.0  ;;  %v529_v39 = vadd.f32 %v7249_v23, %v498_v56 }
 0x2a2   : >> { %v666_v36 = vadd.f32 %v650_v45, %v11265_v9  ;;  %v7360_v27 = vsel %vm399_vm8, %v674_v28, %v680_v38  ;;  %v7365_v24 = vsel %vm399_vm8, %v670_v37, %v680_v38  ;;  %v672_v56 = vadd.f32 %v656_v30, %v11265_v9 }
 0x2a3   : >> { %v524_v25 = vadd.f32 %v522_v61, %v11284_v22  ;;  %v668_v61 = vadd.f32 %v652_v55, %v11265_v9  ;;  %v7372_v23 = vsub.f32 %v529_v39, %v7253_v29  ;;  %v6922_v3 = vmov 1  }
 0x2a4   : >> { %v7357_v40 = vsel %vm399_vm8, %v666_v36, %v680_v38  ;;  %v7376_v54 = vsel %vm399_vm8, %v672_v56, %v680_v38 }
 0x2a5   : >> { %6337 = vmatmul.msk.f32.vlgmr.msra.gmra.mxu2 %vm11280_vm0, %v524_v25  ;;  %v7337_v43 = vsel %vm399_vm8, %v668_v61, %v680_v38  ;;  %v542_v55 = vmul.f32 %v7372_v23, %v7372_v23  ;;  %v562_v59 = vmul.f32 %v524_v25, %v524_v25  ;;  %v7388_v61 = vpop.xlane.xlu1 %538 }
 0x2a6   : >> { %731 = vperm.xlu2 %6456, %v7294_v34   ;;  %711 = vperm.xlu0 %6454, %v7297_v16   ;;  %11285 = vst [vmem:[#allocation30_spill] sm:$0xff] %v7388_v61 }
 0x2a7   : >> { %721 = vperm.xlu1 %6455, %v7302_v35   ;;  %v563_v42 = vsel %vm11280_vm0, %v562_v59, 0.0 }
 0x2ae   : >> { %726 = vperm.xlu0 %6454, %v7320_v57   ;;  %866 = vperm.xlu2 %6456, %v7313_v53  }
 0x2af   : >> { %736 = vperm.xlu1 %6455, %v7327_v60  }
 0x2b6   : >> { %861 = vperm.xlu0 %6454, %v7334_v62   ;;  %881 = vperm.xlu2 %6456, %v7337_v43  }
 0x2b7   : >> { %871 = vperm.xlu1 %6455, %v7340_v63  }
 0x2be   : >> { %876 = vperm.xlu0 %6454, %v7357_v40   ;;  %896 = vperm.xlu2 %6456, %v7360_v27  }
 0x2bf   : >> { %886 = vperm.xlu1 %6455, %v7365_v24  }
 0x2c6   : >> { %891 = vperm.xlu0 %6454, %v7376_v54   ;;  %6459 = vset.pattern.permute.xlu2 %v6922_v3 }
 0x2c7   : >> { %544 = vrot.lane.b32.xlu1 %v542_v55, %s6921_s19 }
 0x2c8   : >> { %6457 = vset.pattern.permute.xlu1 %v6922_v3 }
 0x2ce   : >> { %6458 = vset.pattern.permute.xlu0 %v6922_v3 }
 0x2e7   : >> { %564 = vadd.xlane.f32.xlu2 %v563_v42 }
 0x2f8   : >> { %v7382_v26 = vpop.permute.xlu2 %716 }
 0x2f9   : >> { %6529 = vrcp.f32 %v7382_v26  ;;  %v793_v30 = vand.u32 2147483647, %v7382_v26  ;;  %v795_v55 = vand.u32 2147483648, %v7382_v26  ;;  %vm789_vm15 = vweird.f32 %v7382_v26 }
 0x2fb   : >> { %vm7408_vm9 = vcmp.eq.f32.partialorder %v793_v30, 8.507059e+37  ;;  %v796_v4 = vor.u32 1.1754944e-38, %v795_v55 }
 0x2ff   : >> { %v6530_v38 = vpop.eup %6529 }
 0x300   : >> { %v7384_v29 = vpop.permute.xlu2 %731  ;;  %v785_v45 = vmul.f32 %v6530_v38, %v7382_v26  ;;  %vm790_vm14 = vweird.f32 %v6530_v38 }
 0x301   : >> { %6531 = vrcp.f32 %v7384_v29  ;;  %v840_v1 = vand.u32 2147483648, %v7384_v29  ;;  %vm7420_vm0 = vmor %vm789_vm15, %vm790_vm14  ;;  %vm834_vm13 = vweird.f32 %v7384_v29 }
 0x302   : >> { %v786_v33 = vsub.f32 1.0, %v785_v45 }
 0x303   : >> { %v841_v30 = vor.u32 1.1754944e-38, %v840_v1 }
 0x304   : >> { %v787_v39 = vmul.f32 %v6530_v38, %v786_v33  ;;  %v838_v33 = vand.u32 2147483647, %v7384_v29 }
 0x306   : >> { %v788_v42 = vadd.f32 %v6530_v38, %v787_v39  ;;  %vm7434_vm14 = vcmp.eq.f32.partialorder %v838_v33, 8.507059e+37 }
 0x307   : >> { %v7390_v44 = vpop.eup %6531 }
 0x308   : >> { %v830_v25 = vmul.f32 %v7390_v44, %v7384_v29  ;;  %vm835_vm10 = vweird.f32 %v7390_v44  ;;  %v867_v19 = vpop.permute.xlu2 %866 }
 0x309   : >> { %vm7430_vm11 = vmor %vm834_vm13, %vm835_vm10 }
 0x30a   : >> { %v831_v28 = vsub.f32 1.0, %v830_v25 }
 0x30c   : >> { %v832_v56 = vmul.f32 %v7390_v44, %v831_v28 }
 0x30e   : >> { %v833_v39 = vadd.f32 %v7390_v44, %v832_v56  ;;  %v792_v56 = vsel %vm7420_vm0, %v6530_v38, %v788_v42 }
 0x30f   : >> { %v797_v42 = vsel %vm7408_vm9, %v796_v4, %v792_v56 }
 0x310   : >> { %v7395_v36 = vpop.permute.xlu0 %701  ;;  %v837_v12 = vsel %vm7430_vm11, %v7390_v44, %v833_v39 }
 0x311   : >> { %6533 = vrcp.f32 %v7395_v36  ;;  %v7398_v37 = vpop.permute.xlu1 %706  ;;  %v748_v6 = vand.u32 2147483647, %v7395_v36  ;;  %v750_v7 = vand.u32 2147483648, %v7395_v36  ;;  %vm744_vm0 = vweird.f32 %v7395_v36 }
 0x312   : >> { %6535 = vrcp.f32 %v7398_v37  ;;  %vm759_vm6 = vweird.f32 %v7398_v37  ;;  %v842_v58 = vsel %vm7434_vm14, %v841_v30, %v837_v12 }
 0x313   : >> { %vm749_vm10 = vcmp.eq.f32.partialorder %v748_v6, 8.507059e+37  ;;  %v843_v55 = vmul.f32 %v842_v58, %v7294_v34 }
 0x317   : >> { %v6534_v59 = vpop.eup %6533 }
 0x318   : >> { %v6536_v45 = vpop.eup %6535  ;;  %v740_v3 = vmul.f32 %v6534_v59, %v7395_v36  ;;  %v7405_v25 = vpop.permute.xlu0 %711  ;;  %vm745_vm12 = vweird.f32 %v6534_v59 }
 0x319   : >> { %v755_v28 = vmul.f32 %v6536_v45, %v7398_v37  ;;  %v7414_v0 = vpop.permute.xlu1 %721  ;;  %vm760_vm15 = vweird.f32 %v6536_v45  ;;  %vm7445_vm13 = vmor %vm744_vm0, %vm745_vm12 }
 0x31a   : >> { %v741_v2 = vsub.f32 1.0, %v740_v3  ;;  %6537 = vrcp.f32 %v7414_v0  ;;  %v765_v3 = vand.u32 2147483648, %v7398_v37  ;;  %vm761_vm11 = vmor %vm759_vm6, %vm760_vm15  ;;  %vm804_vm15 = vweird.f32 %v7414_v0 }
 0x31b   : >> { %v756_v5 = vsub.f32 1.0, %v755_v28  ;;  %6539 = vrcp.f32 %v7405_v25 }
 0x31c   : >> { %v742_v8 = vmul.f32 %v6534_v59, %v741_v2  ;;  %v763_v2 = vand.u32 2147483647, %v7398_v37  ;;  %v766_v4 = vor.u32 1.1754944e-38, %v765_v3 }
 0x31d   : >> { %v757_v28 = vmul.f32 %v6536_v45, %v756_v5  ;;  %v751_v5 = vor.u32 1.1754944e-38, %v750_v7 }
 0x31e   : >> { %v743_v38 = vadd.f32 %v6534_v59, %v742_v8  ;;  %vm764_vm12 = vcmp.eq.f32.partialorder %v763_v2, 8.507059e+37  ;;  %v7478_v2 = vperm.slane %v843_v55, 0 }
 0x31f   : >> { %v758_v14 = vadd.f32 %v6536_v45, %v757_v28 }
 0x320   : >> { %v7450_v9 = vpop.eup %6537  ;;  %v7453_v1 = vpop.permute.xlu0 %726  ;;  %v747_v8 = vsel %vm7445_vm13, %v6534_v59, %v743_v38  ;;  %v798_v59 = vmul.f32 %v797_v42, %v7271_v51 }
 0x321   : >> { %v800_v6 = vmul.f32 %v7450_v9, %v7414_v0  ;;  %6541 = vrcp.f32 %v7453_v1  ;;  %v7463_v7 = vpop.permute.xlu1 %736  ;;  %v752_v44 = vsel %vm749_vm10, %v751_v5, %v747_v8  ;;  %v762_v39 = vsel %vm761_vm11, %v6536_v45, %v758_v14  ;;  %v7472_v38 = vpop.eup %6539 }
 0x322   : >> { %6543 = vrcp.f32 %v7463_v7  ;;  %v753_v56 = vmul.f32 %v752_v44, %v7268_v47  ;;  %v767_v3 = vsel %vm764_vm12, %v766_v4, %v762_v39  ;;  %v7474_v5 = vperm.slane %v798_v59, 0 }
 0x323   : >> { %v768_v12 = vmul.f32 %v767_v3, %v7274_v52  ;;  %v801_v28 = vsub.f32 1.0, %v800_v6  ;;  %v770_v3 = vmul.f32 %v7472_v38, %v7405_v25  ;;  %v825_v55 = vand.u32 2147483648, %v7453_v1 }
 0x324   : >> { %v7470_v30 = vperm.slane %v753_v56, 0  ;;  %v913_v56 = vmul.f32 %v7474_v5, %v7382_v26  ;;  %v823_v26 = vand.u32 2147483647, %v7453_v1  ;;  %vm805_vm9 = vweird.f32 %v7450_v9 }
 0x325   : >> { %v900_v33 = vperm.slane %v768_v12, 0  ;;  %v802_v58 = vmul.f32 %v7450_v9, %v801_v28  ;;  %v919_v12 = vmul.f32 %v7478_v2, %v7384_v29  ;;  %vm819_vm14 = vweird.f32 %v7453_v1  ;;  %vm806_vm10 = vmor %vm804_vm15, %vm805_vm9 }
 0x326   : >> { %v907_v45 = vmul.f32 %v7470_v30, %v7395_v36  ;;  %vm824_vm13 = vcmp.eq.f32.partialorder %v823_v26, 8.507059e+37  ;;  %vm775_vm9 = vweird.f32 %v7472_v38  ;;  %vm774_vm15 = vweird.f32 %v7405_v25 }
 0x327   : >> { %v6542_v14 = vpop.eup %6541  ;;  %v909_v4 = vmul.f32 %v900_v33, %v7398_v37 }
 0x328   : >> { %v7480_v42 = vpop.eup %6543  ;;  %v815_v8 = vmul.f32 %v6542_v14, %v7453_v1  ;;  %v923_v39 = vsub.f32 %v7268_v47, %v907_v45  ;;  %vm820_vm6 = vweird.f32 %v6542_v14  ;;  %v803_v45 = vadd.f32 %v7450_v9, %v802_v58  ;;  %v862_v26 = vpop.permute.xlu0 %861 }
 0x329   : >> { %v845_v6 = vmul.f32 %v7480_v42, %v7463_v7  ;;  %v7487_v44 = vpop.permute.xlu1 %871  ;;  %v925_v36 = vsub.f32 %v7274_v52, %v909_v4  ;;  %vm821_vm0 = vmor %vm819_vm14, %vm820_vm6  ;;  %v826_v4 = vor.u32 1.1754944e-38, %v825_v55  ;;  %v935_v58 = vsub.f32 %v7294_v34, %v919_v12 }
 0x32a   : >> { %v816_v59 = vsub.f32 1.0, %v815_v8  ;;  %v7498_v37 = vsel %vm11296_vm2, %v7470_v30, %v923_v39  ;;  %v810_v8 = vand.u32 2147483648, %v7414_v0  ;;  %v929_v39 = vsub.f32 %v7271_v51, %v913_v56 }
 0x32b   : >> { %961 = vperm.xlu1 %6457, %v7498_v37   ;;  %v7506_v47 = vsel %vm11296_vm2, %v900_v33, %v925_v36  ;;  %v846_v28 = vsub.f32 1.0, %v845_v6  ;;  %v771_v6 = vsub.f32 1.0, %v770_v3  ;;  %v807_v18 = vsel %vm806_vm10, %v7450_v9, %v803_v45 }
 0x32c   : >> { %v817_v52 = vmul.f32 %v6542_v14, %v816_v59  ;;  %966 = vperm.xlu0 %6458, %v7506_v47   ;;  %v808_v59 = vand.u32 2147483647, %v7414_v0  ;;  %v811_v20 = vor.u32 1.1754944e-38, %v810_v8  ;;  %v7526_v51 = vsel %vm11296_vm2, %v7474_v5, %v929_v39 }
 0x32d   : >> { %v847_v15 = vmul.f32 %v7480_v42, %v846_v28  ;;  %v772_v34 = vmul.f32 %v7472_v38, %v771_v6  ;;  %v7535_v9 = vsel %vm11296_vm2, %v7478_v2, %v935_v58  ;;  %vm850_vm12 = vweird.f32 %v7480_v42 }
 0x32e   : >> { %v818_v29 = vadd.f32 %v6542_v14, %v817_v52  ;;  %vm809_vm11 = vcmp.eq.f32.partialorder %v808_v59, 8.507059e+37  ;;  %v855_v3 = vand.u32 2147483648, %v7463_v7  ;;  %vm849_vm6 = vweird.f32 %v7463_v7 }
 0x32f   : >> { %v812_v56 = vsel %vm809_vm11, %v811_v20, %v807_v18  ;;  %v910_v28 = vmul.f32 %v900_v33, %v867_v19  ;;  %v853_v8 = vand.u32 2147483647, %v7463_v7  ;;  %v773_v18 = vadd.f32 %v7472_v38, %v772_v34  ;;  %vm7549_vm14 = vmor %vm849_vm6, %vm850_vm12 }
 0x330   : >> { %v822_v36 = vsel %vm821_vm0, %v6542_v14, %v818_v29  ;;  %v813_v45 = vmul.f32 %v812_v56, %v7302_v35  ;;  %v856_v33 = vor.u32 1.1754944e-38, %v855_v3  ;;  %vm776_vm0 = vmor %vm774_vm15, %vm775_vm9  ;;  %v908_v34 = vmul.f32 %v7470_v30, %v862_v26 }
 0x331   : >> { %v827_v17 = vsel %vm824_vm13, %v826_v4, %v822_v36  ;;  %v7519_v52 = vpop.permute.xlu1 %886  ;;  %v778_v4 = vand.u32 2147483647, %v7405_v25  ;;  %v7566_v59 = vsub.f32 %v7313_v53, %v910_v28  ;;  %vm854_vm13 = vcmp.eq.f32.partialorder %v853_v8, 8.507059e+37  ;;  %v882_v36 = vpop.permute.xlu2 %881 }
 0x332   : >> { %v828_v55 = vmul.f32 %v827_v17, %v7320_v57  ;;  %v848_v17 = vadd.f32 %v7480_v42, %v847_v15  ;;  %v903_v6 = vperm.slane %v813_v45, 0  ;;  %v877_v53 = vpop.permute.xlu0 %876 }
 0x333   : >> { %976 = vperm.xlu1 %6457, %v7526_v51   ;;  %vm779_vm10 = vcmp.eq.f32.partialorder %v778_v4, 8.507059e+37  ;;  %v914_v8 = vmul.f32 %v7474_v5, %v877_v53 }
 0x334   : >> { %v7529_v14 = vperm.slane %v828_v55, 0  ;;  %991 = vperm.xlu0 %6458, %v7535_v9   ;;  %v852_v19 = vsel %vm7549_vm14, %v7480_v42, %v848_v17  ;;  %v777_v42 = vsel %vm776_vm0, %v7472_v38, %v773_v18  ;;  %v916_v17 = vmul.f32 %v903_v6, %v882_v36 }
 0x335   : >> { %v857_v58 = vsel %vm854_vm13, %v856_v33, %v852_v19 }
 0x336   : >> { %v917_v12 = vmul.f32 %v7529_v14, %v7453_v1  ;;  %v780_v1 = vand.u32 2147483648, %v7405_v25  ;;  %v858_v3 = vmul.f32 %v857_v58, %v7327_v60  ;;  %v7578_v38 = vsub.f32 %v7337_v43, %v916_v17 }
 0x338   : >> { %v933_v15 = vsub.f32 %v7320_v57, %v917_v12  ;;  %v781_v55 = vor.u32 1.1754944e-38, %v780_v1  ;;  %v7574_v12 = vsub.f32 %v7334_v62, %v908_v34  ;;  %v906_v45 = vperm.slane %v858_v3, 0 }
 0x339   : >> { %v545_v29 = vpop.permute.xlu1 %544  ;;  %v897_v30 = vpop.permute.xlu2 %896 }
 0x33a   : >> { %v547_v39 = vsel %vm399_vm8, %v545_v29, 0.0  ;;  %v7563_v57 = vsel %vm11296_vm2, %v7529_v14, %v933_v15  ;;  %v782_v56 = vsel %vm779_vm10, %v781_v55, %v777_v42  ;;  %v922_v18 = vmul.f32 %v906_v45, %v897_v30  ;;  %v892_v20 = vpop.permute.xlu0 %891 }
 0x33b   : >> { %548 = vadd.xlane.f32.xlu2 %v547_v39  ;;  %986 = vperm.xlu1 %6457, %v7563_v57   ;;  %v783_v28 = vmul.f32 %v782_v56, %v7297_v16  ;;  %v7584_v15 = vsub.f32 %v7357_v40, %v914_v8  ;;  %v920_v43 = vmul.f32 %v7478_v2, %v892_v20 }
 0x33c   : >> { %1126 = vperm.xlu0 %6458, %v7566_v59   ;;  %v7588_v1 = vsub.f32 %v7360_v27, %v922_v18 }
 0x33d   : >> { %v901_v26 = vperm.slane %v783_v28, 0  ;;  %v7595_v5 = vsub.f32 %v7376_v54, %v920_v43 }
 0x33f   : >> { %v911_v62 = vmul.f32 %v901_v26, %v7405_v25  ;;  %v915_v25 = vmul.f32 %v903_v6, %v7414_v0  ;;  %v912_v0 = vmul.f32 %v901_v26, %v7487_v44  ;;  %v6923_v44 = vmov 2  }
 0x341   : >> { %v927_v29 = vsub.f32 %v7297_v16, %v911_v62  ;;  %v931_v27 = vsub.f32 %v7302_v35, %v915_v25  ;;  %v921_v16 = vmul.f32 %v906_v45, %v7463_v7  ;;  %v7619_v35 = vsub.f32 %v7340_v63, %v912_v0 }
 0x342   : >> { %v918_v7 = vmul.f32 %v7529_v14, %v7519_v52 }
 0x343   : >> { %1121 = vperm.xlu1 %6457, %v7574_v12   ;;  %v7599_v40 = vsel %vm11296_vm2, %v901_v26, %v927_v29  ;;  %v7607_v2 = vsel %vm11296_vm2, %v903_v6, %v931_v27  ;;  %v937_v54 = vsub.f32 %v7327_v60, %v921_v16 }
 0x344   : >> { %1141 = vperm.xlu0 %6458, %v7578_v38   ;;  %v7625_v33 = vsub.f32 %v7365_v24, %v918_v7 }
 0x345   : >> { %v7614_v19 = vsel %vm11296_vm2, %v906_v45, %v937_v54 }
 0x34b   : >> { %1136 = vperm.xlu1 %6457, %v7584_v15  }
 0x34c   : >> { %1156 = vperm.xlu0 %6458, %v7588_v1  }
 0x353   : >> { %971 = vperm.xlu2 %6459, %v7599_v40   ;;  %1151 = vperm.xlu1 %6457, %v7595_v5  }
 0x354   : >> { %6462 = vset.pattern.permute.xlu0 %v6923_v44 }
 0x35a   : >> { %v7628_v60 = vpop.xlane.xlu2 %564 }
 0x35b   : >> { %981 = vperm.xlu2 %6459, %v7607_v2   ;;  %6545 = vrsqrt.f32 %v7628_v60  ;;  %6461 = vset.pattern.permute.xlu1 %v6923_v44 }
 0x361   : >> { %v6546_v63 = vpop.eup %6545 }
 0x362   : >> { %v567_v24 = vmul.f32 %v6546_v63, %v7628_v60 }
 0x363   : >> { %996 = vperm.xlu2 %6459, %v7614_v19  }
 0x364   : >> { %v568_v58 = vmul.f32 %v6546_v63, %v567_v24 }
 0x366   : >> { %v569_v26 = vmul.f32 0.5, %v568_v58  ;;  %v11177_v58 = vand.u32 2147483647, %v7388_v61 }
 0x36b   : >> { %1131 = vperm.xlu2 %6459, %v7619_v35  }
 0x373   : >> { %1146 = vperm.xlu2 %6459, %v7625_v33  }
 0x37b   : >> { %6460 = vset.pattern.permute.xlu2 %v6923_v44 }
 0x39d   : >> { %v962_v4 = vpop.permute.xlu1 %961 }
 0x39e   : >> { %v7631_v39 = vpop.permute.xlu0 %966  ;;  %6547 = vrcp.f32 %v962_v4  ;;  %v1008_v56 = vand.u32 2147483647, %v962_v4  ;;  %v1010_v17 = vand.u32 2147483648, %v962_v4  ;;  %vm1004_vm6 = vweird.f32 %v962_v4 }
 0x39f   : >> { %6549 = vrcp.f32 %v7631_v39  ;;  %v1025_v3 = vand.u32 2147483648, %v7631_v39  ;;  %v1023_v30 = vand.u32 2147483647, %v7631_v39  ;;  %vm1019_vm9 = vweird.f32 %v7631_v39 }
 0x3a0   : >> { %vm1009_vm15 = vcmp.eq.f32.partialorder %v1008_v56, 8.507059e+37  ;;  %v1011_v20 = vor.u32 1.1754944e-38, %v1010_v17 }
 0x3a1   : >> { %v1026_v29 = vor.u32 1.1754944e-38, %v1025_v3  ;;  %vm1024_vm13 = vcmp.eq.f32.partialorder %v1023_v30, 8.507059e+37 }
 0x3a4   : >> { %v6548_v52 = vpop.eup %6547 }
 0x3a5   : >> { %v6550_v14 = vpop.eup %6549  ;;  %v1000_v6 = vmul.f32 %v6548_v52, %v962_v4  ;;  %v7635_v36 = vpop.permute.xlu1 %976  ;;  %vm1005_vm11 = vweird.f32 %v6548_v52 }
 0x3a6   : >> { %v1015_v42 = vmul.f32 %v6550_v14, %v7631_v39  ;;  %6551 = vrcp.f32 %v7635_v36  ;;  %v7640_v28 = vpop.permute.xlu0 %991  ;;  %vm1020_vm12 = vweird.f32 %v6550_v14  ;;  %vm1006_vm14 = vmor %vm1004_vm6, %vm1005_vm11  ;;  %v1053_v56 = vand.u32 2147483647, %v7635_v36 }
 0x3a7   : >> { %v1001_v55 = vsub.f32 1.0, %v1000_v6  ;;  %6553 = vrcp.f32 %v7640_v28  ;;  %vm1021_vm0 = vmor %vm1019_vm9, %vm1020_vm12  ;;  %v570_v6 = vsub.f32 1.5, %v569_v26  ;;  %vm1049_vm11 = vweird.f32 %v7635_v36 }
 0x3a8   : >> { %v1016_v34 = vsub.f32 1.0, %v1015_v42  ;;  %vm1054_vm6 = vcmp.eq.f32.partialorder %v1053_v56, 8.507059e+37 }
 0x3a9   : >> { %v1002_v53 = vmul.f32 %v6548_v52, %v1001_v55  ;;  %v571_v30 = vmul.f32 %v6546_v63, %v570_v6 }
 0x3aa   : >> { %v1017_v45 = vmul.f32 %v6550_v14, %v1016_v34 }
 0x3ab   : >> { %v1003_v8 = vadd.f32 %v6548_v52, %v1002_v53 }
 0x3ac   : >> { %v6552_v18 = vpop.eup %6551  ;;  %v1018_v62 = vadd.f32 %v6550_v14, %v1017_v45 }
 0x3ad   : >> { %v1045_v43 = vmul.f32 %v6552_v18, %v7635_v36  ;;  %v7646_v25 = vpop.permute.xlu1 %986  ;;  %v1007_v16 = vsel %vm1006_vm14, %v6548_v52, %v1003_v8  ;;  %vm1050_vm10 = vweird.f32 %v6552_v18  ;;  %v1055_v52 = vand.u32 2147483648, %v7635_v36  ;;  %v7661_v17 = vpop.eup %6553 }
 0x3ae   : >> { %v7648_v27 = vpop.xlane.xlu2 %548  ;;  %v1022_v54 = vsel %vm1021_vm0, %v6550_v14, %v1018_v62  ;;  %6555 = vrcp.f32 %v7646_v25  ;;  %v1012_v0 = vsel %vm1009_vm15, %v1011_v20, %v1007_v16  ;;  %vm7667_vm12 = vmor %vm1049_vm11, %vm1050_vm10  ;;  %v7673_v62 = vmul.f32 0.0625, %v11177_v58 }
 0x3af   : >> { %v1046_v7 = vsub.f32 1.0, %v1045_v43  ;;  %v1027_v44 = vsel %vm1024_vm13, %v1026_v29, %v1022_v54  ;;  %6557 = vrsqrt.f32 %v7648_v27  ;;  %v1013_v24 = vmul.f32 %v1012_v0, %v7498_v37 }
 0x3b0   : >> { %v1028_v42 = vmul.f32 %v1027_v44, %v7506_v47  ;;  %11301 = vst [vmem:[#allocation31_spill] sm:$0xff] %v7673_v62  ;;  %v1056_v16 = vor.u32 1.1754944e-38, %v1055_v52  ;;  %vm1079_vm14 = vweird.f32 %v7646_v25  ;;  %vm573_vm15 = vcmp.eq.f32.partialorder %v7628_v60, inf }
 0x3b1   : >> { %v7655_v55 = vperm.slane %v1013_v24, 1  ;;  %v1047_v34 = vmul.f32 %v6552_v18, %v1046_v7  ;;  %vm575_vm13 = vcmp.eq.f32.partialorder %v7628_v60, 0.0 }
 0x3b2   : >> { %v7658_v14 = vperm.slane %v1028_v42, 1 }
 0x3b3   : >> { %v1167_v3 = vmul.f32 %v7655_v55, %v962_v4  ;;  %v1048_v53 = vadd.f32 %v6552_v18, %v1047_v34 }
 0x3b4   : >> { %v6556_v45 = vpop.eup %6555  ;;  %v1169_v26 = vmul.f32 %v7658_v14, %v7631_v39  ;;  %v1090_v39 = vmul.f32 %v7661_v17, %v7640_v28 }
 0x3b5   : >> { %v6558_v20 = vpop.eup %6557  ;;  %v1075_v43 = vmul.f32 %v6556_v45, %v7646_v25  ;;  %v1183_v29 = vsub.f32 %v7498_v37, %v1167_v3  ;;  %v1052_v63 = vsel %vm7667_vm12, %v6552_v18, %v1048_v53  ;;  %v572_v18 = vmul.f32 %v571_v30, %v7628_v60 }
 0x3b6   : >> { %v7676_v4 = vpop.permute.xlu2 %971  ;;  %v551_v54 = vmul.f32 %v6558_v20, %v7648_v27  ;;  %v1185_v7 = vsub.f32 %v7506_v47, %v1169_v26  ;;  %v1057_v37 = vsel %vm1054_vm6, %v1056_v16, %v1052_v63  ;;  %vm1080_vm9 = vweird.f32 %v6556_v45 }
 0x3b7   : >> { %6559 = vrcp.f32 %v7676_v4  ;;  %v1076_v0 = vsub.f32 1.0, %v1075_v43  ;;  %v7689_v44 = vsel %vm11302_vm3, %v7655_v55, %v1183_v29  ;;  %v1058_v6 = vmul.f32 %v1057_v37, %v7526_v51  ;;  %vm7711_vm0 = vmor %vm1079_vm14, %vm1080_vm9 }
 0x3b8   : >> { %v552_v24 = vmul.f32 %v6558_v20, %v551_v54  ;;  %1221 = vperm.xlu2 %6460, %v7689_v44   ;;  %v7697_v42 = vsel %vm11302_vm3, %v7658_v14, %v1185_v7  ;;  %v1085_v47 = vand.u32 2147483648, %v7646_v25  ;;  %v1091_v52 = vsub.f32 1.0, %v1090_v39 }
 0x3b9   : >> { %v1077_v34 = vmul.f32 %v6556_v45, %v1076_v0  ;;  %1226 = vperm.xlu1 %6461, %v7697_v42   ;;  %v7701_v3 = vperm.slane %v1058_v6, 1  ;;  %v1083_v53 = vand.u32 2147483647, %v7646_v25  ;;  %v7707_v26 = vmul.f32 16.0, %v7673_v62 }
 0x3ba   : >> { %v553_v56 = vmul.f32 0.5, %v552_v24  ;;  %v576_v16 = vand.u32 2147483648, %v7628_v60  ;;  %v1086_v7 = vor.u32 1.1754944e-38, %v1085_v47  ;;  %v574_v37 = vsel %vm573_vm15, %v7628_v60, %v572_v18 }
 0x3bb   : >> { %v1078_v30 = vadd.f32 %v6556_v45, %v1077_v34  ;;  %v1173_v29 = vmul.f32 %v7701_v3, %v7635_v36  ;;  %v1092_v24 = vmul.f32 %v7661_v17, %v1091_v52  ;;  %vm1084_vm10 = vcmp.eq.f32.partialorder %v1083_v53, 8.507059e+37 }
 0x3bc   : >> { %v554_v43 = vsub.f32 1.5, %v553_v56  ;;  %v1098_v34 = vand.u32 2147483647, %v7640_v28  ;;  %v1100_v56 = vand.u32 2147483648, %v7640_v28  ;;  %v1040_v47 = vand.u32 2147483648, %v7676_v4 }
 0x3bd   : >> { %v6560_v8 = vpop.eup %6559  ;;  %v1082_v0 = vsel %vm7711_vm0, %v6556_v45, %v1078_v30  ;;  %v1189_v36 = vsub.f32 %v7526_v51, %v1173_v29  ;;  %v1038_v52 = vand.u32 2147483647, %v7676_v4  ;;  %v577_v53 = vsel %vm575_vm13, %v576_v16, %v574_v37  ;;  %v1122_v30 = vpop.permute.xlu1 %1121 }
 0x3be   : >> { %v1030_v39 = vmul.f32 %v6560_v8, %v7676_v4  ;;  %v7718_v54 = vpop.permute.xlu2 %981  ;;  %v1087_v58 = vsel %vm1084_vm10, %v1086_v7, %v1082_v0  ;;  %v555_v21 = vmul.f32 %v6558_v20, %v554_v43  ;;  %vm1035_vm11 = vweird.f32 %v6560_v8 }
 0x3bf   : >> { %6561 = vrcp.f32 %v7718_v54  ;;  %v7731_v45 = vsel %vm11302_vm3, %v7701_v3, %v1189_v36  ;;  %v1088_v18 = vmul.f32 %v1087_v58, %v7563_v57  ;;  %v1093_v20 = vadd.f32 %v7661_v17, %v1092_v24 }
 0x3c0   : >> { %v1031_v6 = vsub.f32 1.0, %v1030_v39  ;;  %1236 = vperm.xlu2 %6460, %v7731_v45   ;;  %vm1094_vm12 = vweird.f32 %v7640_v28  ;;  %vm1095_vm6 = vweird.f32 %v7661_v17  ;;  %vm7744_vm9 = vcmp.eq.f32.partialorder %v1098_v34, 8.507059e+37 }
 0x3c1   : >> { %v7742_v43 = vperm.slane %v1088_v18, 1  ;;  %v1101_v29 = vor.u32 1.1754944e-38, %v1100_v56  ;;  %vm1034_vm14 = vweird.f32 %v7676_v4  ;;  %v556_v60 = vmul.f32 %v555_v21, %v7648_v27  ;;  %vm7758_vm13 = vmor %vm1094_vm12, %vm1095_vm6 }
 0x3c2   : >> { %v1032_v51 = vmul.f32 %v6560_v8, %v1031_v6  ;;  %vm1036_vm15 = vmor %vm1034_vm14, %vm1035_vm11  ;;  %v1041_v0 = vor.u32 1.1754944e-38, %v1040_v47  ;;  %vm557_vm0 = vcmp.eq.f32.partialorder %v7648_v27, inf  ;;  %v1168_v7 = vmul.f32 %v7655_v55, %v1122_v30 }
 0x3c3   : >> { %v1177_v16 = vmul.f32 %v7742_v43, %v7646_v25  ;;  %vm1039_vm10 = vcmp.eq.f32.partialorder %v1038_v52, 8.507059e+37  ;;  %v1097_v25 = vsel %vm7758_vm13, %v7661_v17, %v1093_v20  ;;  %vm559_vm11 = vcmp.eq.f32.partialorder %v7648_v27, 0.0 }
 0x3c4   : >> { %v1033_v63 = vadd.f32 %v6560_v8, %v1032_v51  ;;  %v560_v18 = vand.u32 2147483648, %v7648_v27  ;;  %v1068_v47 = vand.u32 2147483647, %v7718_v54  ;;  %v1070_v17 = vand.u32 2147483648, %v7718_v54 }
 0x3c5   : >> { %v6562_v39 = vpop.eup %6561  ;;  %v1193_v55 = vsub.f32 %v7563_v57, %v1177_v16  ;;  %v558_v57 = vsel %vm557_vm0, %v7648_v27, %v556_v60  ;;  %v1102_v20 = vsel %vm7744_vm9, %v1101_v29, %v1097_v25  ;;  %vm1064_vm6 = vweird.f32 %v7718_v54  ;;  %v1137_v29 = vpop.permute.xlu1 %1136 }
 0x3c6   : >> { %v1060_v37 = vmul.f32 %v6562_v39, %v7718_v54  ;;  %v7762_v24 = vpop.permute.xlu2 %996  ;;  %v1037_v21 = vsel %vm1036_vm15, %v6560_v8, %v1033_v63  ;;  %vm1065_vm12 = vweird.f32 %v6562_v39  ;;  %v561_v30 = vsel %vm559_vm11, %v560_v18, %v558_v57 }
 0x3c7   : >> { %6563 = vrcp.f32 %v7762_v24  ;;  %v1042_v6 = vsel %vm1039_vm10, %v1041_v0, %v1037_v21  ;;  %v7775_v8 = vsel %vm11302_vm3, %v7742_v43, %v1193_v55  ;;  %v578_v63 = vadd.f32 %v577_v53, %v561_v30  ;;  %vm1066_vm14 = vmor %vm1064_vm6, %vm1065_vm12 }
 0x3c8   : >> { %v1061_v34 = vsub.f32 1.0, %v1060_v37  ;;  %v1043_v56 = vmul.f32 %v1042_v6, %v7599_v40  ;;  %1246 = vperm.xlu2 %6460, %v7775_v8   ;;  %vm1069_vm15 = vcmp.eq.f32.partialorder %v1068_v47, 8.507059e+37  ;;  %v1071_v27 = vor.u32 1.1754944e-38, %v1070_v17 }
 0x3c9   : >> { %v580_v60 = vadd.f32 %v7707_v26, %v578_v63  ;;  %v7794_v58 = vsub.f32 %v7574_v12, %v1168_v7  ;;  %v1103_v53 = vmul.f32 %v1102_v20, %v7535_v9  ;;  %v1115_v12 = vand.u32 2147483648, %v7762_v24 }
 0x3ca   : >> { %v7783_v51 = vperm.slane %v1043_v56, 1  ;;  %v1062_v52 = vmul.f32 %v6562_v39, %v1061_v34  ;;  %v1113_v34 = vand.u32 2147483647, %v7762_v24  ;;  %v1174_v18 = vmul.f32 %v7701_v3, %v1137_v29 }
 0x3cb   : >> { %vm581_vm9 = vcmp.lt.f32.partialorder %v580_v60, %v6897_v50  ;;  %v1165_v56 = vperm.slane %v1103_v53, 1  ;;  %vm1109_vm13 = vweird.f32 %v7762_v24  ;;  %v1116_v57 = vor.u32 1.1754944e-38, %v1115_v12 }
 0x3cc   : >> { %v1171_v16 = vmul.f32 %v7783_v51, %v7676_v4  ;;  %v1063_v0 = vadd.f32 %v6562_v39, %v1062_v52  ;;  %v7805_v50 = vsel %vm581_vm9, %v580_v60, %v6897_v50   ;;  %v7811_v49 = vsel %vm581_vm9, %v6909_v48, %v6893_v49  }
 0x3cd   : >> { %v6564_v37 = vpop.eup %6563  ;;  %11309 = vst [vmem:[#allocation32_spill] sm:$0xff] %v7805_v50  ;;  %vm1114_vm11 = vcmp.eq.f32.partialorder %v1113_v34, 8.507059e+37  ;;  %v7820_v20 = vsub.f32 %v7584_v15, %v1174_v18  ;;  %v1179_v3 = vmul.f32 %v1165_v56, %v7640_v28 }
 0x3ce   : >> { %v1105_v36 = vmul.f32 %v6564_v37, %v7762_v24  ;;  %v1187_v21 = vsub.f32 %v7599_v40, %v1171_v16  ;;  %v1067_v55 = vsel %vm1066_vm14, %v6562_v39, %v1063_v0  ;;  %11310 = vst [vmem:[#allocation33_spill] sm:$0xff] %v7811_v49  ;;  %vm1110_vm0 = vweird.f32 %v6564_v37  ;;  %v1152_v16 = vpop.permute.xlu1 %1151  ;;  %v1132_v60 = vpop.permute.xlu2 %1131 }
 0x3cf   : >> { %v1072_v25 = vsel %vm1069_vm15, %v1071_v27, %v1067_v55  ;;  %vm1111_vm10 = vmor %vm1109_vm13, %vm1110_vm0  ;;  %v1180_v0 = vmul.f32 %v1165_v56, %v1152_v16  ;;  %v1127_v27 = vpop.permute.xlu0 %1126 }
 0x3d0   : >> { %v1106_v4 = vsub.f32 1.0, %v1105_v36  ;;  %v7801_v6 = vsel %vm11302_vm3, %v7783_v51, %v1187_v21  ;;  %v1073_v26 = vmul.f32 %v1072_v25, %v7607_v2  ;;  %1381 = vperm.xlu2 %6460, %v7794_v58  }
 0x3d1   : >> { %1231 = vperm.xlu0 %6462, %v7801_v6   ;;  %v7834_v21 = vsub.f32 %v7595_v5, %v1180_v0 }
 0x3d2   : >> { %v1163_v39 = vperm.slane %v1073_v26, 1  ;;  %v1107_v7 = vmul.f32 %v6564_v37, %v1106_v4 }
 0x3d4   : >> { %v1175_v47 = vmul.f32 %v1163_v39, %v7718_v54  ;;  %v1108_v17 = vadd.f32 %v6564_v37, %v1107_v7 }
 0x3d6   : >> { %v1191_v52 = vsub.f32 %v7607_v2, %v1175_v47  ;;  %v1112_v49 = vsel %vm1111_vm10, %v6564_v37, %v1108_v17  ;;  %v1195_v37 = vsub.f32 %v7535_v9, %v1179_v3  ;;  %v1170_v9 = vmul.f32 %v7658_v14, %v1127_v27  ;;  %v1147_v53 = vpop.permute.xlu2 %1146 }
 0x3d7   : >> { %v1117_v30 = vsel %vm1114_vm11, %v1116_v57, %v1112_v49  ;;  %v1142_v29 = vpop.permute.xlu0 %1141  ;;  %v1178_v25 = vmul.f32 %v7742_v43, %v1147_v53  ;;  %v6924_v43 = vmov 3  }
 0x3d8   : >> { %v7824_v63 = vsel %vm11302_vm3, %v1163_v39, %v1191_v52  ;;  %v1118_v54 = vmul.f32 %v1117_v30, %v7614_v19  ;;  %1396 = vperm.xlu2 %6460, %v7820_v20   ;;  %v7838_v28 = vsel %vm11302_vm3, %v1165_v56, %v1195_v37  ;;  %v7850_v5 = vsub.f32 %v7566_v59, %v1170_v9 }
 0x3d9   : >> { %1241 = vperm.xlu1 %6461, %v7824_v63   ;;  %v1176_v4 = vmul.f32 %v1163_v39, %v1142_v29  ;;  %v7859_v26 = vsub.f32 %v7625_v33, %v1178_v25 }
 0x3da   : >> { %v1166_v2 = vperm.slane %v1118_v54, 1 }
 0x3db   : >> { %v7862_v14 = vsub.f32 %v7578_v38, %v1176_v4 }
 0x3dc   : >> { %v1181_v15 = vmul.f32 %v1166_v2, %v7762_v24 }
 0x3de   : >> { %v1197_v36 = vsub.f32 %v7614_v19, %v1181_v15  ;;  %v1172_v19 = vmul.f32 %v7783_v51, %v1132_v60 }
 0x3df   : >> { %v1157_v59 = vpop.permute.xlu0 %1156 }
 0x3e0   : >> { %v7842_v55 = vsel %vm11302_vm3, %v1166_v2, %v1197_v36  ;;  %1411 = vperm.xlu2 %6460, %v7834_v21   ;;  %v7853_v24 = vsub.f32 %v7619_v35, %v1172_v19  ;;  %v1182_v35 = vmul.f32 %v1166_v2, %v1157_v59 }
 0x3e1   : >> { %1251 = vperm.xlu1 %6461, %v7838_v28   ;;  %1256 = vperm.xlu0 %6462, %v7842_v55  }
 0x3e2   : >> { %v7867_v51 = vsub.f32 %v7588_v1, %v1182_v35 }
 0x3e8   : >> { %6464 = vset.pattern.permute.xlu2 %v6924_v43 }
 0x3e9   : >> { %1386 = vperm.xlu1 %6461, %v7850_v5   ;;  %1391 = vperm.xlu0 %6462, %v7853_v24  }
 0x3f1   : >> { %1401 = vperm.xlu1 %6461, %v7862_v14   ;;  %1406 = vperm.xlu0 %6462, %v7859_v26  }
 0x3f9   : >> { %1416 = vperm.xlu1 %6461, %v7867_v51   ;;  %6463 = vset.pattern.permute.xlu0 %v6924_v43 }
 0x401   : >> { %6465 = vset.pattern.permute.xlu1 %v6924_v43 }
 0x412   : >> { %v1222_v12 = vpop.permute.xlu2 %1221 }
 0x413   : >> { %6565 = vrcp.f32 %v1222_v12  ;;  %v1270_v34 = vand.u32 2147483648, %v1222_v12  ;;  %v1268_v18 = vand.u32 2147483647, %v1222_v12  ;;  %vm1264_vm6 = vweird.f32 %v1222_v12 }
 0x415   : >> { %v1271_v47 = vor.u32 1.1754944e-38, %v1270_v34  ;;  %vm1269_vm15 = vcmp.eq.f32.partialorder %v1268_v18, 8.507059e+37 }
 0x419   : >> { %v6566_v33 = vpop.eup %6565 }
 0x41a   : >> { %v1260_v38 = vmul.f32 %v6566_v33, %v1222_v12  ;;  %v7870_v39 = vpop.permute.xlu2 %1236  ;;  %vm1265_vm12 = vweird.f32 %v6566_v33 }
 0x41b   : >> { %6567 = vrcp.f32 %v7870_v39  ;;  %vm1266_vm14 = vmor %vm1264_vm6, %vm1265_vm12  ;;  %vm1309_vm12 = vweird.f32 %v7870_v39  ;;  %v1313_v34 = vand.u32 2147483647, %v7870_v39 }
 0x41c   : >> { %v1261_v7 = vsub.f32 1.0, %v1260_v38 }
 0x41e   : >> { %v1262_v56 = vmul.f32 %v6566_v33, %v1261_v7 }
 0x420   : >> { %v1263_v1 = vadd.f32 %v6566_v33, %v1262_v56 }
 0x421   : >> { %v6568_v30 = vpop.eup %6567 }
 0x422   : >> { %v1267_v17 = vsel %vm1266_vm14, %v6566_v33, %v1263_v1  ;;  %v1247_v57 = vpop.permute.xlu2 %1246  ;;  %v1305_v54 = vmul.f32 %v6568_v30, %v7870_v39  ;;  %vm1310_vm11 = vweird.f32 %v6568_v30  ;;  %v1315_v33 = vand.u32 2147483648, %v7870_v39 }
 0x423   : >> { %v1272_v52 = vsel %vm1269_vm15, %v1271_v47, %v1267_v17  ;;  %6569 = vrcp.f32 %v1247_v57  ;;  %v1345_v9 = vand.u32 2147483648, %v1247_v57  ;;  %v1343_v29 = vand.u32 2147483647, %v1247_v57  ;;  %vm1311_vm6 = vmor %vm1309_vm12, %vm1310_vm11 }
 0x424   : >> { %v1273_v49 = vmul.f32 %v1272_v52, %v7689_v44  ;;  %v1306_v15 = vsub.f32 1.0, %v1305_v54  ;;  %vm1339_vm0 = vweird.f32 %v1247_v57  ;;  %v1316_v52 = vor.u32 1.1754944e-38, %v1315_v33 }
 0x425   : >> { %vm1344_vm10 = vcmp.eq.f32.partialorder %v1343_v29, 8.507059e+37  ;;  %vm1314_vm15 = vcmp.eq.f32.partialorder %v1313_v34, 8.507059e+37 }
 0x426   : >> { %v1419_v3 = vperm.slane %v1273_v49, 2  ;;  %v1307_v53 = vmul.f32 %v6568_v30, %v1306_v15 }
 0x428   : >> { %v1427_v16 = vmul.f32 %v1419_v3, %v1222_v12  ;;  %v1308_v12 = vadd.f32 %v6568_v30, %v1307_v53 }
 0x429   : >> { %v6570_v2 = vpop.eup %6569 }
 0x42a   : >> { %v1443_v0 = vsub.f32 %v7689_v44, %v1427_v16  ;;  %v1335_v37 = vmul.f32 %v6570_v2, %v1247_v57  ;;  %vm1340_vm9 = vweird.f32 %v6570_v2  ;;  %v1346_v44 = vor.u32 1.1754944e-38, %v1345_v9  ;;  %v1382_v16 = vpop.permute.xlu2 %1381 }
 0x42b   : >> { %v1227_v27 = vpop.permute.xlu1 %1226  ;;  %vm1341_vm13 = vmor %vm1339_vm0, %vm1340_vm9  ;;  %v1312_v1 = vsel %vm1311_vm6, %v6568_v30, %v1308_v12 }
 0x42c   : >> { %v7878_v60 = vsel %vm11311_vm4, %v1419_v3, %v1443_v0  ;;  %v1336_v36 = vsub.f32 1.0, %v1335_v37  ;;  %6571 = vrcp.f32 %v1227_v27  ;;  %v1285_v18 = vand.u32 2147483648, %v1227_v27 }
 0x42d   : >> { %1481 = vperm.xlu0 %6463, %v7878_v60   ;;  %v1283_v17 = vand.u32 2147483647, %v1227_v27  ;;  %vm1279_vm9 = vweird.f32 %v1227_v27 }
 0x42e   : >> { %v1337_v19 = vmul.f32 %v6570_v2, %v1336_v36  ;;  %v1286_v37 = vor.u32 1.1754944e-38, %v1285_v18 }
 0x430   : >> { %v1338_v25 = vadd.f32 %v6570_v2, %v1337_v19  ;;  %v1428_v19 = vmul.f32 %v1419_v3, %v1382_v16 }
 0x432   : >> { %v6572_v4 = vpop.eup %6571  ;;  %v1342_v59 = vsel %vm1341_vm13, %v6570_v2, %v1338_v25  ;;  %v1317_v2 = vsel %vm1314_vm15, %v1316_v52, %v1312_v1  ;;  %vm1284_vm13 = vcmp.eq.f32.partialorder %v1283_v17, 8.507059e+37 }
 0x433   : >> { %v1275_v35 = vmul.f32 %v6572_v4, %v1227_v27  ;;  %v1347_v43 = vsel %vm1344_vm10, %v1346_v44, %v1342_v59  ;;  %vm1280_vm14 = vweird.f32 %v6572_v4  ;;  %v1318_v9 = vmul.f32 %v1317_v2, %v7731_v45  ;;  %v1397_v59 = vpop.permute.xlu2 %1396 }
 0x434   : >> { %v1348_v38 = vmul.f32 %v1347_v43, %v7775_v8  ;;  %vm1281_vm0 = vmor %vm1279_vm9, %vm1280_vm14  ;;  %v7901_v44 = vsub.f32 %v7794_v58, %v1428_v19 }
 0x435   : >> { %v1276_v7 = vsub.f32 1.0, %v1275_v35 }
 0x436   : >> { %v7885_v56 = vperm.slane %v1348_v38, 2 }
 0x437   : >> { %v1277_v47 = vmul.f32 %v6572_v4, %v1276_v7 }
 0x438   : >> { %v1437_v49 = vmul.f32 %v7885_v56, %v1247_v57 }
 0x439   : >> { %v1278_v54 = vadd.f32 %v6572_v4, %v1277_v47 }
 0x43a   : >> { %v1453_v0 = vsub.f32 %v7775_v8, %v1437_v49  ;;  %v1422_v8 = vperm.slane %v1318_v9, 2 }
 0x43b   : >> { %v1282_v15 = vsel %vm1281_vm0, %v6572_v4, %v1278_v54 }
 0x43c   : >> { %v7892_v30 = vsel %vm11311_vm4, %v7885_v56, %v1453_v0  ;;  %v1287_v36 = vsel %vm1284_vm13, %v1286_v37, %v1282_v15  ;;  %v1433_v3 = vmul.f32 %v1422_v8, %v7870_v39  ;;  %v1434_v12 = vmul.f32 %v1422_v8, %v1397_v59 }
 0x43d   : >> { %1506 = vperm.xlu0 %6463, %v7892_v30   ;;  %v1288_v57 = vmul.f32 %v1287_v36, %v7697_v42 }
 0x43e   : >> { %v1449_v58 = vsub.f32 %v7731_v45, %v1433_v3 }
 0x43f   : >> { %v7897_v29 = vperm.slane %v1288_v57, 2 }
 0x440   : >> { %v7918_v34 = vsel %vm11311_vm4, %v1422_v8, %v1449_v58 }
 0x441   : >> { %v1429_v25 = vmul.f32 %v7897_v29, %v1227_v27 }
 0x443   : >> { %v1232_v53 = vpop.permute.xlu0 %1231  ;;  %v1445_v4 = vsub.f32 %v7697_v42, %v1429_v25  ;;  %v7914_v42 = vsub.f32 %v7820_v20, %v1434_v12 }
 0x444   : >> { %6573 = vrcp.f32 %v1232_v53  ;;  %v1300_v7 = vand.u32 2147483648, %v1232_v53  ;;  %v1298_v18 = vand.u32 2147483647, %v1232_v53  ;;  %vm1294_vm11 = vweird.f32 %v1232_v53 }
 0x445   : >> { %v7907_v35 = vsel %vm11311_vm4, %v7897_v29, %v1445_v4  ;;  %1641 = vperm.xlu0 %6463, %v7901_v44  }
 0x446   : >> { %1486 = vperm.xlu2 %6464, %v7907_v35   ;;  %v1301_v47 = vor.u32 1.1754944e-38, %v1300_v7  ;;  %vm1299_vm6 = vcmp.eq.f32.partialorder %v1298_v18, 8.507059e+37 }
 0x44a   : >> { %v6574_v27 = vpop.eup %6573 }
 0x44b   : >> { %v1290_v43 = vmul.f32 %v6574_v27, %v1232_v53  ;;  %v1242_v33 = vpop.permute.xlu1 %1241  ;;  %vm1295_vm10 = vweird.f32 %v6574_v27 }
 0x44c   : >> { %6575 = vrcp.f32 %v1242_v33  ;;  %vm1296_vm12 = vmor %vm1294_vm11, %vm1295_vm10  ;;  %v1330_v0 = vand.u32 2147483648, %v1242_v33  ;;  %v1328_v36 = vand.u32 2147483647, %v1242_v33  ;;  %vm1324_vm15 = vweird.f32 %v1242_v33 }
 0x44d   : >> { %v1291_v38 = vsub.f32 1.0, %v1290_v43  ;;  %1656 = vperm.xlu0 %6463, %v7914_v42  }
 0x44e   : >> { %1496 = vperm.xlu2 %6464, %v7918_v34   ;;  %v1331_v8 = vor.u32 1.1754944e-38, %v1330_v0  ;;  %vm1329_vm0 = vcmp.eq.f32.partialorder %v1328_v36, 8.507059e+37 }
 0x44f   : >> { %v1292_v39 = vmul.f32 %v6574_v27, %v1291_v38 }
 0x451   : >> { %v1293_v1 = vadd.f32 %v6574_v27, %v1292_v39 }
 0x452   : >> { %v6576_v45 = vpop.eup %6575 }
 0x453   : >> { %v1320_v20 = vmul.f32 %v6576_v45, %v1242_v33  ;;  %v7922_v17 = vpop.permute.xlu1 %1251  ;;  %v7924_v52 = vpop.permute.xlu0 %1256  ;;  %v1297_v49 = vsel %vm1296_vm12, %v6574_v27, %v1293_v1  ;;  %vm1325_vm14 = vweird.f32 %v6576_v45 }
 0x454   : >> { %6577 = vrcp.f32 %v7922_v17  ;;  %v1302_v54 = vsel %vm1299_vm6, %v1301_v47, %v1297_v49  ;;  %vm1326_vm9 = vmor %vm1324_vm15, %vm1325_vm14  ;;  %v1360_v38 = vand.u32 2147483648, %v7922_v17  ;;  %v1358_v1 = vand.u32 2147483647, %v7922_v17 }
 0x455   : >> { %v1321_v16 = vsub.f32 1.0, %v1320_v20  ;;  %6579 = vrcp.f32 %v7924_v52  ;;  %v1303_v2 = vmul.f32 %v1302_v54, %v7801_v6  ;;  %v1373_v47 = vand.u32 2147483647, %v7924_v52 }
 0x456   : >> { %vm1354_vm11 = vweird.f32 %v7922_v17  ;;  %v1361_v54 = vor.u32 1.1754944e-38, %v1360_v38  ;;  %vm1369_vm12 = vweird.f32 %v7924_v52  ;;  %vm1359_vm15 = vcmp.eq.f32.partialorder %v1358_v1, 8.507059e+37 }
 0x457   : >> { %v7929_v37 = vperm.slane %v1303_v2, 2  ;;  %v1322_v15 = vmul.f32 %v6576_v45, %v1321_v16 }
 0x459   : >> { %v1431_v9 = vmul.f32 %v7929_v37, %v1232_v53  ;;  %v1323_v57 = vadd.f32 %v6576_v45, %v1322_v15 }
 0x45a   : >> { %v6578_v19 = vpop.eup %6577 }
 0x45b   : >> { %v6580_v25 = vpop.eup %6579  ;;  %v1350_v4 = vmul.f32 %v6578_v19, %v7922_v17  ;;  %v1447_v59 = vsub.f32 %v7801_v6, %v1431_v9  ;;  %v1327_v3 = vsel %vm1326_vm9, %v6576_v45, %v1323_v57  ;;  %v1375_v6 = vand.u32 2147483648, %v7924_v52  ;;  %v1392_v38 = vpop.permute.xlu0 %1391 }
 0x45c   : >> { %v1365_v12 = vmul.f32 %v6580_v25, %v7924_v52  ;;  %v1332_v27 = vsel %vm1329_vm0, %v1331_v8, %v1327_v3  ;;  %vm1355_vm13 = vweird.f32 %v6578_v19  ;;  %vm1370_vm10 = vweird.f32 %v6580_v25 }
 0x45d   : >> { %v1351_v43 = vsub.f32 1.0, %v1350_v4  ;;  %v7938_v53 = vsel %vm11311_vm4, %v7929_v37, %v1447_v59  ;;  %v1333_v58 = vmul.f32 %v1332_v27, %v7824_v63  ;;  %vm1356_vm6 = vmor %vm1354_vm11, %vm1355_vm13  ;;  %v1376_v0 = vor.u32 1.1754944e-38, %v1375_v6 }
 0x45e   : >> { %v1366_v7 = vsub.f32 1.0, %v1365_v12  ;;  %1491 = vperm.xlu1 %6465, %v7938_v53   ;;  %vm1371_vm14 = vmor %vm1369_vm12, %vm1370_vm10  ;;  %vm1374_vm9 = vcmp.eq.f32.partialorder %v1373_v47, 8.507059e+37  ;;  %v1387_v12 = vpop.permute.xlu1 %1386 }
 0x45f   : >> { %v1352_v39 = vmul.f32 %v6578_v19, %v1351_v43  ;;  %v1423_v18 = vperm.slane %v1333_v58, 2 }
 0x460   : >> { %v1367_v45 = vmul.f32 %v6580_v25, %v1366_v7 }
 0x461   : >> { %v1435_v20 = vmul.f32 %v1423_v18, %v1242_v33  ;;  %v1353_v49 = vadd.f32 %v6578_v19, %v1352_v39 }
 0x462   : >> { %v1368_v16 = vadd.f32 %v6580_v25, %v1367_v45 }
 0x463   : >> { %v1451_v2 = vsub.f32 %v7824_v63, %v1435_v20  ;;  %v1357_v15 = vsel %vm1356_vm6, %v6578_v19, %v1353_v49  ;;  %v1412_v63 = vpop.permute.xlu2 %1411  ;;  %v1407_v1 = vpop.permute.xlu0 %1406 }
 0x464   : >> { %v1372_v36 = vsel %vm1371_vm14, %v6580_v25, %v1368_v16  ;;  %v1362_v9 = vsel %vm1359_vm15, %v1361_v54, %v1357_v15  ;;  %v1438_v47 = vmul.f32 %v7885_v56, %v1407_v1 }
 0x465   : >> { %v7951_v57 = vsel %vm11311_vm4, %v1423_v18, %v1451_v2  ;;  %v1377_v33 = vsel %vm1374_vm9, %v1376_v0, %v1372_v36  ;;  %v1363_v8 = vmul.f32 %v1362_v9, %v7838_v28 }
 0x466   : >> { %1501 = vperm.xlu1 %6465, %v7951_v57   ;;  %v1378_v4 = vmul.f32 %v1377_v33, %v7842_v55 }
 0x467   : >> { %v1425_v59 = vperm.slane %v1363_v8, 2 }
 0x468   : >> { %v1426_v3 = vperm.slane %v1378_v4, 2 }
 0x469   : >> { %v1440_v19 = vmul.f32 %v1425_v59, %v1412_v63  ;;  %v1439_v25 = vmul.f32 %v1425_v59, %v7922_v17  ;;  %v1402_v17 = vpop.permute.xlu1 %1401 }
 0x46a   : >> { %v1441_v27 = vmul.f32 %v1426_v3, %v7924_v52  ;;  %v1436_v45 = vmul.f32 %v1423_v18, %v1402_v17  ;;  %v6925_v18 = vmov 4  }
 0x46b   : >> { %v7959_v43 = vsub.f32 %v7834_v21, %v1440_v19  ;;  %v1455_v58 = vsub.f32 %v7838_v28, %v1439_v25  ;;  %v1430_v21 = vmul.f32 %v7897_v29, %v1387_v12  ;;  %v1432_v28 = vmul.f32 %v7929_v37, %v1392_v38 }
 0x46c   : >> { %v1457_v7 = vsub.f32 %v7842_v55, %v1441_v27  ;;  %v7986_v20 = vsub.f32 %v7862_v14, %v1436_v45  ;;  %v7989_v29 = vsub.f32 %v7859_v26, %v1438_v47 }
 0x46d   : >> { %1671 = vperm.xlu0 %6463, %v7959_v43   ;;  %v7966_v6 = vsel %vm11311_vm4, %v1425_v59, %v1455_v58  ;;  %v7977_v55 = vsub.f32 %v7850_v5, %v1430_v21  ;;  %v7980_v52 = vsub.f32 %v7853_v24, %v1432_v28 }
 0x46e   : >> { %v7970_v39 = vsel %vm11311_vm4, %v1426_v3, %v1457_v7  ;;  %1511 = vperm.xlu2 %6464, %v7966_v6  }
 0x46f   : >> { %1516 = vperm.xlu1 %6465, %v7970_v39  }
 0x471   : >> { %v1417_v37 = vpop.permute.xlu1 %1416 }
 0x472   : >> { %v1442_v5 = vmul.f32 %v1426_v3, %v1417_v37 }
 0x474   : >> { %v7994_v24 = vsub.f32 %v7867_v51, %v1442_v5 }
 0x475   : >> { %6467 = vset.pattern.permute.xlu0 %v6925_v18 }
 0x476   : >> { %1646 = vperm.xlu2 %6464, %v7977_v55  }
 0x477   : >> { %1651 = vperm.xlu1 %6465, %v7980_v52  }
 0x47e   : >> { %1661 = vperm.xlu2 %6464, %v7986_v20  }
 0x47f   : >> { %1666 = vperm.xlu1 %6465, %v7989_v29  }
 0x486   : >> { %1676 = vperm.xlu2 %6464, %v7994_v24  }
 0x487   : >> { %6466 = vset.pattern.permute.xlu1 %v6925_v18 }
 0x48e   : >> { %6468 = vset.pattern.permute.xlu2 %v6925_v18 }
 0x49f   : >> { %v1482_v14 = vpop.permute.xlu0 %1481 }
 0x4a0   : >> { %6581 = vrcp.f32 %v1482_v14  ;;  %v1487_v56 = vpop.permute.xlu2 %1486  ;;  %v1530_v51 = vand.u32 2147483648, %v1482_v14  ;;  %v1528_v9 = vand.u32 2147483647, %v1482_v14  ;;  %vm1524_vm13 = vweird.f32 %v1482_v14 }
 0x4a1   : >> { %6583 = vrcp.f32 %v1487_v56  ;;  %v1543_v33 = vand.u32 2147483647, %v1487_v56  ;;  %v1545_v8 = vand.u32 2147483648, %v1487_v56  ;;  %vm1539_vm6 = vweird.f32 %v1487_v56 }
 0x4a2   : >> { %v1531_v63 = vor.u32 1.1754944e-38, %v1530_v51  ;;  %vm1529_vm12 = vcmp.eq.f32.partialorder %v1528_v9, 8.507059e+37 }
 0x4a3   : >> { %vm1544_vm15 = vcmp.eq.f32.partialorder %v1543_v33, 8.507059e+37  ;;  %v1546_v58 = vor.u32 1.1754944e-38, %v1545_v8 }
 0x4a6   : >> { %v6582_v26 = vpop.eup %6581 }
 0x4a7   : >> { %v1520_v49 = vmul.f32 %v6582_v26, %v1482_v14  ;;  %v6584_v54 = vpop.eup %6583  ;;  %vm1525_vm0 = vweird.f32 %v6582_v26 }
 0x4a8   : >> { %v1535_v2 = vmul.f32 %v6584_v54, %v1487_v56  ;;  %v7997_v0 = vpop.permute.xlu2 %1496  ;;  %vm1540_vm10 = vweird.f32 %v6584_v54  ;;  %vm1526_vm11 = vmor %vm1524_vm13, %vm1525_vm0 }
 0x4a9   : >> { %v1521_v16 = vsub.f32 1.0, %v1520_v49  ;;  %6585 = vrcp.f32 %v7997_v0  ;;  %vm1541_vm14 = vmor %vm1539_vm6, %vm1540_vm10  ;;  %v1573_v47 = vand.u32 2147483647, %v7997_v0  ;;  %v1575_v37 = vand.u32 2147483648, %v7997_v0 }
 0x4aa   : >> { %v1536_v15 = vsub.f32 1.0, %v1535_v2  ;;  %vm1569_vm0 = vweird.f32 %v7997_v0 }
 0x4ab   : >> { %v1522_v36 = vmul.f32 %v6582_v26, %v1521_v16  ;;  %vm1574_vm10 = vcmp.eq.f32.partialorder %v1573_v47, 8.507059e+37 }
 0x4ac   : >> { %v1537_v59 = vmul.f32 %v6584_v54, %v1536_v15  ;;  %v1576_v15 = vor.u32 1.1754944e-38, %v1575_v37 }
 0x4ad   : >> { %v1523_v4 = vadd.f32 %v6582_v26, %v1522_v36 }
 0x4ae   : >> { %v1538_v12 = vadd.f32 %v6584_v54, %v1537_v59 }
 0x4af   : >> { %v1527_v3 = vsel %vm1526_vm11, %v6582_v26, %v1523_v4  ;;  %v6586_v19 = vpop.eup %6585  ;;  %v1507_v25 = vpop.permute.xlu0 %1506 }
 0x4b0   : >> { %v1532_v27 = vsel %vm1529_vm12, %v1531_v63, %v1527_v3  ;;  %v1565_v38 = vmul.f32 %v6586_v19, %v7997_v0  ;;  %6587 = vrcp.f32 %v1507_v25  ;;  %v1542_v21 = vsel %vm1541_vm14, %v6584_v54, %v1538_v12 }
 0x4b1   : >> { %v1533_v7 = vmul.f32 %v1532_v27, %v7878_v60  ;;  %v1547_v28 = vsel %vm1544_vm15, %v1546_v58, %v1542_v21  ;;  %vm1570_vm9 = vweird.f32 %v6586_v19  ;;  %v1605_v4 = vand.u32 2147483648, %v1507_v25 }
 0x4b2   : >> { %v1566_v17 = vsub.f32 1.0, %v1565_v38  ;;  %v1548_v45 = vmul.f32 %v1547_v28, %v7907_v35  ;;  %vm1571_vm13 = vmor %vm1569_vm0, %vm1570_vm9  ;;  %v1603_v63 = vand.u32 2147483647, %v1507_v25  ;;  %vm1599_vm12 = vweird.f32 %v1507_v25 }
 0x4b3   : >> { %v1679_v1 = vperm.slane %v1533_v7, 3 }
 0x4b4   : >> { %v8005_v18 = vperm.slane %v1548_v45, 3  ;;  %v1567_v26 = vmul.f32 %v6586_v19, %v1566_v17  ;;  %vm1604_vm14 = vcmp.eq.f32.partialorder %v1603_v63, 8.507059e+37 }
 0x4b5   : >> { %v1687_v5 = vmul.f32 %v1679_v1, %v1482_v14 }
 0x4b6   : >> { %v6588_v49 = vpop.eup %6587  ;;  %v1689_v2 = vmul.f32 %v8005_v18, %v1487_v56  ;;  %v1568_v54 = vadd.f32 %v6586_v19, %v1567_v26 }
 0x4b7   : >> { %v1703_v16 = vsub.f32 %v7878_v60, %v1687_v5  ;;  %v1595_v51 = vmul.f32 %v6588_v49, %v1507_v25  ;;  %vm1600_vm11 = vweird.f32 %v6588_v49  ;;  %v1642_v47 = vpop.permute.xlu0 %1641 }
 0x4b8   : >> { %v1705_v14 = vsub.f32 %v7907_v35, %v1689_v2  ;;  %v1572_v9 = vsel %vm1571_vm13, %v6586_v19, %v1568_v54  ;;  %vm1601_vm6 = vmor %vm1599_vm12, %vm1600_vm11  ;;  %v1606_v19 = vor.u32 1.1754944e-38, %v1605_v4  ;;  %v1688_v5 = vmul.f32 %v1679_v1, %v1642_v47 }
 0x4b9   : >> { %v8012_v36 = vsel %vm11312_vm5, %v1679_v1, %v1703_v16  ;;  %v1596_v33 = vsub.f32 1.0, %v1595_v51  ;;  %v1577_v60 = vsel %vm1574_vm10, %v1576_v15, %v1572_v9 }
 0x4ba   : >> { %1741 = vperm.xlu1 %6466, %v8012_v36   ;;  %v8019_v56 = vsel %vm11312_vm5, %v8005_v18, %v1705_v14  ;;  %v1578_v8 = vmul.f32 %v1577_v60, %v7918_v34  ;;  %v8045_v16 = vsub.f32 %v7901_v44, %v1688_v5 }
 0x4bb   : >> { %1746 = vperm.xlu0 %6467, %v8019_v56   ;;  %v1597_v59 = vmul.f32 %v6588_v49, %v1596_v33 }
 0x4bc   : >> { %v1682_v35 = vperm.slane %v1578_v8, 3 }
 0x4bd   : >> { %v1598_v3 = vadd.f32 %v6588_v49, %v1597_v59 }
 0x4be   : >> { %v1693_v12 = vmul.f32 %v1682_v35, %v7997_v0 }
 0x4bf   : >> { %v1602_v27 = vsel %vm1601_vm6, %v6588_v49, %v1598_v3 }
 0x4c0   : >> { %v1709_v58 = vsub.f32 %v7918_v34, %v1693_v12  ;;  %v1607_v38 = vsel %vm1604_vm14, %v1606_v19, %v1602_v27 }
 0x4c1   : >> { %v1608_v7 = vmul.f32 %v1607_v38, %v7892_v30 }
 0x4c2   : >> { %v8028_v21 = vsel %vm11312_vm5, %v1682_v35, %v1709_v58 }
 0x4c3   : >> { %1756 = vperm.xlu1 %6466, %v8028_v21   ;;  %v8031_v28 = vperm.slane %v1608_v7, 3 }
 0x4c5   : >> { %v1697_v17 = vmul.f32 %v8031_v28, %v1507_v25 }
 0x4c7   : >> { %v1713_v45 = vsub.f32 %v7892_v30, %v1697_v17  ;;  %v1657_v30 = vpop.permute.xlu0 %1656 }
 0x4c8   : >> { %v1512_v0 = vpop.permute.xlu2 %1511  ;;  %v1694_v1 = vmul.f32 %v1682_v35, %v1657_v30 }
 0x4c9   : >> { %6589 = vrcp.f32 %v1512_v0  ;;  %v8038_v34 = vsel %vm11312_vm5, %v8031_v28, %v1713_v45  ;;  %v1620_v54 = vand.u32 2147483648, %v1512_v0  ;;  %v1618_v51 = vand.u32 2147483647, %v1512_v0 }
 0x4ca   : >> { %vm1614_vm9 = vweird.f32 %v1512_v0  ;;  %v8053_v59 = vsub.f32 %v7914_v42, %v1694_v1 }
 0x4cb   : >> { %1766 = vperm.xlu1 %6466, %v8038_v34   ;;  %v1621_v8 = vor.u32 1.1754944e-38, %v1620_v54  ;;  %vm1619_vm13 = vcmp.eq.f32.partialorder %v1618_v51, 8.507059e+37 }
 0x4cf   : >> { %v6590_v37 = vpop.eup %6589 }
 0x4d0   : >> { %v1610_v26 = vmul.f32 %v6590_v37, %v1512_v0  ;;  %v8041_v49 = vpop.permute.xlu1 %1491  ;;  %vm1615_vm15 = vweird.f32 %v6590_v37 }
 0x4d1   : >> { %6591 = vrcp.f32 %v8041_v49  ;;  %vm1616_vm0 = vmor %vm1614_vm9, %vm1615_vm15  ;;  %v1560_v3 = vand.u32 2147483648, %v8041_v49  ;;  %v1558_v12 = vand.u32 2147483647, %v8041_v49  ;;  %vm1554_vm11 = vweird.f32 %v8041_v49 }
 0x4d2   : >> { %v1611_v25 = vsub.f32 1.0, %v1610_v26 }
 0x4d3   : >> { %1901 = vperm.xlu1 %6466, %v8045_v16   ;;  %v1561_v42 = vor.u32 1.1754944e-38, %v1560_v3  ;;  %vm1559_vm6 = vcmp.eq.f32.partialorder %v1558_v12, 8.507059e+37 }
 0x4d4   : >> { %v1612_v2 = vmul.f32 %v6590_v37, %v1611_v25  ;;  %v1647_v25 = vpop.permute.xlu2 %1646 }
 0x4d6   : >> { %v1613_v15 = vadd.f32 %v6590_v37, %v1612_v2 }
 0x4d7   : >> { %v6592_v14 = vpop.eup %6591 }
 0x4d8   : >> { %v1550_v9 = vmul.f32 %v6592_v14, %v8041_v49  ;;  %v8049_v33 = vpop.permute.xlu1 %1501  ;;  %v1617_v60 = vsel %vm1616_vm0, %v6590_v37, %v1613_v15  ;;  %vm1555_vm10 = vweird.f32 %v6592_v14 }
 0x4d9   : >> { %6593 = vrcp.f32 %v8049_v33  ;;  %v1622_v4 = vsel %vm1619_vm13, %v1621_v8, %v1617_v60  ;;  %vm1556_vm12 = vmor %vm1554_vm11, %vm1555_vm10  ;;  %v1590_v54 = vand.u32 2147483648, %v8049_v33  ;;  %vm1584_vm15 = vweird.f32 %v8049_v33 }
 0x4da   : >> { %v1551_v44 = vsub.f32 1.0, %v1550_v9  ;;  %v1623_v63 = vmul.f32 %v1622_v4, %v7966_v6 }
 0x4db   : >> { %1916 = vperm.xlu1 %6466, %v8053_v59   ;;  %v1591_v9 = vor.u32 1.1754944e-38, %v1590_v54 }
 0x4dc   : >> { %v1552_v35 = vmul.f32 %v6592_v14, %v1551_v44  ;;  %v1685_v19 = vperm.slane %v1623_v63, 3 }
 0x4de   : >> { %v1553_v27 = vadd.f32 %v6592_v14, %v1552_v35  ;;  %v1699_v7 = vmul.f32 %v1685_v19, %v1512_v0 }
 0x4df   : >> { %v6594_v58 = vpop.eup %6593  ;;  %v1672_v38 = vpop.permute.xlu0 %1671 }
 0x4e0   : >> { %v1580_v17 = vmul.f32 %v6594_v58, %v8049_v33  ;;  %v1700_v45 = vmul.f32 %v1685_v19, %v1672_v38  ;;  %v1557_v47 = vsel %vm1556_vm12, %v6592_v14, %v1553_v27  ;;  %v1715_v5 = vsub.f32 %v7966_v6, %v1699_v7  ;;  %v1662_v38 = vpop.permute.xlu2 %1661 }
 0x4e1   : >> { %v1517_v37 = vpop.permute.xlu1 %1516  ;;  %v1562_v26 = vsel %vm1559_vm6, %v1561_v42, %v1557_v47  ;;  %vm1585_vm14 = vweird.f32 %v6594_v58  ;;  %v1588_v14 = vand.u32 2147483647, %v8049_v33 }
 0x4e2   : >> { %v1581_v30 = vsub.f32 1.0, %v1580_v17  ;;  %v8063_v2 = vsub.f32 %v7959_v43, %v1700_v45  ;;  %6595 = vrcp.f32 %v1517_v37  ;;  %v8068_v0 = vsel %vm11312_vm5, %v1685_v19, %v1715_v5  ;;  %vm1586_vm9 = vmor %vm1584_vm15, %vm1585_vm14 }
 0x4e3   : >> { %v1563_v51 = vmul.f32 %v1562_v26, %v7938_v53  ;;  %1771 = vperm.xlu0 %6467, %v8068_v0   ;;  %v1690_v43 = vmul.f32 %v8005_v18, %v1647_v25  ;;  %vm1589_vm0 = vcmp.eq.f32.partialorder %v1588_v14, 8.507059e+37  ;;  %vm1629_vm10 = vweird.f32 %v1517_v37 }
 0x4e4   : >> { %v1582_v15 = vmul.f32 %v6594_v58, %v1581_v30  ;;  %1931 = vperm.xlu1 %6466, %v8063_v2  }
 0x4e5   : >> { %v1681_v6 = vperm.slane %v1563_v51, 3  ;;  %v8079_v35 = vsub.f32 %v7977_v55, %v1690_v43 }
 0x4e6   : >> { %v1583_v1 = vadd.f32 %v6594_v58, %v1582_v15 }
 0x4e7   : >> { %v1691_v60 = vmul.f32 %v1681_v6, %v8041_v49  ;;  %v1635_v49 = vand.u32 2147483648, %v1517_v37 }
 0x4e8   : >> { %v6596_v8 = vpop.eup %6595  ;;  %v1587_v44 = vsel %vm1586_vm9, %v6594_v58, %v1583_v1 }
 0x4e9   : >> { %v1592_v4 = vsel %vm1589_vm0, %v1591_v9, %v1587_v44  ;;  %v1625_v63 = vmul.f32 %v6596_v8, %v1517_v37  ;;  %v1707_v3 = vsub.f32 %v7938_v53, %v1691_v60  ;;  %vm1630_vm13 = vweird.f32 %v6596_v8 }
 0x4ea   : >> { %v1593_v12 = vmul.f32 %v1592_v4, %v7951_v57  ;;  %v1633_v53 = vand.u32 2147483647, %v1517_v37  ;;  %vm1631_vm11 = vmor %vm1629_vm10, %vm1630_vm13  ;;  %v1636_v45 = vor.u32 1.1754944e-38, %v1635_v49  ;;  %v6926_v44 = vmov 5  }
 0x4eb   : >> { %v1626_v18 = vsub.f32 1.0, %v1625_v63  ;;  %v8084_v19 = vsel %vm11312_vm5, %v1681_v6, %v1707_v3  ;;  %1906 = vperm.xlu0 %6467, %v8079_v35  }
 0x4ec   : >> { %v1683_v27 = vperm.slane %v1593_v12, 3  ;;  %1751 = vperm.xlu2 %6468, %v8084_v19   ;;  %vm1634_vm12 = vcmp.eq.f32.partialorder %v1633_v53, 8.507059e+37  ;;  %6470 = vset.pattern.permute.xlu1 %v6926_v44 }
 0x4ed   : >> { %v1627_v58 = vmul.f32 %v6596_v8, %v1626_v18 }
 0x4ee   : >> { %v1696_v7 = vmul.f32 %v1683_v27, %v1662_v38  ;;  %v1695_v55 = vmul.f32 %v1683_v27, %v8049_v33 }
 0x4ef   : >> { %v1628_v42 = vadd.f32 %v6596_v8, %v1627_v58 }
 0x4f0   : >> { %v8090_v17 = vsub.f32 %v7986_v20, %v1696_v7  ;;  %v1711_v47 = vsub.f32 %v7951_v57, %v1695_v55  ;;  %v1677_v20 = vpop.permute.xlu2 %1676  ;;  %v1652_v57 = vpop.permute.xlu1 %1651 }
 0x4f1   : >> { %v1632_v5 = vsel %vm1631_vm11, %v6596_v8, %v1628_v42  ;;  %v1692_v1 = vmul.f32 %v1681_v6, %v1652_v57 }
 0x4f2   : >> { %v1637_v26 = vsel %vm1634_vm12, %v1636_v45, %v1632_v5  ;;  %v8095_v25 = vsel %vm11312_vm5, %v1683_v27, %v1711_v47 }
 0x4f3   : >> { %v1638_v30 = vmul.f32 %v1637_v26, %v7970_v39  ;;  %1921 = vperm.xlu0 %6467, %v8090_v17   ;;  %v8111_v9 = vsub.f32 %v7980_v52, %v1692_v1 }
 0x4f4   : >> { %1761 = vperm.xlu2 %6468, %v8095_v25  }
 0x4f5   : >> { %v1686_v33 = vperm.slane %v1638_v30, 3 }
 0x4f7   : >> { %v1702_v54 = vmul.f32 %v1686_v33, %v1677_v20  ;;  %v1701_v51 = vmul.f32 %v1686_v33, %v1517_v37 }
 0x4f8   : >> { %v1667_v60 = vpop.permute.xlu1 %1666 }
 0x4f9   : >> { %v8101_v15 = vsub.f32 %v7994_v24, %v1702_v54  ;;  %v1717_v14 = vsub.f32 %v7970_v39, %v1701_v51  ;;  %v1698_v24 = vmul.f32 %v8031_v28, %v1667_v60 }
 0x4fb   : >> { %v8106_v43 = vsel %vm11312_vm5, %v1686_v33, %v1717_v14  ;;  %1936 = vperm.xlu0 %6467, %v8101_v15   ;;  %v8116_v37 = vsub.f32 %v7989_v29, %v1698_v24 }
 0x4fc   : >> { %1776 = vperm.xlu2 %6468, %v8106_v43  }
 0x503   : >> { %6471 = vset.pattern.permute.xlu0 %v6926_v44 }
 0x504   : >> { %1911 = vperm.xlu2 %6468, %v8111_v9  }
 0x50c   : >> { %1926 = vperm.xlu2 %6468, %v8116_v37  }
 0x514   : >> { %6469 = vset.pattern.permute.xlu2 %v6926_v44 }
 0x52c   : >> { %v1742_v39 = vpop.permute.xlu1 %1741 }
 0x52d   : >> { %6597 = vrcp.f32 %v1742_v39  ;;  %v1747_v8 = vpop.permute.xlu0 %1746  ;;  %v1790_v29 = vand.u32 2147483648, %v1742_v39  ;;  %v1788_v27 = vand.u32 2147483647, %v1742_v39  ;;  %vm1784_vm14 = vweird.f32 %v1742_v39 }
 0x52e   : >> { %6599 = vrcp.f32 %v1747_v8  ;;  %v1805_v38 = vand.u32 2147483648, %v1747_v8  ;;  %v1803_v53 = vand.u32 2147483647, %v1747_v8  ;;  %vm1799_vm13 = vweird.f32 %v1747_v8 }
 0x52f   : >> { %v1791_v7 = vor.u32 1.1754944e-38, %v1790_v29  ;;  %vm1789_vm0 = vcmp.eq.f32.partialorder %v1788_v27, 8.507059e+37 }
 0x530   : >> { %v1806_v5 = vor.u32 1.1754944e-38, %v1805_v38  ;;  %vm1804_vm11 = vcmp.eq.f32.partialorder %v1803_v53, 8.507059e+37 }
 0x533   : >> { %v6598_v52 = vpop.eup %6597 }
 0x534   : >> { %v1780_v6 = vmul.f32 %v6598_v52, %v1742_v39  ;;  %v6600_v4 = vpop.eup %6599  ;;  %vm1785_vm6 = vweird.f32 %v6598_v52 }
 0x535   : >> { %v1795_v3 = vmul.f32 %v6600_v4, %v1747_v8  ;;  %v8119_v12 = vpop.permute.xlu1 %1756  ;;  %vm1800_vm15 = vweird.f32 %v6600_v4  ;;  %vm1786_vm9 = vmor %vm1784_vm14, %vm1785_vm6  ;;  %vm11313_vm14 = vcmp.eq.s32.totalorder %v11260_v10, 4 }
 0x536   : >> { %v1781_v63 = vsub.f32 1.0, %v1780_v6  ;;  %6601 = vrcp.f32 %v8119_v12  ;;  %vm1801_vm10 = vmor %vm1799_vm13, %vm1800_vm15  ;;  %v1835_v1 = vand.u32 2147483648, %v8119_v12  ;;  %vm1829_vm6 = vweird.f32 %v8119_v12 }
 0x537   : >> { %v1796_v28 = vsub.f32 1.0, %v1795_v3 }
 0x538   : >> { %v1782_v18 = vmul.f32 %v6598_v52, %v1781_v63 }
 0x539   : >> { %v1797_v58 = vmul.f32 %v6600_v4, %v1796_v28  ;;  %v1836_v28 = vor.u32 1.1754944e-38, %v1835_v1 }
 0x53a   : >> { %v1783_v49 = vadd.f32 %v6598_v52, %v1782_v18 }
 0x53b   : >> { %v1798_v42 = vadd.f32 %v6600_v4, %v1797_v58 }
 0x53c   : >> { %v1787_v55 = vsel %vm1786_vm9, %v6598_v52, %v1783_v49  ;;  %v6602_v45 = vpop.eup %6601  ;;  %v1833_v52 = vand.u32 2147483647, %v8119_v12 }
 0x53d   : >> { %v1792_v47 = vsel %vm1789_vm0, %v1791_v7, %v1787_v55  ;;  %v1825_v26 = vmul.f32 %v6602_v45, %v8119_v12  ;;  %v8123_v30 = vpop.permute.xlu1 %1766  ;;  %v1802_v20 = vsel %vm1801_vm10, %v6600_v4, %v1798_v42  ;;  %vm1830_vm12 = vweird.f32 %v6602_v45  ;;  %vm11314_vm0 = vmmov %vm11313_vm14 }
 0x53e   : >> { %v1793_v33 = vmul.f32 %v1792_v47, %v8012_v36  ;;  %6603 = vrcp.f32 %v8123_v30  ;;  %v1807_v54 = vsel %vm1804_vm11, %v1806_v5, %v1802_v20  ;;  %vm1831_vm15 = vmor %vm1829_vm6, %vm1830_vm12  ;;  %vm1834_vm9 = vcmp.eq.f32.partialorder %v1833_v52, 8.507059e+37 }
 0x53f   : >> { %v1826_v51 = vsub.f32 1.0, %v1825_v26  ;;  %v1808_v14 = vmul.f32 %v1807_v54, %v8019_v56  ;;  %v1865_v53 = vand.u32 2147483648, %v8123_v30  ;;  %vm1859_vm10 = vweird.f32 %v8123_v30  ;;  %vm11315_vm6 = vmmov %vm11314_vm0 }
 0x540   : >> { %v8127_v57 = vperm.slane %v1793_v33, 4 }
 0x541   : >> { %v8132_v24 = vperm.slane %v1808_v14, 4  ;;  %v1827_v44 = vmul.f32 %v6602_v45, %v1826_v51  ;;  %v1866_v33 = vor.u32 1.1754944e-38, %v1865_v53 }
 0x542   : >> { %v1947_v60 = vmul.f32 %v8127_v57, %v1742_v39 }
 0x543   : >> { %v1949_v4 = vmul.f32 %v8132_v24, %v1747_v8  ;;  %v1828_v63 = vadd.f32 %v6602_v45, %v1827_v44 }
 0x544   : >> { %v1963_v6 = vsub.f32 %v8012_v36, %v1947_v60  ;;  %v6604_v3 = vpop.eup %6603 }
 0x545   : >> { %v1855_v18 = vmul.f32 %v6604_v3, %v8123_v30  ;;  %v1965_v36 = vsub.f32 %v8019_v56, %v1949_v4  ;;  %v1832_v8 = vsel %vm1831_vm15, %v6602_v45, %v1828_v63  ;;  %vm1860_vm13 = vweird.f32 %v6604_v3 }
 0x546   : >> { %v8137_v29 = vpop.permute.xlu2 %1751  ;;  %v8145_v39 = vsel %vm11313_vm14, %v8127_v57, %v1963_v6  ;;  %v1837_v49 = vsel %vm1834_vm9, %v1836_v28, %v1832_v8  ;;  %v1863_v56 = vand.u32 2147483647, %v8123_v30  ;;  %vm1861_vm11 = vmor %vm1859_vm10, %vm1860_vm13 }
 0x547   : >> { %6605 = vrcp.f32 %v8137_v29  ;;  %2001 = vperm.xlu2 %6469, %v8145_v39   ;;  %v1856_v27 = vsub.f32 1.0, %v1855_v18  ;;  %v8152_v38 = vsel %vm11314_vm0, %v8132_v24, %v1965_v36  ;;  %v1838_v58 = vmul.f32 %v1837_v49, %v8028_v21  ;;  %vm11316_vm13 = vmmov %vm11315_vm6 }
 0x548   : >> { %2006 = vperm.xlu1 %6470, %v8152_v38   ;;  %vm1864_vm12 = vcmp.eq.f32.partialorder %v1863_v56, 8.507059e+37  ;;  %v1818_v6 = vand.u32 2147483647, %v8137_v29  ;;  %vm1814_vm15 = vweird.f32 %v8137_v29 }
 0x549   : >> { %v1857_v7 = vmul.f32 %v6604_v3, %v1856_v27  ;;  %v8158_v55 = vperm.slane %v1838_v58, 4  ;;  %v1902_v27 = vpop.permute.xlu1 %1901 }
 0x54a   : >> { %vm1819_vm0 = vcmp.eq.f32.partialorder %v1818_v6, 8.507059e+37 }
 0x54b   : >> { %v1858_v45 = vadd.f32 %v6604_v3, %v1857_v7  ;;  %v1953_v26 = vmul.f32 %v8158_v55, %v8119_v12  ;;  %v1820_v12 = vand.u32 2147483648, %v8137_v29 }
 0x54d   : >> { %v6606_v42 = vpop.eup %6605  ;;  %v1862_v20 = vsel %vm1861_vm11, %v6604_v3, %v1858_v45  ;;  %v1969_v51 = vsub.f32 %v8028_v21, %v1953_v26  ;;  %v1821_v8 = vor.u32 1.1754944e-38, %v1820_v12 }
 0x54e   : >> { %v1810_v47 = vmul.f32 %v6606_v42, %v8137_v29  ;;  %v8162_v5 = vpop.permute.xlu2 %1761  ;;  %v1867_v14 = vsel %vm1864_vm12, %v1866_v33, %v1862_v20  ;;  %vm1815_vm14 = vweird.f32 %v6606_v42 }
 0x54f   : >> { %6607 = vrcp.f32 %v8162_v5  ;;  %v1868_v1 = vmul.f32 %v1867_v14, %v8038_v34  ;;  %v8172_v60 = vsel %vm11315_vm6, %v8158_v55, %v1969_v51  ;;  %vm1816_vm9 = vmor %vm1814_vm15, %vm1815_vm14  ;;  %vm1844_vm11 = vweird.f32 %v8162_v5 }
 0x550   : >> { %v1811_v54 = vsub.f32 1.0, %v1810_v47  ;;  %2016 = vperm.xlu2 %6469, %v8172_v60   ;;  %v1848_v47 = vand.u32 2147483647, %v8162_v5  ;;  %vm11317_vm14 = vmmov %vm11316_vm13 }
 0x551   : >> { %v8176_v52 = vperm.slane %v1868_v1, 4 }
 0x552   : >> { %v1812_v44 = vmul.f32 %v6606_v42, %v1811_v54  ;;  %vm1849_vm6 = vcmp.eq.f32.partialorder %v1848_v47, 8.507059e+37 }
 0x553   : >> { %v1957_v63 = vmul.f32 %v8176_v52, %v8123_v30 }
 0x554   : >> { %v1813_v4 = vadd.f32 %v6606_v42, %v1812_v44 }
 0x555   : >> { %v6608_v21 = vpop.eup %6607  ;;  %v8183_v28 = vpop.permute.xlu0 %1771  ;;  %v1973_v58 = vsub.f32 %v8038_v34, %v1957_v63  ;;  %v1948_v34 = vmul.f32 %v8127_v57, %v1902_v27 }
 0x556   : >> { %v1840_v3 = vmul.f32 %v6608_v21, %v8162_v5  ;;  %v8185_v18 = vpop.permute.xlu2 %1776  ;;  %v1817_v36 = vsel %vm1816_vm9, %v6606_v42, %v1813_v4  ;;  %6609 = vrcp.f32 %v8183_v28  ;;  %vm1845_vm10 = vweird.f32 %v6608_v21  ;;  %v1917_v63 = vpop.permute.xlu1 %1916 }
 0x557   : >> { %6611 = vrcp.f32 %v8185_v18  ;;  %v1822_v53 = vsel %vm1819_vm0, %v1821_v8, %v1817_v36  ;;  %v8194_v7 = vsel %vm11316_vm13, %v8176_v52, %v1973_v58  ;;  %v1850_v42 = vand.u32 2147483648, %v8162_v5  ;;  %vm1846_vm12 = vmor %vm1844_vm11, %vm1845_vm10 }
 0x558   : >> { %v1841_v49 = vsub.f32 1.0, %v1840_v3  ;;  %v1823_v30 = vmul.f32 %v1822_v53, %v8084_v19  ;;  %2026 = vperm.xlu2 %6469, %v8194_v7   ;;  %v8209_v57 = vsub.f32 %v8045_v16, %v1948_v34  ;;  %v1880_v36 = vand.u32 2147483648, %v8183_v28 }
 0x559   : >> { %v1851_v1 = vor.u32 1.1754944e-38, %v1850_v42  ;;  %vm1874_vm0 = vweird.f32 %v8183_v28  ;;  %vm1889_vm10 = vweird.f32 %v8185_v18 }
 0x55a   : >> { %v1842_v56 = vmul.f32 %v6608_v21, %v1841_v49  ;;  %v8198_v45 = vperm.slane %v1823_v30, 4  ;;  %v1893_v49 = vand.u32 2147483647, %v8185_v18  ;;  %v1954_v30 = vmul.f32 %v8158_v55, %v1917_v63 }
 0x55c   : >> { %v1843_v26 = vadd.f32 %v6608_v21, %v1842_v56  ;;  %v6610_v33 = vpop.eup %6609  ;;  %v1951_v20 = vmul.f32 %v8198_v45, %v8137_v29  ;;  %v1878_v29 = vand.u32 2147483647, %v8183_v28  ;;  %v1881_v56 = vor.u32 1.1754944e-38, %v1880_v36 }
 0x55d   : >> { %v6612_v54 = vpop.eup %6611  ;;  %v1870_v51 = vmul.f32 %v6610_v33, %v8183_v28  ;;  %vm1875_vm15 = vweird.f32 %v6610_v33  ;;  %v8230_v55 = vsub.f32 %v8053_v59, %v1954_v30  ;;  %v1907_v59 = vpop.permute.xlu0 %1906 }
 0x55e   : >> { %v1847_v14 = vsel %vm1846_vm12, %v6608_v21, %v1843_v26  ;;  %v1885_v44 = vmul.f32 %v6612_v54, %v8185_v18  ;;  %v1967_v12 = vsub.f32 %v8084_v19, %v1951_v20  ;;  %v1895_v19 = vand.u32 2147483648, %v8185_v18  ;;  %vm1876_vm13 = vmor %vm1874_vm0, %vm1875_vm15  ;;  %v1912_v36 = vpop.permute.xlu2 %1911 }
 0x55f   : >> { %v1871_v6 = vsub.f32 1.0, %v1870_v51  ;;  %v1852_v4 = vsel %vm1849_vm6, %v1851_v1, %v1847_v14  ;;  %vm1890_vm9 = vweird.f32 %v6612_v54  ;;  %vm1879_vm11 = vcmp.eq.f32.partialorder %v1878_v29, 8.507059e+37  ;;  %vm11318_vm15 = vmmov %vm11317_vm14 }
 0x560   : >> { %v1886_v3 = vsub.f32 1.0, %v1885_v44  ;;  %v8216_v21 = vsel %vm11317_vm14, %v8198_v45, %v1967_v12  ;;  %v1853_v16 = vmul.f32 %v1852_v4, %v8095_v25  ;;  %2161 = vperm.xlu2 %6469, %v8209_v57   ;;  %vm1891_vm12 = vmor %vm1889_vm10, %vm1890_vm9  ;;  %v1896_v26 = vor.u32 1.1754944e-38, %v1895_v19 }
 0x561   : >> { %v1872_v8 = vmul.f32 %v6610_v33, %v1871_v6  ;;  %2011 = vperm.xlu0 %6471, %v8216_v21   ;;  %vm1894_vm6 = vcmp.eq.f32.partialorder %v1893_v49, 8.507059e+37  ;;  %vm11319_vm9 = vmmov %vm11317_vm14 }
 0x562   : >> { %v1887_v27 = vmul.f32 %v6612_v54, %v1886_v3  ;;  %v1943_v53 = vperm.slane %v1853_v16, 4 }
 0x563   : >> { %v1873_v58 = vadd.f32 %v6610_v33, %v1872_v8 }
 0x564   : >> { %v1888_v42 = vadd.f32 %v6612_v54, %v1887_v27  ;;  %v1955_v34 = vmul.f32 %v1943_v53, %v8162_v5  ;;  %v1932_v5 = vpop.permute.xlu1 %1931 }
 0x565   : >> { %v1877_v47 = vsel %vm1876_vm13, %v6610_v33, %v1873_v58 }
 0x566   : >> { %v1882_v20 = vsel %vm1879_vm11, %v1881_v56, %v1877_v47  ;;  %v1892_v51 = vsel %vm1891_vm12, %v6612_v54, %v1888_v42  ;;  %v1971_v1 = vsub.f32 %v8095_v25, %v1955_v34  ;;  %v1927_v27 = vpop.permute.xlu2 %1926  ;;  %vm11320_vm12 = vcmp.eq.s32.totalorder %v11260_v10, 5 }
 0x567   : >> { %v1883_v14 = vmul.f32 %v1882_v20, %v8068_v0  ;;  %v1897_v44 = vsel %vm1894_vm6, %v1896_v26, %v1892_v51  ;;  %v1958_v49 = vmul.f32 %v8176_v52, %v1927_v27  ;;  %v6927_v52 = vmov 6  }
 0x568   : >> { %v1898_v12 = vmul.f32 %v1897_v44, %v8106_v43  ;;  %v8235_v33 = vsel %vm11317_vm14, %v1943_v53, %v1971_v1  ;;  %2176 = vperm.xlu2 %6469, %v8230_v55  }
 0x569   : >> { %v1945_v6 = vperm.slane %v1883_v14, 4  ;;  %2021 = vperm.xlu1 %6470, %v8235_v33   ;;  %v8269_v30 = vsub.f32 %v8116_v37, %v1958_v49 }
 0x56a   : >> { %v1946_v54 = vperm.slane %v1898_v12, 4 }
 0x56b   : >> { %v1960_v4 = vmul.f32 %v1945_v6, %v1932_v5  ;;  %v1959_v25 = vmul.f32 %v1945_v6, %v8183_v28  ;;  %v1922_v28 = vpop.permute.xlu0 %1921 }
 0x56c   : >> { %v1961_v63 = vmul.f32 %v1946_v54, %v8185_v18  ;;  %v1956_v58 = vmul.f32 %v1943_v53, %v1922_v28 }
 0x56d   : >> { %v1975_v3 = vsub.f32 %v8068_v0, %v1959_v25  ;;  %v8243_v29 = vsub.f32 %v8063_v2, %v1960_v4  ;;  %v1952_v2 = vmul.f32 %v8198_v45, %v1912_v36  ;;  %v1950_v0 = vmul.f32 %v8132_v24, %v1907_v59 }
 0x56e   : >> { %v1977_v8 = vsub.f32 %v8106_v43, %v1961_v63  ;;  %v8272_v24 = vsub.f32 %v8090_v17, %v1956_v58 }
 0x56f   : >> { %v8248_v16 = vsel %vm11318_vm15, %v1945_v6, %v1975_v3  ;;  %v8260_v43 = vsub.f32 %v8111_v9, %v1952_v2  ;;  %v8263_v18 = vsub.f32 %v8079_v35, %v1950_v0 }
 0x570   : >> { %v8252_v19 = vsel %vm11319_vm9, %v1946_v54, %v1977_v8  ;;  %2191 = vperm.xlu2 %6469, %v8243_v29  }
 0x571   : >> { %2036 = vperm.xlu0 %6471, %v8252_v19   ;;  %2031 = vperm.xlu1 %6470, %v8248_v16  }
 0x573   : >> { %v1937_v9 = vpop.permute.xlu0 %1936 }
 0x574   : >> { %v1962_v35 = vmul.f32 %v1946_v54, %v1937_v9 }
 0x576   : >> { %v8277_v45 = vsub.f32 %v8101_v15, %v1962_v35 }
 0x578   : >> { %6473 = vset.pattern.permute.xlu2 %v6927_v52 }
 0x579   : >> { %2171 = vperm.xlu0 %6471, %v8260_v43   ;;  %2166 = vperm.xlu1 %6470, %v8263_v18  }
 0x581   : >> { %2186 = vperm.xlu0 %6471, %v8269_v30   ;;  %2181 = vperm.xlu1 %6470, %v8272_v24  }
 0x589   : >> { %2196 = vperm.xlu1 %6470, %v8277_v45   ;;  %6472 = vset.pattern.permute.xlu0 %v6927_v52 }
 0x591   : >> { %6474 = vset.pattern.permute.xlu1 %v6927_v52 }
 0x5a1   : >> { %v2002_v56 = vpop.permute.xlu2 %2001 }
 0x5a2   : >> { %6613 = vrcp.f32 %v2002_v56  ;;  %v2050_v47 = vand.u32 2147483648, %v2002_v56  ;;  %v2048_v26 = vand.u32 2147483647, %v2002_v56  ;;  %vm2044_vm13 = vweird.f32 %v2002_v56 }
 0x5a4   : >> { %v2051_v20 = vor.u32 1.1754944e-38, %v2050_v47  ;;  %vm2049_vm11 = vcmp.eq.f32.partialorder %v2048_v26, 8.507059e+37 }
 0x5a8   : >> { %v6614_v37 = vpop.eup %6613 }
 0x5a9   : >> { %v2040_v17 = vmul.f32 %v6614_v37, %v2002_v56  ;;  %vm2045_vm0 = vweird.f32 %v6614_v37 }
 0x5aa   : >> { %v8280_v42 = vpop.permute.xlu2 %2016  ;;  %vm2046_vm10 = vmor %vm2044_vm13, %vm2045_vm0 }
 0x5ab   : >> { %v2041_v53 = vsub.f32 1.0, %v2040_v17  ;;  %6615 = vrcp.f32 %v8280_v42  ;;  %vm2089_vm13 = vweird.f32 %v8280_v42  ;;  %v2093_v17 = vand.u32 2147483647, %v8280_v42 }
 0x5ad   : >> { %v2042_v34 = vmul.f32 %v6614_v37, %v2041_v53 }
 0x5af   : >> { %v2043_v15 = vadd.f32 %v6614_v37, %v2042_v34 }
 0x5b1   : >> { %v2047_v51 = vsel %vm2046_vm10, %v6614_v37, %v2043_v15  ;;  %v6616_v44 = vpop.eup %6615 }
 0x5b2   : >> { %v2052_v14 = vsel %vm2049_vm11, %v2051_v20, %v2047_v51  ;;  %v2027_v12 = vpop.permute.xlu2 %2026  ;;  %v2085_v5 = vmul.f32 %v6616_v44, %v8280_v42  ;;  %vm2090_vm15 = vweird.f32 %v6616_v44 }
 0x5b3   : >> { %v2053_v1 = vmul.f32 %v2052_v14, %v8145_v39  ;;  %6617 = vrcp.f32 %v2027_v12  ;;  %v2125_v0 = vand.u32 2147483648, %v2027_v12  ;;  %v2123_v27 = vand.u32 2147483647, %v2027_v12  ;;  %vm2091_vm10 = vmor %vm2089_vm13, %vm2090_vm15 }
 0x5b4   : >> { %v2086_v63 = vsub.f32 1.0, %v2085_v5  ;;  %vm2119_vm14 = vweird.f32 %v2027_v12 }
 0x5b5   : >> { %v2199_v6 = vperm.slane %v2053_v1, 5  ;;  %v2126_v35 = vor.u32 1.1754944e-38, %v2125_v0  ;;  %vm2124_vm0 = vcmp.eq.f32.partialorder %v2123_v27, 8.507059e+37 }
 0x5b6   : >> { %v2087_v2 = vmul.f32 %v6616_v44, %v2086_v63 }
 0x5b7   : >> { %v2207_v54 = vmul.f32 %v2199_v6, %v2002_v56  ;;  %v2095_v56 = vand.u32 2147483648, %v8280_v42 }
 0x5b8   : >> { %v2088_v9 = vadd.f32 %v6616_v44, %v2087_v2 }
 0x5b9   : >> { %v2223_v4 = vsub.f32 %v8145_v39, %v2207_v54  ;;  %v6618_v25 = vpop.eup %6617  ;;  %v2096_v51 = vor.u32 1.1754944e-38, %v2095_v56 }
 0x5ba   : >> { %v2007_v59 = vpop.permute.xlu1 %2006  ;;  %v2115_v36 = vmul.f32 %v6618_v25, %v2027_v12  ;;  %vm2120_vm6 = vweird.f32 %v6618_v25  ;;  %v2092_v26 = vsel %vm2091_vm10, %v6616_v44, %v2088_v9  ;;  %v2162_v63 = vpop.permute.xlu2 %2161 }
 0x5bb   : >> { %v8288_v3 = vsel %vm11320_vm12, %v2199_v6, %v2223_v4  ;;  %6619 = vrcp.f32 %v2007_v59  ;;  %vm2121_vm9 = vmor %vm2119_vm14, %vm2120_vm6  ;;  %v2065_v34 = vand.u32 2147483648, %v2007_v59  ;;  %v2063_v20 = vand.u32 2147483647, %v2007_v59 }
 0x5bc   : >> { %2261 = vperm.xlu0 %6472, %v8288_v3   ;;  %v2116_v8 = vsub.f32 1.0, %v2115_v36  ;;  %vm2094_vm12 = vcmp.eq.f32.partialorder %v2093_v17, 8.507059e+37  ;;  %vm2059_vm6 = vweird.f32 %v2007_v59 }
 0x5bd   : >> { %v2097_v5 = vsel %vm2094_vm12, %v2096_v51, %v2092_v26  ;;  %v2066_v4 = vor.u32 1.1754944e-38, %v2065_v34  ;;  %vm2064_vm15 = vcmp.eq.f32.partialorder %v2063_v20, 8.507059e+37 }
 0x5be   : >> { %v2117_v28 = vmul.f32 %v6618_v25, %v2116_v8  ;;  %v2098_v8 = vmul.f32 %v2097_v5, %v8172_v60 }
 0x5c0   : >> { %v2118_v58 = vadd.f32 %v6618_v25, %v2117_v28  ;;  %v2208_v28 = vmul.f32 %v2199_v6, %v2162_v63  ;;  %v2202_v27 = vperm.slane %v2098_v8, 5 }
 0x5c1   : >> { %v6620_v49 = vpop.eup %6619 }
 0x5c2   : >> { %v2055_v39 = vmul.f32 %v6620_v49, %v2007_v59  ;;  %v2122_v52 = vsel %vm2121_vm9, %v6618_v25, %v2118_v58  ;;  %vm2060_vm11 = vweird.f32 %v6620_v49  ;;  %vm11321_vm9 = vcmp.eq.s32.totalorder %v11260_v10, 5  ;;  %v2177_v56 = vpop.permute.xlu2 %2176 }
 0x5c3   : >> { %v2127_v53 = vsel %vm2124_vm0, %v2126_v35, %v2122_v52  ;;  %vm2061_vm14 = vmor %vm2059_vm6, %vm2060_vm11  ;;  %v2213_v35 = vmul.f32 %v2202_v27, %v8280_v42  ;;  %v2214_v6 = vmul.f32 %v2202_v27, %v2177_v56 }
 0x5c4   : >> { %v2056_v37 = vsub.f32 1.0, %v2055_v39  ;;  %v2128_v47 = vmul.f32 %v2127_v53, %v8194_v7  ;;  %v8312_v39 = vsub.f32 %v8209_v57, %v2208_v28  ;;  %vm11322_vm0 = vmmov %vm11321_vm9 }
 0x5c5   : >> { %v8324_v57 = vsub.f32 %v8230_v55, %v2214_v6  ;;  %vm11323_vm13 = vmmov %vm11322_vm0 }
 0x5c6   : >> { %v2057_v15 = vmul.f32 %v6620_v49, %v2056_v37  ;;  %v8295_v14 = vperm.slane %v2128_v47, 5 }
 0x5c8   : >> { %v2058_v1 = vadd.f32 %v6620_v49, %v2057_v15  ;;  %v2217_v54 = vmul.f32 %v8295_v14, %v2027_v12 }
 0x5ca   : >> { %v2062_v25 = vsel %vm2061_vm14, %v6620_v49, %v2058_v1  ;;  %v2233_v36 = vsub.f32 %v8194_v7, %v2217_v54 }
 0x5cb   : >> { %v2067_v44 = vsel %vm2064_vm15, %v2066_v4, %v2062_v25 }
 0x5cc   : >> { %v2068_v2 = vmul.f32 %v2067_v44, %v8152_v38  ;;  %v8304_v0 = vsel %vm11321_vm9, %v8295_v14, %v2233_v36 }
 0x5cd   : >> { %2286 = vperm.xlu0 %6472, %v8304_v0  }
 0x5ce   : >> { %v8307_v12 = vperm.slane %v2068_v2, 5 }
 0x5d0   : >> { %v2209_v49 = vmul.f32 %v8307_v12, %v2007_v59  ;;  %v2229_v59 = vsub.f32 %v8172_v60, %v2213_v35 }
 0x5d2   : >> { %v2225_v7 = vsub.f32 %v8152_v38, %v2209_v49  ;;  %v8328_v53 = vsel %vm11323_vm13, %v2202_v27, %v2229_v59 }
 0x5d3   : >> { %v2012_v58 = vpop.permute.xlu0 %2011 }
 0x5d4   : >> { %6621 = vrcp.f32 %v2012_v58  ;;  %v8317_v9 = vsel %vm11322_vm0, %v8307_v12, %v2225_v7  ;;  %v2080_v42 = vand.u32 2147483648, %v2012_v58  ;;  %v2078_v60 = vand.u32 2147483647, %v2012_v58 }
 0x5d5   : >> { %2266 = vperm.xlu2 %6473, %v8317_v9   ;;  %2421 = vperm.xlu0 %6472, %v8312_v39   ;;  %vm2074_vm11 = vweird.f32 %v2012_v58 }
 0x5d6   : >> { %v2081_v26 = vor.u32 1.1754944e-38, %v2080_v42  ;;  %vm2079_vm6 = vcmp.eq.f32.partialorder %v2078_v60, 8.507059e+37 }
 0x5da   : >> { %v6622_v38 = vpop.eup %6621 }
 0x5db   : >> { %v2070_v52 = vmul.f32 %v6622_v38, %v2012_v58  ;;  %v2022_v37 = vpop.permute.xlu1 %2021  ;;  %vm2075_vm10 = vweird.f32 %v6622_v38 }
 0x5dc   : >> { %6623 = vrcp.f32 %v2022_v37  ;;  %vm2076_vm12 = vmor %vm2074_vm11, %vm2075_vm10  ;;  %v2110_v63 = vand.u32 2147483648, %v2022_v37  ;;  %v2108_v44 = vand.u32 2147483647, %v2022_v37  ;;  %vm2104_vm15 = vweird.f32 %v2022_v37 }
 0x5dd   : >> { %v2071_v17 = vsub.f32 1.0, %v2070_v52  ;;  %2276 = vperm.xlu2 %6473, %v8328_v53   ;;  %2436 = vperm.xlu0 %6472, %v8324_v57  }
 0x5de   : >> { %v2111_v35 = vor.u32 1.1754944e-38, %v2110_v63  ;;  %vm2109_vm0 = vcmp.eq.f32.partialorder %v2108_v44, 8.507059e+37 }
 0x5df   : >> { %v2072_v47 = vmul.f32 %v6622_v38, %v2071_v17 }
 0x5e1   : >> { %v2073_v34 = vadd.f32 %v6622_v38, %v2072_v47 }
 0x5e2   : >> { %v6624_v55 = vpop.eup %6623 }
 0x5e3   : >> { %v8332_v15 = vpop.permute.xlu0 %2036  ;;  %v2077_v20 = vsel %vm2076_vm12, %v6622_v38, %v2073_v34  ;;  %v2100_v51 = vmul.f32 %v6624_v55, %v2022_v37  ;;  %v8334_v1 = vpop.permute.xlu1 %2031  ;;  %vm2105_vm14 = vweird.f32 %v6624_v55 }
 0x5e4   : >> { %6625 = vrcp.f32 %v8332_v15  ;;  %v2082_v5 = vsel %vm2079_vm6, %v2081_v26, %v2077_v20  ;;  %vm2106_vm9 = vmor %vm2104_vm15, %vm2105_vm14  ;;  %v2140_v42 = vand.u32 2147483648, %v8334_v1  ;;  %v2153_v60 = vand.u32 2147483647, %v8332_v15 }
 0x5e5   : >> { %6627 = vrcp.f32 %v8334_v1  ;;  %v2083_v54 = vmul.f32 %v2082_v5, %v8216_v21  ;;  %v2101_v4 = vsub.f32 1.0, %v2100_v51  ;;  %vm2149_vm12 = vweird.f32 %v8332_v15 }
 0x5e6   : >> { %vm2134_vm6 = vweird.f32 %v8334_v1  ;;  %vm2154_vm15 = vcmp.eq.f32.partialorder %v2153_v60, 8.507059e+37 }
 0x5e7   : >> { %v8339_v25 = vperm.slane %v2083_v54, 5  ;;  %v2102_v36 = vmul.f32 %v6624_v55, %v2101_v4  ;;  %v2141_v4 = vor.u32 1.1754944e-38, %v2140_v42 }
 0x5e9   : >> { %v2211_v8 = vmul.f32 %v8339_v25, %v2012_v58  ;;  %v2103_v28 = vadd.f32 %v6624_v55, %v2102_v36 }
 0x5ea   : >> { %v6626_v2 = vpop.eup %6625 }
 0x5eb   : >> { %v6628_v27 = vpop.eup %6627  ;;  %v2145_v49 = vmul.f32 %v6626_v2, %v8332_v15  ;;  %v2227_v7 = vsub.f32 %v8216_v21, %v2211_v8  ;;  %v2107_v6 = vsel %vm2106_vm9, %v6624_v55, %v2103_v28  ;;  %v2155_v21 = vand.u32 2147483648, %v8332_v15 }
 0x5ec   : >> { %v2130_v56 = vmul.f32 %v6628_v27, %v8334_v1  ;;  %v2112_v58 = vsel %vm2109_vm0, %v2111_v35, %v2107_v6  ;;  %vm2150_vm10 = vweird.f32 %v6626_v2  ;;  %vm2135_vm11 = vweird.f32 %v6628_v27 }
 0x5ed   : >> { %v2146_v59 = vsub.f32 1.0, %v2145_v49  ;;  %v8348_v38 = vsel %vm11323_vm13, %v8339_v25, %v2227_v7  ;;  %v2113_v17 = vmul.f32 %v2112_v58, %v8235_v33  ;;  %v2138_v55 = vand.u32 2147483647, %v8334_v1  ;;  %vm2151_vm14 = vmor %vm2149_vm12, %vm2150_vm10 }
 0x5ee   : >> { %v2131_v52 = vsub.f32 1.0, %v2130_v56  ;;  %2271 = vperm.xlu1 %6474, %v8348_v38   ;;  %v2156_v5 = vor.u32 1.1754944e-38, %v2155_v21  ;;  %vm2136_vm9 = vmor %vm2134_vm6, %vm2135_vm11  ;;  %v2192_v56 = vpop.permute.xlu2 %2191 }
 0x5ef   : >> { %v2147_v47 = vmul.f32 %v6626_v2, %v2146_v59  ;;  %v2203_v26 = vperm.slane %v2113_v17, 5  ;;  %vm2139_vm0 = vcmp.eq.f32.partialorder %v2138_v55, 8.507059e+37  ;;  %vm11324_vm10 = vmmov %vm11323_vm13 }
 0x5f0   : >> { %v2132_v34 = vmul.f32 %v6628_v27, %v2131_v52  ;;  %v2172_v52 = vpop.permute.xlu0 %2171  ;;  %vm11325_vm11 = vmmov %vm11324_vm10 }
 0x5f1   : >> { %v2148_v20 = vadd.f32 %v6626_v2, %v2147_v47  ;;  %v2215_v51 = vmul.f32 %v2203_v26, %v2022_v37 }
 0x5f2   : >> { %v2133_v54 = vadd.f32 %v6628_v27, %v2132_v34 }
 0x5f3   : >> { %v2152_v63 = vsel %vm2151_vm14, %v6626_v2, %v2148_v20  ;;  %v2231_v36 = vsub.f32 %v8235_v33, %v2215_v51  ;;  %v2167_v33 = vpop.permute.xlu1 %2166 }
 0x5f4   : >> { %v2157_v44 = vsel %vm2154_vm15, %v2156_v5, %v2152_v63  ;;  %v2137_v8 = vsel %vm2136_vm9, %v6628_v27, %v2133_v54 }
 0x5f5   : >> { %v2158_v28 = vmul.f32 %v2157_v44, %v8252_v19  ;;  %v2142_v49 = vsel %vm2139_vm0, %v2141_v4, %v2137_v8  ;;  %v8362_v7 = vsel %vm11323_vm13, %v2203_v26, %v2231_v36 }
 0x5f6   : >> { %v2143_v37 = vmul.f32 %v2142_v49, %v8248_v16  ;;  %2281 = vperm.xlu1 %6474, %v8362_v7  }
 0x5f7   : >> { %v2206_v35 = vperm.slane %v2158_v28, 5 }
 0x5f8   : >> { %v2205_v2 = vperm.slane %v2143_v37, 5  ;;  %v2187_v60 = vpop.permute.xlu0 %2186 }
 0x5f9   : >> { %v2221_v6 = vmul.f32 %v2206_v35, %v8332_v15  ;;  %v2218_v55 = vmul.f32 %v8295_v14, %v2187_v60 }
 0x5fa   : >> { %v2220_v59 = vmul.f32 %v2205_v2, %v2192_v56  ;;  %v2219_v27 = vmul.f32 %v2205_v2, %v8334_v1 }
 0x5fb   : >> { %v2237_v58 = vsub.f32 %v8252_v19, %v2221_v6  ;;  %v2210_v19 = vmul.f32 %v8307_v12, %v2167_v33  ;;  %v2182_v1 = vpop.permute.xlu1 %2181  ;;  %v8399_v12 = vsub.f32 %v8269_v30, %v2218_v55 }
 0x5fc   : >> { %v8370_v17 = vsub.f32 %v8243_v29, %v2220_v59  ;;  %v2235_v21 = vsub.f32 %v8248_v16, %v2219_v27  ;;  %v2212_v29 = vmul.f32 %v8339_v25, %v2172_v52  ;;  %v2216_v34 = vmul.f32 %v2203_v26, %v2182_v1 }
 0x5fd   : >> { %v8375_v42 = vsel %vm11324_vm10, %v2206_v35, %v2237_v58  ;;  %v8387_v16 = vsub.f32 %v8263_v18, %v2210_v19  ;;  %v6928_v26 = vmov 7  }
 0x5fe   : >> { %2451 = vperm.xlu0 %6472, %v8370_v17   ;;  %v8380_v15 = vsel %vm11325_vm11, %v2205_v2, %v2235_v21  ;;  %2296 = vperm.xlu1 %6474, %v8375_v42   ;;  %v8390_v47 = vsub.f32 %v8260_v43, %v2212_v29  ;;  %v8396_v20 = vsub.f32 %v8272_v24, %v2216_v34 }
 0x5ff   : >> { %2291 = vperm.xlu2 %6473, %v8380_v15  }
 0x603   : >> { %v2197_v25 = vpop.permute.xlu1 %2196 }
 0x604   : >> { %v2222_v43 = vmul.f32 %v2206_v35, %v2197_v25 }
 0x606   : >> { %2431 = vperm.xlu1 %6474, %v8390_v47   ;;  %v8404_v18 = vsub.f32 %v8277_v45, %v2222_v43  ;;  %6476 = vset.pattern.permute.xlu0 %v6928_v26 }
 0x607   : >> { %2426 = vperm.xlu2 %6473, %v8387_v16  }
 0x60e   : >> { %2446 = vperm.xlu1 %6474, %v8399_v12  }
 0x60f   : >> { %2441 = vperm.xlu2 %6473, %v8396_v20  }
 0x616   : >> { %6475 = vset.pattern.permute.xlu1 %v6928_v26 }
 0x617   : >> { %2456 = vperm.xlu2 %6473, %v8404_v18  }
 0x61f   : >> { %6477 = vset.pattern.permute.xlu2 %v6928_v26 }
 0x62e   : >> { %v2262_v14 = vpop.permute.xlu0 %2261 }
 0x62f   : >> { %6629 = vrcp.f32 %v2262_v14  ;;  %v2267_v24 = vpop.permute.xlu2 %2266  ;;  %v2310_v36 = vand.u32 2147483648, %v2262_v14  ;;  %v2308_v8 = vand.u32 2147483647, %v2262_v14  ;;  %vm2304_vm6 = vweird.f32 %v2262_v14 }
 0x630   : >> { %6631 = vrcp.f32 %v2267_v24  ;;  %v2325_v28 = vand.u32 2147483648, %v2267_v24  ;;  %v2323_v35 = vand.u32 2147483647, %v2267_v24  ;;  %vm2319_vm0 = vweird.f32 %v2267_v24 }
 0x631   : >> { %v2311_v2 = vor.u32 1.1754944e-38, %v2310_v36  ;;  %vm2309_vm9 = vcmp.eq.f32.partialorder %v2308_v8, 8.507059e+37 }
 0x632   : >> { %v2326_v27 = vor.u32 1.1754944e-38, %v2325_v28  ;;  %vm2324_vm10 = vcmp.eq.f32.partialorder %v2323_v35, 8.507059e+37 }
 0x635   : >> { %v6630_v30 = vpop.eup %6629 }
 0x636   : >> { %v2300_v51 = vmul.f32 %v6630_v30, %v2262_v14  ;;  %v6632_v5 = vpop.eup %6631  ;;  %vm2305_vm12 = vweird.f32 %v6630_v30 }
 0x637   : >> { %v2315_v4 = vmul.f32 %v6632_v5, %v2267_v24  ;;  %v2277_v63 = vpop.permute.xlu2 %2276  ;;  %vm2320_vm14 = vweird.f32 %v6632_v5  ;;  %vm2306_vm15 = vmor %vm2304_vm6, %vm2305_vm12 }
 0x638   : >> { %v2301_v54 = vsub.f32 1.0, %v2300_v51  ;;  %6633 = vrcp.f32 %v2277_v63  ;;  %vm2321_vm13 = vmor %vm2319_vm0, %vm2320_vm14  ;;  %v2353_v55 = vand.u32 2147483647, %v2277_v63  ;;  %v2355_v25 = vand.u32 2147483648, %v2277_v63 }
 0x639   : >> { %v2316_v45 = vsub.f32 1.0, %v2315_v4  ;;  %vm2349_vm12 = vweird.f32 %v2277_v63  ;;  %vm11326_vm14 = vcmp.eq.s32.totalorder %v11260_v10, 6 }
 0x63a   : >> { %v2302_v44 = vmul.f32 %v6630_v30, %v2301_v54  ;;  %v2356_v4 = vor.u32 1.1754944e-38, %v2355_v25 }
 0x63b   : >> { %v2317_v37 = vmul.f32 %v6632_v5, %v2316_v45 }
 0x63c   : >> { %v2303_v49 = vadd.f32 %v6630_v30, %v2302_v44 }
 0x63d   : >> { %v2318_v6 = vadd.f32 %v6632_v5, %v2317_v37 }
 0x63e   : >> { %v2307_v56 = vsel %vm2306_vm15, %v6630_v30, %v2303_v49  ;;  %v6634_v33 = vpop.eup %6633  ;;  %vm2354_vm15 = vcmp.eq.f32.partialorder %v2353_v55, 8.507059e+37 }
 0x63f   : >> { %v2312_v59 = vsel %vm2309_vm9, %v2311_v2, %v2307_v56  ;;  %v2345_v58 = vmul.f32 %v6634_v33, %v2277_v63  ;;  %v2322_v21 = vsel %vm2321_vm13, %v6632_v5, %v2318_v6  ;;  %v2287_v19 = vpop.permute.xlu0 %2286  ;;  %vm2350_vm11 = vweird.f32 %v6634_v33  ;;  %vm11327_vm9 = vmmov %vm11326_vm14 }
 0x640   : >> { %v2313_v52 = vmul.f32 %v2312_v59, %v8288_v3  ;;  %v2327_v29 = vsel %vm2324_vm10, %v2326_v27, %v2322_v21  ;;  %6635 = vrcp.f32 %v2287_v19  ;;  %vm2351_vm6 = vmor %vm2349_vm12, %vm2350_vm11  ;;  %v2385_v35 = vand.u32 2147483648, %v2287_v19 }
 0x641   : >> { %v2346_v1 = vsub.f32 1.0, %v2345_v58  ;;  %v2328_v34 = vmul.f32 %v2327_v29, %v8317_v9  ;;  %vm2379_vm13 = vweird.f32 %v2287_v19  ;;  %vm11328_vm12 = vmmov %vm11327_vm9 }
 0x642   : >> { %v2459_v60 = vperm.slane %v2313_v52, 6  ;;  %v2386_v59 = vor.u32 1.1754944e-38, %v2385_v35 }
 0x643   : >> { %v8409_v26 = vperm.slane %v2328_v34, 6  ;;  %v2347_v30 = vmul.f32 %v6634_v33, %v2346_v1 }
 0x644   : >> { %v2467_v43 = vmul.f32 %v2459_v60, %v2262_v14 }
 0x645   : >> { %v2469_v54 = vmul.f32 %v8409_v26, %v2267_v24  ;;  %v2348_v5 = vadd.f32 %v6634_v33, %v2347_v30 }
 0x646   : >> { %v2483_v51 = vsub.f32 %v8288_v3, %v2467_v43  ;;  %v6636_v36 = vpop.eup %6635 }
 0x647   : >> { %v2485_v44 = vsub.f32 %v8317_v9, %v2469_v54  ;;  %v2352_v14 = vsel %vm2351_vm6, %v6634_v33, %v2348_v5  ;;  %v2375_v8 = vmul.f32 %v6636_v36, %v2287_v19  ;;  %vm2380_vm0 = vweird.f32 %v6636_v36  ;;  %v2422_v1 = vpop.permute.xlu0 %2421  ;;  %vm11329_vm6 = vmmov %vm11327_vm9 }
 0x648   : >> { %v8415_v45 = vsel %vm11326_vm14, %v2459_v60, %v2483_v51  ;;  %v2357_v28 = vsel %vm2354_vm15, %v2356_v4, %v2352_v14  ;;  %v2383_v9 = vand.u32 2147483647, %v2287_v19  ;;  %vm2381_vm10 = vmor %vm2379_vm13, %vm2380_vm0  ;;  %v2468_v25 = vmul.f32 %v2459_v60, %v2422_v1 }
 0x649   : >> { %2521 = vperm.xlu1 %6475, %v8415_v45   ;;  %v8422_v3 = vsel %vm11327_vm9, %v8409_v26, %v2485_v44  ;;  %v2358_v24 = vmul.f32 %v2357_v28, %v8328_v53  ;;  %v2376_v49 = vsub.f32 1.0, %v2375_v8 }
 0x64a   : >> { %2526 = vperm.xlu0 %6476, %v8422_v3   ;;  %vm2384_vm11 = vcmp.eq.f32.partialorder %v2383_v9, 8.507059e+37  ;;  %v8444_v54 = vsub.f32 %v8312_v39, %v2468_v25 }
 0x64b   : >> { %v2462_v37 = vperm.slane %v2358_v24, 6  ;;  %v2377_v2 = vmul.f32 %v6636_v36, %v2376_v49 }
 0x64d   : >> { %v2473_v56 = vmul.f32 %v2462_v37, %v2277_v63  ;;  %v2378_v6 = vadd.f32 %v6636_v36, %v2377_v2 }
 0x64f   : >> { %v2489_v33 = vsub.f32 %v8328_v53, %v2473_v56  ;;  %v2382_v27 = vsel %vm2381_vm10, %v6636_v36, %v2378_v6 }
 0x650   : >> { %v2387_v52 = vsel %vm2384_vm11, %v2386_v59, %v2382_v27 }
 0x651   : >> { %v8429_v58 = vsel %vm11328_vm12, %v2462_v37, %v2489_v33  ;;  %v2388_v21 = vmul.f32 %v2387_v52, %v8304_v0 }
 0x652   : >> { %2536 = vperm.xlu1 %6475, %v8429_v58  }
 0x653   : >> { %v8433_v29 = vperm.slane %v2388_v21, 6 }
 0x655   : >> { %v2477_v63 = vmul.f32 %v8433_v29, %v2287_v19  ;;  %v2437_v19 = vpop.permute.xlu0 %2436 }
 0x656   : >> { %v2474_v36 = vmul.f32 %v2462_v37, %v2437_v19 }
 0x657   : >> { %v2493_v53 = vsub.f32 %v8304_v0, %v2477_v63 }
 0x658   : >> { %v8450_v39 = vsub.f32 %v8324_v57, %v2474_v36 }
 0x659   : >> { %v2292_v34 = vpop.permute.xlu2 %2291  ;;  %v8440_v55 = vsel %vm11329_vm6, %v8433_v29, %v2493_v53 }
 0x65a   : >> { %6637 = vrcp.f32 %v2292_v34  ;;  %2546 = vperm.xlu1 %6475, %v8440_v55   ;;  %v2400_v4 = vand.u32 2147483648, %v2292_v34  ;;  %v2398_v44 = vand.u32 2147483647, %v2292_v34  ;;  %vm2394_vm15 = vweird.f32 %v2292_v34 }
 0x65c   : >> { %v2401_v49 = vor.u32 1.1754944e-38, %v2400_v4  ;;  %vm2399_vm0 = vcmp.eq.f32.partialorder %v2398_v44, 8.507059e+37 }
 0x660   : >> { %v6638_v43 = vpop.eup %6637  ;;  %v2272_v30 = vpop.permute.xlu1 %2271 }
 0x661   : >> { %v2390_v51 = vmul.f32 %v6638_v43, %v2292_v34  ;;  %6639 = vrcp.f32 %v2272_v30  ;;  %vm2395_vm14 = vweird.f32 %v6638_v43  ;;  %v2340_v9 = vand.u32 2147483648, %v2272_v30 }
 0x662   : >> { %2681 = vperm.xlu1 %6475, %v8444_v54   ;;  %vm2396_vm9 = vmor %vm2394_vm15, %vm2395_vm14  ;;  %v2338_v6 = vand.u32 2147483647, %v2272_v30  ;;  %vm2334_vm10 = vweird.f32 %v2272_v30  ;;  %vm11330_vm14 = vcmp.eq.s32.totalorder %v11260_v10, 6 }
 0x663   : >> { %v2391_v5 = vsub.f32 1.0, %v2390_v51  ;;  %v2341_v27 = vor.u32 1.1754944e-38, %v2340_v9  ;;  %v2427_v51 = vpop.permute.xlu2 %2426 }
 0x664   : >> { %vm2339_vm12 = vcmp.eq.f32.partialorder %v2338_v6, 8.507059e+37 }
 0x665   : >> { %v2392_v0 = vmul.f32 %v6638_v43, %v2391_v5 }
 0x667   : >> { %v6640_v14 = vpop.eup %6639  ;;  %v2393_v8 = vadd.f32 %v6638_v43, %v2392_v0 }
 0x668   : >> { %v2330_v60 = vmul.f32 %v6640_v14, %v2272_v30  ;;  %v8447_v28 = vpop.permute.xlu1 %2281  ;;  %vm2335_vm13 = vweird.f32 %v6640_v14 }
 0x669   : >> { %v2397_v24 = vsel %vm2396_vm9, %v6638_v43, %v2393_v8  ;;  %6641 = vrcp.f32 %v8447_v28  ;;  %vm2336_vm11 = vmor %vm2334_vm10, %vm2335_vm13  ;;  %v2368_v36 = vand.u32 2147483647, %v8447_v28  ;;  %vm2364_vm15 = vweird.f32 %v8447_v28 }
 0x66a   : >> { %v2331_v35 = vsub.f32 1.0, %v2330_v60  ;;  %v2402_v2 = vsel %vm2399_vm0, %v2401_v49, %v2397_v24  ;;  %2696 = vperm.xlu1 %6475, %v8450_v39   ;;  %v2470_v24 = vmul.f32 %v8409_v26, %v2427_v51  ;;  %vm11331_vm13 = vmmov %vm11330_vm14 }
 0x66b   : >> { %v2403_v37 = vmul.f32 %v2402_v2, %v8380_v15  ;;  %vm2369_vm0 = vcmp.eq.f32.partialorder %v2368_v36, 8.507059e+37 }
 0x66c   : >> { %v2332_v56 = vmul.f32 %v6640_v14, %v2331_v35 }
 0x66d   : >> { %v2465_v33 = vperm.slane %v2403_v37, 6 }
 0x66e   : >> { %v2333_v59 = vadd.f32 %v6640_v14, %v2332_v56 }
 0x66f   : >> { %v6642_v57 = vpop.eup %6641  ;;  %v2479_v21 = vmul.f32 %v2465_v33, %v2292_v34  ;;  %v2370_v34 = vand.u32 2147483648, %v8447_v28 }
 0x670   : >> { %v2452_v52 = vpop.permute.xlu0 %2451  ;;  %v2337_v63 = vsel %vm2336_vm11, %v6640_v14, %v2333_v59  ;;  %v2360_v1 = vmul.f32 %v6642_v57, %v8447_v28  ;;  %v2297_v25 = vpop.permute.xlu1 %2296  ;;  %vm2365_vm6 = vweird.f32 %v6642_v57 }
 0x671   : >> { %v2480_v53 = vmul.f32 %v2465_v33, %v2452_v52  ;;  %v2342_v43 = vsel %vm2339_vm12, %v2341_v27, %v2337_v63  ;;  %6643 = vrcp.f32 %v2297_v25  ;;  %v2495_v0 = vsub.f32 %v8380_v15, %v2479_v21  ;;  %vm2366_vm9 = vmor %vm2364_vm15, %vm2365_vm6  ;;  %v2442_v59 = vpop.permute.xlu2 %2441 }
 0x672   : >> { %v2361_v19 = vsub.f32 1.0, %v2360_v1  ;;  %v2343_v4 = vmul.f32 %v2342_v43, %v8348_v38  ;;  %v2371_v49 = vor.u32 1.1754944e-38, %v2370_v34  ;;  %v2415_v26 = vand.u32 2147483648, %v2297_v25  ;;  %vm11333_vm15 = vmmov %vm11331_vm13 }
 0x673   : >> { %v8457_v5 = vsub.f32 %v8370_v17, %v2480_v53  ;;  %v8465_v14 = vsel %vm11330_vm14, %v2465_v33, %v2495_v0  ;;  %v2413_v52 = vand.u32 2147483647, %v2297_v25  ;;  %vm2409_vm11 = vweird.f32 %v2297_v25  ;;  %vm11332_vm14 = vmmov %vm11331_vm13 }
 0x674   : >> { %v2362_v44 = vmul.f32 %v6642_v57, %v2361_v19  ;;  %v2461_v8 = vperm.slane %v2343_v4, 6  ;;  %2551 = vperm.xlu0 %6476, %v8465_v14   ;;  %v2416_v1 = vor.u32 1.1754944e-38, %v2415_v26 }
 0x675   : >> { %2711 = vperm.xlu1 %6475, %v8457_v5   ;;  %vm2414_vm6 = vcmp.eq.f32.partialorder %v2413_v52, 8.507059e+37 }
 0x676   : >> { %v2363_v17 = vadd.f32 %v6642_v57, %v2362_v44  ;;  %v2471_v15 = vmul.f32 %v2461_v8, %v2272_v30  ;;  %v8478_v30 = vsub.f32 %v8387_v16, %v2470_v24 }
 0x677   : >> { %v6644_v60 = vpop.eup %6643 }
 0x678   : >> { %v2367_v35 = vsel %vm2366_vm9, %v6642_v57, %v2363_v17  ;;  %v2405_v2 = vmul.f32 %v6644_v60, %v2297_v25  ;;  %v2487_v9 = vsub.f32 %v8348_v38, %v2471_v15  ;;  %vm2410_vm10 = vweird.f32 %v6644_v60  ;;  %v2432_v44 = vpop.permute.xlu1 %2431 }
 0x679   : >> { %v2372_v37 = vsel %vm2369_vm0, %v2371_v49, %v2367_v35  ;;  %vm2411_vm12 = vmor %vm2409_vm11, %vm2410_vm10  ;;  %v2472_v15 = vmul.f32 %v2461_v8, %v2432_v44 }
 0x67a   : >> { %v2373_v56 = vmul.f32 %v2372_v37, %v8362_v7  ;;  %v2406_v6 = vsub.f32 1.0, %v2405_v2  ;;  %v8475_v33 = vsel %vm11331_vm13, %v2461_v8, %v2487_v9  ;;  %v6929_v8 = vmov 8  }
 0x67b   : >> { %2531 = vperm.xlu2 %6477, %v8475_v33  }
 0x67c   : >> { %v2463_v27 = vperm.slane %v2373_v56, 6  ;;  %v2407_v57 = vmul.f32 %v6644_v60, %v2406_v6  ;;  %2686 = vperm.xlu0 %6476, %v8478_v30  }
 0x67d   : >> { %6479 = vset.pattern.permute.xlu1 %v6929_v8 }
 0x67e   : >> { %v2476_v38 = vmul.f32 %v2463_v27, %v2442_v59  ;;  %v2408_v21 = vadd.f32 %v6644_v60, %v2407_v57  ;;  %v2475_v63 = vmul.f32 %v2463_v27, %v8447_v28  ;;  %v2457_v28 = vpop.permute.xlu2 %2456 }
 0x680   : >> { %v2412_v53 = vsel %vm2411_vm12, %v6644_v60, %v2408_v21  ;;  %v2491_v16 = vsub.f32 %v8362_v7, %v2475_v63  ;;  %v8485_v43 = vsub.f32 %v8396_v20, %v2476_v38  ;;  %v8505_v60 = vsub.f32 %v8390_v47, %v2472_v15  ;;  %v2447_v24 = vpop.permute.xlu1 %2446 }
 0x681   : >> { %v2417_v51 = vsel %vm2414_vm6, %v2416_v1, %v2412_v53 }
 0x682   : >> { %v2418_v19 = vmul.f32 %v2417_v51, %v8375_v42  ;;  %v8490_v0 = vsel %vm11332_vm14, %v2463_v27, %v2491_v16 }
 0x683   : >> { %2541 = vperm.xlu2 %6477, %v8490_v0  }
 0x684   : >> { %v2466_v4 = vperm.slane %v2418_v19, 6  ;;  %2701 = vperm.xlu0 %6476, %v8485_v43  }
 0x686   : >> { %v2482_v36 = vmul.f32 %v2466_v4, %v2457_v28  ;;  %v2481_v34 = vmul.f32 %v2466_v4, %v2297_v25 }
 0x688   : >> { %v2497_v7 = vsub.f32 %v8375_v42, %v2481_v34  ;;  %v8496_v20 = vsub.f32 %v8404_v18, %v2482_v36  ;;  %v2478_v42 = vmul.f32 %v8433_v29, %v2447_v24 }
 0x68a   : >> { %v8500_v17 = vsel %vm11333_vm15, %v2466_v4, %v2497_v7  ;;  %v8510_v18 = vsub.f32 %v8399_v12, %v2478_v42 }
 0x68b   : >> { %2556 = vperm.xlu2 %6477, %v8500_v17  }
 0x68c   : >> { %2716 = vperm.xlu0 %6476, %v8496_v20  }
 0x693   : >> { %2691 = vperm.xlu2 %6477, %v8505_v60  }
 0x694   : >> { %6480 = vset.pattern.permute.xlu0 %v6929_v8 }
 0x69b   : >> { %2706 = vperm.xlu2 %6477, %v8510_v18  }
 0x6a3   : >> { %6478 = vset.pattern.permute.xlu2 %v6929_v8 }
 0x6bb   : >> { %v8513_v25 = vpop.permute.xlu1 %2521 }
 0x6bc   : >> { %6645 = vrcp.f32 %v8513_v25  ;;  %v2570_v29 = vand.u32 2147483648, %v8513_v25  ;;  %v8521_v9 = vpop.permute.xlu0 %2526  ;;  %vm2564_vm0 = vweird.f32 %v8513_v25  ;;  %v2568_v56 = vand.u32 2147483647, %v8513_v25 }
 0x6be   : >> { %v2571_v26 = vor.u32 1.1754944e-38, %v2570_v29  ;;  %vm2569_vm10 = vcmp.eq.f32.partialorder %v2568_v56, 8.507059e+37 }
 0x6c2   : >> { %v6646_v49 = vpop.eup %6645 }
 0x6c3   : >> { %v2560_v47 = vmul.f32 %v6646_v49, %v8513_v25  ;;  %vm2565_vm9 = vweird.f32 %v6646_v49 }
 0x6c4   : >> { %v8517_v2 = vpop.permute.xlu1 %2536  ;;  %vm2566_vm13 = vmor %vm2564_vm0, %vm2565_vm9  ;;  %vm2579_vm0 = vweird.f32 %v8521_v9 }
 0x6c5   : >> { %v2561_v35 = vsub.f32 1.0, %v2560_v47  ;;  %6647 = vrcp.f32 %v8517_v2  ;;  %v2615_v21 = vand.u32 2147483648, %v8517_v2  ;;  %v2613_v53 = vand.u32 2147483647, %v8517_v2 }
 0x6c6   : >> { %6649 = vrcp.f32 %v8521_v9  ;;  %vm2609_vm12 = vweird.f32 %v8517_v2 }
 0x6c7   : >> { %v2562_v12 = vmul.f32 %v6646_v49, %v2561_v35  ;;  %v2616_v19 = vor.u32 1.1754944e-38, %v2615_v21  ;;  %vm2614_vm14 = vcmp.eq.f32.partialorder %v2613_v53, 8.507059e+37 }
 0x6c9   : >> { %v2563_v37 = vadd.f32 %v6646_v49, %v2562_v12 }
 0x6cb   : >> { %v2567_v6 = vsel %vm2566_vm13, %v6646_v49, %v2563_v37  ;;  %v6648_v59 = vpop.eup %6647 }
 0x6cc   : >> { %v2605_v27 = vmul.f32 %v6648_v59, %v8517_v2  ;;  %v8527_v57 = vpop.permute.xlu1 %2546  ;;  %v2572_v52 = vsel %vm2569_vm10, %v2571_v26, %v2567_v6  ;;  %vm2610_vm11 = vweird.f32 %v6648_v59  ;;  %v8532_v16 = vpop.eup %6649 }
 0x6cd   : >> { %v2573_v63 = vmul.f32 %v2572_v52, %v8415_v45  ;;  %6651 = vrcp.f32 %v8527_v57  ;;  %vm2611_vm6 = vmor %vm2609_vm12, %vm2610_vm11  ;;  %v2575_v4 = vmul.f32 %v8532_v16, %v8521_v9  ;;  %vm2580_vm15 = vweird.f32 %v8532_v16 }
 0x6ce   : >> { %v2606_v38 = vsub.f32 1.0, %v2605_v27  ;;  %v2583_v27 = vand.u32 2147483647, %v8521_v9  ;;  %vm8573_vm13 = vmor %vm2579_vm0, %vm2580_vm15  ;;  %vm2639_vm15 = vweird.f32 %v8527_v57 }
 0x6cf   : >> { %v8538_v28 = vperm.slane %v2573_v63, 7  ;;  %v2576_v42 = vsub.f32 1.0, %v2575_v4  ;;  %v2585_v63 = vand.u32 2147483648, %v8521_v9 }
 0x6d0   : >> { %v2607_v1 = vmul.f32 %v6648_v59, %v2606_v38  ;;  %vm2584_vm11 = vcmp.eq.f32.partialorder %v2583_v27, 8.507059e+37 }
 0x6d1   : >> { %v2577_v29 = vmul.f32 %v8532_v16, %v2576_v42  ;;  %v2586_v42 = vor.u32 1.1754944e-38, %v2585_v63 }
 0x6d2   : >> { %v2608_v51 = vadd.f32 %v6648_v59, %v2607_v1 }
 0x6d3   : >> { %v8544_v24 = vpop.eup %6651  ;;  %v2578_v38 = vadd.f32 %v8532_v16, %v2577_v29 }
 0x6d4   : >> { %v2612_v36 = vsel %vm2611_vm6, %v6648_v59, %v2608_v51  ;;  %v2682_v34 = vpop.permute.xlu1 %2681  ;;  %v2635_v47 = vmul.f32 %v8544_v24, %v8527_v57 }
 0x6d5   : >> { %v8540_v44 = vpop.permute.xlu2 %2531  ;;  %v2617_v7 = vsel %vm2614_vm14, %v2616_v19, %v2612_v36  ;;  %v2728_v15 = vmul.f32 %v8538_v28, %v2682_v34  ;;  %v2582_v36 = vsel %vm8573_vm13, %v8532_v16, %v2578_v38  ;;  %vm2640_vm14 = vweird.f32 %v8544_v24 }
 0x6d6   : >> { %6653 = vrcp.f32 %v8540_v44  ;;  %v2618_v49 = vmul.f32 %v2617_v7, %v8429_v58  ;;  %v2636_v59 = vsub.f32 1.0, %v2635_v47  ;;  %v2600_v21 = vand.u32 2147483648, %v8540_v44  ;;  %vm8595_vm0 = vmor %vm2639_vm15, %vm2640_vm14 }
 0x6d7   : >> { %v8547_v8 = vsub.f32 %v8444_v54, %v2728_v15  ;;  %v2598_v53 = vand.u32 2147483647, %v8540_v44  ;;  %vm2594_vm10 = vweird.f32 %v8540_v44  ;;  %v2587_v16 = vsel %vm2584_vm11, %v2586_v42, %v2582_v36 }
 0x6d8   : >> { %v8553_v12 = vperm.slane %v2618_v49, 7  ;;  %v2637_v51 = vmul.f32 %v8544_v24, %v2636_v59  ;;  %v2601_v34 = vor.u32 1.1754944e-38, %v2600_v21  ;;  %v2645_v59 = vand.u32 2147483648, %v8527_v57 }
 0x6d9   : >> { %2781 = vperm.xlu2 %6478, %v8547_v8   ;;  %vm2599_vm6 = vcmp.eq.f32.partialorder %v2598_v53, 8.507059e+37  ;;  %v2588_v21 = vmul.f32 %v2587_v16, %v8422_v3 }
 0x6da   : >> { %v2638_v29 = vadd.f32 %v8544_v24, %v2637_v51  ;;  %v2646_v51 = vor.u32 1.1754944e-38, %v2645_v59 }
 0x6dc   : >> { %v6654_v35 = vpop.eup %6653  ;;  %v2697_v56 = vpop.permute.xlu1 %2696 }
 0x6dd   : >> { %v2590_v37 = vmul.f32 %v6654_v35, %v8540_v44  ;;  %v8557_v6 = vpop.permute.xlu2 %2541  ;;  %v2734_v54 = vmul.f32 %v8553_v12, %v2697_v56  ;;  %vm2595_vm9 = vweird.f32 %v6654_v35 }
 0x6de   : >> { %6655 = vrcp.f32 %v8557_v6  ;;  %vm2596_vm12 = vmor %vm2594_vm10, %vm2595_vm9  ;;  %v2630_v27 = vand.u32 2147483648, %v8557_v6  ;;  %v2628_v63 = vand.u32 2147483647, %v8557_v6  ;;  %vm2624_vm13 = vweird.f32 %v8557_v6 }
 0x6df   : >> { %v2591_v26 = vsub.f32 1.0, %v2590_v37  ;;  %v8563_v52 = vsub.f32 %v8450_v39, %v2734_v54 }
 0x6e0   : >> { %v2631_v42 = vor.u32 1.1754944e-38, %v2630_v27 }
 0x6e1   : >> { %v2592_v1 = vmul.f32 %v6654_v35, %v2591_v26  ;;  %2796 = vperm.xlu2 %6478, %v8563_v52  }
 0x6e3   : >> { %v2593_v19 = vadd.f32 %v6654_v35, %v2592_v1  ;;  %v2642_v1 = vsel %vm8595_vm0, %v8544_v24, %v2638_v29 }
 0x6e4   : >> { %v6656_v4 = vpop.eup %6655 }
 0x6e5   : >> { %v2620_v7 = vmul.f32 %v6656_v4, %v8557_v6  ;;  %v8582_v15 = vpop.permute.xlu2 %2556  ;;  %v2597_v49 = vsel %vm2596_vm12, %v6654_v35, %v2593_v19  ;;  %v2643_v35 = vand.u32 2147483647, %v8527_v57  ;;  %vm2625_vm9 = vweird.f32 %v6656_v4 }
 0x6e6   : >> { %6657 = vrcp.f32 %v8582_v15  ;;  %v2602_v47 = vsel %vm2599_vm6, %v2601_v34, %v2597_v49  ;;  %v8587_v56 = vpop.permute.xlu0 %2551  ;;  %vm2626_vm10 = vmor %vm2624_vm13, %vm2625_vm9  ;;  %vm2629_vm12 = vcmp.eq.f32.partialorder %v2628_v63, 8.507059e+37  ;;  %vm2669_vm6 = vweird.f32 %v8582_v15 }
 0x6e7   : >> { %v2621_v37 = vsub.f32 1.0, %v2620_v7  ;;  %6659 = vrcp.f32 %v8587_v56  ;;  %v2603_v54 = vmul.f32 %v2602_v47, %v8475_v33  ;;  %vm2644_vm11 = vcmp.eq.f32.partialorder %v2643_v35, 8.507059e+37 }
 0x6e8   : >> { %v2647_v49 = vsel %vm2644_vm11, %v2646_v51, %v2642_v1  ;;  %v2660_v63 = vand.u32 2147483648, %v8587_v56  ;;  %vm2654_vm0 = vweird.f32 %v8587_v56 }
 0x6e9   : >> { %v2622_v26 = vmul.f32 %v6656_v4, %v2621_v37  ;;  %v8605_v19 = vperm.slane %v2603_v54, 7  ;;  %v8608_v37 = vperm.slane %v2588_v21, 7  ;;  %v2675_v21 = vand.u32 2147483648, %v8582_v15 }
 0x6eb   : >> { %v2623_v53 = vadd.f32 %v6656_v4, %v2622_v26 }
 0x6ec   : >> { %v6658_v39 = vpop.eup %6657 }
 0x6ed   : >> { %v2665_v36 = vmul.f32 %v6658_v39, %v8582_v15  ;;  %v2692_v34 = vpop.permute.xlu2 %2691  ;;  %v2627_v7 = vsel %vm2626_vm10, %v6656_v4, %v2623_v53  ;;  %v6660_v47 = vpop.eup %6659  ;;  %v2648_v4 = vmul.f32 %v2647_v49, %v8440_v55  ;;  %vm2670_vm14 = vweird.f32 %v6658_v39 }
 0x6ee   : >> { %v2732_v24 = vmul.f32 %v8605_v19, %v2692_v34  ;;  %v2650_v29 = vmul.f32 %v6660_v47, %v8587_v56  ;;  %v2687_v59 = vpop.permute.xlu0 %2686  ;;  %v2632_v54 = vsel %vm2629_vm12, %v2631_v42, %v2627_v7  ;;  %vm2655_vm15 = vweird.f32 %v6660_v47  ;;  %vm2671_vm9 = vmor %vm2669_vm6, %vm2670_vm14 }
 0x6ef   : >> { %v2666_v16 = vsub.f32 1.0, %v2665_v36  ;;  %v2730_v26 = vmul.f32 %v8608_v37, %v2687_v59  ;;  %v2633_v53 = vmul.f32 %v2632_v54, %v8490_v0  ;;  %v2658_v36 = vand.u32 2147483647, %v8587_v56  ;;  %vm2656_vm13 = vmor %vm2654_vm0, %vm2655_vm15 }
 0x6f0   : >> { %v8614_v35 = vsub.f32 %v8505_v60, %v2732_v24  ;;  %v2651_v27 = vsub.f32 1.0, %v2650_v29  ;;  %v2673_v60 = vand.u32 2147483647, %v8582_v15  ;;  %v2724_v7 = vperm.slane %v2648_v4, 7 }
 0x6f1   : >> { %v2667_v38 = vmul.f32 %v6658_v39, %v2666_v16  ;;  %v8621_v1 = vsub.f32 %v8478_v30, %v2730_v26  ;;  %v2676_v24 = vor.u32 1.1754944e-38, %v2675_v21  ;;  %v2661_v29 = vor.u32 1.1754944e-38, %v2660_v63 }
 0x6f2   : >> { %2791 = vperm.xlu0 %6480, %v8614_v35   ;;  %v2652_v51 = vmul.f32 %v6660_v47, %v2651_v27  ;;  %v2723_v16 = vperm.slane %v2633_v53, 7  ;;  %vm2674_vm10 = vcmp.eq.f32.partialorder %v2673_v60, 8.507059e+37  ;;  %vm2659_vm11 = vcmp.eq.f32.partialorder %v2658_v36, 8.507059e+37  ;;  %v2712_v53 = vpop.permute.xlu1 %2711 }
 0x6f3   : >> { %v2668_v34 = vadd.f32 %v6658_v39, %v2667_v38  ;;  %2786 = vperm.xlu1 %6479, %v8621_v1   ;;  %vm11338_vm12 = vcmp.eq.s32.totalorder %v11260_v10, 7 }
 0x6f4   : >> { %v2653_v42 = vadd.f32 %v6660_v47, %v2652_v51  ;;  %vm11339_vm6 = vmmov %vm11338_vm12 }
 0x6f5   : >> { %v2707_v30 = vpop.permute.xlu2 %2706  ;;  %v2672_v49 = vsel %vm2671_vm9, %v6658_v39, %v2668_v34  ;;  %v2727_v39 = vmul.f32 %v8538_v28, %v8513_v25  ;;  %vm11340_vm14 = vmmov %vm11339_vm6 }
 0x6f6   : >> { %v2738_v59 = vmul.f32 %v2724_v7, %v2707_v30  ;;  %v2657_v54 = vsel %vm2656_vm13, %v6660_v47, %v2653_v42  ;;  %v2702_v26 = vpop.permute.xlu0 %2701  ;;  %v2677_v27 = vsel %vm2674_vm10, %v2676_v24, %v2672_v49  ;;  %v2731_v24 = vmul.f32 %v8605_v19, %v8540_v44  ;;  %vm11341_vm15 = vmmov %vm11339_vm6 }
 0x6f7   : >> { %v2662_v38 = vsel %vm2659_vm11, %v2661_v29, %v2657_v54  ;;  %v2736_v4 = vmul.f32 %v2723_v16, %v2702_v26  ;;  %v2678_v47 = vmul.f32 %v2677_v27, %v8500_v17  ;;  %v2743_v60 = vsub.f32 %v8415_v45, %v2727_v39  ;;  %vm11342_vm9 = vmmov %vm11339_vm6 }
 0x6f8   : >> { %v8632_v22 = vsub.f32 %v8510_v18, %v2738_v59  ;;  %v2663_v51 = vmul.f32 %v2662_v38, %v8465_v14  ;;  %v2729_v45 = vmul.f32 %v8608_v37, %v8521_v9  ;;  %vm11343_vm0 = vmmov %vm11339_vm6 }
 0x6f9   : >> { %v8638_v21 = vsub.f32 %v8485_v43, %v2736_v4  ;;  %v2726_v36 = vperm.slane %v2678_v47, 7  ;;  %v8647_v25 = vsel %vm11338_vm12, %v8538_v28, %v2743_v60  ;;  %v2733_v43 = vmul.f32 %v8553_v12, %v8517_v2  ;;  %vm11344_vm13 = vmmov %vm11343_vm0 }
 0x6fa   : >> { %2806 = vperm.xlu2 %6478, %v8632_v22   ;;  %v2725_v63 = vperm.slane %v2663_v51, 7  ;;  %v2747_v28 = vsub.f32 %v8475_v33, %v2731_v24  ;;  %v2737_v33 = vmul.f32 %v2724_v7, %v8527_v57  ;;  %vm11345_vm10 = vmmov %vm11343_vm0 }
 0x6fb   : >> { %2801 = vperm.xlu1 %6479, %v8638_v21   ;;  %v2749_v2 = vsub.f32 %v8429_v58, %v2733_v43  ;;  %v2735_v58 = vmul.f32 %v2723_v16, %v8557_v6 }
 0x6fc   : >> { %v2740_v18 = vmul.f32 %v2725_v63, %v2712_v53  ;;  %v2739_v9 = vmul.f32 %v2725_v63, %v8587_v56 }
 0x6fd   : >> { %v2751_v56 = vsub.f32 %v8490_v0, %v2735_v58 }
 0x6fe   : >> { %v2717_v34 = vpop.permute.xlu0 %2716  ;;  %v8652_v30 = vsub.f32 %v8457_v5, %v2740_v18  ;;  %v2745_v5 = vsub.f32 %v8422_v3, %v2729_v45  ;;  %v8682_v3 = vsel %vm11341_vm15, %v8605_v19, %v2747_v28  ;;  %v6930_v19 = vmov 9  }
 0x6ff   : >> { %v2742_v42 = vmul.f32 %v2726_v36, %v2717_v34  ;;  %v8698_v6 = vsel %vm11343_vm0, %v2723_v16, %v2751_v56  ;;  %vm11346_vm15 = vcmp.eq.s32.totalorder %v7094_v13, 8 }
 0x700   : >> { %v8677_v44 = vsel %vm11340_vm14, %v8608_v37, %v2745_v5  ;;  %v2753_v37 = vsub.f32 %v8440_v55, %v2737_v33 }
 0x701   : >> { %v8655_v49 = vsub.f32 %v8496_v20, %v2742_v42  ;;  %v8670_v20 = vsel %vm11339_vm6, %v8553_v12, %v2749_v2  ;;  %v2755_v12 = vsub.f32 %v8465_v14, %v2739_v9  ;;  %v2741_v14 = vmul.f32 %v2726_v36, %v8582_v15 }
 0x702   : >> { %2941 = vperm.xlu2 %6478, %v8647_v25   ;;  %v8702_v57 = vsel %vm11344_vm13, %v2724_v7, %v2753_v37 }
 0x703   : >> { %2811 = vperm.xlu1 %6479, %v8652_v30   ;;  %2816 = vperm.xlu0 %6480, %v8655_v49   ;;  %v8693_v29 = vsel %vm11342_vm9, %v2725_v63, %v2755_v12  ;;  %v2757_v55 = vsub.f32 %v8500_v17, %v2741_v14 }
 0x705   : >> { %v8710_v0 = vsel %vm11345_vm10, %v2726_v36, %v2757_v55 }
 0x70a   : >> { %2956 = vperm.xlu2 %6478, %v8670_v20  }
 0x70b   : >> { %2946 = vperm.xlu1 %6479, %v8677_v44   ;;  %2951 = vperm.xlu0 %6480, %v8682_v3  }
 0x712   : >> { %2971 = vperm.xlu2 %6478, %v8693_v29  }
 0x713   : >> { %2961 = vperm.xlu1 %6479, %v8698_v6   ;;  %2966 = vperm.xlu0 %6480, %v8702_v57  }
 0x71a   : >> { %6482 = vset.pattern.permute.xlu2 %v6930_v19 }
 0x71b   : >> { %2976 = vperm.xlu1 %6479, %v8710_v0   ;;  %6481 = vset.pattern.permute.xlu0 %v6930_v19 }
 0x723   : >> { %6483 = vset.pattern.permute.xlu1 %v6930_v19 }
 0x733   : >> { %v2782_v7 = vpop.permute.xlu2 %2781 }
 0x734   : >> { %6661 = vrcp.f32 %v2782_v7  ;;  %v2830_v54 = vand.u32 2147483648, %v2782_v7  ;;  %v2828_v27 = vand.u32 2147483647, %v2782_v7  ;;  %vm2824_vm12 = vweird.f32 %v2782_v7 }
 0x736   : >> { %v2831_v38 = vor.u32 1.1754944e-38, %v2830_v54  ;;  %vm2829_vm14 = vcmp.eq.f32.partialorder %v2828_v27, 8.507059e+37 }
 0x73a   : >> { %v6662_v16 = vpop.eup %6661 }
 0x73b   : >> { %v2820_v15 = vmul.f32 %v6662_v16, %v2782_v7  ;;  %vm2825_vm11 = vweird.f32 %v6662_v16  ;;  %v8714_v53 = vpop.permute.xlu2 %2796 }
 0x73c   : >> { %vm2826_vm6 = vmor %vm2824_vm12, %vm2825_vm11  ;;  %6663 = vrcp.f32 %v8714_v53  ;;  %vm2869_vm12 = vweird.f32 %v8714_v53 }
 0x73d   : >> { %v2821_v59 = vsub.f32 1.0, %v2820_v15  ;;  %v2873_v15 = vand.u32 2147483647, %v8714_v53 }
 0x73f   : >> { %v2822_v26 = vmul.f32 %v6662_v16, %v2821_v59 }
 0x741   : >> { %v2823_v17 = vadd.f32 %v6662_v16, %v2822_v26 }
 0x742   : >> { %v6664_v34 = vpop.eup %6663 }
 0x743   : >> { %v2827_v4 = vsel %vm2826_vm6, %v6662_v16, %v2823_v17  ;;  %v2865_v43 = vmul.f32 %v6664_v34, %v8714_v53  ;;  %vm2870_vm11 = vweird.f32 %v6664_v34  ;;  %v2875_v16 = vand.u32 2147483648, %v8714_v53 }
 0x744   : >> { %v2832_v51 = vsel %vm2829_vm14, %v2831_v38, %v2827_v4  ;;  %vm2871_vm6 = vmor %vm2869_vm12, %vm2870_vm11  ;;  %vm2874_vm14 = vcmp.eq.f32.partialorder %v2873_v15, 8.507059e+37 }
 0x745   : >> { %v2833_v39 = vmul.f32 %v2832_v51, %v8547_v8  ;;  %v2866_v5 = vsub.f32 1.0, %v2865_v43  ;;  %v2876_v51 = vor.u32 1.1754944e-38, %v2875_v16 }
 0x747   : >> { %v2979_v47 = vperm.slane %v2833_v39, 0  ;;  %v2867_v12 = vmul.f32 %v6664_v34, %v2866_v5 }
 0x749   : >> { %v2988_v63 = vmul.f32 %v2979_v47, %v2782_v7  ;;  %v2868_v19 = vadd.f32 %v6664_v34, %v2867_v12 }
 0x74b   : >> { %v3004_v60 = vsub.f32 %v8547_v8, %v2988_v63  ;;  %v2872_v17 = vsel %vm2871_vm6, %v6664_v34, %v2868_v19 }
 0x74d   : >> { %v8719_v18 = vsel %vm11346_vm15, %v2979_v47, %v3004_v60 }
 0x74e   : >> { %3041 = vperm.xlu0 %6481, %v8719_v18  }
 0x754   : >> { %v2807_v36 = vpop.permute.xlu2 %2806 }
 0x755   : >> { %6665 = vrcp.f32 %v2807_v36  ;;  %v2905_v2 = vand.u32 2147483648, %v2807_v36  ;;  %v2903_v8 = vand.u32 2147483647, %v2807_v36  ;;  %vm2899_vm0 = vweird.f32 %v2807_v36 }
 0x757   : >> { %v2906_v58 = vor.u32 1.1754944e-38, %v2905_v2  ;;  %vm2904_vm10 = vcmp.eq.f32.partialorder %v2903_v8, 8.507059e+37 }
 0x75b   : >> { %v6666_v42 = vpop.eup %6665 }
 0x75c   : >> { %v2895_v45 = vmul.f32 %v6666_v42, %v2807_v36  ;;  %vm2900_vm9 = vweird.f32 %v6666_v42  ;;  %v2942_v26 = vpop.permute.xlu2 %2941 }
 0x75d   : >> { %vm2901_vm13 = vmor %vm2899_vm0, %vm2900_vm9 }
 0x75e   : >> { %v2896_v24 = vsub.f32 1.0, %v2895_v45 }
 0x760   : >> { %v2897_v28 = vmul.f32 %v6666_v42, %v2896_v24  ;;  %v2987_v24 = vmul.f32 %v2979_v47, %v2942_v26 }
 0x762   : >> { %v2898_v9 = vadd.f32 %v6666_v42, %v2897_v28  ;;  %v8757_v47 = vsub.f32 %v8647_v25, %v2987_v24 }
 0x764   : >> { %v8724_v33 = vpop.permute.xlu0 %2791  ;;  %v2902_v56 = vsel %vm2901_vm13, %v6666_v42, %v2898_v9  ;;  %v2877_v42 = vsel %vm2874_vm14, %v2876_v51, %v2872_v17 }
 0x765   : >> { %6667 = vrcp.f32 %v8724_v33  ;;  %v2907_v37 = vsel %vm2904_vm10, %v2906_v58, %v2902_v56  ;;  %v8727_v14 = vpop.permute.xlu1 %2786  ;;  %v2858_v45 = vand.u32 2147483647, %v8724_v33  ;;  %vm2854_vm0 = vweird.f32 %v8724_v33 }
 0x766   : >> { %v2908_v55 = vmul.f32 %v2907_v37, %v8632_v22  ;;  %6669 = vrcp.f32 %v8727_v14  ;;  %v2845_v5 = vand.u32 2147483648, %v8727_v14  ;;  %v2878_v8 = vmul.f32 %v2877_v42, %v8563_v52 }
 0x767   : >> { %v2843_v9 = vand.u32 2147483647, %v8727_v14  ;;  %vm2839_vm11 = vweird.f32 %v8727_v14  ;;  %vm2859_vm12 = vcmp.eq.f32.partialorder %v2858_v45, 8.507059e+37 }
 0x768   : >> { %v8731_v7 = vperm.slane %v2908_v55, 0  ;;  %v2957_v55 = vpop.permute.xlu2 %2956 }
 0x769   : >> { %vm2844_vm14 = vcmp.eq.f32.partialorder %v2843_v9, 8.507059e+37 }
 0x76a   : >> { %v2998_v59 = vmul.f32 %v8731_v7, %v2807_v36 }
 0x76b   : >> { %v6668_v54 = vpop.eup %6667 }
 0x76c   : >> { %v2850_v27 = vmul.f32 %v6668_v54, %v8724_v33  ;;  %v3014_v38 = vsub.f32 %v8632_v22, %v2998_v59  ;;  %v6670_v4 = vpop.eup %6669  ;;  %v2860_v22 = vand.u32 2147483648, %v8724_v33  ;;  %vm2855_vm9 = vweird.f32 %v6668_v54 }
 0x76d   : >> { %v2835_v39 = vmul.f32 %v6670_v4, %v8727_v14  ;;  %v8740_v60 = vpop.permute.xlu1 %2801  ;;  %vm2840_vm13 = vweird.f32 %v6670_v4  ;;  %vm2856_vm10 = vmor %vm2854_vm0, %vm2855_vm9 }
 0x76e   : >> { %v2851_v63 = vsub.f32 1.0, %v2850_v27  ;;  %v8745_v36 = vsel %vm11346_vm15, %v8731_v7, %v3014_v38  ;;  %6671 = vrcp.f32 %v8740_v60  ;;  %v2861_v58 = vor.u32 1.1754944e-38, %v2860_v22  ;;  %vm2841_vm6 = vmor %vm2839_vm11, %vm2840_vm13 }
 0x76f   : >> { %3066 = vperm.xlu0 %6481, %v8745_v36   ;;  %v2836_v34 = vsub.f32 1.0, %v2835_v39  ;;  %v2846_v27 = vor.u32 1.1754944e-38, %v2845_v5  ;;  %v8765_v38 = vperm.slane %v2878_v8, 0  ;;  %v2890_v22 = vand.u32 2147483648, %v8740_v60 }
 0x770   : >> { %v2852_v43 = vmul.f32 %v6668_v54, %v2851_v63  ;;  %vm2884_vm9 = vweird.f32 %v8740_v60  ;;  %vm11347_vm13 = vcmp.eq.s32.totalorder %v7094_v13, 8 }
 0x771   : >> { %v2837_v2 = vmul.f32 %v6670_v4, %v2836_v34  ;;  %v2993_v39 = vmul.f32 %v8765_v38, %v2957_v55  ;;  %v2994_v55 = vmul.f32 %v8765_v38, %v8714_v53  ;;  %vm11348_vm11 = vmmov %vm11347_vm13 }
 0x772   : >> { %v2853_v28 = vadd.f32 %v6668_v54, %v2852_v43  ;;  %v2888_v43 = vand.u32 2147483647, %v8740_v60 }
 0x773   : >> { %v2838_v12 = vadd.f32 %v6670_v4, %v2837_v2  ;;  %v8783_v5 = vsub.f32 %v8670_v20, %v2993_v39 }
 0x774   : >> { %v2857_v56 = vsel %vm2856_vm10, %v6668_v54, %v2853_v28  ;;  %v6672_v37 = vpop.eup %6671  ;;  %vm2889_vm10 = vcmp.eq.f32.partialorder %v2888_v43, 8.507059e+37 }
 0x775   : >> { %v2862_v19 = vsel %vm2859_vm12, %v2861_v58, %v2857_v56  ;;  %v2880_v16 = vmul.f32 %v6672_v37, %v8740_v60  ;;  %v8760_v15 = vpop.permute.xlu1 %2811  ;;  %v8762_v59 = vpop.permute.xlu0 %2816  ;;  %v2842_v26 = vsel %vm2841_vm6, %v6670_v4, %v2838_v12  ;;  %vm2885_vm15 = vweird.f32 %v6672_v37 }
 0x776   : >> { %v2863_v17 = vmul.f32 %v2862_v19, %v8614_v35  ;;  %6673 = vrcp.f32 %v8760_v15  ;;  %v2847_v54 = vsel %vm2844_vm14, %v2846_v27, %v2842_v26  ;;  %vm2886_vm0 = vmor %vm2884_vm9, %vm2885_vm15  ;;  %v2891_v58 = vor.u32 1.1754944e-38, %v2890_v22 }
 0x777   : >> { %3201 = vperm.xlu0 %6481, %v8757_v47   ;;  %v2881_v25 = vsub.f32 1.0, %v2880_v16  ;;  %6675 = vrcp.f32 %v8762_v59  ;;  %v2848_v4 = vmul.f32 %v2847_v54, %v8621_v1  ;;  %v2918_v19 = vand.u32 2147483647, %v8760_v15 }
 0x778   : >> { %v8770_v51 = vperm.slane %v2863_v17, 0  ;;  %v2920_v16 = vand.u32 2147483648, %v8760_v15  ;;  %v2935_v17 = vand.u32 2147483648, %v8762_v59  ;;  %v2933_v53 = vand.u32 2147483647, %v8762_v59 }
 0x779   : >> { %v2882_v42 = vmul.f32 %v6672_v37, %v2881_v25  ;;  %v8777_v34 = vperm.slane %v2848_v4, 0  ;;  %vm2914_vm14 = vweird.f32 %v8760_v15  ;;  %vm2929_vm9 = vweird.f32 %v8762_v59 }
 0x77a   : >> { %v2992_v63 = vmul.f32 %v8770_v51, %v8724_v33  ;;  %v2921_v4 = vor.u32 1.1754944e-38, %v2920_v16  ;;  %v2936_v43 = vor.u32 1.1754944e-38, %v2935_v17 }
 0x77b   : >> { %v2883_v24 = vadd.f32 %v6672_v37, %v2882_v42  ;;  %v2990_v33 = vmul.f32 %v8777_v34, %v8727_v14 }
 0x77c   : >> { %v3008_v45 = vsub.f32 %v8614_v35, %v2992_v63  ;;  %v6674_v2 = vpop.eup %6673  ;;  %v3010_v63 = vsub.f32 %v8563_v52, %v2994_v55 }
 0x77d   : >> { %v6676_v28 = vpop.eup %6675  ;;  %v2910_v8 = vmul.f32 %v6674_v2, %v8760_v15  ;;  %v2887_v35 = vsel %vm2886_vm0, %v6672_v37, %v2883_v24  ;;  %v3006_v20 = vsub.f32 %v8621_v1, %v2990_v33  ;;  %vm2915_vm12 = vweird.f32 %v6674_v2 }
 0x77e   : >> { %v8791_v9 = vsel %vm11347_vm13, %v8770_v51, %v3008_v45  ;;  %v2925_v12 = vmul.f32 %v6676_v28, %v8762_v59  ;;  %v2892_v14 = vsel %vm2889_vm10, %v2891_v58, %v2887_v35  ;;  %vm2930_vm6 = vweird.f32 %v6676_v28  ;;  %vm2916_vm15 = vmor %vm2914_vm14, %vm2915_vm12 }
 0x77f   : >> { %3051 = vperm.xlu1 %6483, %v8791_v9   ;;  %v2911_v56 = vsub.f32 1.0, %v2910_v8  ;;  %3216 = vperm.xlu0 %6481, %v8783_v5   ;;  %v8804_v26 = vsel %vm11348_vm11, %v8777_v34, %v3006_v20  ;;  %v2893_v1 = vmul.f32 %v2892_v14, %v8638_v21  ;;  %vm2919_vm0 = vcmp.eq.f32.partialorder %v2918_v19, 8.507059e+37  ;;  %vm2931_vm13 = vmor %vm2929_vm9, %vm2930_vm6  ;;  %v2947_v14 = vpop.permute.xlu1 %2946 }
 0x780   : >> { %v2926_v37 = vsub.f32 1.0, %v2925_v12  ;;  %3046 = vperm.xlu2 %6482, %v8804_v26   ;;  %vm2934_vm10 = vcmp.eq.f32.partialorder %v2933_v53, 8.507059e+37  ;;  %v8819_v52 = vsel %vm11348_vm11, %v8765_v38, %v3010_v63  ;;  %vm11349_vm12 = vmmov %vm11348_vm11 }
 0x781   : >> { %v2912_v27 = vmul.f32 %v6674_v2, %v2911_v56  ;;  %v2983_v39 = vperm.slane %v2893_v1, 0  ;;  %vm11350_vm6 = vmmov %vm11348_vm11 }
 0x782   : >> { %v2927_v25 = vmul.f32 %v6676_v28, %v2926_v37  ;;  %v2952_v37 = vpop.permute.xlu0 %2951  ;;  %vm11351_vm14 = vmmov %vm11350_vm6 }
 0x783   : >> { %v2913_v54 = vadd.f32 %v6674_v2, %v2912_v27  ;;  %v2996_v22 = vmul.f32 %v2983_v39, %v8740_v60 }
 0x784   : >> { %v2928_v42 = vadd.f32 %v6676_v28, %v2927_v25 }
 0x785   : >> { %v2917_v45 = vsel %vm2916_vm15, %v6674_v2, %v2913_v54  ;;  %v3012_v8 = vsub.f32 %v8638_v21, %v2996_v22 }
 0x786   : >> { %v2932_v24 = vsel %vm2931_vm13, %v6676_v28, %v2928_v42  ;;  %v2922_v33 = vsel %vm2919_vm0, %v2921_v4, %v2917_v45  ;;  %v2972_v28 = vpop.permute.xlu2 %2971 }
 0x787   : >> { %v2937_v35 = vsel %vm2934_vm10, %v2936_v43, %v2932_v24  ;;  %v2923_v58 = vmul.f32 %v2922_v33, %v8652_v30  ;;  %v8824_v60 = vsel %vm11349_vm12, %v2983_v39, %v3012_v8  ;;  %vm11352_vm10 = vcmp.eq.s32.totalorder %v7094_v13, 9 }
 0x788   : >> { %v2938_v12 = vmul.f32 %v2937_v35, %v8655_v49  ;;  %3056 = vperm.xlu2 %6482, %v8819_v52   ;;  %3061 = vperm.xlu1 %6483, %v8824_v60  }
 0x789   : >> { %v2985_v2 = vperm.slane %v2923_v58, 0 }
 0x78a   : >> { %v2986_v21 = vperm.slane %v2938_v12, 0  ;;  %v2967_v17 = vpop.permute.xlu0 %2966 }
 0x78b   : >> { %v2999_v20 = vmul.f32 %v2985_v2, %v2972_v28  ;;  %v3000_v56 = vmul.f32 %v2985_v2, %v8760_v15  ;;  %v2997_v53 = vmul.f32 %v8731_v7, %v2967_v17  ;;  %v6931_v7 = vmov 10  }
 0x78c   : >> { %v3002_v38 = vmul.f32 %v2986_v21, %v8762_v59 }
 0x78d   : >> { %v8831_v55 = vsub.f32 %v8693_v29, %v2999_v20  ;;  %v3016_v19 = vsub.f32 %v8652_v30, %v3000_v56  ;;  %v2989_v29 = vmul.f32 %v8777_v34, %v2947_v14  ;;  %v2991_v30 = vmul.f32 %v8770_v51, %v2952_v37 }
 0x78e   : >> { %v3018_v16 = vsub.f32 %v8655_v49, %v3002_v38  ;;  %v2962_v49 = vpop.permute.xlu1 %2961  ;;  %v8861_v51 = vsub.f32 %v8702_v57, %v2997_v53 }
 0x78f   : >> { %3231 = vperm.xlu0 %6481, %v8831_v55   ;;  %v8838_v27 = vsel %vm11350_vm6, %v2985_v2, %v3016_v19  ;;  %v8849_v59 = vsub.f32 %v8677_v44, %v2989_v29  ;;  %v8852_v1 = vsub.f32 %v8682_v3, %v2991_v30  ;;  %v2995_v25 = vmul.f32 %v2983_v39, %v2962_v49 }
 0x790   : >> { %v8842_v15 = vsel %vm11351_vm14, %v2986_v21, %v3018_v16  ;;  %3071 = vperm.xlu2 %6482, %v8838_v27  }
 0x791   : >> { %3076 = vperm.xlu1 %6483, %v8842_v15   ;;  %v8858_v54 = vsub.f32 %v8698_v6, %v2995_v25 }
 0x796   : >> { %v2977_v34 = vpop.permute.xlu1 %2976 }
 0x797   : >> { %v3001_v44 = vmul.f32 %v2986_v21, %v2977_v34  ;;  %6485 = vset.pattern.permute.xlu0 %v6931_v7 }
 0x798   : >> { %3206 = vperm.xlu2 %6482, %v8849_v59  }
 0x799   : >> { %3211 = vperm.xlu1 %6483, %v8852_v1   ;;  %v8866_v3 = vsub.f32 %v8710_v0, %v3001_v44 }
 0x7a0   : >> { %3221 = vperm.xlu2 %6482, %v8858_v54  }
 0x7a1   : >> { %3226 = vperm.xlu1 %6483, %v8861_v51  }
 0x7a8   : >> { %3236 = vperm.xlu2 %6482, %v8866_v3  }
 0x7a9   : >> { %6484 = vset.pattern.permute.xlu1 %v6931_v7 }
 0x7b0   : >> { %6486 = vset.pattern.permute.xlu2 %v6931_v7 }
 0x7c0   : >> { %v3042_v39 = vpop.permute.xlu0 %3041 }
 0x7c1   : >> { %6677 = vrcp.f32 %v3042_v39  ;;  %v3090_v63 = vand.u32 2147483648, %v3042_v39  ;;  %v3088_v22 = vand.u32 2147483647, %v3042_v39  ;;  %vm3084_vm9 = vweird.f32 %v3042_v39 }
 0x7c3   : >> { %v3091_v0 = vor.u32 1.1754944e-38, %v3090_v63  ;;  %vm3089_vm13 = vcmp.eq.f32.partialorder %v3088_v22, 8.507059e+37 }
 0x7c7   : >> { %v6678_v6 = vpop.eup %6677 }
 0x7c8   : >> { %v3080_v57 = vmul.f32 %v6678_v6, %v3042_v39  ;;  %vm3085_vm15 = vweird.f32 %v6678_v6 }
 0x7c9   : >> { %vm3086_vm0 = vmor %vm3084_vm9, %vm3085_vm15 }
 0x7ca   : >> { %v3081_v4 = vsub.f32 1.0, %v3080_v57 }
 0x7cc   : >> { %v3082_v42 = vmul.f32 %v6678_v6, %v3081_v4 }
 0x7ce   : >> { %v3083_v43 = vadd.f32 %v6678_v6, %v3082_v42 }
 0x7d0   : >> { %v3087_v45 = vsel %vm3086_vm0, %v6678_v6, %v3083_v43 }
 0x7d1   : >> { %v3092_v24 = vsel %vm3089_vm13, %v3091_v0, %v3087_v45 }
 0x7d2   : >> { %v3093_v33 = vmul.f32 %v3092_v24, %v8719_v18 }
 0x7d4   : >> { %v8870_v8 = vperm.slane %v3093_v33, 1 }
 0x7d6   : >> { %v3248_v35 = vmul.f32 %v8870_v8, %v3042_v39 }
 0x7d8   : >> { %v3264_v58 = vsub.f32 %v8719_v18, %v3248_v35 }
 0x7da   : >> { %v8877_v12 = vsel %vm11352_vm10, %v8870_v8, %v3264_v58  ;;  %v3047_v2 = vpop.permute.xlu2 %3046 }
 0x7db   : >> { %3301 = vperm.xlu1 %6484, %v8877_v12   ;;  %6679 = vrcp.f32 %v3047_v2  ;;  %v3105_v14 = vand.u32 2147483648, %v3047_v2  ;;  %v3103_v16 = vand.u32 2147483647, %v3047_v2  ;;  %vm3099_vm12 = vweird.f32 %v3047_v2 }
 0x7dd   : >> { %v3106_v17 = vor.u32 1.1754944e-38, %v3105_v14  ;;  %vm3104_vm14 = vcmp.eq.f32.partialorder %v3103_v16, 8.507059e+37 }
 0x7e1   : >> { %v8880_v28 = vpop.permute.xlu0 %3066  ;;  %v6680_v21 = vpop.eup %6679 }
 0x7e2   : >> { %6681 = vrcp.f32 %v8880_v28  ;;  %v3095_v20 = vmul.f32 %v6680_v21, %v3047_v2  ;;  %v8883_v56 = vpop.permute.xlu2 %3056  ;;  %vm3100_vm11 = vweird.f32 %v6680_v21  ;;  %v3165_v44 = vand.u32 2147483648, %v8880_v28 }
 0x7e3   : >> { %6683 = vrcp.f32 %v8883_v56  ;;  %vm3101_vm6 = vmor %vm3099_vm12, %vm3100_vm11  ;;  %vm3159_vm9 = vweird.f32 %v8880_v28  ;;  %v3133_v4 = vand.u32 2147483647, %v8883_v56  ;;  %v3135_v63 = vand.u32 2147483648, %v8883_v56 }
 0x7e4   : >> { %v3096_v18 = vsub.f32 1.0, %v3095_v20  ;;  %v3163_v22 = vand.u32 2147483647, %v8880_v28  ;;  %v3166_v35 = vor.u32 1.1754944e-38, %v3165_v44  ;;  %vm3129_vm10 = vweird.f32 %v8883_v56 }
 0x7e5   : >> { %vm3134_vm12 = vcmp.eq.f32.partialorder %v3133_v4, 8.507059e+37 }
 0x7e6   : >> { %v3097_v19 = vmul.f32 %v6680_v21, %v3096_v18  ;;  %v3136_v18 = vor.u32 1.1754944e-38, %v3135_v63 }
 0x7e8   : >> { %v6682_v38 = vpop.eup %6681  ;;  %v3098_v29 = vadd.f32 %v6680_v21, %v3097_v19 }
 0x7e9   : >> { %v3155_v37 = vmul.f32 %v6682_v38, %v8880_v28  ;;  %v6684_v30 = vpop.eup %6683  ;;  %vm3160_vm15 = vweird.f32 %v6682_v38 }
 0x7ea   : >> { %v3125_v25 = vmul.f32 %v6684_v30, %v8883_v56  ;;  %v8888_v53 = vpop.permute.xlu2 %3071  ;;  %v3102_v34 = vsel %vm3101_vm6, %v6680_v21, %v3098_v29  ;;  %vm3130_vm0 = vweird.f32 %v6684_v30  ;;  %vm8899_vm13 = vmor %vm3159_vm9, %vm3160_vm15  ;;  %vm3164_vm6 = vcmp.eq.f32.partialorder %v3163_v22, 8.507059e+37 }
 0x7eb   : >> { %v3156_v49 = vsub.f32 1.0, %v3155_v37  ;;  %6685 = vrcp.f32 %v8888_v53  ;;  %v3107_v7 = vsel %vm3104_vm14, %v3106_v17, %v3102_v34  ;;  %vm3131_vm11 = vmor %vm3129_vm10, %vm3130_vm0  ;;  %vm11355_vm14 = vcmp.eq.s32.totalorder %v7094_v13, 9 }
 0x7ec   : >> { %v3126_v6 = vsub.f32 1.0, %v3125_v25  ;;  %v3108_v57 = vmul.f32 %v3107_v7, %v8804_v26  ;;  %v3178_v44 = vand.u32 2147483647, %v8888_v53  ;;  %vm3174_vm9 = vweird.f32 %v8888_v53 }
 0x7ed   : >> { %v3157_v39 = vmul.f32 %v6682_v38, %v3156_v49 }
 0x7ee   : >> { %v3127_v43 = vmul.f32 %v6684_v30, %v3126_v6  ;;  %v8897_v0 = vperm.slane %v3108_v57, 1 }
 0x7ef   : >> { %v3158_v42 = vadd.f32 %v6682_v38, %v3157_v39 }
 0x7f0   : >> { %v3128_v58 = vadd.f32 %v6684_v30, %v3127_v43  ;;  %v3250_v21 = vmul.f32 %v8897_v0, %v3047_v2  ;;  %v3180_v2 = vand.u32 2147483648, %v8888_v53 }
 0x7f1   : >> { %v8903_v24 = vpop.permute.xlu1 %3051  ;;  %v3162_v33 = vsel %vm8899_vm13, %v6682_v38, %v3158_v42  ;;  %v6686_v20 = vpop.eup %6685  ;;  %vm3179_vm13 = vcmp.eq.f32.partialorder %v3178_v44, 8.507059e+37 }
 0x7f2   : >> { %6687 = vrcp.f32 %v8903_v24  ;;  %v3170_v14 = vmul.f32 %v6686_v20, %v8888_v53  ;;  %v3132_v19 = vsel %vm3131_vm11, %v6684_v30, %v3128_v58  ;;  %v3266_v16 = vsub.f32 %v8804_v26, %v3250_v21  ;;  %v3207_v44 = vpop.permute.xlu2 %3206 }
 0x7f3   : >> { %v3167_v37 = vsel %vm3164_vm6, %v3166_v35, %v3162_v33  ;;  %v3137_v38 = vsel %vm3134_vm12, %v3136_v18, %v3132_v19  ;;  %vm3175_vm15 = vweird.f32 %v6686_v20  ;;  %v3181_v4 = vor.u32 1.1754944e-38, %v3180_v2  ;;  %vm11356_vm12 = vmmov %vm11355_vm14  ;;  %v3202_v2 = vpop.permute.xlu0 %3201 }
 0x7f4   : >> { %v3171_v29 = vsub.f32 1.0, %v3170_v14  ;;  %v3138_v49 = vmul.f32 %v3137_v38, %v8819_v52  ;;  %v8916_v17 = vsel %vm11355_vm14, %v8897_v0, %v3266_v16  ;;  %v3168_v25 = vmul.f32 %v3167_v37, %v8745_v36  ;;  %vm3176_vm0 = vmor %vm3174_vm9, %vm3175_vm15 }
 0x7f5   : >> { %3306 = vperm.xlu0 %6485, %v8916_v17   ;;  %v3120_v43 = vand.u32 2147483648, %v8903_v24  ;;  %vm3114_vm11 = vweird.f32 %v8903_v24  ;;  %vm11357_vm15 = vmmov %vm11356_vm12 }
 0x7f6   : >> { %v8921_v30 = vperm.slane %v3138_v49, 1  ;;  %v3172_v26 = vmul.f32 %v6686_v20, %v3171_v29  ;;  %v8928_v63 = vperm.slane %v3168_v25, 1  ;;  %vm11358_vm9 = vmmov %vm11356_vm12 }
 0x7f7   : >> { %v3121_v18 = vor.u32 1.1754944e-38, %v3120_v43 }
 0x7f8   : >> { %v6688_v34 = vpop.eup %6687  ;;  %v3254_v7 = vmul.f32 %v8921_v30, %v8883_v56  ;;  %v3173_v6 = vadd.f32 %v6686_v20, %v3172_v26  ;;  %v3118_v56 = vand.u32 2147483647, %v8903_v24  ;;  %v3258_v21 = vmul.f32 %v8928_v63, %v8880_v28 }
 0x7f9   : >> { %v3110_v39 = vmul.f32 %v6688_v34, %v8903_v24  ;;  %vm3115_vm10 = vweird.f32 %v6688_v34 }
 0x7fa   : >> { %v3270_v42 = vsub.f32 %v8819_v52, %v3254_v7  ;;  %v3177_v22 = vsel %vm3176_vm0, %v6686_v20, %v3173_v6  ;;  %v8932_v45 = vpop.permute.xlu1 %3061  ;;  %vm3116_vm6 = vmor %vm3114_vm11, %vm3115_vm10  ;;  %vm3119_vm14 = vcmp.eq.f32.partialorder %v3118_v56, 8.507059e+37  ;;  %v3274_v37 = vsub.f32 %v8745_v36, %v3258_v21 }
 0x7fb   : >> { %v3111_v57 = vsub.f32 1.0, %v3110_v39  ;;  %v3182_v33 = vsel %vm3179_vm13, %v3181_v4, %v3177_v22  ;;  %6689 = vrcp.f32 %v8932_v45  ;;  %v3150_v7 = vand.u32 2147483648, %v8932_v45 }
 0x7fc   : >> { %v8940_v58 = vsel %vm11356_vm12, %v8921_v30, %v3270_v42  ;;  %v3183_v52 = vmul.f32 %v3182_v33, %v8838_v27  ;;  %v8960_v36 = vsel %vm11357_vm15, %v8928_v63, %v3274_v37  ;;  %v3148_v6 = vand.u32 2147483647, %v8932_v45  ;;  %vm11359_vm12 = vmmov %vm11358_vm9 }
 0x7fd   : >> { %v3112_v35 = vmul.f32 %v6688_v34, %v3111_v57  ;;  %3316 = vperm.xlu1 %6484, %v8940_v58   ;;  %v3247_v4 = vmul.f32 %v8870_v8, %v3202_v2  ;;  %v3249_v42 = vmul.f32 %v8897_v0, %v3207_v44  ;;  %vm3144_vm13 = vweird.f32 %v8932_v45 }
 0x7fe   : >> { %v8946_v14 = vperm.slane %v3183_v52, 1  ;;  %vm3149_vm11 = vcmp.eq.f32.partialorder %v3148_v6, 8.507059e+37 }
 0x7ff   : >> { %v3113_v20 = vadd.f32 %v6688_v34, %v3112_v35  ;;  %v3151_v35 = vor.u32 1.1754944e-38, %v3150_v7  ;;  %v8986_v8 = vsub.f32 %v8757_v47, %v3247_v4  ;;  %v8989_v0 = vsub.f32 %v8849_v59, %v3249_v42 }
 0x800   : >> { %v3260_v38 = vmul.f32 %v8946_v14, %v8888_v53 }
 0x801   : >> { %v3117_v19 = vsel %vm3116_vm6, %v6688_v34, %v3113_v20  ;;  %v6690_v49 = vpop.eup %6689 }
 0x802   : >> { %v3122_v16 = vsel %vm3119_vm14, %v3121_v18, %v3117_v19  ;;  %v3140_v28 = vmul.f32 %v6690_v49, %v8932_v45  ;;  %v3276_v26 = vsub.f32 %v8838_v27, %v3260_v38  ;;  %vm3145_vm0 = vweird.f32 %v6690_v49  ;;  %v3222_v19 = vpop.permute.xlu2 %3221 }
 0x803   : >> { %v3123_v29 = vmul.f32 %v3122_v16, %v8791_v9  ;;  %v8953_v25 = vpop.permute.xlu1 %3076  ;;  %vm3146_vm10 = vmor %vm3144_vm13, %vm3145_vm0 }
 0x804   : >> { %6691 = vrcp.f32 %v8953_v25  ;;  %v3141_v34 = vsub.f32 1.0, %v3140_v28  ;;  %v8965_v53 = vsel %vm11358_vm9, %v8946_v14, %v3276_v26  ;;  %v3195_v16 = vand.u32 2147483648, %v8953_v25  ;;  %vm11360_vm0 = vmmov %vm11359_vm12 }
 0x805   : >> { %v8967_v39 = vperm.slane %v3123_v29, 1  ;;  %3326 = vperm.xlu1 %6484, %v8960_v36   ;;  %3331 = vperm.xlu0 %6485, %v8965_v53   ;;  %v3193_v59 = vand.u32 2147483647, %v8953_v25  ;;  %vm3189_vm14 = vweird.f32 %v8953_v25  ;;  %vm11361_vm13 = vmmov %vm11360_vm0 }
 0x806   : >> { %v3142_v27 = vmul.f32 %v6690_v49, %v3141_v34  ;;  %v3196_v28 = vor.u32 1.1754944e-38, %v3195_v16 }
 0x807   : >> { %v3252_v57 = vmul.f32 %v8967_v39, %v8903_v24  ;;  %vm3194_vm9 = vcmp.eq.f32.partialorder %v3193_v59, 8.507059e+37 }
 0x808   : >> { %v3143_v22 = vadd.f32 %v6690_v49, %v3142_v27 }
 0x809   : >> { %v3268_v43 = vsub.f32 %v8791_v9, %v3252_v57  ;;  %v3217_v9 = vpop.permute.xlu0 %3216 }
 0x80a   : >> { %v6692_v33 = vpop.eup %6691  ;;  %v3147_v56 = vsel %vm3146_vm10, %v6690_v49, %v3143_v22  ;;  %v3253_v38 = vmul.f32 %v8921_v30, %v3217_v9 }
 0x80b   : >> { %v3185_v52 = vmul.f32 %v6692_v33, %v8953_v25  ;;  %v8983_v24 = vsel %vm11359_vm12, %v8967_v39, %v3268_v43  ;;  %v3152_v21 = vsel %vm3149_vm11, %v3151_v35, %v3147_v56  ;;  %vm3190_vm6 = vweird.f32 %v6692_v33  ;;  %v3212_v22 = vpop.permute.xlu1 %3211 }
 0x80c   : >> { %3311 = vperm.xlu2 %6486, %v8983_v24   ;;  %v3153_v20 = vmul.f32 %v3152_v21, %v8824_v60  ;;  %vm3191_vm15 = vmor %vm3189_vm14, %vm3190_vm6  ;;  %v9005_v7 = vsub.f32 %v8783_v5, %v3253_v38  ;;  %vm11362_vm14 = vcmp.eq.s32.totalorder %v7094_v13, 10 }
 0x80d   : >> { %v3186_v18 = vsub.f32 1.0, %v3185_v52  ;;  %3461 = vperm.xlu1 %6484, %v8986_v8   ;;  %3466 = vperm.xlu0 %6485, %v8989_v0   ;;  %v6932_v52 = vmov 11  }
 0x80e   : >> { %v3243_v37 = vperm.slane %v3153_v20, 1 }
 0x80f   : >> { %v3187_v47 = vmul.f32 %v6692_v33, %v3186_v18 }
 0x810   : >> { %v3255_v29 = vmul.f32 %v3243_v37, %v3222_v19  ;;  %v3256_v2 = vmul.f32 %v3243_v37, %v8932_v45  ;;  %v3237_v45 = vpop.permute.xlu2 %3236 }
 0x811   : >> { %v3188_v49 = vadd.f32 %v6692_v33, %v3187_v47  ;;  %v3232_v30 = vpop.permute.xlu0 %3231 }
 0x812   : >> { %v9001_v26 = vsub.f32 %v8858_v54, %v3255_v29  ;;  %v3272_v34 = vsub.f32 %v8824_v60, %v3256_v2  ;;  %v3259_v60 = vmul.f32 %v8946_v14, %v3232_v30  ;;  %v3251_v14 = vmul.f32 %v8967_v39, %v3212_v22 }
 0x813   : >> { %v3192_v44 = vsel %vm3191_vm15, %v6692_v33, %v3188_v49 }
 0x814   : >> { %v3197_v27 = vsel %vm3194_vm9, %v3196_v28, %v3192_v44  ;;  %v9010_v57 = vsel %vm11360_vm0, %v3243_v37, %v3272_v34  ;;  %v9022_v33 = vsub.f32 %v8831_v55, %v3259_v60 }
 0x815   : >> { %v3198_v6 = vmul.f32 %v3197_v27, %v8842_v15  ;;  %3321 = vperm.xlu2 %6486, %v9010_v57   ;;  %3476 = vperm.xlu1 %6484, %v9005_v7  }
 0x816   : >> { %3481 = vperm.xlu0 %6485, %v9001_v26  }
 0x817   : >> { %v3246_v54 = vperm.slane %v3198_v6, 1 }
 0x819   : >> { %v3261_v5 = vmul.f32 %v3246_v54, %v3237_v45  ;;  %v3262_v4 = vmul.f32 %v3246_v54, %v8953_v25  ;;  %v3227_v25 = vpop.permute.xlu1 %3226 }
 0x81a   : >> { %v3257_v55 = vmul.f32 %v8928_v63, %v3227_v25 }
 0x81b   : >> { %v9018_v42 = vsub.f32 %v8866_v3, %v3261_v5  ;;  %v3278_v43 = vsub.f32 %v8842_v15, %v3262_v4  ;;  %v9033_v3 = vsub.f32 %v8852_v1, %v3251_v14 }
 0x81c   : >> { %v9038_v15 = vsub.f32 %v8861_v51, %v3257_v55 }
 0x81d   : >> { %v9026_v35 = vsel %vm11361_vm13, %v3246_v54, %v3278_v43  ;;  %3491 = vperm.xlu1 %6484, %v9022_v33  }
 0x81e   : >> { %3336 = vperm.xlu2 %6486, %v9026_v35   ;;  %3496 = vperm.xlu0 %6485, %v9018_v42  }
 0x825   : >> { %6488 = vset.pattern.permute.xlu1 %v6932_v52 }
 0x826   : >> { %3471 = vperm.xlu2 %6486, %v9033_v3   ;;  %6489 = vset.pattern.permute.xlu0 %v6932_v52 }
 0x82e   : >> { %3486 = vperm.xlu2 %6486, %v9038_v15  }
 0x836   : >> { %6487 = vset.pattern.permute.xlu2 %v6932_v52 }
 0x84d   : >> { %v3302_v56 = vpop.permute.xlu1 %3301 }
 0x84e   : >> { %6693 = vrcp.f32 %v3302_v56  ;;  %v3350_v9 = vand.u32 2147483648, %v3302_v56  ;;  %v3348_v18 = vand.u32 2147483647, %v3302_v56  ;;  %vm3344_vm11 = vweird.f32 %v3302_v56 }
 0x850   : >> { %v3351_v51 = vor.u32 1.1754944e-38, %v3350_v9  ;;  %vm3349_vm6 = vcmp.eq.f32.partialorder %v3348_v18, 8.507059e+37 }
 0x854   : >> { %v6694_v39 = vpop.eup %6693 }
 0x855   : >> { %v3340_v21 = vmul.f32 %v6694_v39, %v3302_v56  ;;  %vm3345_vm10 = vweird.f32 %v6694_v39 }
 0x856   : >> { %vm3346_vm12 = vmor %vm3344_vm11, %vm3345_vm10 }
 0x857   : >> { %v3341_v1 = vsub.f32 1.0, %v3340_v21 }
 0x859   : >> { %v3342_v20 = vmul.f32 %v6694_v39, %v3341_v1 }
 0x85b   : >> { %v3343_v19 = vadd.f32 %v6694_v39, %v3342_v20 }
 0x85d   : >> { %v3347_v63 = vsel %vm3346_vm12, %v6694_v39, %v3343_v19 }
 0x85e   : >> { %v3352_v16 = vsel %vm3349_vm6, %v3351_v51, %v3347_v63 }
 0x85f   : >> { %v3353_v37 = vmul.f32 %v3352_v16, %v8877_v12 }
 0x861   : >> { %v9042_v47 = vperm.slane %v3353_v37, 2 }
 0x863   : >> { %v3508_v59 = vmul.f32 %v9042_v47, %v3302_v56 }
 0x865   : >> { %v3524_v38 = vsub.f32 %v8877_v12, %v3508_v59 }
 0x866   : >> { %v3312_v29 = vpop.permute.xlu2 %3311 }
 0x867   : >> { %v9049_v49 = vsel %vm11362_vm14, %v9042_v47, %v3524_v38  ;;  %v3307_v2 = vpop.permute.xlu0 %3306  ;;  %6695 = vrcp.f32 %v3312_v29  ;;  %v3378_v12 = vand.u32 2147483647, %v3312_v29  ;;  %v3380_v5 = vand.u32 2147483648, %v3312_v29 }
 0x868   : >> { %3561 = vperm.xlu2 %6487, %v9049_v49   ;;  %6697 = vrcp.f32 %v3307_v2  ;;  %v3363_v45 = vand.u32 2147483647, %v3307_v2  ;;  %v3365_v4 = vand.u32 2147483648, %v3307_v2  ;;  %vm3374_vm0 = vweird.f32 %v3312_v29 }
 0x869   : >> { %vm3359_vm13 = vweird.f32 %v3307_v2  ;;  %v3381_v55 = vor.u32 1.1754944e-38, %v3380_v5  ;;  %vm3379_vm6 = vcmp.eq.f32.partialorder %v3378_v12, 8.507059e+37 }
 0x86a   : >> { %vm3364_vm12 = vcmp.eq.f32.partialorder %v3363_v45, 8.507059e+37  ;;  %v3366_v56 = vor.u32 1.1754944e-38, %v3365_v4 }
 0x86d   : >> { %v6696_v28 = vpop.eup %6695 }
 0x86e   : >> { %v6698_v44 = vpop.eup %6697  ;;  %v3370_v34 = vmul.f32 %v6696_v28, %v3312_v29  ;;  %vm3375_vm15 = vweird.f32 %v6696_v28 }
 0x86f   : >> { %v3355_v27 = vmul.f32 %v6698_v44, %v3307_v2  ;;  %v9052_v6 = vpop.permute.xlu1 %3316  ;;  %v9054_v54 = vpop.permute.xlu2 %3321  ;;  %vm3360_vm9 = vweird.f32 %v6698_v44  ;;  %vm3376_vm10 = vmor %vm3374_vm0, %vm3375_vm15 }
 0x870   : >> { %v3371_v30 = vsub.f32 1.0, %v3370_v34  ;;  %6699 = vrcp.f32 %v9052_v6  ;;  %vm3361_vm11 = vmor %vm3359_vm13, %vm3360_vm9  ;;  %vm3389_vm14 = vweird.f32 %v9052_v6  ;;  %v3393_v9 = vand.u32 2147483647, %v9052_v6 }
 0x871   : >> { %v3356_v60 = vsub.f32 1.0, %v3355_v27  ;;  %6701 = vrcp.f32 %v9054_v54  ;;  %v3395_v37 = vand.u32 2147483648, %v9052_v6  ;;  %vm3404_vm15 = vweird.f32 %v9054_v54 }
 0x872   : >> { %v3372_v22 = vmul.f32 %v6696_v28, %v3371_v30  ;;  %v3410_v30 = vand.u32 2147483648, %v9054_v54  ;;  %vm9085_vm0 = vcmp.eq.f32.partialorder %v3393_v9, 8.507059e+37 }
 0x873   : >> { %v3357_v43 = vmul.f32 %v6698_v44, %v3356_v60 }
 0x874   : >> { %v3373_v14 = vadd.f32 %v6696_v28, %v3372_v22 }
 0x875   : >> { %v3358_v25 = vadd.f32 %v6698_v44, %v3357_v43  ;;  %v3396_v43 = vor.u32 1.1754944e-38, %v3395_v37 }
 0x876   : >> { %v3377_v52 = vsel %vm3376_vm10, %v6696_v28, %v3373_v14  ;;  %v6700_v39 = vpop.eup %6699 }
 0x877   : >> { %v3362_v21 = vsel %vm3361_vm11, %v6698_v44, %v3358_v25  ;;  %v3382_v1 = vsel %vm3379_vm6, %v3381_v55, %v3377_v52  ;;  %v9060_v20 = vpop.eup %6701  ;;  %v3385_v18 = vmul.f32 %v6700_v39, %v9052_v6  ;;  %v9063_v19 = vpop.permute.xlu1 %3326  ;;  %v3408_v44 = vand.u32 2147483647, %v9054_v54 }
 0x878   : >> { %v9065_v51 = vpop.permute.xlu0 %3331  ;;  %v3367_v63 = vsel %vm3364_vm12, %v3366_v56, %v3362_v21  ;;  %v3383_v16 = vmul.f32 %v3382_v1, %v8983_v24  ;;  %v3400_v59 = vmul.f32 %v9060_v20, %v9054_v54  ;;  %6703 = vrcp.f32 %v9063_v19  ;;  %v9072_v38 = vpop.permute.xlu2 %3336 }
 0x879   : >> { %v3368_v28 = vmul.f32 %v3367_v63, %v8916_v17  ;;  %v3386_v34 = vsub.f32 1.0, %v3385_v18  ;;  %6705 = vrcp.f32 %v9065_v51  ;;  %vm3390_vm9 = vweird.f32 %v6700_v39 }
 0x87a   : >> { %v9077_v27 = vperm.slane %v3383_v16, 2  ;;  %v3401_v12 = vsub.f32 1.0, %v3400_v59  ;;  %6707 = vrcp.f32 %v9072_v38  ;;  %v3423_v25 = vand.u32 2147483647, %v9063_v19  ;;  %vm9100_vm10 = vmor %vm3389_vm14, %vm3390_vm9 }
 0x87b   : >> { %v9081_v60 = vperm.slane %v3368_v28, 2  ;;  %v3387_v5 = vmul.f32 %v6700_v39, %v3386_v34  ;;  %vm9093_vm13 = vcmp.eq.f32.partialorder %v3408_v44, 8.507059e+37  ;;  %vm3405_vm11 = vweird.f32 %v9060_v20 }
 0x87c   : >> { %v3512_v45 = vmul.f32 %v9077_v27, %v3312_v29  ;;  %v3402_v14 = vmul.f32 %v9060_v20, %v3401_v12  ;;  %v3411_v29 = vor.u32 1.1754944e-38, %v3410_v30  ;;  %vm3419_vm12 = vweird.f32 %v9063_v19 }
 0x87d   : >> { %v3510_v22 = vmul.f32 %v9081_v60, %v3307_v2  ;;  %v3388_v56 = vadd.f32 %v6700_v39, %v3387_v5  ;;  %vm11369_vm6 = vcmp.eq.s32.totalorder %v7094_v13, 10  ;;  %vm9123_vm9 = vcmp.eq.f32.partialorder %v3423_v25, 8.507059e+37 }
 0x87e   : >> { %v3528_v55 = vsub.f32 %v8983_v24, %v3512_v45  ;;  %v6704_v21 = vpop.eup %6703  ;;  %v3425_v24 = vand.u32 2147483648, %v9063_v19  ;;  %v3403_v16 = vadd.f32 %v9060_v20, %v3402_v14  ;;  %vm11370_vm14 = vmmov %vm11369_vm6  ;;  %v3438_v12 = vand.u32 2147483647, %v9065_v51 }
 0x87f   : >> { %v3526_v1 = vsub.f32 %v8916_v17, %v3510_v22  ;;  %v6706_v9 = vpop.eup %6705  ;;  %v3415_v18 = vmul.f32 %v6704_v21, %v9063_v19  ;;  %v3392_v17 = vsel %vm9100_vm10, %v6700_v39, %v3388_v56  ;;  %vm3406_vm10 = vmor %vm3404_vm15, %vm3405_vm11  ;;  %v3440_v14 = vand.u32 2147483648, %v9065_v51 }
 0x880   : >> { %v9111_v63 = vsel %vm11369_vm6, %v9077_v27, %v3528_v55  ;;  %v6708_v37 = vpop.eup %6707  ;;  %v3430_v59 = vmul.f32 %v6706_v9, %v9065_v51  ;;  %vm3434_vm6 = vweird.f32 %v9065_v51  ;;  %v3397_v30 = vsel %vm9085_vm0, %v3396_v43, %v3392_v17 }
 0x881   : >> { %v9120_v28 = vsel %vm11370_vm14, %v9081_v60, %v3526_v1  ;;  %3571 = vperm.xlu0 %6489, %v9111_v63   ;;  %v3416_v34 = vsub.f32 1.0, %v3415_v18  ;;  %v3445_v39 = vmul.f32 %v6708_v37, %v9072_v38  ;;  %v3398_v5 = vmul.f32 %v3397_v30, %v8940_v58 }
 0x882   : >> { %3566 = vperm.xlu1 %6488, %v9120_v28   ;;  %v3431_v45 = vsub.f32 1.0, %v3430_v59  ;;  %v3426_v22 = vor.u32 1.1754944e-38, %v3425_v24  ;;  %v3407_v55 = vsel %vm3406_vm10, %v9060_v20, %v3403_v16  ;;  %vm3420_vm14 = vweird.f32 %v6704_v21 }
 0x883   : >> { %v3446_v25 = vsub.f32 1.0, %v3445_v39  ;;  %v3417_v56 = vmul.f32 %v6704_v21, %v3416_v34  ;;  %v9140_v4 = vperm.slane %v3398_v5, 2  ;;  %v3412_v43 = vsel %vm9093_vm13, %v3411_v29, %v3407_v55  ;;  %vm3421_vm15 = vmor %vm3419_vm12, %vm3420_vm14 }
 0x884   : >> { %v3432_v1 = vmul.f32 %v6706_v9, %v3431_v45  ;;  %vm3435_vm0 = vweird.f32 %v6706_v9  ;;  %v3413_v2 = vmul.f32 %v3412_v43, %v9010_v57  ;;  %vm9145_vm2 = vcmp.eq.f32.partialorder %v3438_v12, 8.507059e+37 }
 0x885   : >> { %v3418_v18 = vadd.f32 %v6704_v21, %v3417_v56  ;;  %v3447_v24 = vmul.f32 %v6708_v37, %v3446_v25  ;;  %v3514_v20 = vmul.f32 %v9140_v4, %v9052_v6  ;;  %v3441_v59 = vor.u32 1.1754944e-38, %v3440_v14  ;;  %vm3436_vm11 = vmor %vm3434_vm6, %vm3435_vm0 }
 0x886   : >> { %v3433_v16 = vadd.f32 %v6706_v9, %v3432_v1  ;;  %vm3449_vm13 = vweird.f32 %v9072_v38  ;;  %v3503_v52 = vperm.slane %v3413_v2, 2  ;;  %vm3450_vm10 = vweird.f32 %v6708_v37  ;;  %v3462_v1 = vpop.permute.xlu1 %3461 }
 0x887   : >> { %v3422_v29 = vsel %vm3421_vm15, %v6704_v21, %v3418_v18  ;;  %v3448_v34 = vadd.f32 %v6708_v37, %v3447_v24  ;;  %v3530_v30 = vsub.f32 %v8940_v58, %v3514_v20  ;;  %v3455_v45 = vand.u32 2147483648, %v9072_v38  ;;  %v3467_v24 = vpop.permute.xlu0 %3466 }
 0x888   : >> { %v3427_v39 = vsel %vm9123_vm9, %v3426_v22, %v3422_v29  ;;  %v3437_v12 = vsel %vm3436_vm11, %v6706_v9, %v3433_v16  ;;  %v3516_v5 = vmul.f32 %v3503_v52, %v9054_v54  ;;  %v3453_v14 = vand.u32 2147483647, %v9072_v38  ;;  %vm3451_vm9 = vmor %vm3449_vm13, %vm3450_vm10 }
 0x889   : >> { %v3428_v6 = vmul.f32 %v3427_v39, %v8960_v36  ;;  %v3442_v21 = vsel %vm9145_vm2, %v3441_v59, %v3437_v12  ;;  %vm11375_vm12 = vcmp.eq.s32.totalorder %v7094_v13, 10  ;;  %v3452_v9 = vsel %vm3451_vm9, %v6708_v37, %v3448_v34 }
 0x88a   : >> { %v9168_v25 = vsel %vm11375_vm12, %v9140_v4, %v3530_v30  ;;  %v3443_v44 = vmul.f32 %v3442_v21, %v8965_v53  ;;  %v3532_v54 = vsub.f32 %v9010_v57, %v3516_v5  ;;  %v3456_v55 = vor.u32 1.1754944e-38, %v3455_v45  ;;  %vm11376_vm2 = vmmov %vm11375_vm12 }
 0x88b   : >> { %v3504_v58 = vperm.slane %v3428_v6, 2  ;;  %3576 = vperm.xlu2 %6487, %v9168_v25   ;;  %vm3454_vm6 = vcmp.eq.f32.partialorder %v3453_v14, 8.507059e+37  ;;  %vm11377_vm14 = vmmov %vm11376_vm2  ;;  %v3507_v59 = vmul.f32 %v9042_v47, %v3462_v1  ;;  %v3509_v34 = vmul.f32 %v9081_v60, %v3467_v24 }
 0x88c   : >> { %v3505_v22 = vperm.slane %v3443_v44, 2  ;;  %v9177_v56 = vsel %vm11376_vm2, %v3503_v52, %v3532_v54  ;;  %v3457_v2 = vsel %vm3454_vm6, %v3456_v55, %v3452_v9  ;;  %vm11378_vm0 = vmmov %vm11376_vm2  ;;  %vm11380_vm9 = vcmp.eq.s32.totalorder %v7094_v13, 11 }
 0x88d   : >> { %v3518_v43 = vmul.f32 %v3504_v58, %v9063_v19  ;;  %3581 = vperm.xlu1 %6488, %v9177_v56   ;;  %v3458_v17 = vmul.f32 %v3457_v2, %v9026_v35  ;;  %vm11379_vm15 = vmmov %vm11378_vm0  ;;  %v9205_v30 = vsub.f32 %v8986_v8, %v3507_v59 }
 0x88e   : >> { %v3520_v18 = vmul.f32 %v3505_v22, %v9065_v51  ;;  %v3477_v39 = vpop.permute.xlu1 %3476 }
 0x88f   : >> { %v3534_v57 = vsub.f32 %v8960_v36, %v3518_v43  ;;  %v3506_v20 = vperm.slane %v3458_v17, 2  ;;  %v3482_v47 = vpop.permute.xlu0 %3481  ;;  %v3513_v12 = vmul.f32 %v9140_v4, %v3477_v39 }
 0x890   : >> { %v3536_v37 = vsub.f32 %v8965_v53, %v3520_v18  ;;  %v3472_v53 = vpop.permute.xlu2 %3471  ;;  %v3515_v60 = vmul.f32 %v3503_v52, %v3482_v47 }
 0x891   : >> { %v9187_v16 = vsel %vm11377_vm14, %v3504_v58, %v3534_v57  ;;  %v3522_v51 = vmul.f32 %v3506_v20, %v9072_v38  ;;  %v3511_v38 = vmul.f32 %v9077_v27, %v3472_v53  ;;  %v9219_v8 = vsub.f32 %v9005_v7, %v3513_v12 }
 0x892   : >> { %v9192_v19 = vsel %vm11378_vm0, %v3505_v22, %v3536_v37 }
 0x893   : >> { %3586 = vperm.xlu2 %6487, %v9187_v16   ;;  %v3538_v36 = vsub.f32 %v9026_v35, %v3522_v51  ;;  %v9210_v35 = vsub.f32 %v8989_v0, %v3509_v34  ;;  %v9214_v45 = vsub.f32 %v9033_v3, %v3511_v38  ;;  %v9223_v0 = vsub.f32 %v9001_v26, %v3515_v60 }
 0x894   : >> { %v6933_v26 = vmov 12  }
 0x895   : >> { %3591 = vperm.xlu1 %6488, %v9192_v19   ;;  %v9200_v29 = vsel %vm11379_vm15, %v3506_v20, %v3538_v36 }
 0x896   : >> { %3596 = vperm.xlu0 %6489, %v9200_v29   ;;  %v3492_v5 = vpop.permute.xlu1 %3491 }
 0x897   : >> { %v3519_v4 = vmul.f32 %v3505_v22, %v3492_v5  ;;  %v3497_v21 = vpop.permute.xlu0 %3496 }
 0x898   : >> { %v3487_v27 = vpop.permute.xlu2 %3486  ;;  %v3521_v52 = vmul.f32 %v3506_v20, %v3497_v21 }
 0x899   : >> { %v3517_v6 = vmul.f32 %v3504_v58, %v3487_v27  ;;  %v9231_v7 = vsub.f32 %v9022_v33, %v3519_v4 }
 0x89a   : >> { %v9235_v14 = vsub.f32 %v9018_v42, %v3521_v52 }
 0x89b   : >> { %3721 = vperm.xlu2 %6487, %v9205_v30   ;;  %v9226_v3 = vsub.f32 %v9038_v15, %v3517_v6 }
 0x89d   : >> { %3726 = vperm.xlu1 %6488, %v9210_v35  }
 0x89e   : >> { %3731 = vperm.xlu0 %6489, %v9214_v45  }
 0x8a3   : >> { %3736 = vperm.xlu2 %6487, %v9219_v8  }
 0x8a5   : >> { %3741 = vperm.xlu1 %6488, %v9223_v0  }
 0x8a6   : >> { %3746 = vperm.xlu0 %6489, %v9226_v3  }
 0x8ab   : >> { %3751 = vperm.xlu2 %6487, %v9231_v7  }
 0x8ad   : >> { %3756 = vperm.xlu1 %6488, %v9235_v14  }
 0x8ae   : >> { %6490 = vset.pattern.permute.xlu0 %v6933_v26 }
 0x8b3   : >> { %6491 = vset.pattern.permute.xlu2 %v6933_v26 }
 0x8b5   : >> { %6492 = vset.pattern.permute.xlu1 %v6933_v26 }
 0x8c2   : >> { %v3562_v15 = vpop.permute.xlu2 %3561 }
 0x8c3   : >> { %6709 = vrcp.f32 %v3562_v15  ;;  %v3610_v9 = vand.u32 2147483648, %v3562_v15  ;;  %v3608_v33 = vand.u32 2147483647, %v3562_v15  ;;  %vm3604_vm11 = vweird.f32 %v3562_v15 }
 0x8c5   : >> { %v3611_v42 = vor.u32 1.1754944e-38, %v3610_v9  ;;  %vm3609_vm12 = vcmp.eq.f32.partialorder %v3608_v33, 8.507059e+37 }
 0x8c9   : >> { %v6710_v44 = vpop.eup %6709 }
 0x8ca   : >> { %v3600_v58 = vmul.f32 %v6710_v44, %v3562_v15  ;;  %vm3605_vm13 = vweird.f32 %v6710_v44 }
 0x8cb   : >> { %vm3606_vm10 = vmor %vm3604_vm11, %vm3605_vm13 }
 0x8cc   : >> { %v3601_v54 = vsub.f32 1.0, %v3600_v58 }
 0x8ce   : >> { %v3602_v22 = vmul.f32 %v6710_v44, %v3601_v54 }
 0x8d0   : >> { %v3603_v55 = vadd.f32 %v6710_v44, %v3602_v22 }
 0x8d2   : >> { %v3607_v43 = vsel %vm3606_vm10, %v6710_v44, %v3603_v55 }
 0x8d3   : >> { %v3612_v1 = vsel %vm3609_vm12, %v3611_v42, %v3607_v43 }
 0x8d4   : >> { %v3613_v2 = vmul.f32 %v3612_v1, %v9049_v49 }
 0x8d6   : >> { %v9239_v18 = vperm.slane %v3613_v2, 3 }
 0x8d8   : >> { %v3768_v17 = vmul.f32 %v9239_v18, %v3562_v15 }
 0x8da   : >> { %v3784_v57 = vsub.f32 %v9049_v49, %v3768_v17 }
 0x8dc   : >> { %v9246_v37 = vsel %vm11380_vm9, %v9239_v18, %v3784_v57 }
 0x8dd   : >> { %3821 = vperm.xlu0 %6490, %v9246_v37  }
 0x8e5   : >> { %v9249_v24 = vpop.permute.xlu2 %3576 }
 0x8e6   : >> { %6711 = vrcp.f32 %v9249_v24  ;;  %v3655_v47 = vand.u32 2147483648, %v9249_v24  ;;  %vm3649_vm14 = vweird.f32 %v9249_v24  ;;  %v3653_v26 = vand.u32 2147483647, %v9249_v24 }
 0x8e8   : >> { %v3656_v15 = vor.u32 1.1754944e-38, %v3655_v47  ;;  %vm3654_vm12 = vcmp.eq.f32.partialorder %v3653_v26, 8.507059e+37 }
 0x8ec   : >> { %v6712_v20 = vpop.eup %6711 }
 0x8ed   : >> { %v3645_v51 = vmul.f32 %v6712_v20, %v9249_v24  ;;  %v3587_v59 = vpop.permute.xlu2 %3586  ;;  %vm3650_vm2 = vweird.f32 %v6712_v20 }
 0x8ee   : >> { %6713 = vrcp.f32 %v3587_v59  ;;  %v3683_v60 = vand.u32 2147483647, %v3587_v59  ;;  %v3685_v27 = vand.u32 2147483648, %v3587_v59  ;;  %vm9264_vm0 = vmor %vm3649_vm14, %vm3650_vm2  ;;  %vm3679_vm15 = vweird.f32 %v3587_v59 }
 0x8ef   : >> { %v3646_v36 = vsub.f32 1.0, %v3645_v51 }
 0x8f0   : >> { %vm3684_vm13 = vcmp.eq.f32.partialorder %v3683_v60, 8.507059e+37  ;;  %v3686_v22 = vor.u32 1.1754944e-38, %v3685_v27 }
 0x8f1   : >> { %v3647_v38 = vmul.f32 %v6712_v20, %v3646_v36 }
 0x8f3   : >> { %v9253_v53 = vpop.permute.xlu0 %3571  ;;  %v3648_v4 = vadd.f32 %v6712_v20, %v3647_v38 }
 0x8f4   : >> { %v9255_v49 = vpop.permute.xlu1 %3566  ;;  %6715 = vrcp.f32 %v9253_v53  ;;  %v6714_v34 = vpop.eup %6713  ;;  %v3638_v55 = vand.u32 2147483647, %v9253_v53  ;;  %v3640_v2 = vand.u32 2147483648, %v9253_v53 }
 0x8f5   : >> { %6717 = vrcp.f32 %v9255_v49  ;;  %v3675_v39 = vmul.f32 %v6714_v34, %v3587_v59  ;;  %vm3680_vm6 = vweird.f32 %v6714_v34  ;;  %v3623_v33 = vand.u32 2147483647, %v9255_v49 }
 0x8f6   : >> { %vm3681_vm11 = vmor %vm3679_vm15, %vm3680_vm6  ;;  %v3652_v43 = vsel %vm9264_vm0, %v6712_v20, %v3648_v4  ;;  %v3625_v57 = vand.u32 2147483648, %v9255_v49  ;;  %vm3619_vm2 = vweird.f32 %v9255_v49  ;;  %vm3634_vm6 = vweird.f32 %v9253_v53 }
 0x8f7   : >> { %v3676_v12 = vsub.f32 1.0, %v3675_v39  ;;  %v3657_v47 = vsel %vm3654_vm12, %v3656_v15, %v3652_v43  ;;  %v3641_v60 = vor.u32 1.1754944e-38, %v3640_v2  ;;  %vm3624_vm15 = vcmp.eq.f32.partialorder %v3623_v33, 8.507059e+37 }
 0x8f8   : >> { %v3626_v27 = vor.u32 1.1754944e-38, %v3625_v57  ;;  %v3658_v4 = vmul.f32 %v3657_v47, %v9168_v25 }
 0x8f9   : >> { %v3677_v5 = vmul.f32 %v6714_v34, %v3676_v12 }
 0x8fa   : >> { %v6716_v6 = vpop.eup %6715  ;;  %v3762_v43 = vperm.slane %v3658_v4, 3 }
 0x8fb   : >> { %v6718_v21 = vpop.eup %6717  ;;  %v3630_v52 = vmul.f32 %v6716_v6, %v9253_v53  ;;  %v3678_v54 = vadd.f32 %v6714_v34, %v3677_v5  ;;  %vm3635_vm10 = vweird.f32 %v6716_v6 }
 0x8fc   : >> { %v3615_v44 = vmul.f32 %v6718_v21, %v9255_v49  ;;  %vm3620_vm9 = vweird.f32 %v6718_v21  ;;  %vm3636_vm14 = vmor %vm3634_vm6, %vm3635_vm10 }
 0x8fd   : >> { %v3631_v9 = vsub.f32 1.0, %v3630_v52  ;;  %v3682_v1 = vsel %vm3681_vm11, %v6714_v34, %v3678_v54  ;;  %vm3621_vm0 = vmor %vm3619_vm2, %vm3620_vm9  ;;  %vm11383_vm11 = vcmp.eq.s32.totalorder %v7094_v13, 11 }
 0x8fe   : >> { %v3616_v42 = vsub.f32 1.0, %v3615_v44  ;;  %v3687_v17 = vsel %vm3684_vm13, %v3686_v22, %v3682_v1  ;;  %vm3639_vm13 = vcmp.eq.f32.partialorder %v3638_v55, 8.507059e+37  ;;  %v3722_v44 = vpop.permute.xlu2 %3721  ;;  %vm11384_vm10 = vmmov %vm11383_vm11 }
 0x8ff   : >> { %v3632_v51 = vmul.f32 %v6716_v6, %v3631_v9  ;;  %v3688_v36 = vmul.f32 %v3687_v17, %v9187_v16  ;;  %v9275_v38 = vpop.permute.xlu1 %3581  ;;  %v3767_v1 = vmul.f32 %v9239_v18, %v3722_v44  ;;  %vm11385_vm9 = vmmov %vm11384_vm10 }
 0x900   : >> { %v3617_v39 = vmul.f32 %v6718_v21, %v3616_v42  ;;  %6719 = vrcp.f32 %v9275_v38  ;;  %vm3664_vm2 = vweird.f32 %v9275_v38 }
 0x901   : >> { %v3633_v12 = vadd.f32 %v6716_v6, %v3632_v51  ;;  %v9280_v20 = vperm.slane %v3688_v36, 3  ;;  %v3668_v36 = vand.u32 2147483647, %v9275_v38 }
 0x902   : >> { %v3618_v34 = vadd.f32 %v6718_v21, %v3617_v39  ;;  %v3670_v39 = vand.u32 2147483648, %v9275_v38 }
 0x903   : >> { %v3637_v5 = vsel %vm3636_vm14, %v6716_v6, %v3633_v12  ;;  %v3778_v52 = vmul.f32 %v9280_v20, %v3587_v59  ;;  %vm3669_vm14 = vcmp.eq.f32.partialorder %v3668_v36, 8.507059e+37 }
 0x904   : >> { %v3622_v26 = vsel %vm3621_vm0, %v6718_v21, %v3618_v34  ;;  %v3642_v15 = vsel %vm3639_vm13, %v3641_v60, %v3637_v5  ;;  %v3671_v60 = vor.u32 1.1754944e-38, %v3670_v39  ;;  %vm11386_vm0 = vmmov %vm11385_vm9 }
 0x905   : >> { %v3627_v58 = vsel %vm3624_vm15, %v3626_v27, %v3622_v26  ;;  %v3643_v54 = vmul.f32 %v3642_v15, %v9111_v63  ;;  %v3794_v9 = vsub.f32 %v9187_v16, %v3778_v52 }
 0x906   : >> { %v3628_v22 = vmul.f32 %v3627_v58, %v9120_v28  ;;  %v6720_v33 = vpop.eup %6719 }
 0x907   : >> { %v9287_v42 = vperm.slane %v3643_v54, 3  ;;  %v9292_v6 = vsel %vm11383_vm11, %v9280_v20, %v3794_v9  ;;  %v3660_v21 = vmul.f32 %v6720_v33, %v9275_v38  ;;  %v9297_v55 = vpop.permute.xlu1 %3591  ;;  %vm3665_vm12 = vweird.f32 %v6720_v33 }
 0x908   : >> { %v9294_v59 = vperm.slane %v3628_v22, 3  ;;  %3846 = vperm.xlu0 %6490, %v9292_v6   ;;  %6721 = vrcp.f32 %v9297_v55  ;;  %v9304_v17 = vpop.permute.xlu0 %3596  ;;  %vm3666_vm6 = vmor %vm3664_vm2, %vm3665_vm12  ;;  %v3698_v54 = vand.u32 2147483647, %v9297_v55  ;;  %v3700_v9 = vand.u32 2147483648, %v9297_v55 }
 0x909   : >> { %v3772_v16 = vmul.f32 %v9287_v42, %v9253_v53  ;;  %v3661_v2 = vsub.f32 1.0, %v3660_v21  ;;  %6723 = vrcp.f32 %v9304_v17  ;;  %v3774_v53 = vmul.f32 %v3762_v43, %v9249_v24 }
 0x90a   : >> { %v3770_v57 = vmul.f32 %v9294_v59, %v9255_v49  ;;  %v3737_v49 = vpop.permute.xlu2 %3736  ;;  %vm3694_vm13 = vweird.f32 %v9297_v55  ;;  %vm3699_vm12 = vcmp.eq.f32.partialorder %v3698_v54, 8.507059e+37 }
 0x90b   : >> { %v3788_v51 = vsub.f32 %v9111_v63, %v3772_v16  ;;  %v3662_v12 = vmul.f32 %v6720_v33, %v3661_v2  ;;  %v9321_v63 = vsub.f32 %v9205_v30, %v3767_v1  ;;  %v3790_v27 = vsub.f32 %v9168_v25, %v3774_v53 }
 0x90c   : >> { %v3786_v47 = vsub.f32 %v9120_v28, %v3770_v57  ;;  %v3773_v52 = vmul.f32 %v3762_v43, %v3737_v49  ;;  %v3713_v1 = vand.u32 2147483647, %v9304_v17  ;;  %v3715_v2 = vand.u32 2147483648, %v9304_v17 }
 0x90d   : >> { %v9317_v18 = vsel %vm11384_vm10, %v9287_v42, %v3788_v51  ;;  %v3663_v24 = vadd.f32 %v6720_v33, %v3662_v12  ;;  %v9339_v25 = vsel %vm11386_vm0, %v3762_v43, %v3790_v27  ;;  %v3701_v43 = vor.u32 1.1754944e-38, %v3700_v9 }
 0x90e   : >> { %3831 = vperm.xlu1 %6492, %v9317_v18   ;;  %v9326_v34 = vsel %vm11385_vm9, %v9294_v59, %v3786_v47  ;;  %v6722_v28 = vpop.eup %6721  ;;  %v9342_v16 = vsub.f32 %v9219_v8, %v3773_v52  ;;  %vm3709_vm9 = vweird.f32 %v9304_v17  ;;  %v3716_v12 = vor.u32 1.1754944e-38, %v3715_v2 }
 0x90f   : >> { %3826 = vperm.xlu2 %6491, %v9326_v34   ;;  %v3690_v5 = vmul.f32 %v6722_v28, %v9297_v55  ;;  %v3667_v30 = vsel %vm3666_vm6, %v6720_v33, %v3663_v24  ;;  %v6724_v4 = vpop.eup %6723  ;;  %vm3695_vm15 = vweird.f32 %v6722_v28  ;;  %vm11387_vm6 = vmmov %vm11386_vm0 }
 0x910   : >> { %3981 = vperm.xlu0 %6490, %v9321_v63   ;;  %v3672_v26 = vsel %vm3669_vm14, %v3671_v60, %v3667_v30  ;;  %v3705_v44 = vmul.f32 %v6724_v4, %v9304_v17  ;;  %vm3710_vm11 = vweird.f32 %v6724_v4  ;;  %vm3696_vm10 = vmor %vm3694_vm13, %vm3695_vm15  ;;  %vm3714_vm14 = vcmp.eq.f32.partialorder %v3713_v1, 8.507059e+37  ;;  %v3727_v30 = vpop.permute.xlu1 %3726 }
 0x911   : >> { %v3691_v15 = vsub.f32 1.0, %v3690_v5  ;;  %v3673_v58 = vmul.f32 %v3672_v26, %v9177_v56  ;;  %vm3711_vm2 = vmor %vm3709_vm9, %vm3710_vm11 }
 0x912   : >> { %v3706_v22 = vsub.f32 1.0, %v3705_v44  ;;  %v3752_v27 = vpop.permute.xlu2 %3751  ;;  %vm11388_vm15 = vmmov %vm11386_vm0 }
 0x913   : >> { %v3692_v21 = vmul.f32 %v6722_v28, %v3691_v15  ;;  %v3763_v33 = vperm.slane %v3673_v58, 3  ;;  %v3732_v58 = vpop.permute.xlu0 %3731 }
 0x914   : >> { %v3707_v36 = vmul.f32 %v6724_v4, %v3706_v22 }
 0x915   : >> { %v3693_v57 = vadd.f32 %v6722_v28, %v3692_v21  ;;  %v3776_v51 = vmul.f32 %v3763_v33, %v9275_v38 }
 0x916   : >> { %v3708_v53 = vadd.f32 %v6724_v4, %v3707_v36  ;;  %v6934_v36 = vmov 13  }
 0x917   : >> { %3836 = vperm.xlu2 %6491, %v9339_v25   ;;  %v3697_v39 = vsel %vm3696_vm10, %v6722_v28, %v3693_v57  ;;  %v3792_v8 = vsub.f32 %v9177_v56, %v3776_v51 }
 0x918   : >> { %3996 = vperm.xlu0 %6490, %v9342_v16   ;;  %v3702_v47 = vsel %vm3699_vm12, %v3701_v43, %v3697_v39  ;;  %v3712_v24 = vsel %vm3711_vm2, %v6724_v4, %v3708_v53 }
 0x919   : >> { %v3703_v38 = vmul.f32 %v3702_v47, %v9192_v19  ;;  %v9355_v49 = vsel %vm11387_vm6, %v3763_v33, %v3792_v8  ;;  %v3717_v28 = vsel %vm3714_vm14, %v3716_v12, %v3712_v24 }
 0x91a   : >> { %3841 = vperm.xlu1 %6492, %v9355_v49   ;;  %v3718_v60 = vmul.f32 %v3717_v28, %v9200_v29 }
 0x91b   : >> { %v3765_v56 = vperm.slane %v3703_v38, 3  ;;  %v3747_v21 = vpop.permute.xlu0 %3746 }
 0x91c   : >> { %v3766_v52 = vperm.slane %v3718_v60, 3  ;;  %v3777_v2 = vmul.f32 %v9280_v20, %v3747_v21 }
 0x91d   : >> { %v3779_v5 = vmul.f32 %v3765_v56, %v3752_v27  ;;  %v3780_v26 = vmul.f32 %v3765_v56, %v9297_v55 }
 0x91e   : >> { %v3782_v44 = vmul.f32 %v3766_v52, %v9304_v17  ;;  %v3742_v17 = vpop.permute.xlu1 %3741 }
 0x91f   : >> { %v9361_v15 = vsub.f32 %v9231_v7, %v3779_v5  ;;  %v3796_v4 = vsub.f32 %v9192_v19, %v3780_v26  ;;  %v3769_v7 = vmul.f32 %v9294_v59, %v3727_v30  ;;  %v3771_v19 = vmul.f32 %v9287_v42, %v3732_v58 }
 0x920   : >> { %v3798_v54 = vsub.f32 %v9200_v29, %v3782_v44  ;;  %v3775_v1 = vmul.f32 %v3763_v33, %v3742_v17  ;;  %v9392_v42 = vsub.f32 %v9226_v3, %v3777_v2 }
 0x921   : >> { %v9368_v9 = vsel %vm11386_vm0, %v3765_v56, %v3796_v4  ;;  %4011 = vperm.xlu0 %6490, %v9361_v15   ;;  %v9380_v29 = vsub.f32 %v9210_v35, %v3769_v7  ;;  %v9383_v22 = vsub.f32 %v9214_v45, %v3771_v19 }
 0x922   : >> { %3851 = vperm.xlu2 %6491, %v9368_v9   ;;  %v9374_v55 = vsel %vm11388_vm15, %v3766_v52, %v3798_v54  ;;  %v9389_v59 = vsub.f32 %v9223_v0, %v3775_v1 }
 0x923   : >> { %3856 = vperm.xlu1 %6492, %v9374_v55  }
 0x926   : >> { %v3757_v57 = vpop.permute.xlu1 %3756 }
 0x927   : >> { %v3781_v35 = vmul.f32 %v3766_v52, %v3757_v57 }
 0x929   : >> { %v9397_v45 = vsub.f32 %v9235_v14, %v3781_v35  ;;  %6494 = vset.pattern.permute.xlu0 %v6934_v36 }
 0x92a   : >> { %3986 = vperm.xlu2 %6491, %v9380_v29  }
 0x92b   : >> { %3991 = vperm.xlu1 %6492, %v9383_v22  }
 0x932   : >> { %4001 = vperm.xlu2 %6491, %v9389_v59  }
 0x933   : >> { %4006 = vperm.xlu1 %6492, %v9392_v42  }
 0x93a   : >> { %4016 = vperm.xlu2 %6491, %v9397_v45  }
 0x93b   : >> { %6493 = vset.pattern.permute.xlu1 %v6934_v36 }
 0x942   : >> { %6495 = vset.pattern.permute.xlu2 %v6934_v36 }
 0x94f   : >> { %v9400_v33 = vpop.permute.xlu0 %3821 }
 0x950   : >> { %6725 = vrcp.f32 %v9400_v33  ;;  %v3870_v47 = vand.u32 2147483648, %v9400_v33  ;;  %vm3864_vm11 = vweird.f32 %v9400_v33  ;;  %v3868_v38 = vand.u32 2147483647, %v9400_v33 }
 0x952   : >> { %v3871_v27 = vor.u32 1.1754944e-38, %v3870_v47  ;;  %vm3869_vm9 = vcmp.eq.f32.partialorder %v3868_v38, 8.507059e+37 }
 0x956   : >> { %v6726_v0 = vpop.eup %6725 }
 0x957   : >> { %v3860_v20 = vmul.f32 %v6726_v0, %v9400_v33  ;;  %vm3865_vm13 = vweird.f32 %v6726_v0 }
 0x958   : >> { %vm3866_vm10 = vmor %vm3864_vm11, %vm3865_vm13 }
 0x959   : >> { %v3861_v51 = vsub.f32 1.0, %v3860_v20 }
 0x95b   : >> { %v3862_v43 = vmul.f32 %v6726_v0, %v3861_v51 }
 0x95d   : >> { %v3863_v53 = vadd.f32 %v6726_v0, %v3862_v43 }
 0x95f   : >> { %v3867_v28 = vsel %vm3866_vm10, %v6726_v0, %v3863_v53  ;;  %vm11389_vm10 = vcmp.eq.s32.totalorder %v7094_v13, 12 }
 0x960   : >> { %v3872_v52 = vsel %vm3869_vm9, %v3871_v27, %v3867_v28 }
 0x961   : >> { %v3873_v19 = vmul.f32 %v3872_v52, %v9246_v37 }
 0x963   : >> { %v4019_v20 = vperm.slane %v3873_v19, 4 }
 0x965   : >> { %v4028_v28 = vmul.f32 %v4019_v20, %v9400_v33 }
 0x969   : >> { %v3827_v3 = vpop.permute.xlu2 %3826 }
 0x96a   : >> { %6727 = vrcp.f32 %v3827_v3  ;;  %v3885_v24 = vand.u32 2147483648, %v3827_v3  ;;  %v3883_v60 = vand.u32 2147483647, %v3827_v3  ;;  %vm3879_vm2 = vweird.f32 %v3827_v3 }
 0x96c   : >> { %v3886_v26 = vor.u32 1.1754944e-38, %v3885_v24  ;;  %vm3884_vm14 = vcmp.eq.f32.partialorder %v3883_v60, 8.507059e+37 }
 0x970   : >> { %v6728_v39 = vpop.eup %6727 }
 0x971   : >> { %v3875_v14 = vmul.f32 %v6728_v39, %v3827_v3  ;;  %v9404_v8 = vpop.permute.xlu2 %3836  ;;  %vm3880_vm12 = vweird.f32 %v6728_v39 }
 0x972   : >> { %6729 = vrcp.f32 %v9404_v8  ;;  %vm3881_vm6 = vmor %vm3879_vm2, %vm3880_vm12  ;;  %v3915_v57 = vand.u32 2147483648, %v9404_v8  ;;  %v3913_v35 = vand.u32 2147483647, %v9404_v8  ;;  %vm3909_vm15 = vweird.f32 %v9404_v8 }
 0x973   : >> { %v3876_v12 = vsub.f32 1.0, %v3875_v14 }
 0x974   : >> { %v3916_v53 = vor.u32 1.1754944e-38, %v3915_v57  ;;  %vm3914_vm11 = vcmp.eq.f32.partialorder %v3913_v35, 8.507059e+37 }
 0x975   : >> { %v3877_v56 = vmul.f32 %v6728_v39, %v3876_v12 }
 0x977   : >> { %v3878_v5 = vadd.f32 %v6728_v39, %v3877_v56 }
 0x978   : >> { %v6730_v30 = vpop.eup %6729 }
 0x979   : >> { %v3905_v44 = vmul.f32 %v6730_v30, %v9404_v8  ;;  %v3882_v4 = vsel %vm3881_vm6, %v6728_v39, %v3878_v5  ;;  %vm3910_vm0 = vweird.f32 %v6730_v30 }
 0x97a   : >> { %v9411_v58 = vpop.permute.xlu0 %3846  ;;  %v3887_v54 = vsel %vm3884_vm14, %v3886_v26, %v3882_v4  ;;  %vm3911_vm13 = vmor %vm3909_vm15, %vm3910_vm0 }
 0x97b   : >> { %v3906_v7 = vsub.f32 1.0, %v3905_v44  ;;  %6731 = vrcp.f32 %v9411_v58  ;;  %v3888_v17 = vmul.f32 %v3887_v54, %v9326_v34  ;;  %v3943_v5 = vand.u32 2147483647, %v9411_v58 }
 0x97c   : >> { %v9416_v21 = vpop.permute.xlu2 %3851  ;;  %v3945_v33 = vand.u32 2147483648, %v9411_v58  ;;  %v4044_v54 = vsub.f32 %v9246_v37, %v4028_v28  ;;  %vm3939_vm9 = vweird.f32 %v9411_v58 }
 0x97d   : >> { %v9418_v1 = vperm.slane %v3888_v17, 4  ;;  %v3907_v2 = vmul.f32 %v6730_v30, %v3906_v7  ;;  %6733 = vrcp.f32 %v9416_v21  ;;  %vm3954_vm2 = vweird.f32 %v9416_v21 }
 0x97e   : >> { %v3960_v7 = vand.u32 2147483648, %v9416_v21  ;;  %vm3944_vm0 = vcmp.eq.f32.partialorder %v3943_v5, 8.507059e+37  ;;  %v3946_v37 = vor.u32 1.1754944e-38, %v3945_v33 }
 0x97f   : >> { %v4030_v51 = vmul.f32 %v9418_v1, %v3827_v3  ;;  %v3908_v36 = vadd.f32 %v6730_v30, %v3907_v2 }
 0x980   : >> { %v9423_v0 = vpop.permute.xlu1 %3831 }
 0x981   : >> { %6735 = vrcp.f32 %v9423_v0  ;;  %v6732_v43 = vpop.eup %6731  ;;  %v4046_v39 = vsub.f32 %v9326_v34, %v4030_v51  ;;  %v3912_v14 = vsel %vm3911_vm13, %v6730_v30, %v3908_v36  ;;  %v3900_v35 = vand.u32 2147483648, %v9423_v0  ;;  %vm11390_vm13 = vmmov %vm11389_vm10 }
 0x982   : >> { %v3935_v47 = vmul.f32 %v6732_v43, %v9411_v58  ;;  %v3982_v12 = vpop.permute.xlu0 %3981  ;;  %v3917_v24 = vsel %vm3914_vm11, %v3916_v53, %v3912_v14  ;;  %6737 = vrcp.f32 %v6905_v41  ;;  %vm3940_vm12 = vweird.f32 %v6732_v43 }
 0x983   : >> { %v4027_v38 = vmul.f32 %v4019_v20, %v3982_v12  ;;  %v9433_v3 = vsel %vm11389_vm10, %v9418_v1, %v4046_v39  ;;  %v6734_v56 = vpop.eup %6733  ;;  %v3918_v26 = vmul.f32 %v3917_v24, %v9339_v25  ;;  %vm3941_vm14 = vmor %vm3939_vm9, %vm3940_vm12  ;;  %v3898_v53 = vand.u32 2147483647, %v9423_v0 }
 0x984   : >> { %v3936_v60 = vsub.f32 1.0, %v3935_v47  ;;  %4086 = vperm.xlu0 %6494, %v9433_v3   ;;  %v3950_v34 = vmul.f32 %v6734_v56, %v9416_v21  ;;  %vm3955_vm6 = vweird.f32 %v6734_v56  ;;  %v9460_v47 = vsel %vm11390_vm13, %v4019_v20, %v4044_v54 }
 0x985   : >> { %v9440_v27 = vsub.f32 %v9321_v63, %v4027_v38  ;;  %v3958_v63 = vand.u32 2147483647, %v9416_v21  ;;  %v9452_v57 = vperm.slane %v3918_v26, 4  ;;  %vm3956_vm11 = vmor %vm3954_vm2, %vm3955_vm6  ;;  %v3961_v24 = vor.u32 1.1754944e-38, %v3960_v7 }
 0x986   : >> { %v3937_v52 = vmul.f32 %v6732_v43, %v3936_v60  ;;  %v3951_v44 = vsub.f32 1.0, %v3950_v34  ;;  %vm3894_vm12 = vweird.f32 %v9423_v0  ;;  %v3901_v20 = vor.u32 1.1754944e-38, %v3900_v35  ;;  %vm11391_vm6 = vmmov %vm11390_vm13 }
 0x987   : >> { %v6736_v30 = vpop.eup %6735  ;;  %4241 = vperm.xlu1 %6493, %v9440_v27   ;;  %vm3959_vm10 = vcmp.eq.f32.partialorder %v3958_v63, 8.507059e+37  ;;  %v4034_v60 = vmul.f32 %v9452_v57, %v9404_v8  ;;  %vm3899_vm2 = vcmp.eq.f32.partialorder %v3898_v53, 8.507059e+37  ;;  %vm591_vm13 = vweird.f32 %v6905_v41 }
 0x988   : >> { %v3890_v4 = vmul.f32 %v6736_v30, %v9423_v0  ;;  %v3938_v19 = vadd.f32 %v6732_v43, %v3937_v52  ;;  %v3952_v2 = vmul.f32 %v6734_v56, %v3951_v44  ;;  %v9455_v36 = vpop.eup %6737  ;;  %vm3895_vm15 = vweird.f32 %v6736_v30 }
 0x989   : >> { %vm3896_vm9 = vmor %vm3894_vm12, %vm3895_vm15  ;;  %v587_v63 = vmul.f32 %v6905_v41, %v9455_v36 }
 0x98a   : >> { %v3891_v17 = vsub.f32 1.0, %v3890_v4  ;;  %v3942_v51 = vsel %vm3941_vm14, %v6732_v43, %v3938_v19  ;;  %v3953_v39 = vadd.f32 %v6734_v56, %v3952_v2  ;;  %v4050_v4 = vsub.f32 %v9339_v25, %v4034_v60 }
 0x98b   : >> { %v3947_v12 = vsel %vm3944_vm0, %v3946_v37, %v3942_v51  ;;  %v588_v51 = vsub.f32 1.0, %v587_v63  ;;  %vm11392_vm0 = vmmov %vm11391_vm6 }
 0x98c   : >> { %v3892_v14 = vmul.f32 %v6736_v30, %v3891_v17  ;;  %v9464_v38 = vpop.permute.xlu1 %3841  ;;  %v3957_v43 = vsel %vm3956_vm11, %v6734_v56, %v3953_v39  ;;  %v3948_v34 = vmul.f32 %v3947_v12, %v9292_v6  ;;  %v9492_v25 = vsel %vm11391_vm6, %v9452_v57, %v4050_v4  ;;  %vm11393_vm15 = vmmov %vm11392_vm0 }
 0x98d   : >> { %6739 = vrcp.f32 %v9464_v38  ;;  %v3962_v5 = vsel %vm3959_vm10, %v3961_v24, %v3957_v43  ;;  %vm592_vm11 = vweird.f32 %v9455_v36  ;;  %vm3924_vm10 = vweird.f32 %v9464_v38  ;;  %vm11396_vm6 = vmmov %vm11392_vm0 }
 0x98e   : >> { %v3893_v28 = vadd.f32 %v6736_v30, %v3892_v14  ;;  %v3963_v56 = vmul.f32 %v3962_v5, %v9368_v9  ;;  %v9477_v54 = vperm.slane %v3948_v34, 4  ;;  %v3987_v14 = vpop.permute.xlu2 %3986 }
 0x98f   : >> { %4081 = vperm.xlu1 %6493, %v9460_v47   ;;  %v4029_v60 = vmul.f32 %v9418_v1, %v3987_v14 }
 0x990   : >> { %v3897_v52 = vsel %vm3896_vm9, %v6736_v30, %v3893_v28  ;;  %v9474_v44 = vperm.slane %v3963_v56, 4  ;;  %v4038_v35 = vmul.f32 %v9477_v54, %v9411_v58  ;;  %v597_v28 = vand.u32 2147483648, %v6905_v41 }
 0x991   : >> { %v3902_v26 = vsel %vm3899_vm2, %v3901_v20, %v3897_v52  ;;  %v3997_v20 = vpop.permute.xlu0 %3996  ;;  %v595_v52 = vand.u32 2147483647, %v6905_v41  ;;  %vm9525_vm2 = vmor %vm591_vm13, %vm592_vm11 }
 0x992   : >> { %v3903_v33 = vmul.f32 %v3902_v26, %v9317_v18  ;;  %v4040_v30 = vmul.f32 %v9474_v44, %v9416_v21  ;;  %v4054_v43 = vsub.f32 %v9292_v6, %v4038_v35 }
 0x993   : >> { %v6740_v7 = vpop.eup %6739 }
 0x994   : >> { %v9479_v8 = vperm.slane %v3903_v33, 4  ;;  %v3920_v19 = vmul.f32 %v6740_v7, %v9464_v38  ;;  %v4056_v2 = vsub.f32 %v9368_v9, %v4040_v30  ;;  %vm3925_vm14 = vweird.f32 %v6740_v7 }
 0x995   : >> { %v9496_v39 = vpop.permute.xlu1 %3856  ;;  %v3928_v9 = vand.u32 2147483647, %v9464_v38  ;;  %vm3926_vm12 = vmor %vm3924_vm10, %vm3925_vm14  ;;  %v9532_v1 = vsel %vm11396_vm6, %v9477_v54, %v4054_v43  ;;  %v598_v30 = vor.u32 1.1754944e-38, %v597_v28  ;;  %vm596_vm14 = vcmp.eq.f32.partialorder %v595_v52, 8.507059e+37 }
 0x996   : >> { %v4032_v17 = vmul.f32 %v9479_v8, %v9423_v0  ;;  %v3921_v37 = vsub.f32 1.0, %v3920_v19  ;;  %v3930_v0 = vand.u32 2147483648, %v9464_v38  ;;  %6741 = vrcp.f32 %v9496_v39  ;;  %vm11398_vm10 = vmmov %vm11396_vm6 }
 0x997   : >> { %4096 = vperm.xlu1 %6493, %v9492_v25   ;;  %v9506_v58 = vsel %vm11392_vm0, %v9474_v44, %v4056_v2  ;;  %vm3929_vm9 = vcmp.eq.f32.partialorder %v3928_v9, 8.507059e+37 }
 0x998   : >> { %v4048_v21 = vsub.f32 %v9317_v18, %v4032_v17  ;;  %v3922_v53 = vmul.f32 %v6740_v7, %v3921_v37  ;;  %v589_v18 = vmul.f32 %v9455_v36, %v588_v51  ;;  %4111 = vperm.xlu0 %6494, %v9506_v58   ;;  %v3931_v34 = vor.u32 1.1754944e-38, %v3930_v0  ;;  %v4002_v51 = vpop.permute.xlu2 %4001 }
 0x999   : >> { %v4033_v17 = vmul.f32 %v9452_v57, %v3997_v20  ;;  %v3973_v37 = vand.u32 2147483647, %v9496_v39 }
 0x99a   : >> { %v9511_v12 = vsel %vm11393_vm15, %v9479_v8, %v4048_v21  ;;  %v3923_v24 = vadd.f32 %v6740_v7, %v3922_v53  ;;  %v590_v5 = vadd.f32 %v9455_v36, %v589_v18  ;;  %v3975_v21 = vand.u32 2147483648, %v9496_v39 }
 0x99b   : >> { %4091 = vperm.xlu2 %6495, %v9511_v12   ;;  %vm3969_vm15 = vweird.f32 %v9496_v39  ;;  %vm3974_vm11 = vcmp.eq.f32.partialorder %v3973_v37, 8.507059e+37 }
 0x99c   : >> { %v3927_v6 = vsel %vm3926_vm12, %v6740_v7, %v3923_v24  ;;  %v6742_v26 = vpop.eup %6741  ;;  %v9538_v7 = vsub.f32 %v9380_v29, %v4029_v60  ;;  %v594_v19 = vsel %vm9525_vm2, %v9455_v36, %v590_v5  ;;  %v9551_v36 = vsub.f32 %v9342_v16, %v4033_v17  ;;  %v4012_v24 = vpop.permute.xlu0 %4011  ;;  %vm11400_vm12 = vmmov %vm11396_vm6 }
 0x99d   : >> { %v3932_v33 = vsel %vm3929_vm9, %v3931_v34, %v3927_v6  ;;  %v3965_v63 = vmul.f32 %v6742_v26, %v9496_v39  ;;  %vm3970_vm0 = vweird.f32 %v6742_v26  ;;  %v9548_v0 = vsel %vm596_vm14, %v598_v30, %v594_v19  ;;  %v3992_v53 = vpop.permute.xlu1 %3991 }
 0x99e   : >> { %v3933_v4 = vmul.f32 %v3932_v33, %v9355_v49  ;;  %11397 = vst [vmem:[#allocation34_spill] sm:$0xff] %v9548_v0  ;;  %vm3971_vm13 = vmor %vm3969_vm15, %vm3970_vm0  ;;  %v3976_v28 = vor.u32 1.1754944e-38, %v3975_v21  ;;  %v4031_v34 = vmul.f32 %v9479_v8, %v3992_v53 }
 0x99f   : >> { %4106 = vperm.xlu1 %6493, %v9532_v1   ;;  %v3966_v35 = vsub.f32 1.0, %v3965_v63 }
 0x9a0   : >> { %v4023_v2 = vperm.slane %v3933_v4, 4  ;;  %4246 = vperm.xlu0 %6494, %v9538_v7   ;;  %v4017_v52 = vpop.permute.xlu2 %4016 }
 0x9a1   : >> { %v3967_v29 = vmul.f32 %v6742_v26, %v3966_v35 }
 0x9a2   : >> { %v4035_v14 = vmul.f32 %v4023_v2, %v4002_v51  ;;  %v4036_v9 = vmul.f32 %v4023_v2, %v9464_v38  ;;  %v600_v38 = vmul.f32 %v6901_v46, %v9548_v0 }
 0x9a3   : >> { %v3968_v57 = vadd.f32 %v6742_v26, %v3967_v29 }
 0x9a4   : >> { %v4052_v18 = vsub.f32 %v9355_v49, %v4036_v9  ;;  %v9556_v43 = vsub.f32 %v9389_v59, %v4035_v14  ;;  %v4039_v49 = vmul.f32 %v9474_v44, %v4012_v24  ;;  %6743 = vrcp.f32 %v600_v38 }
 0x9a5   : >> { %v3972_v60 = vsel %vm3971_vm13, %v6742_v26, %v3968_v57  ;;  %v9575_v26 = vsub.f32 %v9383_v22, %v4031_v34  ;;  %v4007_v44 = vpop.permute.xlu1 %4006 }
 0x9a6   : >> { %v9563_v16 = vsel %vm11398_vm10, %v4023_v2, %v4052_v18  ;;  %v3977_v20 = vsel %vm3974_vm11, %v3976_v28, %v3972_v60  ;;  %v9572_v6 = vsub.f32 %v9361_v15, %v4039_v49  ;;  %v4037_v8 = vmul.f32 %v9477_v54, %v4007_v44 }
 0x9a7   : >> { %4256 = vperm.xlu1 %6493, %v9551_v36   ;;  %4101 = vperm.xlu2 %6495, %v9563_v16   ;;  %v3978_v59 = vmul.f32 %v3977_v20, %v9374_v55 }
 0x9a8   : >> { %4261 = vperm.xlu0 %6494, %v9556_v43   ;;  %v9589_v22 = vsub.f32 %v9392_v42, %v4037_v8 }
 0x9a9   : >> { %v4026_v5 = vperm.slane %v3978_v59, 4 }
 0x9aa   : >> { %v9581_v4 = vpop.eup %6743 }
 0x9ab   : >> { %v4041_v56 = vmul.f32 %v4026_v5, %v4017_v52  ;;  %11399 = vst [vmem:[#allocation35_spill] sm:$0xff] %v9581_v4  ;;  %v4882_v15 = vmul.f32 %v6901_v46, %v9581_v4 }
 0x9ad   : >> { %v9578_v33 = vsub.f32 %v9397_v45, %v4041_v56  ;;  %v4042_v45 = vmul.f32 %v4026_v5, %v9496_v39  ;;  %v6935_v39 = vmov 14  }
 0x9af   : >> { %4271 = vperm.xlu1 %6493, %v9572_v6   ;;  %4251 = vperm.xlu2 %6495, %v9575_v26   ;;  %v4058_v63 = vsub.f32 %v9374_v55, %v4042_v45 }
 0x9b0   : >> { %4276 = vperm.xlu0 %6494, %v9578_v33  }
 0x9b1   : >> { %v9597_v30 = vsel %vm11400_vm12, %v4026_v5, %v4058_v63 }
 0x9b7   : >> { %4884 = vrot.lane.b32.xlu1 %v4882_v15, %s6918_s13  ;;  %4266 = vperm.xlu2 %6495, %v9589_v22   ;;  %s6244_s13 = sshll.u32 (%p469_p11), %s6240_s25, 4  ;;  %s6245_s13 = int_to_ptr.hbm [resolvable:$true] %s6244_s13 }
 0x9b8   : >> { %6498 = vset.pattern.permute.xlu0 %v6935_v39  ;;  %6497 = vset.pattern.permute.xlu1 %v6935_v39 }
 0x9bf   : >> { %4116 = vperm.xlu2 %6495, %v9597_v30  }
 0x9c7   : >> { %6496 = vset.pattern.permute.xlu2 %v6935_v39 }
 0x9f5   : >> { %v9600_v54 = vpop.permute.xlu2 %4091 }
 0x9f6   : >> { %6745 = vrcp.f32 %v9600_v54  ;;  %v9603_v42 = vpop.permute.xlu0 %4086  ;;  %v4160_v14 = vand.u32 2147483648, %v9600_v54  ;;  %v4158_v9 = vand.u32 2147483647, %v9600_v54  ;;  %vm4154_vm2 = vweird.f32 %v9600_v54 }
 0x9f7   : >> { %6747 = vrcp.f32 %v9603_v42  ;;  %v4145_v60 = vand.u32 2147483648, %v9603_v42  ;;  %vm4139_vm15 = vweird.f32 %v9603_v42  ;;  %v4143_v49 = vand.u32 2147483647, %v9603_v42 }
 0x9f8   : >> { %v4161_v24 = vor.u32 1.1754944e-38, %v4160_v14  ;;  %vm4159_vm0 = vcmp.eq.f32.partialorder %v4158_v9, 8.507059e+37 }
 0x9f9   : >> { %v9606_v19 = vpop.permute.xlu1 %4241  ;;  %v4146_v15 = vor.u32 1.1754944e-38, %v4145_v60  ;;  %vm4144_vm11 = vcmp.eq.f32.partialorder %v4143_v49, 8.507059e+37 }
 0x9fc   : >> { %v6746_v55 = vpop.eup %6745 }
 0x9fd   : >> { %v4150_v17 = vmul.f32 %v6746_v55, %v9600_v54  ;;  %v6748_v2 = vpop.eup %6747  ;;  %vm4155_vm9 = vweird.f32 %v6746_v55 }
 0x9fe   : >> { %v4135_v35 = vmul.f32 %v6748_v2, %v9603_v42  ;;  %vm4156_vm6 = vmor %vm4154_vm2, %vm4155_vm9  ;;  %vm4140_vm14 = vweird.f32 %v6748_v2 }
 0x9ff   : >> { %v4151_v51 = vsub.f32 1.0, %v4150_v17  ;;  %vm4141_vm13 = vmor %vm4139_vm15, %vm4140_vm14 }
 0xa00   : >> { %v4136_v37 = vsub.f32 1.0, %v4135_v35 }
 0xa01   : >> { %v4152_v21 = vmul.f32 %v6746_v55, %v4151_v51  ;;  %v9611_v29 = vpop.permute.xlu1 %4081  ;;  %v9614_v57 = vpop.permute.xlu2 %4101 }
 0xa02   : >> { %6749 = vrcp.f32 %v9611_v29  ;;  %v4137_v18 = vmul.f32 %v6748_v2, %v4136_v37  ;;  %v4130_v51 = vand.u32 2147483648, %v9611_v29  ;;  %vm4124_vm12 = vweird.f32 %v9611_v29 }
 0xa03   : >> { %6751 = vrcp.f32 %v9614_v57  ;;  %v4153_v53 = vadd.f32 %v6746_v55, %v4152_v21 }
 0xa04   : >> { %v4138_v38 = vadd.f32 %v6748_v2, %v4137_v18  ;;  %v4188_v18 = vand.u32 2147483647, %v9614_v57 }
 0xa05   : >> { %v4157_v28 = vsel %vm4156_vm6, %v6746_v55, %v4153_v53  ;;  %vm4184_vm6 = vweird.f32 %v9614_v57 }
 0xa06   : >> { %v4162_v20 = vsel %vm4159_vm0, %v4161_v24, %v4157_v28  ;;  %v4142_v5 = vsel %vm4141_vm13, %v6748_v2, %v4138_v38  ;;  %v4128_v2 = vand.u32 2147483647, %v9611_v29  ;;  %v4190_v24 = vand.u32 2147483648, %v9614_v57 }
 0xa07   : >> { %v4163_v59 = vmul.f32 %v4162_v20, %v9511_v12  ;;  %v4147_v17 = vsel %vm4144_vm11, %v4146_v15, %v4142_v5  ;;  %v4131_v20 = vor.u32 1.1754944e-38, %v4130_v51  ;;  %vm4189_vm15 = vcmp.eq.f32.partialorder %v4188_v18, 8.507059e+37 }
 0xa08   : >> { %v6750_v34 = vpop.eup %6749  ;;  %v4148_v9 = vmul.f32 %v4147_v17, %v9433_v3  ;;  %vm4129_vm14 = vcmp.eq.f32.partialorder %v4128_v2, 8.507059e+37 }
 0xa09   : >> { %v6752_v52 = vpop.eup %6751  ;;  %v4120_v56 = vmul.f32 %v6750_v34, %v9611_v29  ;;  %v9624_v44 = vperm.slane %v4163_v59, 5  ;;  %v9626_v8 = vpop.permute.xlu1 %4096  ;;  %vm4125_vm10 = vweird.f32 %v6750_v34 }
 0xa0a   : >> { %v4180_v45 = vmul.f32 %v6752_v52, %v9614_v57  ;;  %v4252_v63 = vpop.permute.xlu2 %4251  ;;  %6753 = vrcp.f32 %v9626_v8  ;;  %v9633_v37 = vpop.permute.xlu0 %4111  ;;  %vm4185_vm9 = vweird.f32 %v6752_v52  ;;  %vm9644_vm2 = vmor %vm4124_vm12, %vm4125_vm10  ;;  %v4173_v17 = vand.u32 2147483647, %v9626_v8 }
 0xa0b   : >> { %v4121_v39 = vsub.f32 1.0, %v4120_v56  ;;  %v4291_v55 = vmul.f32 %v9624_v44, %v4252_v63  ;;  %6755 = vrcp.f32 %v9633_v37  ;;  %v9654_v56 = vperm.slane %v4148_v9, 5  ;;  %vm4186_vm0 = vmor %vm4184_vm6, %vm4185_vm9 }
 0xa0c   : >> { %v4181_v35 = vsub.f32 1.0, %v4180_v45  ;;  %v4191_v45 = vor.u32 1.1754944e-38, %v4190_v24  ;;  %vm4169_vm11 = vweird.f32 %v9626_v8  ;;  %vm4174_vm10 = vcmp.eq.f32.partialorder %v4173_v17, 8.507059e+37 }
 0xa0d   : >> { %v4122_v21 = vmul.f32 %v6750_v34, %v4121_v39  ;;  %v9637_v14 = vsub.f32 %v9575_v26, %v4291_v55 }
 0xa0e   : >> { %v4182_v53 = vmul.f32 %v6752_v52, %v4181_v35 }
 0xa0f   : >> { %v4123_v28 = vadd.f32 %v6750_v34, %v4122_v21  ;;  %4511 = vperm.xlu0 %6498, %v9637_v14  }
 0xa10   : >> { %v6754_v38 = vpop.eup %6753  ;;  %v4183_v26 = vadd.f32 %v6752_v52, %v4182_v53 }
 0xa11   : >> { %v4165_v49 = vmul.f32 %v6754_v38, %v9626_v8  ;;  %v9650_v59 = vpop.permute.xlu1 %4106  ;;  %v4127_v5 = vsel %vm9644_vm2, %v6750_v34, %v4123_v28  ;;  %v6756_v63 = vpop.eup %6755  ;;  %v4175_v34 = vand.u32 2147483648, %v9626_v8  ;;  %vm4170_vm13 = vweird.f32 %v6754_v38 }
 0xa12   : >> { %v9656_v15 = vpop.permute.xlu2 %4266  ;;  %6757 = vrcp.f32 %v9650_v59  ;;  %v4187_v55 = vsel %vm4186_vm0, %v6752_v52, %v4183_v26  ;;  %v4132_v35 = vsel %vm4129_vm14, %v4131_v20, %v4127_v5  ;;  %v4210_v2 = vmul.f32 %v6756_v63, %v9633_v37  ;;  %v4247_v51 = vpop.permute.xlu0 %4246  ;;  %vm4171_vm12 = vmor %vm4169_vm11, %vm4170_vm13 }
 0xa13   : >> { %v4166_v39 = vsub.f32 1.0, %v4165_v49  ;;  %v4192_v21 = vsel %vm4189_vm15, %v4191_v45, %v4187_v55  ;;  %v4289_v9 = vmul.f32 %v9654_v56, %v4247_v51  ;;  %v4133_v28 = vmul.f32 %v4132_v35, %v9460_v47 }
 0xa14   : >> { %v4211_v18 = vsub.f32 1.0, %v4210_v2  ;;  %v4193_v24 = vmul.f32 %v4192_v21, %v9563_v16  ;;  %v4218_v52 = vand.u32 2147483647, %v9633_v37  ;;  %v4176_v5 = vor.u32 1.1754944e-38, %v4175_v34 }
 0xa15   : >> { %v4167_v53 = vmul.f32 %v6754_v38, %v4166_v39  ;;  %v9668_v60 = vsub.f32 %v9538_v7, %v4289_v9  ;;  %v9670_v20 = vperm.slane %v4133_v28, 5  ;;  %vm4215_vm9 = vweird.f32 %v6756_v63 }
 0xa16   : >> { %v4212_v45 = vmul.f32 %v6756_v63, %v4211_v18  ;;  %v4220_v39 = vand.u32 2147483648, %v9633_v37  ;;  %vm4214_vm2 = vweird.f32 %v9633_v37  ;;  %v9678_v17 = vperm.slane %v4193_v24, 5 }
 0xa17   : >> { %v4168_v26 = vadd.f32 %v6754_v38, %v4167_v53  ;;  %4506 = vperm.xlu1 %6497, %v9668_v60   ;;  %v4287_v7 = vmul.f32 %v9670_v20, %v9606_v19  ;;  %vm9682_vm6 = vcmp.eq.f32.partialorder %v4218_v52, 8.507059e+37  ;;  %vm4216_vm14 = vmor %vm4214_vm2, %vm4215_vm9  ;;  %v4203_v28 = vand.u32 2147483647, %v9650_v59 }
 0xa18   : >> { %v6758_v49 = vpop.eup %6757  ;;  %v4213_v34 = vadd.f32 %v6756_v63, %v4212_v45  ;;  %v4205_v18 = vand.u32 2147483648, %v9650_v59  ;;  %v4221_v52 = vor.u32 1.1754944e-38, %v4220_v39  ;;  %vm4199_vm15 = vweird.f32 %v9650_v59 }
 0xa19   : >> { %v4195_v55 = vmul.f32 %v6758_v49, %v9650_v59  ;;  %v4172_v35 = vsel %vm4171_vm12, %v6754_v38, %v4168_v26  ;;  %v4257_v21 = vpop.permute.xlu1 %4256  ;;  %v9689_v19 = vsub.f32 %v9440_v27, %v4287_v7  ;;  %vm4200_vm0 = vweird.f32 %v6758_v49 }
 0xa1a   : >> { %v9680_v2 = vpop.permute.xlu2 %4116  ;;  %v4177_v51 = vsel %vm4174_vm10, %v4176_v5, %v4172_v35  ;;  %v4262_v24 = vpop.permute.xlu0 %4261  ;;  %v4217_v26 = vsel %vm4216_vm14, %v6756_v63, %v4213_v34  ;;  %vm4201_vm13 = vmor %vm4199_vm15, %vm4200_vm0  ;;  %v4206_v39 = vor.u32 1.1754944e-38, %v4205_v18  ;;  %vm4204_vm11 = vcmp.eq.f32.partialorder %v4203_v28, 8.507059e+37 }
 0xa1b   : >> { %v4196_v53 = vsub.f32 1.0, %v4195_v55  ;;  %6759 = vrcp.f32 %v9680_v2  ;;  %v4178_v38 = vmul.f32 %v4177_v51, %v9492_v25  ;;  %v4295_v45 = vmul.f32 %v9678_v17, %v4262_v24  ;;  %4501 = vperm.xlu2 %6496, %v9689_v19  }
 0xa1c   : >> { %v4222_v27 = vsel %vm9682_vm6, %v4221_v52, %v4217_v26  ;;  %vm4229_vm12 = vweird.f32 %v9680_v2  ;;  %vm11405_vm6 = vcmp.eq.s32.totalorder %v7094_v13, 13 }
 0xa1d   : >> { %v4197_v5 = vmul.f32 %v6758_v49, %v4196_v53  ;;  %v9695_v55 = vperm.slane %v4178_v38, 5  ;;  %v9702_v7 = vsub.f32 %v9556_v43, %v4295_v45  ;;  %v4223_v9 = vmul.f32 %v4222_v27, %v9506_v58  ;;  %vm11406_vm14 = vmmov %vm11405_vm6 }
 0xa1e   : >> { %vm11408_vm0 = vmmov %vm11405_vm6 }
 0xa1f   : >> { %v4198_v35 = vadd.f32 %v6758_v49, %v4197_v5  ;;  %v4293_v63 = vmul.f32 %v9695_v55, %v4257_v21  ;;  %4521 = vperm.xlu1 %6497, %v9702_v7   ;;  %v4235_v21 = vand.u32 2147483648, %v9680_v2  ;;  %v9713_v18 = vperm.slane %v4223_v9, 5  ;;  %vm11409_vm15 = vmmov %vm11408_vm0 }
 0xa20   : >> { %v4233_v5 = vand.u32 2147483647, %v9680_v2  ;;  %v4292_v9 = vmul.f32 %v9624_v44, %v9600_v54 }
 0xa21   : >> { %v6760_v51 = vpop.eup %6759  ;;  %v9706_v34 = vsub.f32 %v9551_v36, %v4293_v63  ;;  %v4202_v53 = vsel %vm4201_vm13, %v6758_v49, %v4198_v35  ;;  %v4272_v52 = vpop.permute.xlu1 %4271  ;;  %v4236_v35 = vor.u32 1.1754944e-38, %v4235_v21  ;;  %vm11410_vm13 = vmmov %vm11408_vm0 }
 0xa22   : >> { %v4225_v38 = vmul.f32 %v6760_v51, %v9680_v2  ;;  %v4207_v24 = vsel %vm4204_vm11, %v4206_v39, %v4202_v53  ;;  %vm4230_vm10 = vweird.f32 %v6760_v51  ;;  %v4299_v49 = vmul.f32 %v9713_v18, %v4272_v52  ;;  %vm11411_vm11 = vmmov %vm11408_vm0 }
 0xa23   : >> { %v4208_v43 = vmul.f32 %v4207_v24, %v9532_v1  ;;  %4516 = vperm.xlu2 %6496, %v9706_v34   ;;  %vm4231_vm9 = vmor %vm4229_vm12, %vm4230_vm10  ;;  %vm4234_vm2 = vcmp.eq.f32.partialorder %v4233_v5, 8.507059e+37  ;;  %v4288_v24 = vmul.f32 %v9670_v20, %v9611_v29  ;;  %v4290_v29 = vmul.f32 %v9654_v56, %v9603_v42 }
 0xa24   : >> { %v4226_v26 = vsub.f32 1.0, %v4225_v38  ;;  %v9726_v38 = vsub.f32 %v9572_v6, %v4299_v49  ;;  %vm11412_vm10 = vmmov %vm11408_vm0 }
 0xa25   : >> { %v4284_v36 = vperm.slane %v4208_v43, 5  ;;  %v4277_v43 = vpop.permute.xlu0 %4276  ;;  %v4304_v54 = vsub.f32 %v9460_v47, %v4288_v24  ;;  %vm11413_vm12 = vmmov %vm11408_vm0 }
 0xa26   : >> { %v4227_v28 = vmul.f32 %v6760_v51, %v4226_v26 }
 0xa27   : >> { %v4297_v45 = vmul.f32 %v4284_v36, %v9656_v15  ;;  %v9751_v47 = vsel %vm11406_vm14, %v9670_v20, %v4304_v54 }
 0xa28   : >> { %v4228_v27 = vadd.f32 %v6760_v51, %v4227_v28  ;;  %v9758_v28 = vpop.f32.mrf.mxu2 }
 0xa29   : >> { %v9721_v63 = vsub.f32 %v9589_v22, %v4297_v45  ;;  %11407 = vst [vmem:[#allocation36_spill] sm:$0xff] %v9758_v28 }
 0xa2a   : >> { %v4232_v39 = vsel %vm4231_vm9, %v6760_v51, %v4228_v27  ;;  %v4308_v51 = vsub.f32 %v9511_v12, %v4292_v9  ;;  %v4294_v12 = vmul.f32 %v9695_v55, %v9626_v8 }
 0xa2b   : >> { %v4237_v53 = vsel %vm4234_vm2, %v4236_v35, %v4232_v39  ;;  %4526 = vperm.xlu0 %6498, %v9721_v63   ;;  %4531 = vperm.xlu2 %6496, %v9726_v38  }
 0xa2c   : >> { %v4238_v15 = vmul.f32 %v4237_v53, %v9597_v30  ;;  %v9741_v6 = vsel %vm11405_vm6, %v9624_v44, %v4308_v51  ;;  %v4310_v42 = vsub.f32 %v9492_v25, %v4294_v12 }
 0xa2e   : >> { %v4286_v22 = vperm.slane %v4238_v15, 5  ;;  %v9778_v25 = vsel %vm11410_vm13, %v9695_v55, %v4310_v42 }
 0xa30   : >> { %v4301_v26 = vmul.f32 %v4286_v22, %v4277_v43  ;;  %v4302_v21 = vmul.f32 %v4286_v22, %v9680_v2  ;;  %v4306_v2 = vsub.f32 %v9433_v3, %v4290_v29  ;;  %v4296_v3 = vmul.f32 %v9678_v17, %v9614_v57 }
 0xa32   : >> { %v9736_v52 = vsub.f32 %v9578_v33, %v4301_v26  ;;  %v4885_v33 = vpop.permute.xlu1 %4884  ;;  %v4318_v44 = vsub.f32 %v9597_v30, %v4302_v21  ;;  %v9769_v8 = vsel %vm11409_vm15, %v9654_v56, %v4306_v2  ;;  %v4298_v30 = vmul.f32 %v4284_v36, %v9650_v59 }
 0xa33   : >> { %4351 = vperm.xlu0 %6498, %v9741_v6   ;;  %4341 = vperm.xlu2 %6496, %v9751_v47   ;;  %v4887_v5 = vadd.f32 %v4885_v33, %v9758_v28  ;;  %v4312_v56 = vsub.f32 %v9563_v16, %v4296_v3  ;;  %v6937_v26 = vmov 15  }
 0xa34   : >> { %4536 = vperm.xlu1 %6497, %v9736_v52   ;;  %v9764_v20 = vsel %vm11408_vm0, %v4286_v22, %v4318_v44  ;;  %v4314_v45 = vsub.f32 %v9532_v1, %v4298_v30 }
 0xa35   : >> { %v9782_v49 = vsub.f32 %v4887_v5, %v7372_v23  ;;  %v9791_v27 = vsel %vm11411_vm11, %v9678_v17, %v4312_v56  ;;  %v4300_v23 = vmul.f32 %v9713_v18, %v9633_v37 }
 0xa36   : >> { %v9799_v16 = vsel %vm11412_vm10, %v4284_v36, %v4314_v45 }
 0xa37   : >> { %v4897_v57 = vperm.slane %v9782_v49, 0  ;;  %v4892_v1 = vrot.slane %v9782_v49, 3  ;;  %v4316_v59 = vsub.f32 %v9506_v58, %v4300_v23  ;;  %v4890_v17 = vrot.slane %v9782_v49, 1 }
 0xa38   : >> { %v4891_v36 = vrot.slane %v9782_v49, 2  ;;  %v4893_v39 = vrot.slane %v9782_v49, 4 }
 0xa39   : >> { %v4900_v55 = vperm.slane %v4892_v1, 0  ;;  %v9808_v35 = vsel %vm11413_vm12, %v9713_v18, %v4316_v59  ;;  %v4898_v37 = vperm.slane %v4890_v17, 0  ;;  %v4894_v18 = vrot.slane %v9782_v49, 5 }
 0xa3a   : >> { %v4899_v58 = vperm.slane %v4891_v36, 0  ;;  %v4901_v9 = vperm.slane %v4893_v39, 0 }
 0xa3b   : >> { %4376 = vperm.xlu0 %6498, %v9764_v20   ;;  %4356 = vperm.xlu2 %6496, %v9778_v25   ;;  %v4902_v53 = vperm.slane %v4894_v18, 0 }
 0xa3c   : >> { %4346 = vperm.xlu1 %6497, %v9769_v8  }
 0xa43   : >> { %4905 = vrot.lane.b32.xlu0 %v4897_v57, %s6936_s20  ;;  %4366 = vperm.xlu2 %6496, %v9799_v16  }
 0xa44   : >> { %4361 = vperm.xlu1 %6497, %v9791_v27   ;;  %6499 = vset.pattern.permute.xlu0 %v6937_v26 }
 0xa4b   : >> { %4911 = vrot.lane.b32.xlu0 %v4900_v55, %s6936_s20  ;;  %4907 = vrot.lane.b32.xlu2 %v4898_v37, %s6936_s20 }
 0xa4c   : >> { %4371 = vperm.xlu1 %6497, %v9808_v35   ;;  %6500 = vset.pattern.permute.xlu2 %v6937_v26 }
 0xa53   : >> { %4913 = vrot.lane.b32.xlu2 %v4901_v9, %s6936_s20 }
 0xa54   : >> { %4909 = vrot.lane.b32.xlu1 %v4899_v58, %s6936_s20 }
 0xa55   : >> { %6501 = vset.pattern.permute.xlu1 %v6937_v26 }
 0xa5c   : >> { %4915 = vrot.lane.b32.xlu1 %v4902_v53, %s6936_s20 }
 0xa75   : >> { %v4502_v15 = vpop.permute.xlu2 %4501 }
 0xa7d   : >> { %v4517_v24 = vpop.permute.xlu2 %4516 }
 0xa81   : >> { %v9826_v54 = vpop.permute.xlu0 %4511 }
 0xa85   : >> { %v9819_v22 = vpop.permute.xlu2 %4531 }
 0xa89   : >> { %v9824_v43 = vpop.permute.xlu1 %4506 }
 0xa8d   : >> { %v9821_v51 = vpop.permute.xlu2 %4341 }
 0xa8e   : >> { %6761 = vrcp.f32 %v9821_v51  ;;  %v4390_v2 = vand.u32 2147483648, %v9821_v51  ;;  %v4388_v42 = vand.u32 2147483647, %v9821_v51  ;;  %vm4384_vm2 = vweird.f32 %v9821_v51 }
 0xa90   : >> { %v4391_v45 = vor.u32 1.1754944e-38, %v4390_v2  ;;  %vm4389_vm14 = vcmp.eq.f32.partialorder %v4388_v42, 8.507059e+37 }
 0xa91   : >> { %v9837_v56 = vpop.permute.xlu1 %4521 }
 0xa94   : >> { %v6762_v21 = vpop.eup %6761 }
 0xa95   : >> { %v4380_v29 = vmul.f32 %v6762_v21, %v9821_v51  ;;  %v9829_v12 = vpop.permute.xlu2 %4356  ;;  %vm4385_vm9 = vweird.f32 %v6762_v21 }
 0xa96   : >> { %6763 = vrcp.f32 %v9829_v12  ;;  %vm4386_vm6 = vmor %vm4384_vm2, %vm4385_vm9  ;;  %v4435_v55 = vand.u32 2147483648, %v9829_v12  ;;  %v4433_v39 = vand.u32 2147483647, %v9829_v12  ;;  %vm4429_vm15 = vweird.f32 %v9829_v12 }
 0xa97   : >> { %v4381_v33 = vsub.f32 1.0, %v4380_v29 }
 0xa98   : >> { %v4436_v26 = vor.u32 1.1754944e-38, %v4435_v55  ;;  %vm4434_vm11 = vcmp.eq.f32.partialorder %v4433_v39, 8.507059e+37 }
 0xa99   : >> { %v4382_v44 = vmul.f32 %v6762_v21, %v4381_v33 }
 0xa9b   : >> { %v4383_v5 = vadd.f32 %v6762_v21, %v4382_v44 }
 0xa9c   : >> { %v6764_v30 = vpop.eup %6763 }
 0xa9d   : >> { %v9835_v3 = vpop.permute.xlu0 %4526  ;;  %v4425_v57 = vmul.f32 %v6764_v30, %v9829_v12  ;;  %v9840_v23 = vpop.permute.xlu2 %4366  ;;  %v4387_v1 = vsel %vm4386_vm6, %v6762_v21, %v4383_v5  ;;  %vm4430_vm0 = vweird.f32 %v6764_v30 }
 0xa9e   : >> { %6765 = vrcp.f32 %v9840_v23  ;;  %v4392_v17 = vsel %vm4389_vm14, %v4391_v45, %v4387_v1  ;;  %vm4431_vm13 = vmor %vm4429_vm15, %vm4430_vm0  ;;  %vm4459_vm9 = vweird.f32 %v9840_v23 }
 0xa9f   : >> { %v4426_v59 = vsub.f32 1.0, %v4425_v57  ;;  %v4393_v37 = vmul.f32 %v4392_v17, %v9751_v47 }
 0xaa1   : >> { %v4427_v36 = vmul.f32 %v6764_v30, %v4426_v59  ;;  %v9846_v58 = vperm.slane %v4393_v37, 6 }
 0xaa3   : >> { %v4428_v9 = vadd.f32 %v6764_v30, %v4427_v36  ;;  %v4547_v33 = vmul.f32 %v9846_v58, %v4502_v15 }
 0xaa4   : >> { %v6766_v53 = vpop.eup %6765 }
 0xaa5   : >> { %v9849_v18 = vpop.permute.xlu0 %4351  ;;  %v4455_v29 = vmul.f32 %v6766_v53, %v9840_v23  ;;  %v4432_v44 = vsel %vm4431_vm13, %v6764_v30, %v4428_v9  ;;  %v9857_v5 = vsub.f32 %v9689_v19, %v4547_v33  ;;  %vm4460_vm10 = vweird.f32 %v6766_v53 }
 0xaa6   : >> { %v9851_v21 = vpop.permute.xlu1 %4536  ;;  %6767 = vrcp.f32 %v9849_v18  ;;  %v4437_v2 = vsel %vm4434_vm11, %v4436_v26, %v4432_v44  ;;  %v4420_v36 = vand.u32 2147483648, %v9849_v18  ;;  %v4465_v9 = vand.u32 2147483648, %v9840_v23  ;;  %vm9879_vm2 = vmor %vm4459_vm9, %vm4460_vm10 }
 0xaa7   : >> { %v4456_v42 = vsub.f32 1.0, %v4455_v29  ;;  %v4438_v45 = vmul.f32 %v4437_v2, %v9778_v25  ;;  %4761 = vperm.xlu0 %6499, %v9857_v5   ;;  %v4463_v29 = vand.u32 2147483647, %v9840_v23  ;;  %vm4414_vm6 = vweird.f32 %v9849_v18 }
 0xaa8   : >> { %v4421_v2 = vor.u32 1.1754944e-38, %v4420_v36 }
 0xaa9   : >> { %v9861_v57 = vperm.slane %v4438_v45, 6  ;;  %v4457_v59 = vmul.f32 %v6766_v53, %v4456_v42  ;;  %vm4464_vm15 = vcmp.eq.f32.partialorder %v4463_v29, 8.507059e+37 }
 0xaab   : >> { %v4553_v15 = vmul.f32 %v9861_v57, %v4517_v24  ;;  %v4458_v37 = vadd.f32 %v6766_v53, %v4457_v59  ;;  %v4418_v24 = vand.u32 2147483647, %v9849_v18  ;;  %v4466_v59 = vor.u32 1.1754944e-38, %v4465_v9 }
 0xaac   : >> { %v6768_v1 = vpop.eup %6767 }
 0xaad   : >> { %v4410_v17 = vmul.f32 %v6768_v1, %v9849_v18  ;;  %v9864_v55 = vpop.permute.xlu0 %4376  ;;  %v9873_v39 = vsub.f32 %v9706_v34, %v4553_v15  ;;  %vm4415_vm12 = vweird.f32 %v6768_v1  ;;  %v4462_v42 = vsel %vm9879_vm2, %v6766_v53, %v4458_v37 }
 0xaae   : >> { %v9867_v30 = vpop.permute.xlu1 %4346  ;;  %6769 = vrcp.f32 %v9864_v55  ;;  %vm4416_vm14 = vmor %vm4414_vm6, %vm4415_vm12  ;;  %vm4419_vm0 = vcmp.eq.f32.partialorder %v4418_v24, 8.507059e+37  ;;  %v4467_v32 = vsel %vm4464_vm15, %v4466_v59, %v4462_v42  ;;  %vm4489_vm6 = vweird.f32 %v9864_v55 }
 0xaaf   : >> { %v4411_v19 = vsub.f32 1.0, %v4410_v17  ;;  %6771 = vrcp.f32 %v9867_v30  ;;  %4776 = vperm.xlu0 %6499, %v9873_v39   ;;  %v4405_v53 = vand.u32 2147483648, %v9867_v30  ;;  %v4403_v29 = vand.u32 2147483647, %v9867_v30 }
 0xab0   : >> { %vm4399_vm11 = vweird.f32 %v9867_v30 }
 0xab1   : >> { %v4412_v26 = vmul.f32 %v6768_v1, %v4411_v19  ;;  %vm4404_vm12 = vcmp.eq.f32.partialorder %v4403_v29, 8.507059e+37 }
 0xab3   : >> { %v4413_v44 = vadd.f32 %v6768_v1, %v4412_v26 }
 0xab4   : >> { %v9885_v34 = vpop.eup %6769 }
 0xab5   : >> { %v6772_v45 = vpop.eup %6771  ;;  %v4485_v17 = vmul.f32 %v9885_v34, %v9864_v55  ;;  %v4417_v15 = vsel %vm4416_vm14, %v6768_v1, %v4413_v44  ;;  %v4468_v1 = vmul.f32 %v4467_v32, %v9799_v16  ;;  %vm4490_vm9 = vweird.f32 %v9885_v34 }
 0xab6   : >> { %v4395_v19 = vmul.f32 %v6772_v45, %v9867_v30  ;;  %v9892_v26 = vpop.permute.xlu1 %4361  ;;  %v4422_v31 = vsel %vm4419_vm0, %v4421_v2, %v4417_v15  ;;  %vm4400_vm13 = vweird.f32 %v6772_v45  ;;  %vm9927_vm14 = vmor %vm4489_vm6, %vm4490_vm9  ;;  %vm11418_vm6 = vcmp.eq.s32.totalorder %v7094_v13, 14 }
 0xab7   : >> { %6773 = vrcp.f32 %v9892_v26  ;;  %v4423_v33 = vmul.f32 %v4422_v31, %v9741_v6  ;;  %v4486_v37 = vsub.f32 1.0, %v4485_v17  ;;  %vm4401_vm10 = vmor %vm4399_vm11, %vm4400_vm13  ;;  %v4406_v31 = vor.u32 1.1754944e-38, %v4405_v53 }
 0xab8   : >> { %v4396_v36 = vsub.f32 1.0, %v4395_v19  ;;  %vm4444_vm0 = vweird.f32 %v9892_v26 }
 0xab9   : >> { %v9897_v24 = vperm.slane %v4423_v33, 6  ;;  %v4487_v59 = vmul.f32 %v9885_v34, %v4486_v37 }
 0xaba   : >> { %v4397_v9 = vmul.f32 %v6772_v45, %v4396_v36  ;;  %v9911_v36 = vperm.slane %v4468_v1, 6  ;;  %v4448_v1 = vand.u32 2147483647, %v9892_v26 }
 0xabb   : >> { %v4551_v2 = vmul.f32 %v9897_v24, %v9826_v54  ;;  %v4495_v54 = vand.u32 2147483648, %v9864_v55  ;;  %v4488_v37 = vadd.f32 %v9885_v34, %v4487_v59 }
 0xabc   : >> { %v4398_v44 = vadd.f32 %v6772_v45, %v4397_v9  ;;  %v4450_v9 = vand.u32 2147483648, %v9892_v26  ;;  %v4557_v29 = vmul.f32 %v9911_v36, %v9835_v3  ;;  %vm4449_vm13 = vcmp.eq.f32.partialorder %v4448_v1, 8.507059e+37 }
 0xabd   : >> { %v6774_v42 = vpop.eup %6773  ;;  %v9909_v19 = vsub.f32 %v9637_v14, %v4551_v2 }
 0xabe   : >> { %v4440_v17 = vmul.f32 %v6774_v42, %v9892_v26  ;;  %v9906_v15 = vpop.permute.xlu1 %4371  ;;  %v4402_v32 = vsel %vm4401_vm10, %v6772_v45, %v4398_v44  ;;  %vm4445_vm2 = vweird.f32 %v6774_v42  ;;  %v4493_v44 = vand.u32 2147483647, %v9864_v55 }
 0xabf   : >> { %6775 = vrcp.f32 %v9906_v15  ;;  %4771 = vperm.xlu1 %6501, %v9909_v19   ;;  %v4407_v53 = vsel %vm4404_vm12, %v4406_v31, %v4402_v32  ;;  %v4496_v32 = vor.u32 1.1754944e-38, %v4495_v54  ;;  %vm4446_vm15 = vmor %vm4444_vm0, %vm4445_vm2  ;;  %v9939_v50 = vsub.f32 %v9721_v63, %v4557_v29 }
 0xac0   : >> { %v4441_v33 = vsub.f32 1.0, %v4440_v17  ;;  %v4408_v14 = vmul.f32 %v4407_v53, %v9769_v8  ;;  %v4492_v53 = vsel %vm9927_vm14, %v9885_v34, %v4488_v37  ;;  %vm4494_vm11 = vcmp.eq.f32.partialorder %v4493_v44, 8.507059e+37  ;;  %vm11419_vm14 = vmmov %vm11418_vm6 }
 0xac1   : >> { %v4497_v37 = vsel %vm4494_vm11, %v4496_v32, %v4492_v53  ;;  %v4480_v1 = vand.u32 2147483648, %v9906_v15  ;;  %vm4474_vm12 = vweird.f32 %v9906_v15  ;;  %vm11420_vm0 = vmmov %vm11418_vm6 }
 0xac2   : >> { %v4442_v45 = vmul.f32 %v6774_v42, %v4441_v33  ;;  %v9925_v2 = vperm.slane %v4408_v14, 6  ;;  %v4451_v33 = vor.u32 1.1754944e-38, %v4450_v9  ;;  %v4552_v9 = vmul.f32 %v9897_v24, %v9849_v18  ;;  %vm11423_vm11 = vmmov %vm11420_vm0 }
 0xac3   : >> { %v4498_v44 = vmul.f32 %v4497_v37, %v9764_v20 }
 0xac4   : >> { %v4443_v59 = vadd.f32 %v6774_v42, %v4442_v45  ;;  %v4549_v3 = vmul.f32 %v9925_v2, %v9824_v43  ;;  %v4568_v29 = vsub.f32 %v9741_v6, %v4552_v9 }
 0xac5   : >> { %v6776_v17 = vpop.eup %6775  ;;  %v4546_v6 = vperm.slane %v4498_v44, 6 }
 0xac6   : >> { %v4470_v14 = vmul.f32 %v6776_v17, %v9906_v15  ;;  %v4447_v45 = vsel %vm4446_vm15, %v6774_v42, %v4443_v59  ;;  %v9942_v40 = vsub.f32 %v9668_v60, %v4549_v3  ;;  %vm4475_vm10 = vweird.f32 %v6776_v17  ;;  %vm11421_vm15 = vmmov %vm11420_vm0 }
 0xac7   : >> { %v4452_v54 = vsel %vm4449_vm13, %v4451_v33, %v4447_v45  ;;  %4786 = vperm.xlu1 %6501, %v9939_v50   ;;  %v4478_v42 = vand.u32 2147483647, %v9906_v15  ;;  %vm4476_vm9 = vmor %vm4474_vm12, %vm4475_vm10  ;;  %v4481_v59 = vor.u32 1.1754944e-38, %v4480_v1  ;;  %v9961_v3 = vsel %vm11418_vm6, %v9897_v24, %v4568_v29 }
 0xac8   : >> { %v4471_v43 = vsub.f32 1.0, %v4470_v14  ;;  %v4453_v34 = vmul.f32 %v4452_v54, %v9791_v27  ;;  %4766 = vperm.xlu2 %6500, %v9942_v40   ;;  %vm11422_vm13 = vmmov %vm11420_vm0 }
 0xac9   : >> { %vm4479_vm2 = vcmp.eq.f32.partialorder %v4478_v42, 8.507059e+37  ;;  %vm11424_vm10 = vmmov %vm11420_vm0  ;;  %v10046_v42 = vpop.permute.xlu0 %4905 }
 0xaca   : >> { %v4472_v63 = vmul.f32 %v6776_v17, %v4471_v43  ;;  %v4543_v60 = vperm.slane %v4453_v34, 6  ;;  %v4548_v43 = vmul.f32 %v9846_v58, %v9821_v51  ;;  %v4562_v34 = vmul.f32 %v4546_v6, %v9864_v55  ;;  %vm11425_vm12 = vmmov %vm11420_vm0 }
 0xacb   : >> { %v4558_v55 = vmul.f32 %v9911_v36, %v9840_v23 }
 0xacc   : >> { %v4473_v18 = vadd.f32 %v6776_v17, %v4472_v63  ;;  %v4555_v31 = vmul.f32 %v4543_v60, %v9837_v56  ;;  %v4556_v14 = vmul.f32 %v4543_v60, %v9892_v26  ;;  %v10044_v63 = vpop.permute.xlu1 %4909 }
 0xace   : >> { %v9956_v32 = vsub.f32 %v9702_v7, %v4555_v31  ;;  %v4477_v33 = vsel %vm4476_vm9, %v6776_v17, %v4473_v18  ;;  %v4561_v7 = vmul.f32 %v4546_v6, %v9851_v21  ;;  %v4572_v17 = vsub.f32 %v9791_v27, %v4556_v14 }
 0xacf   : >> { %v4482_v53 = vsel %vm4479_vm2, %v4481_v59, %v4477_v33  ;;  %4611 = vperm.xlu1 %6501, %v9961_v3   ;;  %v4578_v27 = vsub.f32 %v9764_v20, %v4562_v34  ;;  %v4554_v20 = vmul.f32 %v9861_v57, %v9829_v12 }
 0xad0   : >> { %v4483_v56 = vmul.f32 %v4482_v53, %v9808_v35  ;;  %4781 = vperm.xlu2 %6500, %v9956_v32   ;;  %v9974_v9 = vsub.f32 %v9736_v52, %v4561_v7  ;;  %v9978_v26 = vsel %vm11419_vm14, %v4543_v60, %v4572_v17  ;;  %v4564_v52 = vsub.f32 %v9751_v47, %v4548_v43 }
 0xad1   : >> { %v9998_v21 = vsel %vm11421_vm15, %v4546_v6, %v4578_v27  ;;  %v10052_v29 = vpop.permute.xlu0 %4911 }
 0xad2   : >> { %v4545_v45 = vperm.slane %v4483_v56, 6  ;;  %v9994_v51 = vsel %vm11420_vm0, %v9846_v58, %v4564_v52  ;;  %v4570_v58 = vsub.f32 %v9778_v25, %v4554_v20  ;;  %v4896_v25 = vrot.slane %v9782_v49, 7 }
 0xad4   : >> { %v4559_v54 = vmul.f32 %v4545_v45, %v9819_v22  ;;  %v10048_v60 = vpop.permute.xlu1 %4915 }
 0xad6   : >> { %v9971_v24 = vsub.f32 %v9726_v38, %v4559_v54  ;;  %v4550_v38 = vmul.f32 %v9925_v2, %v9867_v30  ;;  %v10022_v30 = vsel %vm11424_vm10, %v9861_v57, %v4570_v58 }
 0xad7   : >> { %4621 = vperm.xlu1 %6501, %v9978_v26  }
 0xad8   : >> { %4791 = vperm.xlu0 %6499, %v9971_v24   ;;  %4796 = vperm.xlu2 %6500, %v9974_v9   ;;  %v4566_v22 = vsub.f32 %v9769_v8, %v4550_v38  ;;  %v4574_v8 = vsub.f32 %v9799_v16, %v4558_v55  ;;  %v4895_v16 = vrot.slane %v9782_v49, 6  ;;  %v10040_v49 = vpop.permute.xlu2 %4907 }
 0xad9   : >> { %11426 = vst [vmem:[#allocation37_spill] sm:$0xff] %v10040_v49 }
 0xada   : >> { %v10005_v47 = vsel %vm11422_vm13, %v9925_v2, %v4566_v22  ;;  %v10017_v23 = vsel %vm11423_vm11, %v9911_v36, %v4574_v8  ;;  %v4903_v12 = vperm.slane %v4895_v16, 0  ;;  %v4904_v2 = vperm.slane %v4896_v25, 0 }
 0xadb   : >> { %v4560_v36 = vmul.f32 %v4545_v45, %v9906_v15 }
 0xadd   : >> { %v4576_v57 = vsub.f32 %v9808_v35, %v4560_v36 }
 0xadf   : >> { %4636 = vperm.xlu1 %6501, %v9998_v21   ;;  %v10036_v37 = vsel %vm11425_vm12, %v4545_v45, %v4576_v57 }
 0xae0   : >> { %4601 = vperm.xlu0 %6499, %v9994_v51   ;;  %4606 = vperm.xlu2 %6500, %v10005_v47   ;;  %v10042_v1 = vpop.permute.xlu2 %4913 }
 0xae7   : >> { %6503 = vset.pattern.permute.xlu1 %v7094_v13 }
 0xae8   : >> { %4626 = vperm.xlu0 %6499, %v10017_v23   ;;  %4616 = vperm.xlu2 %6500, %v10022_v30  }
 0xaf0   : >> { %4917 = vrot.lane.b32.xlu0 %v4903_v12, %s6936_s20  ;;  %4919 = vrot.lane.b32.xlu2 %v4904_v2, %s6936_s20 }
 0xaf1   : >> { %6502 = vset.pattern.permute.xlu0 %v11260_v10 }
 0xaf8   : >> { %4631 = vperm.xlu2 %6500, %v10036_v37  }
 0xb00   : >> { %6504 = vset.pattern.permute.xlu2 %v11260_v10 }
 0xb19   : >> { %v10058_v31 = vpop.permute.xlu0 %4761 }
 0xb21   : >> { %v10065_v53 = vpop.permute.xlu0 %4776 }
 0xb22   : >> { %v4767_v15 = vpop.permute.xlu2 %4766 }
 0xb2a   : >> { %v10050_v35 = vpop.permute.xlu2 %4781 }
 0xb31   : >> { %v10054_v44 = vpop.permute.xlu1 %4771 }
 0xb32   : >> { %v10056_v18 = vpop.permute.xlu2 %4796 }
 0xb39   : >> { %v10060_v59 = vpop.permute.xlu1 %4786 }
 0xb3a   : >> { %v10062_v33 = vpop.permute.xlu2 %4606 }
 0xb3b   : >> { %6777 = vrcp.f32 %v10062_v33  ;;  %v4665_v54 = vand.u32 2147483648, %v10062_v33  ;;  %v4663_v43 = vand.u32 2147483647, %v10062_v33  ;;  %vm4659_vm2 = vweird.f32 %v10062_v33 }
 0xb3d   : >> { %v4666_v8 = vor.u32 1.1754944e-38, %v4665_v54  ;;  %vm4664_vm14 = vcmp.eq.f32.partialorder %v4663_v43, 8.507059e+37 }
 0xb41   : >> { %v6778_v6 = vpop.eup %6777  ;;  %v10067_v14 = vpop.permute.xlu1 %4611 }
 0xb42   : >> { %v4655_v56 = vmul.f32 %v6778_v6, %v10062_v33  ;;  %v10070_v45 = vpop.permute.xlu2 %4616  ;;  %6779 = vrcp.f32 %v10067_v14  ;;  %vm4660_vm9 = vweird.f32 %v6778_v6  ;;  %vm4674_vm15 = vweird.f32 %v10067_v14 }
 0xb43   : >> { %6781 = vrcp.f32 %v10070_v45  ;;  %vm4661_vm6 = vmor %vm4659_vm2, %vm4660_vm9  ;;  %vm4689_vm13 = vweird.f32 %v10070_v45 }
 0xb44   : >> { %v4656_v7 = vsub.f32 1.0, %v4655_v56 }
 0xb46   : >> { %v4657_v17 = vmul.f32 %v6778_v6, %v4656_v7  ;;  %v4678_v7 = vand.u32 2147483647, %v10067_v14 }
 0xb48   : >> { %v6780_v34 = vpop.eup %6779  ;;  %v4658_v38 = vadd.f32 %v6778_v6, %v4657_v17  ;;  %vm4679_vm10 = vcmp.eq.f32.partialorder %v4678_v7, 8.507059e+37 }
 0xb49   : >> { %v10077_v52 = vpop.eup %6781  ;;  %v4670_v27 = vmul.f32 %v6780_v34, %v10067_v14  ;;  %v10082_v55 = vpop.permute.xlu1 %4621  ;;  %vm4675_vm0 = vweird.f32 %v6780_v34 }
 0xb4a   : >> { %v10080_v22 = vpop.permute.xlu0 %4791  ;;  %11427 = vst [vmem:[#allocation38_spill] sm:$0xff] %v10082_v55  ;;  %v4662_v20 = vsel %vm4661_vm6, %v6778_v6, %v4658_v38  ;;  %v4685_v58 = vmul.f32 %v10077_v52, %v10070_v45  ;;  %v10086_v16 = vpop.permute.xlu2 %4919  ;;  %6783 = vrcp.f32 %v10082_v55  ;;  %v4680_v6 = vand.u32 2147483648, %v10067_v14  ;;  %vm10099_vm11 = vmor %vm4674_vm15, %vm4675_vm0 }
 0xb4b   : >> { %v4671_v25 = vsub.f32 1.0, %v4670_v27  ;;  %v4667_v12 = vsel %vm4664_vm14, %v4666_v8, %v4662_v20  ;;  %vm4690_vm12 = vweird.f32 %v10077_v52  ;;  %v4710_v28 = vand.u32 2147483648, %v10082_v55 }
 0xb4c   : >> { %v4686_v2 = vsub.f32 1.0, %v4685_v58  ;;  %v4668_v57 = vmul.f32 %v4667_v12, %v10005_v47  ;;  %v4695_v12 = vand.u32 2147483648, %v10070_v45  ;;  %vm4704_vm2 = vweird.f32 %v10082_v55  ;;  %vm10142_vm14 = vmor %vm4689_vm13, %vm4690_vm12 }
 0xb4d   : >> { %v4672_v36 = vmul.f32 %v6780_v34, %v4671_v25  ;;  %v4693_v25 = vand.u32 2147483647, %v10070_v45 }
 0xb4e   : >> { %v10092_v17 = vperm.slane %v4668_v57, 7  ;;  %v4687_v43 = vmul.f32 %v10077_v52, %v4686_v2  ;;  %v4681_v57 = vor.u32 1.1754944e-38, %v4680_v6 }
 0xb4f   : >> { %v4673_v56 = vadd.f32 %v6780_v34, %v4672_v36  ;;  %vm10127_vm9 = vcmp.eq.f32.partialorder %v4693_v25, 8.507059e+37 }
 0xb50   : >> { %v10094_v54 = vpop.eup %6783  ;;  %v4809_v58 = vmul.f32 %v10092_v17, %v4767_v15  ;;  %v4708_v15 = vand.u32 2147483647, %v10082_v55  ;;  %v4688_v38 = vadd.f32 %v10077_v52, %v4687_v43 }
 0xb51   : >> { %v4700_v27 = vmul.f32 %v10094_v54, %v10082_v55  ;;  %v10107_v8 = vpop.permute.xlu1 %4636  ;;  %v4677_v2 = vsel %vm10099_vm11, %v6780_v34, %v4673_v56  ;;  %vm4705_vm6 = vweird.f32 %v10094_v54 }
 0xb52   : >> { %v10105_v20 = vpop.permute.xlu0 %4601  ;;  %v10115_v36 = vpop.permute.xlu2 %4631  ;;  %v10125_v56 = vsub.f32 %v9942_v40, %v4809_v58  ;;  %v4682_v7 = vsel %vm4679_vm10, %v4681_v57, %v4677_v2  ;;  %vm10146_vm0 = vcmp.eq.f32.partialorder %v4708_v15, 8.507059e+37  ;;  %v4753_v2 = vand.u32 2147483647, %v10107_v8  ;;  %vm10168_vm15 = vmor %vm4704_vm2, %vm4705_vm6 }
 0xb53   : >> { %6785 = vrcp.f32 %v10105_v20  ;;  %v4701_v48 = vsub.f32 1.0, %v4700_v27  ;;  %v4696_v27 = vor.u32 1.1754944e-38, %v4695_v12  ;;  %v4683_v0 = vmul.f32 %v4682_v7, %v9961_v3 }
 0xb54   : >> { %6787 = vrcp.f32 %v10115_v36  ;;  %11430 = vst [vmem:[#allocation39_spill] sm:$0xff] %v10125_v56  ;;  %v4648_v43 = vand.u32 2147483647, %v10105_v20  ;;  %v4650_v12 = vand.u32 2147483648, %v10105_v20  ;;  %v4692_v7 = vsel %vm10142_vm14, %v10077_v52, %v4688_v38 }
 0xb55   : >> { %6789 = vrcp.f32 %v10107_v8  ;;  %v4702_v34 = vmul.f32 %v10094_v54, %v4701_v48  ;;  %v4931_v48 = vmul.f32 %v10040_v49, %v10125_v56  ;;  %v10152_v57 = vperm.slane %v4683_v0, 7 }
 0xb56   : >> { %v4711_v56 = vor.u32 1.1754944e-38, %v4710_v28  ;;  %v4755_v15 = vand.u32 2147483648, %v10107_v8  ;;  %vm4644_vm13 = vweird.f32 %v10105_v20  ;;  %vm4749_vm11 = vweird.f32 %v10107_v8 }
 0xb57   : >> { %v4703_v62 = vadd.f32 %v10094_v54, %v4702_v34  ;;  %4965 = vrot.lane.b32.xlu2 %v4931_v48, %s6936_s20  ;;  %vm10180_vm10 = vcmp.eq.f32.partialorder %v4648_v43, 8.507059e+37  ;;  %v4651_v10 = vor.u32 1.1754944e-38, %v4650_v12  ;;  %vm10185_vm12 = vcmp.eq.f32.partialorder %v4753_v2, 8.507059e+37 }
 0xb58   : >> { %v4811_v49 = vmul.f32 %v10152_v57, %v10054_v44  ;;  %v4697_v12 = vsel %vm10127_vm9, %v4696_v27, %v4692_v7  ;;  %v4740_v25 = vand.u32 2147483648, %v10115_v36 }
 0xb59   : >> { %v6786_v40 = vpop.eup %6785  ;;  %v4707_v52 = vsel %vm10168_vm15, %v10094_v54, %v4703_v62  ;;  %v4756_v62 = vor.u32 1.1754944e-38, %v4755_v15  ;;  %vm4734_vm15 = vweird.f32 %v10115_v36  ;;  %v4698_v15 = vmul.f32 %v4697_v12, %v10022_v30 }
 0xb5a   : >> { %v10154_v34 = vpop.eup %6787  ;;  %v4640_v61 = vmul.f32 %v6786_v40, %v10105_v20  ;;  %v10162_v41 = vpop.permute.xlu0 %4626  ;;  %vm4645_vm2 = vweird.f32 %v6786_v40  ;;  %v4712_v43 = vsel %vm10146_vm0, %v4711_v56, %v4707_v52 }
 0xb5b   : >> { %v6790_v4 = vpop.eup %6789  ;;  %v4730_v28 = vmul.f32 %v10154_v34, %v10115_v36  ;;  %6791 = vrcp.f32 %v10162_v41  ;;  %v4713_v44 = vmul.f32 %v4712_v43, %v9978_v26  ;;  %vm4646_vm14 = vmor %vm4644_vm13, %vm4645_vm2  ;;  %vm4735_vm3 = vweird.f32 %v10154_v34 }
 0xb5c   : >> { %v4641_v38 = vsub.f32 1.0, %v4640_v61  ;;  %v4745_v58 = vmul.f32 %v6790_v4, %v10107_v8  ;;  %v10192_v61 = vsub.f32 %v9909_v19, %v4811_v49  ;;  %vm4750_vm6 = vweird.f32 %v6790_v4  ;;  %vm10225_vm13 = vmor %vm4734_vm15, %vm4735_vm3 }
 0xb5d   : >> { %v4731_v46 = vsub.f32 1.0, %v4730_v28  ;;  %vm4751_vm9 = vmor %vm4749_vm11, %vm4750_vm6  ;;  %v10215_v7 = vperm.slane %v4713_v44, 7  ;;  %v4741_v44 = vor.u32 1.1754944e-38, %v4740_v25  ;;  %vm4719_vm3 = vweird.f32 %v10162_v41 }
 0xb5e   : >> { %v4642_v55 = vmul.f32 %v6786_v40, %v4641_v38  ;;  %v4746_v0 = vsub.f32 1.0, %v4745_v58  ;;  %v4933_v19 = vmul.f32 %v10044_v63, %v10192_v61  ;;  %vm11445_vm2 = vcmp.eq.s32.totalorder %v7094_v13, 15 }
 0xb5f   : >> { %v4732_v54 = vmul.f32 %v10154_v34, %v4731_v46  ;;  %v4738_v46 = vand.u32 2147483647, %v10115_v36  ;;  %vm11446_vm6 = vmmov %vm11445_vm2 }
 0xb60   : >> { %v4643_v2 = vadd.f32 %v6786_v40, %v4642_v55  ;;  %v4747_v28 = vmul.f32 %v6790_v4, %v4746_v0  ;;  %4969 = vrot.lane.b32.xlu0 %v4933_v19, %s6936_s20  ;;  %v4723_v0 = vand.u32 2147483647, %v10162_v41  ;;  %vm11448_vm15 = vmmov %vm11445_vm2 }
 0xb61   : >> { %v6792_v38 = vpop.eup %6791  ;;  %v4733_v6 = vadd.f32 %v10154_v34, %v4732_v54  ;;  %v4815_v54 = vmul.f32 %v10215_v7, %v10050_v35  ;;  %vm4739_vm11 = vcmp.eq.f32.partialorder %v4738_v46, 8.507059e+37 }
 0xb62   : >> { %v4647_v49 = vsel %vm4646_vm14, %v6786_v40, %v4643_v2  ;;  %v4748_v56 = vadd.f32 %v6790_v4, %v4747_v28  ;;  %v4715_v55 = vmul.f32 %v6792_v38, %v10162_v41  ;;  %vm4720_vm0 = vweird.f32 %v6792_v38  ;;  %vm11447_vm14 = vmmov %vm11445_vm2 }
 0xb63   : >> { %v4652_v27 = vsel %vm10180_vm10, %v4651_v10, %v4647_v49  ;;  %v4725_v10 = vand.u32 2147483648, %v10162_v41  ;;  %v4737_v2 = vsel %vm10225_vm13, %v10154_v34, %v4733_v6  ;;  %v10238_v19 = vsub.f32 %v9956_v32, %v4815_v54  ;;  %vm4721_vm10 = vmor %vm4719_vm3, %vm4720_vm0 }
 0xb64   : >> { %v4653_v40 = vmul.f32 %v4652_v27, %v9994_v51  ;;  %v4752_v52 = vsel %vm4751_vm9, %v6790_v4, %v4748_v56  ;;  %v4716_v58 = vsub.f32 1.0, %v4715_v55  ;;  %v4802_v49 = vperm.slane %v4698_v15, 7  ;;  %vm11449_vm9 = vmmov %vm11445_vm2 }
 0xb65   : >> { %v4757_v4 = vsel %vm10185_vm12, %v4756_v62, %v4752_v52  ;;  %v4726_v62 = vor.u32 1.1754944e-38, %v4725_v10  ;;  %v4742_v55 = vsel %vm4739_vm11, %v4741_v44, %v4737_v2  ;;  %v4937_v34 = vmul.f32 %v10042_v1, %v10238_v19  ;;  %v4918_v2 = vpop.permute.xlu0 %4917  ;;  %v11451_v44 = vld [vmem:[#allocation37_spill] sm:$0xff]  ;;  %vm11452_vm0 = vmmov %vm11445_vm2 }
 0xb66   : >> { %v4799_v43 = vperm.slane %v4653_v40, 7  ;;  %v4717_v12 = vmul.f32 %v6792_v38, %v4716_v58  ;;  %v4758_v28 = vmul.f32 %v4757_v4, %v9998_v21  ;;  %vm4724_vm12 = vcmp.eq.f32.partialorder %v4723_v0, 8.507059e+37  ;;  %vm11453_vm13 = vmmov %vm11452_vm0 }
 0xb67   : >> { %4977 = vrot.lane.b32.xlu2 %v4937_v34, %s6936_s20  ;;  %v4743_v15 = vmul.f32 %v4742_v55, %v10036_v37  ;;  %vm11454_vm11 = vmmov %vm11452_vm0 }
 0xb68   : >> { %v4718_v56 = vadd.f32 %v6792_v38, %v4717_v12  ;;  %v4807_v11 = vmul.f32 %v4799_v43, %v10058_v31  ;;  %v10242_v35 = vperm.slane %v4758_v28, 7  ;;  %v4813_v31 = vmul.f32 %v4802_v49, %v10065_v53 }
 0xb69   : >> { %v4805_v53 = vperm.slane %v4743_v15, 7  ;;  %v4808_v10 = vmul.f32 %v4799_v43, %v10105_v20  ;;  %v4810_v20 = vmul.f32 %v10092_v17, %v10062_v33 }
 0xb6a   : >> { %v4722_v46 = vsel %vm4721_vm10, %v6792_v38, %v4718_v56  ;;  %v10248_v32 = vsub.f32 %v9857_v5, %v4807_v11  ;;  %v4821_v6 = vmul.f32 %v10242_v35, %v10056_v18  ;;  %v4812_v18 = vmul.f32 %v10152_v57, %v10067_v14 }
 0xb6b   : >> { %v4727_v27 = vsel %vm4724_vm12, %v4726_v62, %v4722_v46  ;;  %v10268_v0 = vsub.f32 %v9873_v39, %v4813_v31  ;;  %v4819_v14 = vmul.f32 %v4805_v53, %v10080_v22  ;;  %v4824_v39 = vsub.f32 %v9994_v51, %v4808_v10 }
 0xb6c   : >> { %v4728_v25 = vmul.f32 %v4727_v27, %v10017_v23  ;;  %v4929_v40 = vmul.f32 %v10046_v42, %v10248_v32  ;;  %v10259_v38 = vsub.f32 %v9974_v9, %v4821_v6  ;;  %v4828_v48 = vsub.f32 %v9961_v3, %v4812_v18 }
 0xb6d   : >> { %v10291_v3 = vsub.f32 %v9971_v24, %v4819_v14  ;;  %v10297_v51 = vsel %vm11446_vm6, %v4799_v43, %v4824_v39  ;;  %v4826_v43 = vsub.f32 %v10005_v47, %v4810_v20 }
 0xb6e   : >> { %v4804_v5 = vperm.slane %v4728_v25, 7  ;;  %4961 = vrot.lane.b32.xlu1 %v4929_v40, %s6936_s20  ;;  %v4943_v52 = vmul.f32 %v10086_v16, %v10259_v38 }
 0xb6f   : >> { %v4941_v24 = vmul.f32 %v4918_v2, %v10291_v3  ;;  %v10325_v47 = vsel %vm11449_vm9, %v10092_v17, %v4826_v43 }
 0xb70   : >> { %v4817_v58 = vmul.f32 %v4804_v5, %v10060_v59  ;;  %4989 = vrot.lane.b32.xlu2 %v4943_v52, %s6936_s20  ;;  %v4935_v59 = vmul.f32 %v10052_v29, %v10268_v0  ;;  %v4818_v4 = vmul.f32 %v4804_v5, %v10162_v41  ;;  %v4814_v41 = vmul.f32 %v4802_v49, %v10070_v45 }
 0xb72   : >> { %v10272_v9 = vsub.f32 %v9939_v50, %v4817_v58  ;;  %v10288_v50 = vsel %vm11445_vm2, %v10152_v57, %v4828_v48  ;;  %v4834_v12 = vsub.f32 %v10017_v23, %v4818_v4  ;;  %v4930_v57 = vmul.f32 %v10046_v42, %v10297_v51 }
 0xb73   : >> { %v4934_v22 = vmul.f32 %v10044_v63, %v10288_v50  ;;  %v4830_v63 = vsub.f32 %v10022_v30, %v4814_v41  ;;  %v4820_v23 = vmul.f32 %v4805_v53, %v10115_v36  ;;  %v11450_v30 = vld [vmem:[#allocation38_spill] sm:$0xff] }
 0xb74   : >> { %v4939_v54 = vmul.f32 %v10048_v60, %v10272_v9  ;;  %v10313_v33 = vsel %vm11447_vm14, %v4804_v5, %v4834_v12  ;;  %v4816_v28 = vmul.f32 %v10215_v7, %v11450_v30  ;;  %vm11217_vm14 = vcmask 130112  }
 0xb75   : >> { %v4940_v45 = vmul.f32 %v10048_v60, %v10313_v33  ;;  %v10320_v42 = vsel %vm11448_vm15, %v4802_v49, %v4830_v63  ;;  %v4932_v60 = vmul.f32 %v11451_v44, %v10325_v47  ;;  %v4836_v56 = vsub.f32 %v10036_v37, %v4820_v23 }
 0xb76   : >> { %4981 = vrot.lane.b32.xlu0 %v4939_v54, %s6936_s20  ;;  %4973 = vrot.lane.b32.xlu1 %v4935_v59, %s6936_s20  ;;  %v4936_v36 = vmul.f32 %v10052_v29, %v10320_v42  ;;  %v4832_v49 = vsub.f32 %v9978_v26, %v4816_v28  ;;  %v4822_v29 = vmul.f32 %v10242_v35, %v10107_v8 }
 0xb77   : >> { %v10340_v17 = vsel %vm11452_vm0, %v4805_v53, %v4836_v56  ;;  %vm11209_vm0 = vcmask 1041409  }
 0xb78   : >> { %4971 = vrot.lane.b32.xlu2 %v4934_v22, %s6936_s20  ;;  %v10345_v11 = vsel %vm11453_vm13, %v10215_v7, %v4832_v49  ;;  %v4942_v37 = vmul.f32 %v4918_v2, %v10340_v17  ;;  %v4838_v62 = vsub.f32 %v9998_v21, %v4822_v29 }
 0xb79   : >> { %v4938_v26 = vmul.f32 %v10042_v1, %v10345_v11 }
 0xb7a   : >> { %v10358_v55 = vsel %vm11454_vm11, %v10242_v35, %v4838_v62 }
 0xb7b   : >> { %v4944_v7 = vmul.f32 %v10086_v16, %v10358_v55 }
 0xb7e   : >> { %4963 = vrot.lane.b32.xlu0 %v4930_v57, %s6936_s20  ;;  %4985 = vrot.lane.b32.xlu1 %v4941_v24, %s6936_s20 }
 0xb80   : >> { %4983 = vrot.lane.b32.xlu2 %v4940_v45, %s6936_s20 }
 0xb86   : >> { %4975 = vrot.lane.b32.xlu0 %v4936_v36, %s6936_s20  ;;  %4967 = vrot.lane.b32.xlu1 %v4932_v60, %s6936_s20 }
 0xb8e   : >> { %4987 = vrot.lane.b32.xlu0 %v4942_v37, %s6936_s20  ;;  %4979 = vrot.lane.b32.xlu1 %v4938_v26, %s6936_s20 }
 0xb96   : >> { %4991 = vrot.lane.b32.xlu1 %v4944_v7, %s6936_s20 }
 0xbb1   : >> { %v4966_v8 = vpop.permute.xlu2 %4965 }
 0xbb2   : >> { %v5015_v34 = vsel %vm399_vm8, %v4966_v8, 0.0 }
 0xbc0   : >> { %5016 = vadd.xlane.f32.xlu1 %v5015_v34 }
 0xbc1   : >> { %v4978_v1 = vpop.permute.xlu2 %4977 }
 0xbc2   : >> { %v5033_v21 = vsel %vm399_vm8, %v4978_v1, 0.0 }
 0xbc8   : >> { %5034 = vadd.xlane.f32.xlu1 %v5033_v21 }
 0xbca   : >> { %v4990_v46 = vpop.permute.xlu2 %4989 }
 0xbcb   : >> { %v5051_v6 = vsel %vm399_vm8, %v4990_v46, 0.0 }
 0xbd0   : >> { %5052 = vadd.xlane.f32.xlu1 %v5051_v6  ;;  %v11455_v6 = vld [vmem:[#allocation15_spill] sm:$0xff] }
 0xbd2   : >> { %v4972_v27 = vpop.permute.xlu2 %4971  ;;  %v4970_v25 = vpop.permute.xlu0 %4969 }
 0xbd3   : >> { %v5024_v35 = vsel %vm399_vm8, %v4972_v27, 0.0  ;;  %v5021_v52 = vsel %vm399_vm8, %v4970_v25, 0.0  ;;  %v10407_v27 = vadd.s32 4294967288, %v11455_v6 }
 0xbd8   : >> { %5025 = vadd.xlane.f32.xlu1 %v5024_v35 }
 0xbda   : >> { %v4984_v31 = vpop.permute.xlu2 %4983 }
 0xbdb   : >> { %v5042_v16 = vsel %vm399_vm8, %v4984_v31, 0.0 }
 0xbe0   : >> { %v4962_v15 = vpop.permute.xlu1 %4961  ;;  %5043 = vadd.xlane.f32.xlu1 %v5042_v16 }
 0xbe1   : >> { %v5009_v40 = vsel %vm399_vm8, %v4962_v15, 0.0 }
 0xbe2   : >> { %5010 = vadd.xlane.f32.xlu0 %v5009_v40 }
 0xbe8   : >> { %v4982_v5 = vpop.permute.xlu0 %4981  ;;  %v4974_v18 = vpop.permute.xlu1 %4973 }
 0xbe9   : >> { %v5027_v53 = vsel %vm399_vm8, %v4974_v18, 0.0  ;;  %v5039_v48 = vsel %vm399_vm8, %v4982_v5, 0.0 }
 0xbea   : >> { %5028 = vadd.xlane.f32.xlu2 %v5027_v53  ;;  %5022 = vadd.xlane.f32.xlu0 %v5021_v52 }
 0xbf0   : >> { %v4964_v58 = vpop.permute.xlu0 %4963  ;;  %v4986_v10 = vpop.permute.xlu1 %4985 }
 0xbf1   : >> { %v5045_v14 = vsel %vm399_vm8, %v4986_v10, 0.0  ;;  %v5012_v59 = vsel %vm399_vm8, %v4964_v58, 0.0 }
 0xbf2   : >> { %5040 = vadd.xlane.f32.xlu0 %v5039_v48  ;;  %5046 = vadd.xlane.f32.xlu2 %v5045_v14 }
 0xbf8   : >> { %v4976_v54 = vpop.permute.xlu0 %4975  ;;  %v4968_v4 = vpop.permute.xlu1 %4967 }
 0xbf9   : >> { %v5030_v39 = vsel %vm399_vm8, %v4976_v54, 0.0  ;;  %v5018_v41 = vsel %vm399_vm8, %v4968_v4, 0.0 }
 0xbfa   : >> { %5031 = vadd.xlane.f32.xlu0 %v5030_v39  ;;  %5013 = vadd.xlane.f32.xlu2 %v5012_v59 }
 0xc00   : >> { %v4988_v22 = vpop.permute.xlu0 %4987  ;;  %v4980_v12 = vpop.permute.xlu1 %4979 }
 0xc01   : >> { %v5048_v20 = vsel %vm399_vm8, %v4988_v22, 0.0  ;;  %v5036_v2 = vsel %vm399_vm8, %v4980_v12, 0.0 }
 0xc02   : >> { %5049 = vadd.xlane.f32.xlu0 %v5048_v20  ;;  %5019 = vadd.xlane.f32.xlu2 %v5018_v41 }
 0xc08   : >> { %v4992_v24 = vpop.permute.xlu1 %4991 }
 0xc09   : >> { %v5054_v57 = vsel %vm399_vm8, %v4992_v24, 0.0 }
 0xc0a   : >> { %5037 = vadd.xlane.f32.xlu2 %v5036_v2 }
 0xc12   : >> { %5055 = vadd.xlane.f32.xlu2 %v5054_v57 }
 0xc33   : >> { %v5017_v63 = vpop.xlane.xlu1 %5016 }
 0xc34   : >> { %v10381_v56 = vsub.f32 0.0, %v5017_v63 }
 0xc36   : >> { %vm5159_vm3 = vcmp.lt.f32.partialorder %v10381_v56, 0.0  ;;  %v5095_v35 = vperm.slane %v10381_v56, %v11455_v6 }
 0xc37   : >> { %v5175_v8 = vsel %vm5159_vm3, %v10381_v56, -1.0 }
 0xc38   : >> { %v5208_v25 = vperm.slane %v5175_v8, %v11455_v6 }
 0xc3b   : >> { %v5035_v43 = vpop.xlane.xlu1 %5034 }
 0xc3c   : >> { %v10383_v49 = vsub.f32 0.0, %v5035_v43 }
 0xc3e   : >> { %vm11204_vm10 = vcmp.lt.f32.partialorder %v10383_v49, 0.0  ;;  %v5104_v15 = vperm.slane %v10383_v49, %v11455_v6 }
 0xc3f   : >> { %v10404_v46 = vsel %vm11204_vm10, %v10383_v49, -1.0  ;;  %vm11211_vm10 = vcmask 1043459  }
 0xc40   : >> { %v5217_v40 = vperm.slane %v10404_v46, %v11455_v6 }
 0xc43   : >> { %v5053_v45 = vpop.xlane.xlu1 %5052 }
 0xc44   : >> { %v10397_v34 = vsub.f32 0.0, %v5053_v45 }
 0xc46   : >> { %v5113_v5 = vperm.slane %v10397_v34, %v11455_v6  ;;  %vm5171_vm4 = vcmp.lt.f32.partialorder %v10397_v34, 0.0 }
 0xc4b   : >> { %v5026_v36 = vpop.xlane.xlu1 %5025 }
 0xc4c   : >> { %v10385_v29 = vsub.f32 0.0, %v5026_v36 }
 0xc4e   : >> { %vm11205_vm12 = vcmp.lt.f32.partialorder %v10385_v29, 0.0  ;;  %v5099_v52 = vperm.slane %v10385_v29, %v10407_v27 }
 0xc4f   : >> { %v10415_v31 = vsel %vm11205_vm12, %v10385_v29, -1.0  ;;  %vm11212_vm12 = vcmask 1044484  }
 0xc50   : >> { %v5212_v53 = vperm.slane %v10415_v31, %v10407_v27 }
 0xc53   : >> { %v5044_v37 = vpop.xlane.xlu1 %5043 }
 0xc54   : >> { %v10392_v7 = vsub.f32 0.0, %v5044_v37 }
 0xc55   : >> { %v5011_v23 = vpop.xlane.xlu0 %5010 }
 0xc56   : >> { %v10388_v26 = vsub.f32 0.0, %v5011_v23  ;;  %vm11203_vm6 = vcmp.lt.f32.partialorder %v10392_v7, 0.0  ;;  %v5108_v58 = vperm.slane %v10392_v7, %v10407_v27 }
 0xc57   : >> { %v10442_v14 = vsel %vm11203_vm6, %v10392_v7, -1.0  ;;  %vm11213_vm6 = vcmask 1042434  }
 0xc58   : >> { %vm5157_vm2 = vcmp.lt.f32.partialorder %v10388_v26, 0.0  ;;  %v5090_v39 = vperm.slane %v10388_v26, %v11455_v6 }
 0xc59   : >> { %v5173_v18 = vsel %vm5157_vm2, %v10388_v26, -1.0 }
 0xc5a   : >> { %v5205_v4 = vperm.slane %v5173_v18, %v11455_v6 }
 0xc5d   : >> { %v5023_v30 = vpop.xlane.xlu0 %5022  ;;  %v5029_v28 = vpop.xlane.xlu2 %5028 }
 0xc5e   : >> { %v10417_v16 = vsub.f32 0.0, %v5023_v30  ;;  %v10437_v10 = vsub.f32 0.0, %v5029_v28 }
 0xc60   : >> { %vm5161_vm9 = vcmp.lt.f32.partialorder %v10417_v16, 0.0  ;;  %v5098_v2 = vperm.slane %v10417_v16, %v11455_v6  ;;  %vm11210_vm11 = vcmp.lt.f32.partialorder %v10437_v10, 0.0  ;;  %v5101_v30 = vperm.slane %v10437_v10, %v11455_v6 }
 0xc61   : >> { %v5177_v24 = vsel %vm5161_vm9, %v10417_v16, -1.0  ;;  %v5179_v28 = vsel %vm11210_vm11, %v10437_v10, -1.0  ;;  %vm11214_vm11 = vcmask 1045509  }
 0xc62   : >> { %v5211_v37 = vperm.slane %v5177_v24, %v11455_v6  ;;  %v5100_v31 = vsel %vm11217_vm14, %v5099_v52, %v5098_v2 }
 0xc64   : >> { %v5213_v24 = vsel %vm11217_vm14, %v5212_v53, %v5211_v37  ;;  %v5187_v37 = vsel %vm5171_vm4, %v10397_v34, -1.0 }
 0xc65   : >> { %v10379_v44 = vpop.xlane.xlu2 %5046  ;;  %v5041_v60 = vpop.xlane.xlu0 %5040 }
 0xc66   : >> { %v10455_v41 = vsub.f32 0.0, %v5041_v60 }
 0xc6d   : >> { %v5014_v62 = vpop.xlane.xlu2 %5013  ;;  %v5032_v1 = vpop.xlane.xlu0 %5031 }
 0xc6e   : >> { %v10399_v21 = vsub.f32 0.0, %v5014_v62  ;;  %v10445_v54 = vsub.f32 0.0, %v5032_v1 }
 0xc70   : >> { %vm5158_vm15 = vcmp.lt.f32.partialorder %v10399_v21, 0.0  ;;  %v5092_v20 = vperm.slane %v10399_v21, %v10407_v27  ;;  %vm11207_vm5 = vcmp.lt.f32.partialorder %v10445_v54, 0.0  ;;  %v5102_v18 = vperm.slane %v10445_v54, %v10407_v27 }
 0xc71   : >> { %v5174_v22 = vsel %vm5158_vm15, %v10399_v21, -1.0  ;;  %v5180_v62 = vsel %vm11207_vm5, %v10445_v54, -1.0 }
 0xc72   : >> { %v5206_v63 = vperm.slane %v5174_v22, %v10407_v27  ;;  %v5094_v36 = vsel %vm11217_vm14, %v5092_v20, %v5090_v39  ;;  %v10502_v20 = vsub.f32 0.0, %v10379_v44  ;;  %v5215_v52 = vperm.slane %v5180_v62, %v10407_v27 }
 0xc73   : >> { %v5221_v62 = vperm.slane %v10442_v14, %v10407_v27 }
 0xc74   : >> { %v5110_v14 = vperm.slane %v10502_v20, %v11455_v6 }
 0xc75   : >> { %v5020_v48 = vpop.xlane.xlu2 %5019  ;;  %v5050_v43 = vpop.xlane.xlu0 %5049 }
 0xc76   : >> { %v10447_v59 = vsub.f32 0.0, %v5020_v48  ;;  %v10488_v8 = vsub.f32 0.0, %v5050_v43  ;;  %v5207_v48 = vsel %vm11217_vm14, %v5206_v63, %v5205_v4  ;;  %v5103_v63 = vsel %vm11217_vm14, %v5102_v18, %v5101_v30 }
 0xc78   : >> { %v5096_v12 = vperm.slane %v10447_v59, %v10407_v27  ;;  %vm11206_vm13 = vcmp.lt.f32.partialorder %v10447_v59, 0.0 }
 0xc79   : >> { %v5176_v57 = vsel %vm11206_vm13, %v10447_v59, -1.0  ;;  %vm11208_vm13 = vcmp.lt.f32.partialorder %v10455_v41, 0.0 }
 0xc7a   : >> { %v5097_v23 = vsel %vm11217_vm14, %v5096_v12, %v5095_v35  ;;  %v5209_v45 = vperm.slane %v5176_v57, %v10407_v27  ;;  %v5183_v22 = vsel %vm11208_vm13, %v10455_v41, -1.0  ;;  %v5107_v57 = vperm.slane %v10455_v41, %v11455_v6 }
 0xc7b   : >> { %v5117_v1 = vsel %vm11209_vm0, %v5097_v23, %v5094_v36  ;;  %vm11216_vm13 = vcmp.lt.f32.partialorder %v10488_v8, 0.0 }
 0xc7c   : >> { %v5210_v60 = vsel %vm11217_vm14, %v5209_v45, %v5208_v25  ;;  %v5214_v25 = vperm.slane %v5179_v28, %v11455_v6  ;;  %v5119_v4 = vsel %vm11213_vm6, %v5100_v31, %v5117_v1  ;;  %v5220_v45 = vperm.slane %v5183_v22, %v11455_v6 }
 0xc7d   : >> { %v5038_v35 = vpop.xlane.xlu2 %5037  ;;  %v5229_v12 = vsel %vm11209_vm0, %v5210_v60, %v5207_v48  ;;  %vm5169_vm0 = vcmp.lt.f32.partialorder %v10502_v20, 0.0  ;;  %v5121_v28 = vsel %vm11211_vm10, %v5103_v63, %v5119_v4  ;;  %v5186_v30 = vsel %vm11216_vm13, %v10488_v8, -1.0 }
 0xc7e   : >> { %v10495_v39 = vsub.f32 0.0, %v5038_v35  ;;  %v5230_v43 = vsel %vm11213_vm6, %v5213_v24, %v5229_v12  ;;  %v5216_v36 = vsel %vm11217_vm14, %v5215_v52, %v5214_v25  ;;  %v5111_v1 = vperm.slane %v10488_v8, %v10407_v27 }
 0xc7f   : >> { %v5231_v35 = vsel %vm11211_vm10, %v5216_v36, %v5230_v43  ;;  %v5185_v46 = vsel %vm5169_vm0, %v10502_v20, -1.0  ;;  %v5109_v48 = vsel %vm11217_vm14, %v5108_v58, %v5107_v57  ;;  %v5224_v25 = vperm.slane %v5186_v30, %v10407_v27 }
 0xc80   : >> { %v5105_v2 = vperm.slane %v10495_v39, %v10407_v27  ;;  %vm5166_vm5 = vcmp.lt.f32.partialorder %v10495_v39, 0.0  ;;  %vm5126_vm10 = vcmask 1046534   ;;  %v5222_v12 = vsel %vm11217_vm14, %v5221_v62, %v5220_v45 }
 0xc81   : >> { %v5182_v44 = vsel %vm5166_vm5, %v10495_v39, -1.0  ;;  %vm5128_vm6 = vcmask 1047559   ;;  %v5112_v24 = vsel %vm11217_vm14, %v5111_v1, %v5110_v14  ;;  %v5226_v57 = vperm.slane %v5187_v37, %v11455_v6 }
 0xc82   : >> { %v5218_v23 = vperm.slane %v5182_v44, %v10407_v27  ;;  %v5106_v53 = vsel %vm11217_vm14, %v5105_v2, %v5104_v15  ;;  %v5223_v2 = vperm.slane %v5185_v46, %v11455_v6 }
 0xc83   : >> { %v5123_v15 = vsel %vm11212_vm12, %v5106_v53, %v5121_v28 }
 0xc84   : >> { %v5219_v60 = vsel %vm11217_vm14, %v5218_v23, %v5217_v40  ;;  %v5125_v22 = vsel %vm11214_vm11, %v5109_v48, %v5123_v15  ;;  %v5225_v23 = vsel %vm11217_vm14, %v5224_v25, %v5223_v2  ;;  %v11457_v2 = vld [vmem:[#allocation14_spill] sm:$0xff] }
 0xc85   : >> { %v5056_v31 = vpop.xlane.xlu2 %5055  ;;  %v5232_v40 = vsel %vm11212_vm12, %v5219_v60, %v5231_v35  ;;  %v5127_v43 = vsel %vm5126_vm10, %v5112_v24, %v5125_v22 }
 0xc86   : >> { %v10548_v18 = vsub.f32 0.0, %v5056_v31  ;;  %v5233_v58 = vsel %vm11214_vm11, %v5222_v12, %v5232_v40  ;;  %v11456_v31 = vld [vmem:[#allocation27_spill] sm:$0xff] }
 0xc87   : >> { %v5234_v28 = vsel %vm5126_vm10, %v5225_v23, %v5233_v58  ;;  %v10585_v46 = vsub.f32 0.0, %v11456_v31 }
 0xc88   : >> { %v5114_v52 = vperm.slane %v10548_v18, %v10407_v27  ;;  %vm11215_vm12 = vcmp.lt.f32.partialorder %v10548_v18, 0.0 }
 0xc89   : >> { %v5188_v4 = vsel %vm11215_vm12, %v10548_v18, -1.0 }
 0xc8a   : >> { %v5227_v44 = vperm.slane %v5188_v4, %v10407_v27  ;;  %v5115_v63 = vsel %vm11217_vm14, %v5114_v52, %v5113_v5 }
 0xc8b   : >> { %v10577_v53 = vsel %vm5128_vm6, %v5115_v63, %v5127_v43 }
 0xc8c   : >> { %v5228_v45 = vsel %vm11217_vm14, %v5227_v44, %v5226_v57  ;;  %6338 = vmatmul.msk.f32.vlgmr.msra.gmra.mxu3 %vm399_vm8, %v10577_v53  ;;  %v11458_v57 = vmov 0  }
 0xc8d   : >> { %v5235_v36 = vsel %vm5128_vm6, %v5228_v45, %v5234_v28 }
 0xc8e   : >> { %6793 = vrcp.f32 %v5235_v36  ;;  %v5248_v15 = vand.u32 2147483648, %v5235_v36  ;;  %v5246_v62 = vand.u32 2147483647, %v5235_v36  ;;  %vm5242_vm12 = vweird.f32 %v5235_v36 }
 0xc90   : >> { %v5249_v35 = vor.u32 1.1754944e-38, %v5248_v15  ;;  %vm5247_vm14 = vcmp.eq.f32.partialorder %v5246_v62, 8.507059e+37 }
 0xc94   : >> { %v6794_v30 = vpop.eup %6793 }
 0xc95   : >> { %v5238_v60 = vmul.f32 %v6794_v30, %v5235_v36  ;;  %vm5243_vm11 = vweird.f32 %v6794_v30 }
 0xc96   : >> { %vm5244_vm13 = vmor %vm5242_vm12, %vm5243_vm11  ;;  %vm11460_vm12 = vcmp.lt.f32.partialorder %v10447_v59, 0.0  ;;  %vm11468_vm11 = vcmp.lt.f32.partialorder %v10548_v18, 0.0 }
 0xc97   : >> { %v5239_v5 = vsub.f32 1.0, %v5238_v60 }
 0xc99   : >> { %v5240_v37 = vmul.f32 %v6794_v30, %v5239_v5 }
 0xc9b   : >> { %v5241_v1 = vadd.f32 %v6794_v30, %v5240_v37 }
 0xc9d   : >> { %v5245_v40 = vsel %vm5244_vm13, %v6794_v30, %v5241_v1  ;;  %vm11467_vm13 = vcmp.lt.f32.partialorder %v10488_v8, 0.0 }
 0xc9e   : >> { %v5250_v48 = vsel %vm5247_vm14, %v5249_v35, %v5245_v40  ;;  %vm11461_vm14 = vcmp.lt.f32.partialorder %v10385_v29, 0.0 }
 0xc9f   : >> { %v5251_v14 = vmul.f32 %v5250_v48, %v10585_v46 }
 0xca1   : >> { %v5266_v25 = vperm.slane %v5251_v14, 1  ;;  %v5253_v22 = vperm.slane %v5251_v14, 0  ;;  %v5279_v12 = vperm.slane %v5251_v14, 2  ;;  %v5292_v52 = vperm.slane %v5251_v14, 3 }
 0xca2   : >> { %v5305_v58 = vperm.slane %v5251_v14, 4  ;;  %v5331_v4 = vperm.slane %v5251_v14, 6  ;;  %v5318_v24 = vperm.slane %v5251_v14, 5  ;;  %v5344_v44 = vperm.slane %v5251_v14, 7 }
 0xca3   : >> { %5271 = vperm.xlu2 %6504, %v5266_v25   ;;  %5264 = vperm.xlu1 %6503, %v5253_v22  }
 0xca4   : >> { %5258 = vperm.xlu0 %6502, %v5253_v22  }
 0xcab   : >> { %5284 = vperm.xlu2 %6504, %v5279_v12   ;;  %5277 = vperm.xlu1 %6503, %v5266_v25  }
 0xcac   : >> { %6505 = vset.pattern.permute.xlu0 %v7094_v13 }
 0xcb3   : >> { %5297 = vperm.xlu2 %6504, %v5292_v52   ;;  %5290 = vperm.xlu1 %6503, %v5279_v12  }
 0xcb4   : >> { %5303 = vperm.xlu0 %6505, %v5292_v52  }
 0xcbb   : >> { %6507 = vset.pattern.permute.xlu2 %v7094_v13  ;;  %6506 = vset.pattern.permute.xlu1 %v11457_v2 }
 0xcbc   : >> { %6508 = vset.pattern.permute.xlu0 %v11457_v2 }
 0xcc3   : >> { %5316 = vperm.xlu2 %6507, %v5305_v58   ;;  %5310 = vperm.xlu1 %6506, %v5305_v58  }
 0xcc4   : >> { %5336 = vperm.xlu0 %6508, %v5331_v4  }
 0xccb   : >> { %5329 = vperm.xlu2 %6507, %v5318_v24   ;;  %5323 = vperm.xlu1 %6506, %v5318_v24  }
 0xccc   : >> { %6512 = vset.pattern.permute.xlu0 %v11458_v57 }
 0xcd3   : >> { %6510 = vset.pattern.permute.xlu2 %v11457_v2  ;;  %6509 = vset.pattern.permute.xlu1 %v7094_v13 }
 0xcdb   : >> { %5349 = vperm.xlu2 %6510, %v5344_v44   ;;  %5342 = vperm.xlu1 %6509, %v5331_v4   ;;  %v5155_v4 = vsub.f32 %v10585_v46, %v10577_v53 }
 0xce3   : >> { %5355 = vperm.xlu1 %6509, %v5344_v44   ;;  %6511 = vset.pattern.permute.xlu2 %v11458_v57 }
 0xceb   : >> { %6513 = vset.pattern.permute.xlu1 %v11458_v57 }
 0xcfd   : >> { %v5272_v63 = vpop.permute.xlu2 %5271 }
 0xcfe   : >> { %v5375_v43 = vsel %vm5159_vm3, %v5272_v63, 3.4028235e+38  ;;  %vm11459_vm3 = vcmp.lt.f32.partialorder %v10437_v10, 0.0 }
 0xcff   : >> { %5412 = vperm.xlu1 %6513, %v5375_v43  }
 0xd05   : >> { %v5285_v23 = vpop.permute.xlu2 %5284 }
 0xd06   : >> { %v5377_v45 = vsel %vm5161_vm9, %v5285_v23, 3.4028235e+38  ;;  %vm11465_vm9 = vcmp.lt.f32.partialorder %v10455_v41, 0.0  ;;  %v11466_v23 = vld [vmem:[#allocation35_spill] sm:$0xff] }
 0xd07   : >> { %5418 = vperm.xlu1 %6513, %v5377_v45   ;;  %v10626_v45 = vmul.f32 %v11466_v23, %v5155_v4 }
 0xd0d   : >> { %v5298_v5 = vpop.permute.xlu2 %5297 }
 0xd0e   : >> { %v5379_v37 = vsel %vm11459_vm3, %v5298_v5, 3.4028235e+38 }
 0xd15   : >> { %v5265_v28 = vpop.permute.xlu1 %5264 }
 0xd16   : >> { %v5374_v36 = vsel %vm5158_vm15, %v5265_v28, 3.4028235e+38  ;;  %v5259_v30 = vpop.permute.xlu0 %5258  ;;  %vm11463_vm15 = vcmp.lt.f32.partialorder %v10383_v49, 0.0 }
 0xd17   : >> { %v5373_v60 = vsel %vm5157_vm2, %v5259_v30, 3.4028235e+38  ;;  %5409 = vperm.xlu0 %6512, %v5374_v36   ;;  %vm11462_vm2 = vcmp.lt.f32.partialorder %v10445_v54, 0.0 }
 0xd18   : >> { %5406 = vperm.xlu2 %6511, %v5373_v60  }
 0xd1d   : >> { %v5278_v15 = vpop.permute.xlu1 %5277  ;;  %v5317_v1 = vpop.permute.xlu2 %5316 }
 0xd1e   : >> { %v5376_v62 = vsel %vm11460_vm12, %v5278_v15, 3.4028235e+38  ;;  %v5382_v40 = vsel %vm5166_vm5, %v5317_v1, 3.4028235e+38  ;;  %vm11464_vm5 = vcmp.lt.f32.partialorder %v10392_v7, 0.0 }
 0xd1f   : >> { %5424 = vperm.xlu0 %6512, %v5379_v37  }
 0xd20   : >> { %5415 = vperm.xlu2 %6511, %v5376_v62  }
 0xd25   : >> { %v5291_v35 = vpop.permute.xlu1 %5290  ;;  %v5330_v24 = vpop.permute.xlu2 %5329 }
 0xd26   : >> { %v5378_v48 = vsel %vm11461_vm14, %v5291_v35, 3.4028235e+38  ;;  %v5304_v14 = vpop.permute.xlu0 %5303  ;;  %v5384_v63 = vsel %vm11464_vm5, %v5330_v24, 3.4028235e+38  ;;  %vm11472_vm5 = vcmask 1041409  }
 0xd27   : >> { %v5380_v25 = vsel %vm11462_vm2, %v5304_v14, 3.4028235e+38  ;;  %5433 = vperm.xlu0 %6512, %v5382_v40   ;;  %vm11470_vm2 = vcmask 130112  }
 0xd28   : >> { %5421 = vperm.xlu2 %6511, %v5378_v48   ;;  %5427 = vperm.xlu1 %6513, %v5380_v25  }
 0xd35   : >> { %v5311_v22 = vpop.permute.xlu1 %5310  ;;  %v5350_v28 = vpop.permute.xlu2 %5349 }
 0xd36   : >> { %v5381_v12 = vsel %vm11463_vm15, %v5311_v22, 3.4028235e+38  ;;  %v5337_v52 = vpop.permute.xlu0 %5336  ;;  %v5387_v36 = vsel %vm5171_vm4, %v5350_v28, 3.4028235e+38  ;;  %vm11471_vm15 = vmmov %vm11470_vm2 }
 0xd37   : >> { %v5385_v58 = vsel %vm5169_vm0, %v5337_v52, 3.4028235e+38  ;;  %5430 = vperm.xlu2 %6511, %v5381_v12   ;;  %vm5488_vm0 = vcmp.lt.f32.partialorder %v10626_v45, 0.0  ;;  %v11469_v52 = vld [vmem:[#allocation28_spill] sm:$0xff] }
 0xd38   : >> { %5442 = vperm.xlu0 %6512, %v5385_v58   ;;  %v5490_v30 = vsel %vm5488_vm0, %v10626_v45, -1.0  ;;  %v11218_v58 = vsub.f32 0.0, %v11469_v52 }
 0xd39   : >> { %6795 = vrcp.f32 %v5490_v30  ;;  %v5502_v14 = vand.u32 2147483648, %v5490_v30  ;;  %vm5496_vm3 = vweird.f32 %v5490_v30  ;;  %v5500_v25 = vand.u32 2147483647, %v5490_v30 }
 0xd3b   : >> { %v5503_v12 = vor.u32 1.1754944e-38, %v5502_v14  ;;  %vm5501_vm14 = vcmp.eq.f32.partialorder %v5500_v25, 8.507059e+37 }
 0xd3d   : >> { %v5324_v44 = vpop.permute.xlu1 %5323 }
 0xd3e   : >> { %v5383_v43 = vsel %vm11465_vm9, %v5324_v44, 3.4028235e+38  ;;  %vm11473_vm9 = vmmov %vm11470_vm2 }
 0xd3f   : >> { %5439 = vperm.xlu2 %6511, %v5384_v63   ;;  %5436 = vperm.xlu1 %6513, %v5383_v43   ;;  %v6796_v15 = vpop.eup %6795 }
 0xd40   : >> { %v5492_v37 = vmul.f32 %v6796_v15, %v5490_v30  ;;  %vm5497_vm4 = vweird.f32 %v6796_v15 }
 0xd41   : >> { %vm5498_vm12 = vmor %vm5496_vm3, %vm5497_vm4 }
 0xd42   : >> { %v5493_v35 = vsub.f32 1.0, %v5492_v37 }
 0xd44   : >> { %v5494_v40 = vmul.f32 %v6796_v15, %v5493_v35 }
 0xd46   : >> { %v5495_v48 = vadd.f32 %v6796_v15, %v5494_v40 }
 0xd47   : >> { %5448 = vperm.xlu2 %6511, %v5387_v36  }
 0xd48   : >> { %v5499_v22 = vsel %vm5498_vm12, %v6796_v15, %v5495_v48 }
 0xd49   : >> { %v5504_v4 = vsel %vm5501_vm14, %v5503_v12, %v5499_v22  ;;  %vm11480_vm14 = vcmask 1044484  }
 0xd4a   : >> { %v5505_v24 = vmul.f32 %v5504_v4, %v11218_v58 }
 0xd4c   : >> { %v5506_v44 = vsel %vm5488_vm0, %v5505_v24, 3.4028235e+38  ;;  %vm11474_vm0 = vmmov %vm11470_vm2 }
 0xd4d   : >> { %v5343_v60 = vpop.permute.xlu1 %5342  ;;  %v5507_v63 = vsel %vm399_vm8, %v5506_v44, inf  ;;  %vm11477_vm4 = vmmov %vm11474_vm0 }
 0xd4e   : >> { %v5386_v5 = vsel %vm11467_vm13, %v5343_v60, 3.4028235e+38  ;;  %vm11475_vm13 = vcmask 1042434   ;;  %vm11478_vm3 = vmmov %vm11474_vm0 }
 0xd4f   : >> { %5445 = vperm.xlu1 %6513, %v5386_v5   ;;  %6515 = vset.pattern.permute.xlu2 %v7094_v13  ;;  %vm11479_vm12 = vmmov %vm11474_vm0 }
 0xd55   : >> { %v5356_v62 = vpop.permute.xlu1 %5355 }
 0xd56   : >> { %v5388_v1 = vsel %vm11468_vm11, %v5356_v62, 3.4028235e+38  ;;  %vm11476_vm11 = vcmask 1043459  }
 0xd57   : >> { %5451 = vperm.xlu0 %6512, %v5388_v1   ;;  %6516 = vset.pattern.permute.xlu1 %v11457_v2 }
 0xd5f   : >> { %6514 = vset.pattern.permute.xlu0 %v11457_v2 }
 0xd70   : >> { %5508 = vmin.xlane.f32.xlu2 %v5507_v63 }
 0xd71   : >> { %v5413_v28 = vpop.permute.xlu1 %5412 }
 0xd72   : >> { %v5407_v43 = vpop.permute.xlu2 %5406  ;;  %v5456_v22 = vperm.slane %v5413_v28, %v11455_v6 }
 0xd73   : >> { %v5453_v14 = vperm.slane %v5407_v43, %v11455_v6 }
 0xd79   : >> { %v5419_v60 = vpop.permute.xlu1 %5418 }
 0xd7a   : >> { %v5416_v36 = vpop.permute.xlu2 %5415 }
 0xd7b   : >> { %v5457_v25 = vperm.slane %v5416_v36, %v10407_v27 }
 0xd7d   : >> { %v5458_v63 = vsel %vm11471_vm15, %v5457_v25, %v5456_v22  ;;  %vm11482_vm15 = vmmov %vm11474_vm0 }
 0xd82   : >> { %v5422_v5 = vpop.permute.xlu2 %5421 }
 0xd83   : >> { %v5460_v24 = vperm.slane %v5422_v5, %v10407_v27 }
 0xd89   : >> { %v5410_v30 = vpop.permute.xlu0 %5409 }
 0xd8a   : >> { %v5454_v40 = vperm.slane %v5410_v30, %v10407_v27  ;;  %v5459_v30 = vperm.slane %v5419_v60, %v11455_v6 }
 0xd8c   : >> { %v5455_v12 = vsel %vm11470_vm2, %v5454_v40, %v5453_v14  ;;  %vm11481_vm2 = vcmask 1045509  }
 0xd8d   : >> { %v5477_v43 = vsel %vm11472_vm5, %v5458_v63, %v5455_v12 }
 0xd91   : >> { %v5425_v15 = vpop.permute.xlu0 %5424  ;;  %v5431_v62 = vpop.permute.xlu2 %5430 }
 0xd92   : >> { %v5462_v58 = vperm.slane %v5425_v15, %v11455_v6  ;;  %v5465_v5 = vperm.slane %v5431_v62, %v11455_v6 }
 0xd99   : >> { %v5434_v1 = vpop.permute.xlu0 %5433  ;;  %v5440_v48 = vpop.permute.xlu2 %5439 }
 0xd9a   : >> { %v5428_v37 = vpop.permute.xlu1 %5427  ;;  %v5466_v36 = vperm.slane %v5434_v1, %v10407_v27  ;;  %v5469_v25 = vperm.slane %v5440_v48, %v10407_v27 }
 0xd9b   : >> { %v5463_v4 = vperm.slane %v5428_v37, %v10407_v27  ;;  %v5461_v37 = vsel %vm11474_vm0, %v5460_v24, %v5459_v30 }
 0xd9c   : >> { %v5478_v15 = vsel %vm11475_vm13, %v5461_v37, %v5477_v43  ;;  %v5467_v22 = vsel %vm11477_vm4, %v5466_v36, %v5465_v5 }
 0xd9d   : >> { %v5464_v28 = vsel %vm11473_vm9, %v5463_v4, %v5462_v58 }
 0xd9e   : >> { %v5479_v60 = vsel %vm11476_vm11, %v5464_v28, %v5478_v15  ;;  %vm11488_vm11 = vmmov %vm11478_vm3 }
 0xd9f   : >> { %v5480_v62 = vsel %vm11480_vm14, %v5467_v22, %v5479_v60  ;;  %vm11489_vm14 = vmmov %vm11488_vm11 }
 0xda1   : >> { %v5449_v12 = vpop.permute.xlu2 %5448 }
 0xdaa   : >> { %v5443_v44 = vpop.permute.xlu0 %5442 }
 0xdab   : >> { %v5471_v1 = vperm.slane %v5443_v44, %v11455_v6 }
 0xdb1   : >> { %v5437_v35 = vpop.permute.xlu1 %5436 }
 0xdb2   : >> { %v5468_v40 = vperm.slane %v5437_v35, %v11455_v6 }
 0xdb4   : >> { %v5470_v58 = vsel %vm11478_vm3, %v5469_v25, %v5468_v40 }
 0xdb5   : >> { %v5481_v24 = vsel %vm11481_vm2, %v5470_v58, %v5480_v62  ;;  %vm11490_vm2 = vcmask 1041409  }
 0xdc1   : >> { %v5446_v57 = vpop.permute.xlu1 %5445 }
 0xdc2   : >> { %v5472_v14 = vperm.slane %v5446_v57, %v10407_v27  ;;  %v5474_v57 = vperm.slane %v5449_v12, %v11455_v6  ;;  %v11483_v12 = vld [vmem:[#allocation30_spill] sm:$0xff] }
 0xdc3   : >> { %6797 = vrcp.f32 %v11483_v12  ;;  %vm5525_vm5 = vweird.f32 %v11483_v12  ;;  %v5531_v62 = vand.u32 2147483648, %v11483_v12 }
 0xdc4   : >> { %v5473_v35 = vsel %vm11479_vm12, %v5472_v14, %v5471_v1 }
 0xdc5   : >> { %v5482_v30 = vsel %vm5126_vm10, %v5473_v35, %v5481_v24 }
 0xdc9   : >> { %v5452_v4 = vpop.permute.xlu0 %5451  ;;  %v6798_v1 = vpop.eup %6797 }
 0xdca   : >> { %v5475_v48 = vperm.slane %v5452_v4, %v10407_v27  ;;  %v5521_v58 = vmul.f32 %v6798_v1, %v11483_v12  ;;  %vm5526_vm9 = vweird.f32 %v6798_v1 }
 0xdcb   : >> { %vm5527_vm0 = vmor %vm5525_vm5, %vm5526_vm9 }
 0xdcc   : >> { %v5476_v63 = vsel %vm11482_vm15, %v5475_v48, %v5474_v57  ;;  %v5522_v35 = vsub.f32 1.0, %v5521_v58  ;;  %v5532_v48 = vor.u32 1.1754944e-38, %v5531_v62  ;;  %vm11491_vm9 = vmmov %vm11488_vm11 }
 0xdcd   : >> { %v5483_v43 = vsel %vm5128_vm6, %v5476_v63, %v5482_v30  ;;  %v11484_v63 = vand.u32 2147483647, %v11483_v12 }
 0xdce   : >> { %v5485_v44 = vsel %vm399_vm8, %v5483_v43, inf  ;;  %v5523_v4 = vmul.f32 %v6798_v1, %v5522_v35 }
 0xdcf   : >> { %5486 = vmin.xlane.f32.xlu1 %v5485_v44  ;;  %vm5530_vm13 = vcmp.eq.f32.partialorder %v11484_v63, 8.507059e+37 }
 0xdd0   : >> { %v5524_v57 = vadd.f32 %v6798_v1, %v5523_v4 }
 0xdd2   : >> { %v5528_v24 = vsel %vm5527_vm0, %v6798_v1, %v5524_v57  ;;  %vm11492_vm0 = vmmov %vm11491_vm9 }
 0xdd3   : >> { %v5533_v30 = vsel %vm5530_vm13, %v5532_v48, %v5528_v24 }
 0xde3   : >> { %v5509_v36 = vpop.xlane.xlu2 %5508 }
 0xe42   : >> { %v5487_v28 = vpop.xlane.xlu1 %5486 }
 0xe43   : >> { %v5510_v40 = vmin.f32 %v5487_v28, %v5509_v36  ;;  %v11485_v28 = vld [vmem:[#allocation31_spill] sm:$0xff] }
 0xe45   : >> { %v5511_v37 = vmin.f32 %v5510_v40, 1.0  ;;  %v5537_v40 = vsub.f32 0.0, %v11485_v28 }
 0xe47   : >> { %v5512_v5 = vmul.f32 %v5511_v37, %v10626_v45  ;;  %v5514_v14 = vmul.f32 %v5511_v37, %v10577_v53 }
 0xe49   : >> { %v5513_v25 = vadd.f32 %v11469_v52, %v5512_v5  ;;  %v5515_v15 = vadd.f32 %v11456_v31, %v5514_v14  ;;  %v5539_v5 = vmul.f32 %v10626_v45, %v10577_v53 }
 0xe4b   : >> { %v5516_v60 = vmul.f32 %v5515_v15, %v5513_v25  ;;  %v11486_v15 = vld [vmem:[#allocation34_spill] sm:$0xff] }
 0xe4d   : >> { %v5517_v22 = vsel %vm399_vm8, %v5516_v60, 0.0 }
 0xe4e   : >> { %5518 = vadd.xlane.f32.xlu0 %v5517_v22 }
 0xec1   : >> { %v5519_v43 = vpop.xlane.xlu0 %5518 }
 0xec2   : >> { %v5534_v44 = vmul.f32 %v5533_v30, %v5519_v43 }
 0xec4   : >> { %v5535_v36 = vmul.f32 %v5534_v44, %v5534_v44 }
 0xec6   : >> { %v5536_v37 = vmul.f32 %v5535_v36, %v5534_v44 }
 0xec8   : >> { %v5538_v14 = vmul.f32 %v5537_v40, %v5536_v37  ;;  %v11487_v40 = vld [vmem:[#allocation39_spill] sm:$0xff] }
 0xeca   : >> { %v5540_v25 = vadd.f32 %v5539_v5, %v5538_v14 }
 0xecc   : >> { %v10694_v60 = vmul.f32 %v5540_v25, %v11486_v15 }
 0xece   : >> { %v5542_v22 = vmul.f32 %v11466_v23, %v10694_v60 }
 0xed0   : >> { %v5551_v12 = vperm.slane %v5542_v22, 0  ;;  %v5545_v1 = vrot.slane %v5542_v22, 2  ;;  %v5544_v58 = vrot.slane %v5542_v22, 1  ;;  %v5546_v53 = vrot.slane %v5542_v22, 3 }
 0xed1   : >> { %v5547_v62 = vrot.slane %v5542_v22, 4  ;;  %v5548_v57 = vrot.slane %v5542_v22, 5  ;;  %v5549_v30 = vrot.slane %v5542_v22, 6  ;;  %v5550_v43 = vrot.slane %v5542_v22, 7 }
 0xed2   : >> { %5559 = vrot.lane.b32.xlu1 %v5551_v12, %s6919_s18  ;;  %v5553_v35 = vperm.slane %v5545_v1, 0  ;;  %v5552_v4 = vperm.slane %v5544_v58, 0  ;;  %v5554_v48 = vperm.slane %v5546_v53, 0 }
 0xed3   : >> { %v5555_v24 = vperm.slane %v5547_v62, 0  ;;  %v5556_v63 = vperm.slane %v5548_v57, 0  ;;  %v5557_v44 = vperm.slane %v5549_v30, 0  ;;  %v5558_v36 = vperm.slane %v5550_v43, 0 }
 0xed4   : >> { %5563 = vrot.lane.b32.xlu0 %v5553_v35, %s6919_s18  ;;  %5561 = vrot.lane.b32.xlu2 %v5552_v4, %s6919_s18 }
 0xeda   : >> { %5565 = vrot.lane.b32.xlu1 %v5554_v48, %s6919_s18 }
 0xedc   : >> { %5567 = vrot.lane.b32.xlu0 %v5555_v24, %s6919_s18  ;;  %5569 = vrot.lane.b32.xlu2 %v5556_v63, %s6919_s18 }
 0xee2   : >> { %5571 = vrot.lane.b32.xlu1 %v5557_v44, %s6919_s18 }
 0xee4   : >> { %5573 = vrot.lane.b32.xlu0 %v5558_v36, %s6919_s18  ;;  %s6817_s18 = sshra.s32 (%p469_p11), %s6245_s13, 4  ;;  %s6818_s18 = int_to_ptr.hbm [resolvable:$true] %s6817_s18 }
 0xee5   : > { %s6819_s19 = scalar_lea.hbm (%p469_p11), %s6818_s18, 8  ;;  %p6824_p1 = scmp.lt.s32.totalorder (%p469_p11), %s6818_s18, %s11162_s8 }
 0xee6   : > { %p6820_p12 = scmp.ne.s32.totalorder (%p469_p11), %s6818_s18, %s6819_s19  ;;  %p6825_p2 = scmp.lt.s32.totalorder (%p469_p11), %s6823_s0, %s6819_s19 }
 0xee8   : > { %p6821_p13 = pnand (%p469_p11), %p6820_p12, %p7021_p5  ;;  %p6826_p3 = por (%p469_p11), %p6825_p2, %p6824_p1 }
 0xeea   : > { %p6822_p0 = pneg (%p469_p11), %p6821_p13 }
 0xeec   : > { %p6827_p4 = pnand (%p469_p11), %p6826_p3, %p6822_p0 }
 0xf2e   : >> { %v5562_v28 = vpop.permute.xlu2 %5561 }
 0xf2f   : >> { %v5585_v37 = vmul.f32 %v5562_v28, %v11487_v40  ;;  %v5586_v22 = vmul.f32 %v5562_v28, %v10325_v47 }
 0xf31   : >> { %5619 = vrot.lane.b32.xlu0 %v5585_v37, %s6936_s20 }
 0xf44   : >> { %v5560_v5 = vpop.permute.xlu1 %5559 }
 0xf45   : >> { %v5583_v14 = vmul.f32 %v5560_v5, %v10248_v32  ;;  %v5584_v25 = vmul.f32 %v5560_v5, %v10297_v51 }
 0xf46   : >> { %v5564_v15 = vpop.permute.xlu0 %5563 }
 0xf47   : >> { %v5588_v12 = vmul.f32 %v5564_v15, %v10288_v50  ;;  %5617 = vrot.lane.b32.xlu1 %v5584_v25, %s6936_s20  ;;  %5615 = vrot.lane.b32.xlu2 %v5583_v14, %s6936_s20  ;;  %v5587_v1 = vmul.f32 %v5564_v15, %v10192_v61  ;;  %v5570_v50 = vpop.permute.xlu2 %5569 }
 0xf48   : >> { %v5594_v53 = vmul.f32 %v5570_v50, %v10313_v33 }
 0xf49   : >> { %5625 = vrot.lane.b32.xlu0 %v5588_v12, %s6936_s20 }
 0xf4c   : >> { %v5566_v32 = vpop.permute.xlu1 %5565 }
 0xf4d   : >> { %v5589_v51 = vmul.f32 %v5566_v32, %v10268_v0  ;;  %v5590_v4 = vmul.f32 %v5566_v32, %v10320_v42 }
 0xf4e   : >> { %v5568_v58 = vpop.permute.xlu0 %5567 }
 0xf4f   : >> { %v5591_v35 = vmul.f32 %v5568_v58, %v10238_v19  ;;  %5623 = vrot.lane.b32.xlu1 %v5587_v1, %s6936_s20  ;;  %5621 = vrot.lane.b32.xlu2 %v5586_v22, %s6936_s20  ;;  %v5593_v19 = vmul.f32 %v5570_v50, %v10272_v9  ;;  %v5592_v47 = vmul.f32 %v5568_v58, %v10345_v11 }
 0xf51   : >> { %5631 = vrot.lane.b32.xlu0 %v5591_v35, %s6936_s20 }
 0xf54   : >> { %v5572_v0 = vpop.permute.xlu1 %5571 }
 0xf55   : >> { %v5595_v33 = vmul.f32 %v5572_v0, %v10291_v3  ;;  %v5596_v42 = vmul.f32 %v5572_v0, %v10340_v17 }
 0xf56   : >> { %v5574_v61 = vpop.permute.xlu0 %5573 }
 0xf57   : >> { %5629 = vrot.lane.b32.xlu1 %v5590_v4, %s6936_s20  ;;  %5627 = vrot.lane.b32.xlu2 %v5589_v51, %s6936_s20  ;;  %v5597_v62 = vmul.f32 %v5574_v61, %v10259_v38  ;;  %v5598_v9 = vmul.f32 %v5574_v61, %v10358_v55 }
 0xf59   : >> { %5637 = vrot.lane.b32.xlu0 %v5594_v53, %s6936_s20 }
 0xf5f   : >> { %5633 = vrot.lane.b32.xlu2 %v5592_v47, %s6936_s20  ;;  %5635 = vrot.lane.b32.xlu1 %v5593_v19, %s6936_s20 }
 0xf61   : >> { %5643 = vrot.lane.b32.xlu0 %v5597_v62, %s6936_s20 }
 0xf67   : >> { %5639 = vrot.lane.b32.xlu2 %v5595_v33, %s6936_s20  ;;  %5641 = vrot.lane.b32.xlu1 %v5596_v42, %s6936_s20 }
 0xf6f   : >> { %5645 = vrot.lane.b32.xlu2 %v5598_v9, %s6936_s20 }
 0xfa1   : >> { %v5616_v38 = vpop.permute.xlu2 %5615 }
 0xfa2   : >> { %v5663_v11 = vsel %vm399_vm8, %v5616_v38, 0.0 }
 0xfa3   : >> { %v5620_v57 = vpop.permute.xlu0 %5619  ;;  %5664 = vadd.xlane.f32.xlu1 %v5663_v11 }
 0xfa4   : >> { %v5669_v48 = vsel %vm399_vm8, %v5620_v57, 0.0 }
 0xfa5   : >> { %5670 = vadd.xlane.f32.xlu2 %v5669_v48 }
 0xfa9   : >> { %v5622_v24 = vpop.permute.xlu2 %5621 }
 0xfaa   : >> { %v5672_v3 = vsel %vm399_vm8, %v5622_v24, 0.0 }
 0xfab   : >> { %5673 = vadd.xlane.f32.xlu1 %v5672_v3 }
 0xfb1   : >> { %v5628_v17 = vpop.permute.xlu2 %5627 }
 0xfb2   : >> { %v5681_v63 = vsel %vm399_vm8, %v5628_v17, 0.0 }
 0xfb3   : >> { %5682 = vadd.xlane.f32.xlu1 %v5681_v63 }
 0xfb9   : >> { %v5618_v30 = vpop.permute.xlu1 %5617  ;;  %v5634_v55 = vpop.permute.xlu2 %5633 }
 0xfba   : >> { %v5666_v43 = vsel %vm399_vm8, %v5618_v30, 0.0  ;;  %v5690_v44 = vsel %vm399_vm8, %v5634_v55, 0.0 }
 0xfbb   : >> { %v5626_v36 = vpop.permute.xlu0 %5625  ;;  %5667 = vadd.xlane.f32.xlu0 %v5666_v43  ;;  %5691 = vadd.xlane.f32.xlu1 %v5690_v44 }
 0xfbc   : >> { %v5678_v28 = vsel %vm399_vm8, %v5626_v36, 0.0 }
 0xfbd   : >> { %5679 = vadd.xlane.f32.xlu2 %v5678_v28 }
 0xfc1   : >> { %v5624_v40 = vpop.permute.xlu1 %5623  ;;  %v5640_v37 = vpop.permute.xlu2 %5639 }
 0xfc2   : >> { %v5675_v5 = vsel %vm399_vm8, %v5624_v40, 0.0  ;;  %v5699_v14 = vsel %vm399_vm8, %v5640_v37, 0.0 }
 0xfc3   : >> { %v5632_v25 = vpop.permute.xlu0 %5631  ;;  %5676 = vadd.xlane.f32.xlu0 %v5675_v5  ;;  %5700 = vadd.xlane.f32.xlu1 %v5699_v14 }
 0xfc4   : >> { %v5687_v15 = vsel %vm399_vm8, %v5632_v25, 0.0 }
 0xfc5   : >> { %5688 = vadd.xlane.f32.xlu2 %v5687_v15 }
 0xfc9   : >> { %v5630_v12 = vpop.permute.xlu1 %5629  ;;  %v5646_v22 = vpop.permute.xlu2 %5645 }
 0xfca   : >> { %v5684_v1 = vsel %vm399_vm8, %v5630_v12, 0.0  ;;  %v5708_v58 = vsel %vm399_vm8, %v5646_v22, 0.0 }
 0xfcb   : >> { %5685 = vadd.xlane.f32.xlu0 %v5684_v1  ;;  %v5638_v35 = vpop.permute.xlu0 %5637  ;;  %5709 = vadd.xlane.f32.xlu1 %v5708_v58 }
 0xfcc   : >> { %v5696_v32 = vsel %vm399_vm8, %v5638_v35, 0.0 }
 0xfcd   : >> { %5697 = vadd.xlane.f32.xlu2 %v5696_v32 }
 0xfd1   : >> { %v5636_v50 = vpop.permute.xlu1 %5635 }
 0xfd2   : >> { %v5693_v51 = vsel %vm399_vm8, %v5636_v50, 0.0 }
 0xfd3   : >> { %v5644_v4 = vpop.permute.xlu0 %5643  ;;  %5694 = vadd.xlane.f32.xlu0 %v5693_v51  ;;  %v5797_v51 = vsub.f32 0.0, %v10694_v60 }
 0xfd4   : >> { %v5705_v53 = vsel %vm399_vm8, %v5644_v4, 0.0 }
 0xfd5   : >> { %5706 = vadd.xlane.f32.xlu2 %v5705_v53 }
 0xfd9   : >> { %v5642_v61 = vpop.permute.xlu1 %5641 }
 0xfda   : >> { %v5702_v19 = vsel %vm399_vm8, %v5642_v61, 0.0 }
 0xfdb   : >> { %5703 = vadd.xlane.f32.xlu0 %v5702_v19 }
0x1016   : >> { %v5665_v47 = vpop.xlane.xlu1 %5664 }
0x1017   : >> { %v5711_v3 = vsub.f32 0.0, %v5665_v47 }
0x1018   : >> { %v5671_v62 = vpop.xlane.xlu2 %5670 }
0x1019   : >> { %v5713_v0 = vsub.f32 0.0, %v5671_v62  ;;  %v10766_v17 = vadd.f32 %v5711_v3, %v10388_v26  ;;  %v5743_v35 = vperm.slane %v5711_v3, %v11455_v6 }
0x101b   : >> { %v10755_v42 = vadd.f32 %v5713_v0, %v10381_v56  ;;  %vm5819_vm4 = vcmp.lt.f32.partialorder %v10766_v17, 0.0  ;;  %v6194_v44 = vperm.slane %v10766_v17, %v11455_v6  ;;  %v5746_v53 = vperm.slane %v5713_v0, %v11455_v6 }
0x101c   : >> { %v5835_v37 = vsel %vm5819_vm4, %v10766_v17, -1.0 }
0x101d   : >> { %v6197_v11 = vperm.slane %v10755_v42, %v11455_v6  ;;  %vm11223_vm12 = vcmp.lt.f32.partialorder %v10755_v42, 0.0  ;;  %v5867_v4 = vperm.slane %v5835_v37, %v11455_v6 }
0x101e   : >> { %v5674_v33 = vpop.xlane.xlu1 %5673  ;;  %v5837_v5 = vsel %vm11223_vm12, %v10755_v42, -1.0  ;;  %vm11502_vm12 = vcmask 1043459  }
0x101f   : >> { %v5714_v9 = vsub.f32 0.0, %v5674_v33 }
0x1021   : >> { %v10758_v38 = vadd.f32 %v5714_v9, %v10447_v59  ;;  %v5747_v12 = vperm.slane %v5714_v9, %v10407_v27 }
0x1023   : >> { %v6198_v57 = vperm.slane %v10758_v38, %v10407_v27  ;;  %vm5822_vm3 = vcmp.lt.f32.partialorder %v10758_v38, 0.0  ;;  %v5748_v62 = vsel %vm11491_vm9, %v5747_v12, %v5746_v53 }
0x1025   : >> { %v6199_v48 = vsel %vm11488_vm11, %v6198_v57, %v6197_v11 }
0x1026   : >> { %v5683_v24 = vpop.xlane.xlu1 %5682 }
0x1027   : >> { %v5717_v43 = vsub.f32 0.0, %v5683_v24 }
0x1029   : >> { %v10792_v14 = vadd.f32 %v5717_v43, %v10437_v10  ;;  %v5752_v11 = vperm.slane %v5717_v43, %v11455_v6 }
0x102b   : >> { %vm11222_vm5 = vcmp.lt.f32.partialorder %v10792_v14, 0.0 }
0x102c   : >> { %v10834_v57 = vsel %vm11222_vm5, %v10792_v14, -1.0 }
0x102d   : >> { %v5876_v37 = vperm.slane %v10834_v57, %v11455_v6 }
0x102e   : >> { %v5668_v63 = vpop.xlane.xlu0 %5667  ;;  %v5692_v56 = vpop.xlane.xlu1 %5691 }
0x102f   : >> { %v5712_v30 = vsub.f32 0.0, %v5668_v63  ;;  %v5720_v28 = vsub.f32 0.0, %v5692_v56 }
0x1030   : >> { %v10768_v55 = vpop.xlane.xlu2 %5679 }
0x1031   : >> { %v10771_v59 = vadd.f32 %v5712_v30, %v10399_v21  ;;  %v5716_v36 = vsub.f32 0.0, %v10768_v55  ;;  %v5838_v21 = vsel %vm5822_vm3, %v10758_v38, -1.0  ;;  %v10807_v32 = vadd.f32 %v5720_v28, %v10495_v39 }
0x1032   : >> { %v5871_v10 = vperm.slane %v5838_v21, %v10407_v27  ;;  %v5744_v19 = vperm.slane %v5712_v30, %v10407_v27 }
0x1033   : >> { %v6195_v26 = vperm.slane %v10771_v59, %v10407_v27  ;;  %vm5820_vm15 = vcmp.lt.f32.partialorder %v10771_v59, 0.0  ;;  %v10800_v22 = vadd.f32 %v5716_v36, %v10385_v29  ;;  %v5870_v29 = vperm.slane %v5837_v5, %v11455_v6 }
0x1034   : >> { %v5836_v39 = vsel %vm5820_vm15, %v10771_v59, -1.0  ;;  %vm11220_vm13 = vcmp.lt.f32.partialorder %v10807_v32, 0.0  ;;  %v6207_v5 = vperm.slane %v10807_v32, %v10407_v27 }
0x1035   : >> { %v6196_v40 = vsel %vm11489_vm14, %v6195_v26, %v6194_v44  ;;  %v6201_v33 = vperm.slane %v10800_v22, %v10407_v27  ;;  %v5872_v9 = vsel %vm11492_vm0, %v5871_v10, %v5870_v29  ;;  %v5868_v24 = vperm.slane %v5836_v39, %v10407_v27  ;;  %vm11493_vm14 = vmmov %vm11492_vm0 }
0x1036   : >> { %v6218_v25 = vsel %vm11490_vm2, %v6199_v48, %v6196_v40  ;;  %v5677_v15 = vpop.xlane.xlu0 %5676  ;;  %v10802_v58 = vpop.xlane.xlu1 %5700  ;;  %v6203_v48 = vperm.slane %v10792_v14, %v11455_v6  ;;  %vm11494_vm2 = vmmov %vm11492_vm0  ;;  %vm11221_vm9 = vcmp.lt.f32.partialorder %v10800_v22, 0.0  ;;  %vm11495_vm0 = vcmask 1042434  }
0x1037   : >> { %v5715_v1 = vsub.f32 0.0, %v5677_v15  ;;  %v5745_v63 = vsel %vm11494_vm2, %v5744_v19, %v5743_v35  ;;  %v10849_v44 = vsel %vm11220_vm13, %v10807_v32, -1.0 }
0x1038   : >> { %v5689_v50 = vpop.xlane.xlu2 %5688 }
0x1039   : >> { %v10814_v61 = vadd.f32 %v5715_v1, %v10417_v16  ;;  %v5719_v47 = vsub.f32 0.0, %v5689_v50  ;;  %v5723_v16 = vsub.f32 0.0, %v10802_v58  ;;  %v5749_v58 = vperm.slane %v5715_v1, %v11455_v6 }
0x103a   : >> { %v5880_v50 = vperm.slane %v10849_v44, %v10407_v27 }
0x103b   : >> { %v6200_v0 = vperm.slane %v10814_v61, %v11455_v6  ;;  %vm11227_vm11 = vcmp.lt.f32.partialorder %v10814_v61, 0.0  ;;  %v10844_v30 = vadd.f32 %v5719_v47, %v10383_v49  ;;  %v10855_v21 = vadd.f32 %v5723_v16, %v10502_v20 }
0x103c   : >> { %v5839_v26 = vsel %vm11227_vm11, %v10814_v61, -1.0  ;;  %v5756_v49 = vperm.slane %v5720_v28, %v10407_v27  ;;  %v5840_v20 = vsel %vm11221_vm9, %v10800_v22, -1.0 }
0x103d   : >> { %v6202_v3 = vsel %vm11493_vm14, %v6201_v33, %v6200_v0  ;;  %vm11496_vm14 = vmmov %vm11494_vm2  ;;  %vm11497_vm2 = vcmask 1041409   ;;  %v5873_v53 = vperm.slane %v5839_v26, %v11455_v6  ;;  %v5874_v39 = vperm.slane %v5840_v20, %v10407_v27 }
0x103e   : >> { %v6219_v56 = vsel %vm11495_vm0, %v6202_v3, %v6218_v25  ;;  %v5686_v43 = vpop.xlane.xlu0 %5685  ;;  %v6206_v25 = vperm.slane %v10844_v30, %v11455_v6  ;;  %v5869_v12 = vsel %vm11496_vm14, %v5868_v24, %v5867_v4  ;;  %v5710_v10 = vpop.xlane.xlu1 %5709  ;;  %v5767_v28 = vsel %vm11497_vm2, %v5748_v62, %v5745_v63  ;;  %vm11498_vm0 = vmmov %vm11496_vm14 }
0x103f   : >> { %v5718_v40 = vsub.f32 0.0, %v5686_v43  ;;  %v5750_v4 = vperm.slane %v5716_v36, %v10407_v27  ;;  %vm11224_vm14 = vcmp.lt.f32.partialorder %v10855_v21, 0.0  ;;  %vm11499_vm13 = vmmov %vm11497_vm2  ;;  %v5726_v62 = vsub.f32 0.0, %v5710_v10 }
0x1040   : >> { %v5698_v15 = vpop.xlane.xlu2 %5697  ;;  %v6208_v29 = vsel %vm11498_vm0, %v6207_v5, %v6206_v25  ;;  %v5891_v19 = vsel %vm11499_vm13, %v5872_v9, %v5869_v12  ;;  %vm11500_vm9 = vmmov %vm11498_vm0  ;;  %v5755_v0 = vperm.slane %v5719_v47, %v11455_v6  ;;  %v10894_v24 = vsel %vm11224_vm14, %v10855_v21, -1.0 }
0x1041   : >> { %v10870_v35 = vadd.f32 %v5718_v40, %v10445_v54  ;;  %v5722_v1 = vsub.f32 0.0, %v5698_v15  ;;  %v5751_v33 = vsel %vm11500_vm9, %v5750_v4, %v5749_v58  ;;  %v5753_v55 = vperm.slane %v5718_v40, %v10407_v27  ;;  %vm11501_vm5 = vmmov %vm11498_vm0 }
0x1042   : >> { %v5875_v57 = vsel %vm11501_vm5, %v5874_v39, %v5873_v53  ;;  %vm11226_vm13 = vcmp.lt.f32.partialorder %v10844_v30, 0.0  ;;  %vm11503_vm9 = vcmask 1044484   ;;  %vm11504_vm5 = vcmask 1042434  }
0x1043   : >> { %v6204_v54 = vperm.slane %v10870_v35, %v10407_v27  ;;  %vm11225_vm2 = vcmp.lt.f32.partialorder %v10870_v35, 0.0  ;;  %v10902_v63 = vadd.f32 %v5722_v1, %v10392_v7  ;;  %v5768_v26 = vsel %vm11504_vm5, %v5751_v33, %v5767_v28 }
0x1044   : >> { %v5842_v47 = vsel %vm11225_vm2, %v10870_v35, -1.0  ;;  %v5761_v40 = vperm.slane %v5723_v16, %v11455_v6  ;;  %v6212_v5 = vperm.slane %v10855_v21, %v11455_v6  ;;  %v5885_v15 = vperm.slane %v10894_v24, %v11455_v6 }
0x1045   : >> { %v6205_v36 = vsel %vm11498_vm0, %v6204_v54, %v6203_v48  ;;  %v5754_v12 = vsel %vm11498_vm0, %v5753_v55, %v5752_v11  ;;  %v5843_v16 = vsel %vm11226_vm13, %v10844_v30, -1.0  ;;  %v6210_v28 = vperm.slane %v10902_v63, %v10407_v27 }
0x1046   : >> { %v6220_v9 = vsel %vm11502_vm12, %v6205_v36, %v6219_v56  ;;  %v5695_v3 = vpop.xlane.xlu0 %5694  ;;  %v10910_v56 = vadd.f32 %v5726_v62, %v10548_v18  ;;  %vm11505_vm12 = vmmov %vm11498_vm0  ;;  %v5877_v18 = vperm.slane %v5842_v47, %v10407_v27  ;;  %v5759_v4 = vperm.slane %v5722_v1, %v10407_v27 }
0x1047   : >> { %v5721_v48 = vsub.f32 0.0, %v5695_v3  ;;  %v6221_v43 = vsel %vm11503_vm9, %v6208_v29, %v6220_v9  ;;  %v5757_v7 = vsel %vm11505_vm12, %v5756_v49, %v5755_v0  ;;  %vm11506_vm9 = vmmov %vm11504_vm5  ;;  %vm11507_vm12 = vcmask 1043459  }
0x1048   : >> { %v5707_v25 = vpop.xlane.xlu2 %5706  ;;  %v5892_v58 = vsel %vm11506_vm9, %v5875_v57, %v5891_v19  ;;  %v5769_v11 = vsel %vm11507_vm12, %v5754_v12, %v5768_v26  ;;  %vm5834_vm0 = vcmp.lt.f32.partialorder %v10910_v56, 0.0  ;;  %vm5830_vm9 = vcmp.lt.f32.partialorder %v10902_v63, 0.0 }
0x1049   : >> { %v10917_v20 = vadd.f32 %v5721_v48, %v10455_v41  ;;  %v5725_v10 = vsub.f32 0.0, %v5707_v25  ;;  %v5758_v53 = vperm.slane %v5721_v48, %v11455_v6  ;;  %v6216_v29 = vperm.slane %v10910_v56, %v10407_v27 }
0x104a   : >> { %vm11508_vm14 = vcmask 130112   ;;  %vm11510_vm13 = vcmask 1045509   ;;  %v5846_v1 = vsel %vm5830_vm9, %v10902_v63, -1.0  ;;  %v5879_v24 = vperm.slane %v5843_v16, %v11455_v6 }
0x104b   : >> { %vm11229_vm5 = vcmp.lt.f32.partialorder %v10917_v20, 0.0  ;;  %v6209_v41 = vperm.slane %v10917_v20, %v11455_v6  ;;  %v10934_v49 = vadd.f32 %v5725_v10, %v10397_v34  ;;  %vm11509_vm2 = vmmov %vm11508_vm14  ;;  %v5764_v36 = vperm.slane %v5725_v10, %v11455_v6 }
0x104c   : >> { %v5845_v54 = vsel %vm11229_vm5, %v10917_v20, -1.0  ;;  %v5878_v39 = vsel %vm11509_vm2, %v5877_v18, %v5876_v37  ;;  %vm11511_vm11 = vmmov %vm11509_vm2  ;;  %v5765_v37 = vperm.slane %v5726_v62, %v10407_v27  ;;  %v5850_v62 = vsel %vm5834_vm0, %v10910_v56, -1.0 }
0x104d   : >> { %v6211_v19 = vsel %vm11508_vm14, %v6210_v28, %v6209_v41  ;;  %vm11228_vm12 = vcmp.lt.f32.partialorder %v10934_v49, 0.0  ;;  %v6215_v33 = vperm.slane %v10934_v49, %v11455_v6  ;;  %v5760_v55 = vsel %vm11511_vm11, %v5759_v4, %v5758_v53  ;;  %vm11512_vm14 = vmmov %vm11509_vm2 }
0x104e   : >> { %v5704_v34 = vpop.xlane.xlu0 %5703  ;;  %v6222_v0 = vsel %vm11510_vm13, %v6211_v19, %v6221_v43  ;;  %v5882_v9 = vperm.slane %v5845_v54, %v11455_v6  ;;  %v5849_v47 = vsel %vm11228_vm12, %v10934_v49, -1.0  ;;  %vm11513_vm11 = vcmask 1044484  }
0x104f   : >> { %v5724_v57 = vsub.f32 0.0, %v5704_v34  ;;  %v6217_v3 = vsel %vm11512_vm14, %v6216_v29, %v6215_v33  ;;  %v5770_v26 = vsel %vm11513_vm11, %v5757_v7, %v5769_v11  ;;  %vm11514_vm2 = vcmask 1043459  }
0x1050   : >> { %v5893_v25 = vsel %vm11514_vm2, %v5878_v39, %v5892_v58  ;;  %v5883_v12 = vperm.slane %v5846_v1, %v10407_v27  ;;  %v5771_v16 = vsel %vm11510_vm13, %v5760_v55, %v5770_v26  ;;  %vm11515_vm12 = vcmask 130112  }
0x1051   : >> { %v5762_v48 = vperm.slane %v5724_v57, %v10407_v27  ;;  %v10962_v43 = vadd.f32 %v5724_v57, %v10488_v8  ;;  %vm11516_vm5 = vmmov %vm11515_vm12  ;;  %v5888_v58 = vperm.slane %v5849_v47, %v11455_v6  ;;  %v5889_v4 = vperm.slane %v5850_v62, %v10407_v27 }
0x1052   : >> { %v5766_v10 = vsel %vm11516_vm5, %v5765_v37, %v5764_v36  ;;  %vm11517_vm11 = vmmov %vm11516_vm5 }
0x1053   : >> { %vm5832_vm14 = vcmp.lt.f32.partialorder %v10962_v43, 0.0  ;;  %v6213_v18 = vperm.slane %v10962_v43, %v10407_v27  ;;  %v5763_v8 = vsel %vm11515_vm12, %v5762_v48, %v5761_v40  ;;  %v5884_v7 = vsel %vm11517_vm11, %v5883_v12, %v5882_v9  ;;  %vm11518_vm2 = vmmov %vm11516_vm5 }
0x1054   : >> { %v5848_v28 = vsel %vm5832_vm14, %v10962_v43, -1.0  ;;  %v5772_v53 = vsel %vm5126_vm10, %v5763_v8, %v5771_v16  ;;  %v5881_v41 = vsel %vm11518_vm2, %v5880_v50, %v5879_v24  ;;  %vm11519_vm5 = vmmov %vm11518_vm2  ;;  %vm11520_vm12 = vcmask 1044484  }
0x1055   : >> { %v5886_v11 = vperm.slane %v5848_v28, %v10407_v27  ;;  %v5773_v40 = vsel %vm5128_vm6, %v5766_v10, %v5772_v53  ;;  %v6214_v29 = vsel %vm11519_vm5, %v6213_v18, %v6212_v5  ;;  %v5894_v54 = vsel %vm11520_vm12, %v5881_v41, %v5893_v25  ;;  %vm11521_vm11 = vmmov %vm11518_vm2 }
0x1056   : >> { %6339 = vmatmul.msk.f32.vlgmr.msrb.gmra.mxu1 %vm399_vm8, %v5773_v40  ;;  %v10994_v19 = vsub.f32 %v5797_v51, %v5773_v40  ;;  %v6223_v44 = vsel %vm5126_vm10, %v6214_v29, %v6222_v0  ;;  %v5895_v50 = vsel %vm11510_vm13, %v5884_v7, %v5894_v54  ;;  %v5890_v5 = vsel %vm11518_vm2, %v5889_v4, %v5888_v58 }
0x1057   : >> { %v5887_v39 = vsel %vm11521_vm11, %v5886_v11, %v5885_v15  ;;  %v11000_v33 = vsel %vm5128_vm6, %v6217_v3, %v6223_v44  ;;  %v11522_v18 = vmov 0   ;;  %vm11523_vm2 = vcmp.lt.f32.partialorder %v10814_v61, 0.0 }
0x1058   : >> { %v5896_v34 = vsel %vm5126_vm10, %v5887_v39, %v5895_v50 }
0x1059   : >> { %v5897_v1 = vsel %vm5128_vm6, %v5890_v5, %v5896_v34 }
0x105a   : >> { %6799 = vrcp.f32 %v5897_v1  ;;  %v5910_v36 = vand.u32 2147483648, %v5897_v1  ;;  %v5908_v0 = vand.u32 2147483647, %v5897_v1  ;;  %vm5904_vm12 = vweird.f32 %v5897_v1 }
0x105c   : >> { %v5911_v15 = vor.u32 1.1754944e-38, %v5910_v36  ;;  %vm5909_vm11 = vcmp.eq.f32.partialorder %v5908_v0, 8.507059e+37 }
0x1060   : >> { %v6800_v55 = vpop.eup %6799 }
0x1061   : >> { %v5900_v60 = vmul.f32 %v6800_v55, %v5897_v1  ;;  %vm5905_vm5 = vweird.f32 %v6800_v55 }
0x1062   : >> { %vm5906_vm13 = vmor %vm5904_vm12, %vm5905_vm5  ;;  %vm11525_vm5 = vcmp.lt.f32.partialorder %v10755_v42, 0.0  ;;  %vm11528_vm12 = vcmp.lt.f32.partialorder %v10870_v35, 0.0 }
0x1063   : >> { %v5901_v51 = vsub.f32 1.0, %v5900_v60 }
0x1065   : >> { %v5902_v57 = vmul.f32 %v6800_v55, %v5901_v51 }
0x1067   : >> { %v5903_v24 = vadd.f32 %v6800_v55, %v5902_v57 }
0x1069   : >> { %v5907_v37 = vsel %vm5906_vm13, %v6800_v55, %v5903_v24  ;;  %vm11529_vm13 = vcmp.lt.f32.partialorder %v10807_v32, 0.0 }
0x106a   : >> { %v5912_v9 = vsel %vm5909_vm11, %v5911_v15, %v5907_v37  ;;  %v11533_v37 = vsub.f32 0.0, %v11469_v52 }
0x106b   : >> { %v5913_v3 = vmul.f32 %v5912_v9, %v10585_v46 }
0x106d   : >> { %v5928_v47 = vperm.slane %v5913_v3, 1  ;;  %v5915_v48 = vperm.slane %v5913_v3, 0  ;;  %v5941_v26 = vperm.slane %v5913_v3, 2  ;;  %v5954_v25 = vperm.slane %v5913_v3, 3 }
0x106e   : >> { %v5967_v62 = vperm.slane %v5913_v3, 4  ;;  %v5980_v46 = vperm.slane %v5913_v3, 5  ;;  %v6006_v12 = vperm.slane %v5913_v3, 7  ;;  %v5993_v16 = vperm.slane %v5913_v3, 6 }
0x106f   : >> { %5933 = vperm.xlu1 %6516, %v5928_v47   ;;  %5926 = vperm.xlu2 %6515, %v5915_v48  }
0x1070   : >> { %5920 = vperm.xlu0 %6514, %v5915_v48  }
0x1077   : >> { %5946 = vperm.xlu1 %6516, %v5941_v26   ;;  %5939 = vperm.xlu2 %6515, %v5928_v47  }
0x1078   : >> { %5959 = vperm.xlu0 %6514, %v5954_v25  }
0x107f   : >> { %6517 = vset.pattern.permute.xlu1 %v7094_v13  ;;  %5952 = vperm.xlu2 %6515, %v5941_v26  }
0x1080   : >> { %6519 = vset.pattern.permute.xlu0 %v7094_v13 }
0x1087   : >> { %5965 = vperm.xlu1 %6517, %v5954_v25   ;;  %6518 = vset.pattern.permute.xlu2 %v11457_v2 }
0x1088   : >> { %5978 = vperm.xlu0 %6519, %v5967_v62  }
0x108f   : >> { %6520 = vset.pattern.permute.xlu1 %v11457_v2  ;;  %5972 = vperm.xlu2 %6518, %v5967_v62  }
0x1090   : >> { %6522 = vset.pattern.permute.xlu0 %v11457_v2 }
0x1097   : >> { %5985 = vperm.xlu1 %6520, %v5980_v46   ;;  %6521 = vset.pattern.permute.xlu2 %v7094_v13 }
0x1098   : >> { %6011 = vperm.xlu0 %6522, %v6006_v12  }
0x109f   : >> { %5998 = vperm.xlu1 %6520, %v5993_v16   ;;  %5991 = vperm.xlu2 %6521, %v5980_v46  }
0x10a0   : >> { %6526 = vset.pattern.permute.xlu0 %v11522_v18 }
0x10a7   : >> { %6523 = vset.pattern.permute.xlu1 %v7094_v13  ;;  %6004 = vperm.xlu2 %6521, %v5993_v16  }
0x10af   : >> { %6017 = vperm.xlu1 %6523, %v6006_v12   ;;  %6524 = vset.pattern.permute.xlu2 %v11522_v18 }
0x10b7   : >> { %6525 = vset.pattern.permute.xlu1 %v11522_v18 }
0x10c9   : >> { %v5927_v2 = vpop.permute.xlu2 %5926 }
0x10ca   : >> { %v6036_v8 = vsel %vm5820_vm15, %v5927_v2, 3.4028235e+38  ;;  %vm11524_vm15 = vcmp.lt.f32.partialorder %v10844_v30, 0.0 }
0x10cb   : >> { %6071 = vperm.xlu1 %6525, %v6036_v8  }
0x10d1   : >> { %v5940_v10 = vpop.permute.xlu2 %5939 }
0x10d2   : >> { %v6038_v7 = vsel %vm5822_vm3, %v5940_v10, 3.4028235e+38  ;;  %vm11526_vm3 = vcmp.lt.f32.partialorder %v10792_v14, 0.0  ;;  %v5800_v14 = vmul.f32 %v11466_v23, %v10994_v19 }
0x10d3   : >> { %6077 = vperm.xlu0 %6526, %v6038_v7  }
0x10d9   : >> { %v5953_v58 = vpop.permute.xlu2 %5952 }
0x10e1   : >> { %v5934_v28 = vpop.permute.xlu1 %5933 }
0x10e2   : >> { %v5921_v53 = vpop.permute.xlu0 %5920  ;;  %v6037_v38 = vsel %vm11525_vm5, %v5934_v28, 3.4028235e+38 }
0x10e3   : >> { %v6035_v41 = vsel %vm5819_vm4, %v5921_v53, 3.4028235e+38  ;;  %vm11527_vm4 = vcmp.lt.f32.partialorder %v10800_v22, 0.0  ;;  %v11041_v22 = vadd.f32 %v5800_v14, %v10626_v45 }
0x10e4   : >> { %6068 = vperm.xlu2 %6524, %v6035_v41   ;;  %v6040_v54 = vsel %vm11527_vm4, %v5953_v58, 3.4028235e+38 }
0x10e5   : >> { %vm6150_vm11 = vcmp.lt.f32.partialorder %v11041_v22, 0.0 }
0x10e6   : >> { %v6151_v34 = vsel %vm6150_vm11, %v11041_v22, -1.0 }
0x10e7   : >> { %6801 = vrcp.f32 %v6151_v34  ;;  %v6163_v0 = vand.u32 2147483648, %v6151_v34  ;;  %v6161_v43 = vand.u32 2147483647, %v6151_v34 }
0x10e9   : >> { %v5947_v11 = vpop.permute.xlu1 %5946  ;;  %v5973_v40 = vpop.permute.xlu2 %5972  ;;  %vm6162_vm4 = vcmp.eq.f32.partialorder %v6161_v43, 8.507059e+37 }
0x10ea   : >> { %v6039_v29 = vsel %vm11523_vm2, %v5947_v11, 3.4028235e+38  ;;  %v6043_v59 = vsel %vm11524_vm15, %v5973_v40, 3.4028235e+38  ;;  %v5960_v4 = vpop.permute.xlu0 %5959  ;;  %vm11530_vm2 = vcmp.lt.f32.partialorder %v10917_v20, 0.0  ;;  %vm11532_vm15 = vcmp.lt.f32.partialorder %v10855_v21, 0.0  ;;  %v5149_v43 = vpop.f32.mrf.mxu3 }
0x10eb   : >> { %6080 = vperm.xlu1 %6525, %v6039_v29   ;;  %6092 = vperm.xlu0 %6526, %v6043_v59   ;;  %v6041_v17 = vsel %vm11526_vm3, %v5960_v4, 3.4028235e+38  ;;  %vm6157_vm3 = vweird.f32 %v6151_v34  ;;  %v6164_v21 = vor.u32 1.1754944e-38, %v6163_v0  ;;  %v5793_v0 = vpop.f32.mrf.mxu1 }
0x10ec   : >> { %6074 = vperm.xlu2 %6524, %v6037_v38  }
0x10ed   : >> { %v6802_v1 = vpop.eup %6801 }
0x10ee   : >> { %vm6158_vm5 = vweird.f32 %v6802_v1 }
0x10f3   : >> { %6086 = vperm.xlu1 %6525, %v6041_v17  }
0x10f4   : >> { %6083 = vperm.xlu2 %6524, %v6040_v54  }
0x10f9   : >> { %v5966_v61 = vpop.permute.xlu1 %5965  ;;  %v5992_v44 = vpop.permute.xlu2 %5991 }
0x10fa   : >> { %v6042_v30 = vsel %vm11528_vm12, %v5966_v61, 3.4028235e+38  ;;  %v6046_v42 = vsel %vm5830_vm9, %v5992_v44, 3.4028235e+38  ;;  %v5979_v50 = vpop.permute.xlu0 %5978  ;;  %vm11531_vm9 = vcmp.lt.f32.partialorder %v10934_v49, 0.0  ;;  %v6153_v49 = vmul.f32 %v6802_v1, %v6151_v34 }
0x10fb   : >> { %v6044_v39 = vsel %vm11529_vm13, %v5979_v50, 3.4028235e+38  ;;  %6101 = vperm.xlu0 %6526, %v6046_v42  }
0x10fc   : >> { %6089 = vperm.xlu2 %6524, %v6042_v30   ;;  %6095 = vperm.xlu1 %6525, %v6044_v39   ;;  %v6154_v55 = vsub.f32 1.0, %v6153_v49 }
0x10fe   : >> { %v6155_v60 = vmul.f32 %v6802_v1, %v6154_v55 }
0x1100   : >> { %v6156_v57 = vadd.f32 %v6802_v1, %v6155_v60 }
0x1101   : >> { %v6005_v23 = vpop.permute.xlu2 %6004 }
0x1102   : >> { %v6048_v19 = vsel %vm5832_vm14, %v6005_v23, 3.4028235e+38  ;;  %vm6159_vm14 = vmor %vm6157_vm3, %vm6158_vm5  ;;  %vm11541_vm5 = vcmask 1043459   ;;  %vm11542_vm3 = vcmask 1044484  }
0x1103   : >> { %v6160_v24 = vsel %vm6159_vm14, %v6802_v1, %v6156_v57 }
0x1104   : >> { %v6165_v15 = vsel %vm6162_vm4, %v6164_v21, %v6160_v24 }
0x1105   : >> { %v6166_v9 = vmul.f32 %v6165_v15, %v11533_v37  ;;  %v11547_v15 = vld [vmem:[#allocation36_spill] sm:$0xff] }
0x1106   : >> { %v5073_v37 = vsub.f32 0.0, %v11547_v15 }
0x1107   : >> { %v6167_v3 = vsel %vm6150_vm11, %v6166_v9, 3.4028235e+38  ;;  %v5796_v9 = vsub.f32 0.0, %v5793_v0 }
0x1108   : >> { %v6168_v56 = vsel %vm399_vm8, %v6167_v3, inf }
0x1109   : >> { %v5986_v5 = vpop.permute.xlu1 %5985 }
0x110a   : >> { %v6045_v35 = vsel %vm11530_vm2, %v5986_v5, 3.4028235e+38  ;;  %v6012_v63 = vpop.permute.xlu0 %6011  ;;  %vm11538_vm2 = vcmask 1041409  }
0x110b   : >> { %v6049_v32 = vsel %vm11531_vm9, %v6012_v63, 3.4028235e+38  ;;  %6098 = vperm.xlu2 %6524, %v6045_v35  }
0x110c   : >> { %6110 = vperm.xlu0 %6526, %v6049_v32  }
0x1111   : >> { %v5999_v45 = vpop.permute.xlu1 %5998 }
0x1112   : >> { %v6047_v20 = vsel %vm11532_vm15, %v5999_v45, 3.4028235e+38  ;;  %vm11540_vm15 = vcmask 1042434  }
0x1113   : >> { %6107 = vperm.xlu2 %6524, %v6048_v19   ;;  %6104 = vperm.xlu1 %6525, %v6047_v20  }
0x1121   : >> { %v6018_v51 = vpop.permute.xlu1 %6017 }
0x1122   : >> { %v6050_v36 = vsel %vm5834_vm0, %v6018_v51, 3.4028235e+38  ;;  %vm11534_vm0 = vcmask 130112  }
0x1123   : >> { %6113 = vperm.xlu1 %6525, %v6050_v36   ;;  %vm11535_vm12 = vmmov %vm11534_vm0 }
0x1124   : >> { %vm11536_vm13 = vmmov %vm11534_vm0 }
0x1125   : >> { %vm11537_vm11 = vmmov %vm11534_vm0 }
0x1126   : >> { %vm11539_vm9 = vmmov %vm11534_vm0 }
0x1127   : >> { %vm11543_vm14 = vmmov %vm11534_vm0 }
0x1128   : >> { %vm11544_vm4 = vmmov %vm11534_vm0 }
0x1136   : >> { %6169 = vmin.xlane.f32.xlu0 %v6168_v56 }
0x113d   : >> { %v6072_v48 = vpop.permute.xlu1 %6071 }
0x113e   : >> { %v6069_v47 = vpop.permute.xlu2 %6068  ;;  %v6116_v53 = vperm.slane %v6072_v48, %v10407_v27 }
0x113f   : >> { %v6115_v41 = vperm.slane %v6069_v47, %v11455_v6 }
0x1141   : >> { %v6117_v61 = vsel %vm11536_vm13, %v6116_v53, %v6115_v41 }
0x1145   : >> { %v6078_v46 = vpop.permute.xlu0 %6077 }
0x1146   : >> { %v6075_v26 = vpop.permute.xlu2 %6074  ;;  %v6119_v7 = vperm.slane %v6078_v46, %v10407_v27  ;;  %v11548_v46 = vld [vmem:[#allocation29_spill] sm:$0xff] }
0x1147   : >> { %v6118_v10 = vperm.slane %v6075_v26, %v11455_v6 }
0x1149   : >> { %v6120_v38 = vsel %vm11534_vm0, %v6119_v7, %v6118_v10  ;;  %vm11545_vm0 = vcmask 1045509  }
0x114a   : >> { %v6139_v50 = vsel %vm11538_vm2, %v6120_v38, %v6117_v61 }
0x114e   : >> { %v6084_v62 = vpop.permute.xlu2 %6083 }
0x114f   : >> { %v6122_v40 = vperm.slane %v6084_v62, %v10407_v27 }
0x1156   : >> { %v6090_v16 = vpop.permute.xlu2 %6089 }
0x1157   : >> { %v6125_v4 = vperm.slane %v6090_v16, %v10407_v27 }
0x115d   : >> { %v6081_v25 = vpop.permute.xlu1 %6080  ;;  %v6093_v18 = vpop.permute.xlu0 %6092 }
0x115e   : >> { %v6121_v58 = vperm.slane %v6081_v25, %v11455_v6  ;;  %v6127_v54 = vperm.slane %v6093_v18, %v11455_v6 }
0x1160   : >> { %v6123_v17 = vsel %vm11535_vm12, %v6122_v40, %v6121_v58  ;;  %vm11546_vm12 = vmmov %vm11544_vm4 }
0x1161   : >> { %v6140_v5 = vsel %vm11540_vm15, %v6123_v17, %v6139_v50  ;;  %v11550_v50 = vld [vmem:[#allocation32_spill] sm:$0xff] }
0x1165   : >> { %v6087_v12 = vpop.permute.xlu1 %6086  ;;  %v6099_v8 = vpop.permute.xlu2 %6098 }
0x1166   : >> { %v6124_v11 = vperm.slane %v6087_v12, %v11455_v6  ;;  %v6130_v35 = vperm.slane %v6099_v8, %v11455_v6 }
0x1168   : >> { %v6126_v44 = vsel %vm11537_vm11, %v6125_v4, %v6124_v11 }
0x1169   : >> { %v6141_v63 = vsel %vm11541_vm5, %v6126_v44, %v6140_v5 }
0x116d   : >> { %v6102_v28 = vpop.permute.xlu0 %6101  ;;  %v6108_v30 = vpop.permute.xlu2 %6107 }
0x116e   : >> { %v6096_v2 = vpop.permute.xlu1 %6095  ;;  %v6131_v42 = vperm.slane %v6102_v28, %v10407_v27  ;;  %v6134_v32 = vperm.slane %v6108_v30, %v10407_v27 }
0x116f   : >> { %v6128_v29 = vperm.slane %v6096_v2, %v10407_v27 }
0x1170   : >> { %v6132_v45 = vsel %vm11543_vm14, %v6131_v42, %v6130_v35 }
0x1171   : >> { %v6129_v39 = vsel %vm11539_vm9, %v6128_v29, %v6127_v54 }
0x1172   : >> { %v6142_v23 = vsel %vm11542_vm3, %v6129_v39, %v6141_v63 }
0x1173   : >> { %v6143_v55 = vsel %vm11545_vm0, %v6132_v45, %v6142_v23 }
0x117e   : >> { %v6111_v34 = vpop.permute.xlu0 %6110 }
0x117f   : >> { %v6136_v1 = vperm.slane %v6111_v34, %v11455_v6 }
0x1185   : >> { %v6105_v59 = vpop.permute.xlu1 %6104 }
0x1186   : >> { %v6133_v14 = vperm.slane %v6105_v59, %v11455_v6 }
0x1188   : >> { %v6135_v19 = vsel %vm11544_vm4, %v6134_v32, %v6133_v14 }
0x1189   : >> { %v6144_v51 = vsel %vm5126_vm10, %v6135_v19, %v6143_v55  ;;  %vm11552_vm10 = vcmask (%p469_p11), 261120  }
0x1195   : >> { %v6114_v20 = vpop.permute.xlu1 %6113 }
0x1196   : >> { %v6137_v49 = vperm.slane %v6114_v20, %v10407_v27  ;;  %v5152_v27 = vsub.f32 %v5073_v37, %v5149_v43 }
0x1198   : >> { %v6138_v60 = vsel %vm11546_vm12, %v6137_v49, %v6136_v1  ;;  %v5801_v47 = vadd.f32 %v5796_v9, %v5152_v27  ;;  %v11549_v49 = vld [vmem:[#allocation33_spill] sm:$0xff] }
0x1199   : >> { %v6145_v36 = vsel %vm5128_vm6, %v6138_v60, %v6144_v51 }
0x119a   : >> { %v6147_v57 = vsel %vm399_vm8, %v6145_v36, inf }
0x119b   : >> { %6148 = vmin.xlane.f32.xlu2 %v6147_v57 }
0x11a9   : >> { %v6170_v24 = vpop.xlane.xlu0 %6169 }
0x120e   : >> { %v6149_v21 = vpop.xlane.xlu2 %6148 }
0x120f   : >> { %v6171_v3 = vmin.f32 %v6149_v21, %v6170_v24 }
0x1211   : >> { %v6172_v56 = vmul.f32 0.999, %v6171_v3 }
0x1213   : >> { %v6173_v48 = vmin.f32 %v6172_v56, 1.0  ;;  %471 = sbr.rel (!%p469_p11) target bundleno = 537 (0x219), region = 94 }
0x1215   : >> { %v6174_v26 = vmul.f32 %v6173_v48, %v5801_v47  ;;  %v6176_v25 = vmul.f32 %v6173_v48, %v11041_v22  ;;  %v6226_v62 = vmul.f32 %v11000_v33, %v6173_v48 }
0x1217   : >> { %v6175_v48 = vadd.f32 %v11548_v46, %v6174_v26   ;;  %v6177_v41 = vadd.f32 %v11469_v52, %v6176_v25   ;;  %v6227_v46 = vadd.f32 %v11456_v31, %v6226_v62   ;;  %v11551_v52 = vld [vmem:[#allocation33_spill] sm:$0xff] (%p469_p11) }
0x1218   : > { %6228 = vst.msk [vmem:[%s296_s10] sm:$0xff] %vm11552_vm10, %v11551_v52 }
0x1219   : > { %6830 = shalt.err (!%p6827_p4)
}
0x121a   : > { %6344 = dma.vmem_to_hbm [thread:$0]  (%p7021_p5), %s6243_s26, 128, %s6245_s13, %s6230_s12  }
0x121b PF: > { %p6350_p7 = scmp.ge.s32.totalorder %s6889_s30, 2  ;;  %s6256_s17 = sand.u32 1, %s6877_s27  }
0x121c   : > { %s6257_s24 = scalar_lea.sflag [#allocation3], %s6256_s17 }
0x121d   : > { %p6347_p8 = pnand %p6350_p7, %p7025_p6 }
0x121f   : > { %p6348_p9 = pneg %p6347_p8 }
0x1221   : > { %6872 = dma.done.wait (%p6348_p9), %s6257_s24, 128  }
0x1222   : > { %6874 = vsyncadd (%p6348_p9), %s6257_s24, 4294967168  ;;  %p18_p10 = scmp.ge.s32.totalorder %s7008_s11, 4   ;;  %s11553_s27 = smov %s6881_s28 }
0x1223   : > { %s11554_s28 = smov %s6885_s29  ;;  %s11555_s29 = smov %s7019_s14 }
0x1224   : > { %s11556_s30 = smov %s7008_s11  ;;  %20 = sbr.rel (!%p18_p10) target bundleno = 5 (0x5), region = 105 }
0x1229   :  { %6263 = vsyncpa [#allocation3], 1 }
0x122a   :  { %6265 = vsyncpa [#allocation3 + $0x1], 1 }

</bundles_post_ra>
